<compile_context>
chip_gen: v6e
topology: v6e:2x2x1
jax: 0.10.0
libtpu: 0.0.40
codegen_flags: <defaults>
</compile_context>

<pallas_src>
import numpy as np
import jax
import jax.numpy as jnp
from jax import lax
from jax.experimental import pallas as pl
from jax.experimental.pallas import tpu as pltpu

C1H = 512   # conv1 per-parity padded column half (13*32 = 416 used, rest zero)
C2H = 384   # conv2 per-parity padded column half (5*64  = 320 used, rest zero)


# -----------------------------------------------------------------------------
# Fused network kernel
# -----------------------------------------------------------------------------
def _network_kernel(x_ref, t1_ref, b1_ref, t2_ref, b2_ref, w3_ref, b3_ref,
                    w4_ref, b4_ref, o_ref):
    f32, bf16 = jnp.float32, jnp.bfloat16

    def mm(a, b):
        return jnp.dot(a, b, preferred_element_type=f32)

    # Image rows were pre-permuted by the wrapper into 4 phase planes:
    # kernel row r*7 + j  <->  original image row 4*j + r.
    xb = x_ref[0].astype(bf16)                               # (28, 28)
    ph0, ph1, ph2, ph3 = xb[0:7], xb[7:14], xb[14:21], xb[21:28]

    t10, t11, t12 = t1_ref[0], t1_ref[1], t1_ref[2]          # (28, 1024) bf16

    # ---------------- Conv1 (1->32, 3x3) + MaxPool(2) + ReLU -----------------
    # Toeplitz columns are ordered (width-parity, pooled_w, c) so the width pool is a
    # single max of 128-aligned lane halves. Conv rows are produced in four groups so
    # the height pool needs only contiguous row blocks:
    #   E0[j] = conv row 4j,   E1[j] = conv row 4j+1   (j = 0..6) -> even pooled rows
    #   O0[j] = conv row 4j+2, O1[j] = conv row 4j+3   (j = 0..5) -> odd  pooled rows
    e0 = mm(ph0, t10) + mm(ph1, t11) + mm(ph2, t12)                      # (7, 1024)
    e1 = mm(ph1, t10) + mm(ph2, t11) + mm(ph3, t12)                      # (7, 1024)
    o0 = mm(ph2[0:6], t10) + mm(ph3[0:6], t11) + mm(ph0[1:7], t12)       # (6, 1024)
    o1 = mm(ph3[0:6], t10) + mm(ph0[1:7], t11) + mm(ph1[1:7], t12)       # (6, 1024)

    b1 = b1_ref[...]                                                     # (1, 512)
    he = jnp.maximum(e0, e1)                                             # height pool
    ho = jnp.maximum(o0, o1)
    # bias commutes with max-pool (per-channel constant); ReLU after pool as in module
    a1e = jnp.maximum(jnp.maximum(he[:, :C1H], he[:, C1H:]) + b1, 0.0)   # (7, 512) p even
    a1o = jnp.maximum(jnp.maximum(ho[:, :C1H], ho[:, C1H:]) + b1, 0.0)   # (6, 512) p odd
    a1e = a1e.astype(bf16)
    a1o = a1o.astype(bf16)

    # ------------- Conv2 (32->64, 3x3) + MaxPool(2, floor) + ReLU ------------
    t20, t21, t22 = t2_ref[0], t2_ref[1], t2_ref[2]                      # (512, 768) bf16
    acc_e = mm(a1e[0:5], t20) + mm(a1o[0:5], t21) + mm(a1e[1:6], t22)    # conv rows 2P
    acc_o = mm(a1o[0:5], t20) + mm(a1e[1:6], t21) + mm(a1o[1:6], t22)    # conv rows 2P+1
    hp2 = jnp.maximum(acc_e, acc_o)                                      # (5, 768)
    wp2 = jnp.maximum(hp2[:, :C2H], hp2[:, C2H:])                        # (5, 384)
    a2 = jnp.maximum(wp2 + b2_ref[...], 0.0).astype(bf16)                # (5, 384)

    # --------- Flatten + Linear(1600,128) + ReLU + Linear(128,10) + Softmax ---
    # w3 rows were pre-permuted to the kernel's (h, w, c) flatten order, one
    # (384, 128) block per pooled row h -> no activation transpose / reshape.
    h = mm(a2[0:1], w3_ref[0])
    for r in range(1, 5):
        h = h + mm(a2[r:r + 1], w3_ref[r])
    h = jnp.maximum(h + b3_ref[...], 0.0)                                # (1, 128) f32
    # TODO(synk): nn.Dropout(0.5) is identity at inference time; training-mode mask not implemented.

    logits = jnp.dot(h, w4_ref[...], preferred_element_type=f32) + b4_ref[...]  # (1, 10)
    m = jnp.max(logits, axis=1, keepdims=True)                           # stable softmax
    e = jnp.exp(logits - m)
    probs = e / jnp.sum(e, axis=1, keepdims=True)
    o_ref[...] = probs.reshape(1, 1, 10).astype(o_ref.dtype)


# -----------------------------------------------------------------------------
# Host-side parameter preparation (PyTorch-shaped params -> kernel layouts)
# -----------------------------------------------------------------------------
def init_torch_like_params(key):
    ks = jax.random.split(key, 8)
    f32 = jnp.float32
    return dict(
        w1=0.05 * jax.random.normal(ks[0], (32, 1, 3, 3), f32),   # Conv2d(1, 32, 3)
        b1=0.05 * jax.random.normal(ks[1], (32,), f32),
        w2=0.05 * jax.random.normal(ks[2], (64, 32, 3, 3), f32),  # Conv2d(32, 64, 3)
        b2=0.05 * jax.random.normal(ks[3], (64,), f32),
        w3=0.05 * jax.random.normal(ks[4], (128, 1600), f32),     # Linear(1600, 128)
        b3=0.05 * jax.random.normal(ks[5], (128,), f32),
        w4=0.05 * jax.random.normal(ks[6], (10, 128), f32),       # Linear(128, 10)
        b4=0.05 * jax.random.normal(ks[7], (10,), f32),
    )


def prepare_kernel_params(p):
    w1 = np.asarray(p["w1"], np.float32)
    w2 = np.asarray(p["w2"], np.float32)
    w3 = np.asarray(p["w3"], np.float32)

    # Conv1 row-Toeplitz: t1[kh, 2q+par+kw, par*C1H + q*32 + c] = w1[c, 0, kh, kw]
    t1 = np.zeros((3, 28, 2, 13, 32), np.float32)
    for kh in range(3):
        for kw in range(3):
            for par in range(2):
                for q in range(13):
                    t1[kh, 2 * q + par + kw, par, q, :] = w1[:, 0, kh, kw]
    t1p = np.zeros((3, 28, 2, C1H), np.float32)
    t1p[:, :, :, :416] = t1.reshape(3, 28, 2, 416)
    t1p = t1p.reshape(3, 28, 2 * C1H)

    # Conv2 row-Toeplitz on the (w, ci)-interleaved rows of a1:
    # t2[kh, w*32+ci, par*C2H + q*64 + co] = w2[co, ci, kh, kw], w = 2q + par + kw.
    t2 = np.zeros((3, 13, 32, 2, 5, 64), np.float32)
    for kh in range(3):
        for kw in range(3):
            for par in range(2):
                for q in range(5):
                    t2[kh, 2 * q + par + kw, :, par, q, :] = w2[:, :, kh, kw].T
    t2 = t2.reshape(3, 416, 640)
    t2p = np.zeros((3, C1H, 2, C2H), np.float32)
    t2p[:, :416, :, :320] = t2.reshape(3, 416, 2, 320)
    t2p = t2p.reshape(3, C1H, 2 * C2H)

    # Linear(1600,128): permute rows from torch's (c, h, w) flatten to (h, w, c),
    # split into 5 row blocks (one per pooled h) and zero-pad rows 320..383.
    w3s = np.transpose(w3.reshape(128, 64, 5, 5), (2, 3, 1, 0)).reshape(5, 320, 128)
    w3p = np.zeros((5, C2H, 128), np.float32)
    w3p[:, :320, :] = w3s

    b1t = np.zeros((1, C1H), np.float32)
    b1t[0, :416] = np.tile(np.asarray(p["b1"], np.float32), 13)
    b2t = np.zeros((1, C2H), np.float32)
    b2t[0, :320] = np.tile(np.asarray(p["b2"], np.float32), 5)

    return dict(
        t1=jnp.asarray(t1p, jnp.bfloat16),
        b1t=jnp.asarray(b1t),
        t2=jnp.asarray(t2p, jnp.bfloat16),
        b2t=jnp.asarray(b2t),
        w3s=jnp.asarray(w3p, jnp.bfloat16),
        b3=jnp.asarray(np.asarray(p["b3"], np.float32).reshape(1, 128)),
        w4=jnp.asarray(np.asarray(p["w4"], np.float32).T),   # (128, 10)
        b4=jnp.asarray(np.asarray(p["b4"], np.float32).reshape(1, 10)),
    )


# -----------------------------------------------------------------------------
# Forward pass wrapper
# -----------------------------------------------------------------------------
@jax.jit
def network_forward(x_nchw, kp):
    """x_nchw: (B, 1, 28, 28), as in the PyTorch module. Returns (B, 10) softmax probs."""
    B = x_nchw.shape[0]
    x = x_nchw.reshape(B, 28, 28).astype(jnp.float32)
    # De-interleave rows into 4 phase planes (kernel row r*7+j <-> image row 4j+r),
    # so every pooling-related row access inside the kernel is a contiguous slice.
    xp = x.reshape(B, 7, 4, 28).transpose(0, 2, 1, 3).reshape(B, 28, 28)
    out = pl.pallas_call(
        _network_kernel,
        out_shape=jax.ShapeDtypeStruct((B, 1, 10), jnp.float32),
        grid=(B,),
        in_specs=[
            pl.BlockSpec((1, 28, 28), lambda b: (b, 0, 0)),          # image (row-permuted)
            pl.BlockSpec((3, 28, 2 * C1H), lambda b: (0, 0, 0)),     # conv1 Toeplitz (bf16)
            pl.BlockSpec((1, C1H), lambda b: (0, 0)),                # conv1 bias (tiled, padded)
            pl.BlockSpec((3, C1H, 2 * C2H), lambda b: (0, 0, 0)),    # conv2 Toeplitz (bf16)
            pl.BlockSpec((1, C2H), lambda b: (0, 0)),                # conv2 bias (tiled, padded)
            pl.BlockSpec((5, C2H, 128), lambda b: (0, 0, 0)),        # fc1 weights (permuted, bf16)
            pl.BlockSpec((1, 128), lambda b: (0, 0)),                # fc1 bias
            pl.BlockSpec((128, 10), lambda b: (0, 0)),               # fc2 weights
            pl.BlockSpec((1, 10), lambda b: (0, 0)),                 # fc2 bias
        ],
        out_specs=pl.BlockSpec((1, 1, 10), lambda b: (b, 0, 0)),
        compiler_params=pltpu.CompilerParams(
            dimension_semantics=("parallel",)),                      # batch across cores
    )(xp, kp["t1"], kp["b1t"], kp["t2"], kp["b2t"],
      kp["w3s"], kp["b3"], kp["w4"], kp["b4"])
    return out.reshape(B, 10)


# -----------------------------------------------------------------------------
# Pure-JAX reference (same bf16 operand rounding as the kernel)
# -----------------------------------------------------------------------------
def reference_forward(x_nchw, p):
    f32, bf16 = jnp.float32, jnp.bfloat16
    rnd = lambda a: a.astype(bf16).astype(f32)
    dn = ("NCHW", "OIHW", "NCHW")
    x = rnd(x_nchw.astype(f32))
    y = lax.conv_general_dilated(x, rnd(p["w1"]), (1, 1), "VALID", dimension_numbers=dn)
    y = y + p["b1"][None, :, None, None]
    y = lax.reduce_window(y, -jnp.inf, lax.max, (1, 1, 2, 2), (1, 1, 2, 2), "VALID")
    y = rnd(jnp.maximum(y, 0.0))
    y = lax.conv_general_dilated(y, rnd(p["w2"]), (1, 1), "VALID", dimension_numbers=dn)
    y = y + p["b2"][None, :, None, None]
    y = lax.reduce_window(y, -jnp.inf, lax.max, (1, 1, 2, 2), (1, 1, 2, 2), "VALID")
    y = rnd(jnp.maximum(y, 0.0))
    y = y.reshape(y.shape[0], 1600)
    h = jnp.maximum(y @ rnd(p["w3"]).T + p["b3"], 0.0)
    logits = h @ p["w4"].T + p["b4"]
    return jax.nn.softmax(logits, axis=1)


if __name__ == "__main__":
    key = jax.random.PRNGKey(0)
    k_x, k_p = jax.random.split(key)
    # Network's view(-1, 1600) implies MNIST-sized input: (B, 1, 28, 28); small batch B=2.
    x = jax.random.normal(k_x, (2, 1, 28, 28), jnp.float32)
    torch_params = init_torch_like_params(k_p)
    kparams = prepare_kernel_params(torch_params)

    out = jax.block_until_ready(network_forward(x, kparams))
    ref = jax.block_until_ready(reference_forward(x, torch_params))

    assert out.shape == (2, 10), out.shape
    assert bool(jnp.all(jnp.isfinite(out)))
    row_sums = jnp.sum(out, axis=1)
    assert bool(jnp.all(jnp.abs(row_sums - 1.0) < 1e-3)), row_sums
    err = float(jnp.max(jnp.abs(out - ref)))
    assert err < 5e-3, f"max |kernel - reference| = {err}"
    print("KERNEL_OK")
</pallas_src>

<mosaic_0001>
module attributes {stable_mosaic.version = 11 : i64} {
  func.func @_network_kernel(%arg0: i32, %arg1: memref<1x28x28xf32, #tpu.memory_space<vmem>>, %arg2: memref<3x28x1024xbf16, #tpu.memory_space<vmem>>, %arg3: memref<1x512xf32, #tpu.memory_space<vmem>>, %arg4: memref<3x512x768xbf16, #tpu.memory_space<vmem>>, %arg5: memref<1x384xf32, #tpu.memory_space<vmem>>, %arg6: memref<5x384x128xbf16, #tpu.memory_space<vmem>>, %arg7: memref<1x128xf32, #tpu.memory_space<vmem>>, %arg8: memref<128x10xf32, #tpu.memory_space<vmem>>, %arg9: memref<1x10xf32, #tpu.memory_space<vmem>>, %arg10: memref<1x1x10xf32, #tpu.memory_space<vmem>>) attributes {dimension_semantics = [#tpu.dimension_semantics<parallel>], iteration_bounds = array<i64: 2>, scalar_prefetch = 0 : i64, scratch_operands = 0 : i64, tpu.core_type = #tpu.core_type<tc>, window_params = [{transform_indices = @transform_0, window_bounds = array<i64: 1, 28, 28>}, {pipeline_mode = #tpu.pipeline_mode<synchronous>, transform_indices = @transform_1, window_bounds = array<i64: 3, 28, 1024>}, {pipeline_mode = #tpu.pipeline_mode<synchronous>, transform_indices = @transform_2, window_bounds = array<i64: 1, 512>}, {pipeline_mode = #tpu.pipeline_mode<synchronous>, transform_indices = @transform_3, window_bounds = array<i64: 3, 512, 768>}, {pipeline_mode = #tpu.pipeline_mode<synchronous>, transform_indices = @transform_4, window_bounds = array<i64: 1, 384>}, {pipeline_mode = #tpu.pipeline_mode<synchronous>, transform_indices = @transform_5, window_bounds = array<i64: 5, 384, 128>}, {pipeline_mode = #tpu.pipeline_mode<synchronous>, transform_indices = @transform_6, window_bounds = array<i64: 1, 128>}, {pipeline_mode = #tpu.pipeline_mode<synchronous>, transform_indices = @transform_7, window_bounds = array<i64: 128, 10>}, {pipeline_mode = #tpu.pipeline_mode<synchronous>, transform_indices = @transform_8, window_bounds = array<i64: 1, 10>}, {transform_indices = @transform_9, window_bounds = array<i64: 1, 1, 10>}]} {
    %c0 = arith.constant 0 : index
    %c0_0 = arith.constant 0 : index
    %c0_1 = arith.constant 0 : index
    %0 = vector.load %arg1[%c0, %c0_0, %c0_1] : memref<1x28x28xf32, #tpu.memory_space<vmem>>, vector<1x28x28xf32>
    %1 = vector.shape_cast %0 : vector<1x28x28xf32> to vector<28x28xf32>
    %2 = arith.truncf %1 : vector<28x28xf32> to vector<28x28xbf16>
    %3 = vector.extract_strided_slice %2 {offsets = [0, 0], sizes = [7, 28], strides = [1, 1]} : vector<28x28xbf16> to vector<7x28xbf16>
    %4 = vector.extract_strided_slice %2 {offsets = [7, 0], sizes = [7, 28], strides = [1, 1]} : vector<28x28xbf16> to vector<7x28xbf16>
    %5 = vector.extract_strided_slice %2 {offsets = [14, 0], sizes = [7, 28], strides = [1, 1]} : vector<28x28xbf16> to vector<7x28xbf16>
    %6 = vector.extract_strided_slice %2 {offsets = [21, 0], sizes = [7, 28], strides = [1, 1]} : vector<28x28xbf16> to vector<7x28xbf16>
    %c0_2 = arith.constant 0 : index
    %c0_3 = arith.constant 0 : index
    %c0_4 = arith.constant 0 : index
    %7 = vector.load %arg2[%c0_2, %c0_3, %c0_4] : memref<3x28x1024xbf16, #tpu.memory_space<vmem>>, vector<1x28x1024xbf16>
    %8 = vector.shape_cast %7 : vector<1x28x1024xbf16> to vector<28x1024xbf16>
    %c1 = arith.constant 1 : index
    %c0_5 = arith.constant 0 : index
    %c0_6 = arith.constant 0 : index
    %9 = vector.load %arg2[%c1, %c0_5, %c0_6] : memref<3x28x1024xbf16, #tpu.memory_space<vmem>>, vector<1x28x1024xbf16>
    %10 = vector.shape_cast %9 : vector<1x28x1024xbf16> to vector<28x1024xbf16>
    %c2 = arith.constant 2 : index
    %c0_7 = arith.constant 0 : index
    %c0_8 = arith.constant 0 : index
    %11 = vector.load %arg2[%c2, %c0_7, %c0_8] : memref<3x28x1024xbf16, #tpu.memory_space<vmem>>, vector<1x28x1024xbf16>
    %12 = vector.shape_cast %11 : vector<1x28x1024xbf16> to vector<28x1024xbf16>
    %cst = arith.constant dense<0.000000e+00> : vector<7x1024xf32>
    %13 = tpu.matmul %3, %8, %cst {dimension_numbers = #tpu.dot_dimension_numbers<[1], [0], [0], [1], [0, 0, 1, 1], [], []>} : vector<7x28xbf16>, vector<28x1024xbf16>, vector<7x1024xf32> -> vector<7x1024xf32>
    %cst_9 = arith.constant dense<0.000000e+00> : vector<7x1024xf32>
    %14 = tpu.matmul %4, %10, %cst_9 {dimension_numbers = #tpu.dot_dimension_numbers<[1], [0], [0], [1], [0, 0, 1, 1], [], []>} : vector<7x28xbf16>, vector<28x1024xbf16>, vector<7x1024xf32> -> vector<7x1024xf32>
    %15 = arith.addf %13, %14 : vector<7x1024xf32>
    %cst_10 = arith.constant dense<0.000000e+00> : vector<7x1024xf32>
    %16 = tpu.matmul %5, %12, %cst_10 {dimension_numbers = #tpu.dot_dimension_numbers<[1], [0], [0], [1], [0, 0, 1, 1], [], []>} : vector<7x28xbf16>, vector<28x1024xbf16>, vector<7x1024xf32> -> vector<7x1024xf32>
    %17 = arith.addf %15, %16 : vector<7x1024xf32>
    %cst_11 = arith.constant dense<0.000000e+00> : vector<7x1024xf32>
    %18 = tpu.matmul %4, %8, %cst_11 {dimension_numbers = #tpu.dot_dimension_numbers<[1], [0], [0], [1], [0, 0, 1, 1], [], []>} : vector<7x28xbf16>, vector<28x1024xbf16>, vector<7x1024xf32> -> vector<7x1024xf32>
    %cst_12 = arith.constant dense<0.000000e+00> : vector<7x1024xf32>
    %19 = tpu.matmul %5, %10, %cst_12 {dimension_numbers = #tpu.dot_dimension_numbers<[1], [0], [0], [1], [0, 0, 1, 1], [], []>} : vector<7x28xbf16>, vector<28x1024xbf16>, vector<7x1024xf32> -> vector<7x1024xf32>
    %20 = arith.addf %18, %19 : vector<7x1024xf32>
    %cst_13 = arith.constant dense<0.000000e+00> : vector<7x1024xf32>
    %21 = tpu.matmul %6, %12, %cst_13 {dimension_numbers = #tpu.dot_dimension_numbers<[1], [0], [0], [1], [0, 0, 1, 1], [], []>} : vector<7x28xbf16>, vector<28x1024xbf16>, vector<7x1024xf32> -> vector<7x1024xf32>
    %22 = arith.addf %20, %21 : vector<7x1024xf32>
    %23 = vector.extract_strided_slice %5 {offsets = [0, 0], sizes = [6, 28], strides = [1, 1]} : vector<7x28xbf16> to vector<6x28xbf16>
    %cst_14 = arith.constant dense<0.000000e+00> : vector<6x1024xf32>
    %24 = tpu.matmul %23, %8, %cst_14 {dimension_numbers = #tpu.dot_dimension_numbers<[1], [0], [0], [1], [0, 0, 1, 1], [], []>} : vector<6x28xbf16>, vector<28x1024xbf16>, vector<6x1024xf32> -> vector<6x1024xf32>
    %25 = vector.extract_strided_slice %6 {offsets = [0, 0], sizes = [6, 28], strides = [1, 1]} : vector<7x28xbf16> to vector<6x28xbf16>
    %cst_15 = arith.constant dense<0.000000e+00> : vector<6x1024xf32>
    %26 = tpu.matmul %25, %10, %cst_15 {dimension_numbers = #tpu.dot_dimension_numbers<[1], [0], [0], [1], [0, 0, 1, 1], [], []>} : vector<6x28xbf16>, vector<28x1024xbf16>, vector<6x1024xf32> -> vector<6x1024xf32>
    %27 = arith.addf %24, %26 : vector<6x1024xf32>
    %28 = vector.extract_strided_slice %3 {offsets = [1, 0], sizes = [6, 28], strides = [1, 1]} : vector<7x28xbf16> to vector<6x28xbf16>
    %cst_16 = arith.constant dense<0.000000e+00> : vector<6x1024xf32>
    %29 = tpu.matmul %28, %12, %cst_16 {dimension_numbers = #tpu.dot_dimension_numbers<[1], [0], [0], [1], [0, 0, 1, 1], [], []>} : vector<6x28xbf16>, vector<28x1024xbf16>, vector<6x1024xf32> -> vector<6x1024xf32>
    %30 = arith.addf %27, %29 : vector<6x1024xf32>
    %31 = vector.extract_strided_slice %6 {offsets = [0, 0], sizes = [6, 28], strides = [1, 1]} : vector<7x28xbf16> to vector<6x28xbf16>
    %cst_17 = arith.constant dense<0.000000e+00> : vector<6x1024xf32>
    %32 = tpu.matmul %31, %8, %cst_17 {dimension_numbers = #tpu.dot_dimension_numbers<[1], [0], [0], [1], [0, 0, 1, 1], [], []>} : vector<6x28xbf16>, vector<28x1024xbf16>, vector<6x1024xf32> -> vector<6x1024xf32>
    %33 = vector.extract_strided_slice %3 {offsets = [1, 0], sizes = [6, 28], strides = [1, 1]} : vector<7x28xbf16> to vector<6x28xbf16>
    %cst_18 = arith.constant dense<0.000000e+00> : vector<6x1024xf32>
    %34 = tpu.matmul %33, %10, %cst_18 {dimension_numbers = #tpu.dot_dimension_numbers<[1], [0], [0], [1], [0, 0, 1, 1], [], []>} : vector<6x28xbf16>, vector<28x1024xbf16>, vector<6x1024xf32> -> vector<6x1024xf32>
    %35 = arith.addf %32, %34 : vector<6x1024xf32>
    %36 = vector.extract_strided_slice %4 {offsets = [1, 0], sizes = [6, 28], strides = [1, 1]} : vector<7x28xbf16> to vector<6x28xbf16>
    %cst_19 = arith.constant dense<0.000000e+00> : vector<6x1024xf32>
    %37 = tpu.matmul %36, %12, %cst_19 {dimension_numbers = #tpu.dot_dimension_numbers<[1], [0], [0], [1], [0, 0, 1, 1], [], []>} : vector<6x28xbf16>, vector<28x1024xbf16>, vector<6x1024xf32> -> vector<6x1024xf32>
    %38 = arith.addf %35, %37 : vector<6x1024xf32>
    %c0_20 = arith.constant 0 : index
    %c0_21 = arith.constant 0 : index
    %39 = vector.load %arg3[%c0_20, %c0_21] : memref<1x512xf32, #tpu.memory_space<vmem>>, vector<1x512xf32>
    %40 = arith.maximumf %17, %22 : vector<7x1024xf32>
    %41 = arith.maximumf %30, %38 : vector<6x1024xf32>
    %42 = vector.extract_strided_slice %40 {offsets = [0, 0], sizes = [7, 512], strides = [1, 1]} : vector<7x1024xf32> to vector<7x512xf32>
    %43 = vector.extract_strided_slice %40 {offsets = [0, 512], sizes = [7, 512], strides = [1, 1]} : vector<7x1024xf32> to vector<7x512xf32>
    %44 = arith.maximumf %42, %43 : vector<7x512xf32>
    %45 = vector.broadcast %39 : vector<1x512xf32> to vector<7x512xf32>
    %46 = arith.addf %44, %45 : vector<7x512xf32>
    %cst_22 = arith.constant 0.000000e+00 : f32
    %47 = vector.broadcast %cst_22 : f32 to vector<7x512xf32>
    %48 = arith.maximumf %46, %47 : vector<7x512xf32>
    %49 = vector.extract_strided_slice %41 {offsets = [0, 0], sizes = [6, 512], strides = [1, 1]} : vector<6x1024xf32> to vector<6x512xf32>
    %50 = vector.extract_strided_slice %41 {offsets = [0, 512], sizes = [6, 512], strides = [1, 1]} : vector<6x1024xf32> to vector<6x512xf32>
    %51 = arith.maximumf %49, %50 : vector<6x512xf32>
    %52 = vector.broadcast %39 : vector<1x512xf32> to vector<6x512xf32>
    %53 = arith.addf %51, %52 : vector<6x512xf32>
    %cst_23 = arith.constant 0.000000e+00 : f32
    %54 = vector.broadcast %cst_23 : f32 to vector<6x512xf32>
    %55 = arith.maximumf %53, %54 : vector<6x512xf32>
    %56 = arith.truncf %48 : vector<7x512xf32> to vector<7x512xbf16>
    %57 = arith.truncf %55 : vector<6x512xf32> to vector<6x512xbf16>
    %c0_24 = arith.constant 0 : index
    %c0_25 = arith.constant 0 : index
    %c0_26 = arith.constant 0 : index
    %58 = vector.load %arg4[%c0_24, %c0_25, %c0_26] : memref<3x512x768xbf16, #tpu.memory_space<vmem>>, vector<1x512x768xbf16>
    %59 = vector.shape_cast %58 : vector<1x512x768xbf16> to vector<512x768xbf16>
    %c1_27 = arith.constant 1 : index
    %c0_28 = arith.constant 0 : index
    %c0_29 = arith.constant 0 : index
    %60 = vector.load %arg4[%c1_27, %c0_28, %c0_29] : memref<3x512x768xbf16, #tpu.memory_space<vmem>>, vector<1x512x768xbf16>
    %61 = vector.shape_cast %60 : vector<1x512x768xbf16> to vector<512x768xbf16>
    %c2_30 = arith.constant 2 : index
    %c0_31 = arith.constant 0 : index
    %c0_32 = arith.constant 0 : index
    %62 = vector.load %arg4[%c2_30, %c0_31, %c0_32] : memref<3x512x768xbf16, #tpu.memory_space<vmem>>, vector<1x512x768xbf16>
    %63 = vector.shape_cast %62 : vector<1x512x768xbf16> to vector<512x768xbf16>
    %64 = vector.extract_strided_slice %56 {offsets = [0, 0], sizes = [5, 512], strides = [1, 1]} : vector<7x512xbf16> to vector<5x512xbf16>
    %cst_33 = arith.constant dense<0.000000e+00> : vector<5x768xf32>
    %65 = tpu.matmul %64, %59, %cst_33 {dimension_numbers = #tpu.dot_dimension_numbers<[1], [0], [0], [1], [0, 0, 1, 1], [], []>} : vector<5x512xbf16>, vector<512x768xbf16>, vector<5x768xf32> -> vector<5x768xf32>
    %66 = vector.extract_strided_slice %57 {offsets = [0, 0], sizes = [5, 512], strides = [1, 1]} : vector<6x512xbf16> to vector<5x512xbf16>
    %cst_34 = arith.constant dense<0.000000e+00> : vector<5x768xf32>
    %67 = tpu.matmul %66, %61, %cst_34 {dimension_numbers = #tpu.dot_dimension_numbers<[1], [0], [0], [1], [0, 0, 1, 1], [], []>} : vector<5x512xbf16>, vector<512x768xbf16>, vector<5x768xf32> -> vector<5x768xf32>
    %68 = arith.addf %65, %67 : vector<5x768xf32>
    %69 = vector.extract_strided_slice %56 {offsets = [1, 0], sizes = [5, 512], strides = [1, 1]} : vector<7x512xbf16> to vector<5x512xbf16>
    %cst_35 = arith.constant dense<0.000000e+00> : vector<5x768xf32>
    %70 = tpu.matmul %69, %63, %cst_35 {dimension_numbers = #tpu.dot_dimension_numbers<[1], [0], [0], [1], [0, 0, 1, 1], [], []>} : vector<5x512xbf16>, vector<512x768xbf16>, vector<5x768xf32> -> vector<5x768xf32>
    %71 = arith.addf %68, %70 : vector<5x768xf32>
    %72 = vector.extract_strided_slice %57 {offsets = [0, 0], sizes = [5, 512], strides = [1, 1]} : vector<6x512xbf16> to vector<5x512xbf16>
    %cst_36 = arith.constant dense<0.000000e+00> : vector<5x768xf32>
    %73 = tpu.matmul %72, %59, %cst_36 {dimension_numbers = #tpu.dot_dimension_numbers<[1], [0], [0], [1], [0, 0, 1, 1], [], []>} : vector<5x512xbf16>, vector<512x768xbf16>, vector<5x768xf32> -> vector<5x768xf32>
    %74 = vector.extract_strided_slice %56 {offsets = [1, 0], sizes = [5, 512], strides = [1, 1]} : vector<7x512xbf16> to vector<5x512xbf16>
    %cst_37 = arith.constant dense<0.000000e+00> : vector<5x768xf32>
    %75 = tpu.matmul %74, %61, %cst_37 {dimension_numbers = #tpu.dot_dimension_numbers<[1], [0], [0], [1], [0, 0, 1, 1], [], []>} : vector<5x512xbf16>, vector<512x768xbf16>, vector<5x768xf32> -> vector<5x768xf32>
    %76 = arith.addf %73, %75 : vector<5x768xf32>
    %77 = vector.extract_strided_slice %57 {offsets = [1, 0], sizes = [5, 512], strides = [1, 1]} : vector<6x512xbf16> to vector<5x512xbf16>
    %cst_38 = arith.constant dense<0.000000e+00> : vector<5x768xf32>
    %78 = tpu.matmul %77, %63, %cst_38 {dimension_numbers = #tpu.dot_dimension_numbers<[1], [0], [0], [1], [0, 0, 1, 1], [], []>} : vector<5x512xbf16>, vector<512x768xbf16>, vector<5x768xf32> -> vector<5x768xf32>
    %79 = arith.addf %76, %78 : vector<5x768xf32>
    %80 = arith.maximumf %71, %79 : vector<5x768xf32>
    %81 = vector.extract_strided_slice %80 {offsets = [0, 0], sizes = [5, 384], strides = [1, 1]} : vector<5x768xf32> to vector<5x384xf32>
    %82 = vector.extract_strided_slice %80 {offsets = [0, 384], sizes = [5, 384], strides = [1, 1]} : vector<5x768xf32> to vector<5x384xf32>
    %83 = arith.maximumf %81, %82 : vector<5x384xf32>
    %c0_39 = arith.constant 0 : index
    %c0_40 = arith.constant 0 : index
    %84 = vector.load %arg5[%c0_39, %c0_40] : memref<1x384xf32, #tpu.memory_space<vmem>>, vector<1x384xf32>
    %85 = vector.broadcast %84 : vector<1x384xf32> to vector<5x384xf32>
    %86 = arith.addf %83, %85 : vector<5x384xf32>
    %cst_41 = arith.constant 0.000000e+00 : f32
    %87 = vector.broadcast %cst_41 : f32 to vector<5x384xf32>
    %88 = arith.maximumf %86, %87 : vector<5x384xf32>
    %89 = arith.truncf %88 : vector<5x384xf32> to vector<5x384xbf16>
    %90 = vector.extract_strided_slice %89 {offsets = [0, 0], sizes = [1, 384], strides = [1, 1]} : vector<5x384xbf16> to vector<1x384xbf16>
    %c0_42 = arith.constant 0 : index
    %c0_43 = arith.constant 0 : index
    %c0_44 = arith.constant 0 : index
    %91 = vector.load %arg6[%c0_42, %c0_43, %c0_44] : memref<5x384x128xbf16, #tpu.memory_space<vmem>>, vector<1x384x128xbf16>
    %92 = vector.shape_cast %91 : vector<1x384x128xbf16> to vector<384x128xbf16>
    %cst_45 = arith.constant dense<0.000000e+00> : vector<1x128xf32>
    %93 = tpu.matmul %90, %92, %cst_45 {dimension_numbers = #tpu.dot_dimension_numbers<[1], [0], [0], [1], [0, 0, 1, 1], [], []>} : vector<1x384xbf16>, vector<384x128xbf16>, vector<1x128xf32> -> vector<1x128xf32>
    %94 = vector.extract_strided_slice %89 {offsets = [1, 0], sizes = [1, 384], strides = [1, 1]} : vector<5x384xbf16> to vector<1x384xbf16>
    %c1_46 = arith.constant 1 : index
    %c0_47 = arith.constant 0 : index
    %c0_48 = arith.constant 0 : index
    %95 = vector.load %arg6[%c1_46, %c0_47, %c0_48] : memref<5x384x128xbf16, #tpu.memory_space<vmem>>, vector<1x384x128xbf16>
    %96 = vector.shape_cast %95 : vector<1x384x128xbf16> to vector<384x128xbf16>
    %cst_49 = arith.constant dense<0.000000e+00> : vector<1x128xf32>
    %97 = tpu.matmul %94, %96, %cst_49 {dimension_numbers = #tpu.dot_dimension_numbers<[1], [0], [0], [1], [0, 0, 1, 1], [], []>} : vector<1x384xbf16>, vector<384x128xbf16>, vector<1x128xf32> -> vector<1x128xf32>
    %98 = arith.addf %93, %97 : vector<1x128xf32>
    %99 = vector.extract_strided_slice %89 {offsets = [2, 0], sizes = [1, 384], strides = [1, 1]} : vector<5x384xbf16> to vector<1x384xbf16>
    %c2_50 = arith.constant 2 : index
    %c0_51 = arith.constant 0 : index
    %c0_52 = arith.constant 0 : index
    %100 = vector.load %arg6[%c2_50, %c0_51, %c0_52] : memref<5x384x128xbf16, #tpu.memory_space<vmem>>, vector<1x384x128xbf16>
    %101 = vector.shape_cast %100 : vector<1x384x128xbf16> to vector<384x128xbf16>
    %cst_53 = arith.constant dense<0.000000e+00> : vector<1x128xf32>
    %102 = tpu.matmul %99, %101, %cst_53 {dimension_numbers = #tpu.dot_dimension_numbers<[1], [0], [0], [1], [0, 0, 1, 1], [], []>} : vector<1x384xbf16>, vector<384x128xbf16>, vector<1x128xf32> -> vector<1x128xf32>
    %103 = arith.addf %98, %102 : vector<1x128xf32>
    %104 = vector.extract_strided_slice %89 {offsets = [3, 0], sizes = [1, 384], strides = [1, 1]} : vector<5x384xbf16> to vector<1x384xbf16>
    %c3 = arith.constant 3 : index
    %c0_54 = arith.constant 0 : index
    %c0_55 = arith.constant 0 : index
    %105 = vector.load %arg6[%c3, %c0_54, %c0_55] : memref<5x384x128xbf16, #tpu.memory_space<vmem>>, vector<1x384x128xbf16>
    %106 = vector.shape_cast %105 : vector<1x384x128xbf16> to vector<384x128xbf16>
    %cst_56 = arith.constant dense<0.000000e+00> : vector<1x128xf32>
    %107 = tpu.matmul %104, %106, %cst_56 {dimension_numbers = #tpu.dot_dimension_numbers<[1], [0], [0], [1], [0, 0, 1, 1], [], []>} : vector<1x384xbf16>, vector<384x128xbf16>, vector<1x128xf32> -> vector<1x128xf32>
    %108 = arith.addf %103, %107 : vector<1x128xf32>
    %109 = vector.extract_strided_slice %89 {offsets = [4, 0], sizes = [1, 384], strides = [1, 1]} : vector<5x384xbf16> to vector<1x384xbf16>
    %c4 = arith.constant 4 : index
    %c0_57 = arith.constant 0 : index
    %c0_58 = arith.constant 0 : index
    %110 = vector.load %arg6[%c4, %c0_57, %c0_58] : memref<5x384x128xbf16, #tpu.memory_space<vmem>>, vector<1x384x128xbf16>
    %111 = vector.shape_cast %110 : vector<1x384x128xbf16> to vector<384x128xbf16>
    %cst_59 = arith.constant dense<0.000000e+00> : vector<1x128xf32>
    %112 = tpu.matmul %109, %111, %cst_59 {dimension_numbers = #tpu.dot_dimension_numbers<[1], [0], [0], [1], [0, 0, 1, 1], [], []>} : vector<1x384xbf16>, vector<384x128xbf16>, vector<1x128xf32> -> vector<1x128xf32>
    %113 = arith.addf %108, %112 : vector<1x128xf32>
    %c0_60 = arith.constant 0 : index
    %c0_61 = arith.constant 0 : index
    %114 = vector.load %arg7[%c0_60, %c0_61] : memref<1x128xf32, #tpu.memory_space<vmem>>, vector<1x128xf32>
    %115 = arith.addf %113, %114 : vector<1x128xf32>
    %cst_62 = arith.constant 0.000000e+00 : f32
    %116 = vector.broadcast %cst_62 : f32 to vector<1x128xf32>
    %117 = arith.maximumf %115, %116 : vector<1x128xf32>
    %c0_63 = arith.constant 0 : index
    %c0_64 = arith.constant 0 : index
    %118 = vector.load %arg8[%c0_63, %c0_64] : memref<128x10xf32, #tpu.memory_space<vmem>>, vector<128x10xf32>
    %cst_65 = arith.constant dense<0.000000e+00> : vector<1x10xf32>
    %119 = tpu.matmul %117, %118, %cst_65 {dimension_numbers = #tpu.dot_dimension_numbers<[1], [0], [0], [1], [0, 0, 1, 1], [], []>} : vector<1x128xf32>, vector<128x10xf32>, vector<1x10xf32> -> vector<1x10xf32>
    %c0_66 = arith.constant 0 : index
    %c0_67 = arith.constant 0 : index
    %120 = vector.load %arg9[%c0_66, %c0_67] : memref<1x10xf32, #tpu.memory_space<vmem>>, vector<1x10xf32>
    %121 = arith.addf %119, %120 : vector<1x10xf32>
    %cst_68 = arith.constant dense<0xFF800000> : vector<1xf32>
    %122 = vector.multi_reduction <maximumf>, %121, %cst_68 [1] : vector<1x10xf32> to vector<1xf32>
    %123 = vector.shape_cast %122 : vector<1xf32> to vector<1x1xf32>
    %124 = vector.broadcast %123 : vector<1x1xf32> to vector<1x10xf32>
    %125 = arith.subf %121, %124 : vector<1x10xf32>
    %126 = math.exp %125 : vector<1x10xf32>
    %cst_69 = arith.constant dense<0.000000e+00> : vector<1xf32>
    %127 = vector.multi_reduction <add>, %126, %cst_69 [1] : vector<1x10xf32> to vector<1xf32>
    %128 = vector.shape_cast %127 : vector<1xf32> to vector<1x1xf32>
    %129 = vector.broadcast %128 : vector<1x1xf32> to vector<1x10xf32>
    %130 = arith.divf %126, %129 : vector<1x10xf32>
    %131 = vector.shape_cast %130 : vector<1x10xf32> to vector<1x1x10xf32>
    %c0_70 = arith.constant 0 : index
    %c0_71 = arith.constant 0 : index
    %c0_72 = arith.constant 0 : index
    %132 = vector.load %arg10[%c0_70, %c0_71, %c0_72] : memref<1x1x10xf32, #tpu.memory_space<vmem>>, vector<1x1x10xf32>
    tpu.vector_store %arg10[%c0_70, %c0_71, %c0_72], %131 {strides = array<i32>} : memref<1x1x10xf32, #tpu.memory_space<vmem>>, vector<1x1x10xf32>,
    return
  }
  func.func @transform_0(%arg0: i32) -> (i32, i32, i32) {
    %c0_i32 = arith.constant 0 : i32
    %c0_i32_0 = arith.constant 0 : i32
    %c0_i32_1 = arith.constant 0 : i32
    return %arg0, %c0_i32, %c0_i32_0 : i32, i32, i32
  }
  func.func @transform_1(%arg0: i32) -> (i32, i32, i32) {
    %c0_i32 = arith.constant 0 : i32
    %c0_i32_0 = arith.constant 0 : i32
    %c0_i32_1 = arith.constant 0 : i32
    %c0_i32_2 = arith.constant 0 : i32
    return %c0_i32, %c0_i32_0, %c0_i32_1 : i32, i32, i32
  }
  func.func @transform_2(%arg0: i32) -> (i32, i32) {
    %c0_i32 = arith.constant 0 : i32
    %c0_i32_0 = arith.constant 0 : i32
    %c0_i32_1 = arith.constant 0 : i32
    return %c0_i32, %c0_i32_0 : i32, i32
  }
  func.func @transform_3(%arg0: i32) -> (i32, i32, i32) {
    %c0_i32 = arith.constant 0 : i32
    %c0_i32_0 = arith.constant 0 : i32
    %c0_i32_1 = arith.constant 0 : i32
    %c0_i32_2 = arith.constant 0 : i32
    return %c0_i32, %c0_i32_0, %c0_i32_1 : i32, i32, i32
  }
  func.func @transform_4(%arg0: i32) -> (i32, i32) {
    %c0_i32 = arith.constant 0 : i32
    %c0_i32_0 = arith.constant 0 : i32
    %c0_i32_1 = arith.constant 0 : i32
    return %c0_i32, %c0_i32_0 : i32, i32
  }
  func.func @transform_5(%arg0: i32) -> (i32, i32, i32) {
    %c0_i32 = arith.constant 0 : i32
    %c0_i32_0 = arith.constant 0 : i32
    %c0_i32_1 = arith.constant 0 : i32
    %c0_i32_2 = arith.constant 0 : i32
    return %c0_i32, %c0_i32_0, %c0_i32_1 : i32, i32, i32
  }
  func.func @transform_6(%arg0: i32) -> (i32, i32) {
    %c0_i32 = arith.constant 0 : i32
    %c0_i32_0 = arith.constant 0 : i32
    %c0_i32_1 = arith.constant 0 : i32
    return %c0_i32, %c0_i32_0 : i32, i32
  }
  func.func @transform_7(%arg0: i32) -> (i32, i32) {
    %c0_i32 = arith.constant 0 : i32
    %c0_i32_0 = arith.constant 0 : i32
    %c0_i32_1 = arith.constant 0 : i32
    return %c0_i32, %c0_i32_0 : i32, i32
  }
  func.func @transform_8(%arg0: i32) -> (i32, i32) {
    %c0_i32 = arith.constant 0 : i32
    %c0_i32_0 = arith.constant 0 : i32
    %c0_i32_1 = arith.constant 0 : i32
    return %c0_i32, %c0_i32_0 : i32, i32
  }
  func.func @transform_9(%arg0: i32) -> (i32, i32, i32) {
    %c0_i32 = arith.constant 0 : i32
    %c0_i32_0 = arith.constant 0 : i32
    %c0_i32_1 = arith.constant 0 : i32
    return %arg0, %c0_i32, %c0_i32_0 : i32, i32, i32
  }
}

</mosaic_0001>

<bundles_post_ra>
// kernel: network_forward.1
= control target key start
LH: loop header
LB: loop body
LE: loop exit
PB: predicated region body
PF: predicated region fallthrough
CT: control target
= control target key end

     0   :  { %s14041_s0 = inlined_call_operand.vmem [shape: f32[2,28,28], index: 0, kind: input, shape index: {}]   ;;  %s14042_s1 = inlined_call_operand.hbm [shape: bf16[3,28,1024], index: 1, kind: input, shape index: {}]   ;;  %s14043_s2 = inlined_call_operand.hbm [shape: f32[1,512], index: 2, kind: input, shape index: {}]   ;;  %s14044_s3 = inlined_call_operand.hbm [shape: bf16[3,512,768], index: 3, kind: input, shape index: {}]   ;;  %s14045_s4 = inlined_call_operand.hbm [shape: f32[1,384], index: 4, kind: input, shape index: {}]   ;;  %s14046_s5 = inlined_call_operand.hbm [shape: bf16[5,384,128], index: 5, kind: input, shape index: {}]   ;;  %s14047_s6 = inlined_call_operand.hbm [shape: f32[1,128], index: 6, kind: input, shape index: {}]   ;;  %s14048_s7 = inlined_call_operand.vmem [shape: f32[128,10], index: 7, kind: input, shape index: {}]   ;;  %s14049_s8 = inlined_call_operand.hbm [shape: f32[1,10], index: 8, kind: input, shape index: {}]   ;;  %s14050_s9 = inlined_call_operand.hbm [shape: f32[2,1,10], index: 9, kind: output, shape index: {}]  }
   0x1   :  { %14054 = sst [smem:[#allocation20_spill]] %s14042_s1 }
   0x2   :  { %14055 = sst [smem:[#allocation21_spill]] %s14043_s2 }
   0x3   :  { %14 = vsyncpa [#allocation3], 0 }
   0x4   :  { %15 = vsyncpa [#allocation6], 0 }
   0x5   :  { %16 = vsyncpa [#allocation9], 0 }
   0x6   :  { %17 = vsyncpa [#allocation12], 0 }
   0x7   :  { %18 = vsyncpa [#allocation4], 0 }
   0x8   :  { %20 = vsyncpa [#allocation4 + $0x1], 0  ;;  %s12749_s30 = smov 0   ;;  %s12751_s10 = smov 0  }
   0x9   :  { %s12753_s11 = smov 0   ;;  %s12755_s12 = smov 0  }
   0xa LB: > { %s12770_s13 = sadd.s32 4294967295, %s12680_s12   ;;  %s9568_s14 = sadd.s32 4294967294, %s12680_s12   ;;  %s12680_s12 = sphi %s12755_s12, %s14077_s12   ;;  %s12676_s11 = sphi %s12753_s11, %s14076_s11   ;;  %s12672_s10 = sphi %s12751_s10, %s14075_s10   ;;  %s12668_s30 = sphi %s12749_s30, %s14074_s30  }
   0xb   : > { %s12774_s15 = sadd.s32 1, %s12680_s12   ;;  %s227_s16 = sadd.s32 1, %s12676_s11 }
   0xc   : > { %s224_s17 = ssub.s32 %s12680_s12, %s12774_s15  ;;  %p237_p0 = scmp.ne.s32.totalorder %s12676_s11, %s12672_s10 }
   0xd   : > { %p225_p1 = scmp.eq.s32.totalorder %s224_s17, 0  ;;  %p238_p2 = scmp.eq.s32.totalorder %s12770_s13, 1 }
   0xe   : > { %p243_p3 = scmp.ne.s32.totalorder %s12672_s10, %s12668_s30  ;;  %p244_p4 = scmp.eq.s32.totalorder %s9568_s14, 1 }
   0xf   : > { %s12785_s18 = scalar_select %p225_p1, %s12676_s11, %s227_s16  }
  0x10   : > { %p12787_p5 = por %p238_p2, %p237_p0  ;;  %p12791_p6 = por %p244_p4, %p243_p3 }
  0x11   : > { %p9569_p7 = scmp.ge.s32.totalorder %s12680_s12, 1  ;;  %p251_p8 = scmp.lt.s32.totalorder %s12680_s12, 3 }
  0x12   : > { %s14056_s19 = scalar_select %p12787_p5, 1, 0 }
  0x13   : > { %s14057_s20 = scalar_select %p12791_p6, 1, 0 }
  0x14   : > { %p14051_p9 = scmp.eq.s32.totalorder %s12770_s13, 0  ;;  %p12798_p10 = pnand %p9569_p7, %p251_p8 }
  0x15   : > { %s12682_s22 = smov [#allocation5]   ;;  %s12683_s24 = smov [#allocation8]  }
  0x16   : > { %s14058_s21 = scalar_select %p12798_p10, 1, 0 }
  0x17   : > { %s277_s23 = sshll.u32 %s12682_s22, 4  ;;  %p10769_p11 = pneg %p12798_p10  ;;  %s278_s23 = int_to_ptr.vmem [resolvable:$true] %s277_s23 }
  0x18   : > { %s301_s25 = sshll.u32 %s12683_s24, 4  ;;  %s12684_s27 = smov [#allocation11]   ;;  %s302_s25 = int_to_ptr.vmem [resolvable:$true] %s301_s25 }
  0x19   : > { %p12806_p12 = pnand %p14051_p9, %p10769_p11  ;;  %s325_s28 = sshll.u32 %s12684_s27, 4  ;;  %s12810_s28 = int_to_ptr.vmem [resolvable:$true] %s325_s28 }
  0x1a   : > { %s12433_s14 = scalar_lea.vmem %s278_s23, 64  ;;  %p12441_p3 = scmp.lt.s32.totalorder %s278_s23, %s278_s23 }
  0x1b   : > { %p12814_p13 = pneg %p12806_p12  ;;  %p12434_p0 = scmp.ne.s32.totalorder %s278_s23, %s12433_s14 }
  0x1c   : > { %p12442_p4 = scmp.lt.s32.totalorder %s12433_s14, %s12433_s14 }
  0x1d   : > { %p12436_p1 = pnand %p12434_p0, %p12814_p13 }
  0x1e   : > { %p12443_p7 = por %p12442_p4, %p12441_p3 }
  0x1f   : > { %p12437_p2 = pneg %p12436_p1 }
  0x21   : > { %p12444_p8 = pnand %p12443_p7, %p12437_p2 }
  0x23   : > { %12447 = shalt.err (!%p12444_p8)
}
  0x24   : > { %s14061_s2 = sld [smem:[#allocation21_spill]]  ;;  %s12459_s22 = scalar_lea.vmem %s302_s25, 48 }
  0x25   : > { %p12460_p11 = scmp.ne.s32.totalorder %s302_s25, %s12459_s22  ;;  %s12466_s24 = scalar_lea.vmem %s302_s25, 64 }
  0x26   : > { %p12467_p0 = scmp.lt.s32.totalorder %s302_s25, %s302_s25  ;;  %p12468_p1 = scmp.lt.s32.totalorder %s12466_s24, %s12459_s22 }
  0x27   : > { %p12462_p9 = pnand %p12460_p11, %p12814_p13 }
  0x28   : > { %p12469_p5 = por %p12468_p1, %p12467_p0 }
  0x29   : > { %p12463_p6 = pneg %p12462_p9 }
  0x2a   : > { %10775 = dma.hbm_to_vmem [thread:$0]  (!%p12806_p12), %s14061_s2, 64, %s278_s23, [#allocation6]  }
  0x2b   : > { %p12470_p10 = pnand %p12469_p5, %p12463_p6 }
  0x2d   : > { %12473 = shalt.err (!%p12470_p10)
}
  0x2e   : > { %10781 = dma.hbm_to_vmem [thread:$0]  (!%p12806_p12), %s14045_s4, 48, %s302_s25, [#allocation9]  }
  0x2f   : > { %s12485_s23 = scalar_lea.vmem %s12810_s28, 16  ;;  %s12492_s16 = scalar_lea.vmem %s12810_s28, 32 }
  0x30   : > { %p12486_p2 = scmp.ne.s32.totalorder %s12810_s28, %s12485_s23  ;;  %p12493_p5 = scmp.lt.s32.totalorder %s12810_s28, %s12810_s28 }
  0x31   : > { %p12494_p6 = scmp.lt.s32.totalorder %s12492_s16, %s12485_s23 }
  0x32   : > { %p12488_p9 = pnand %p12486_p2, %p12814_p13 }
  0x33   : > { %p12495_p10 = por %p12494_p6, %p12493_p5 }
  0x34   : > { %p12489_p3 = pneg %p12488_p9 }
  0x36   : > { %p12496_p4 = pnand %p12495_p10, %p12489_p3 }
  0x38   : > { %12499 = shalt.err (!%p12496_p4)
}
  0x39   : > { %10787 = dma.hbm_to_vmem [thread:$0]  (!%p12806_p12), %s14047_s6, 16, %s12810_s28, [#allocation12]  }
  0x3a   : > { %s12685_s25 = smov [#allocation2]  }
  0x3b   : > { %s263_s24 = sshll.u32 %s12685_s25, 4  ;;  %s264_s24 = int_to_ptr.vmem [resolvable:$true] %s263_s24 }
  0x3c   : > { %s12511_s27 = scalar_lea.vmem %s264_s24, 6144  ;;  %p12519_p0 = scmp.lt.s32.totalorder %s264_s24, %s264_s24 }
  0x3d   : > { %p12512_p7 = scmp.ne.s32.totalorder %s264_s24, %s12511_s27  ;;  %p12520_p1 = scmp.lt.s32.totalorder %s12511_s27, %s12511_s27 }
  0x3f   : > { %p12514_p8 = pnand %p12512_p7, %p12814_p13  ;;  %p12521_p2 = por %p12520_p1, %p12519_p0 }
  0x41   : > { %p12515_p11 = pneg %p12514_p8 }
  0x43   : > { %p12522_p9 = pnand %p12521_p2, %p12515_p11 }
  0x45   : > { %12525 = shalt.err (!%p12522_p9)
}
  0x46   : > { %s12686_s14 = smov 512   ;;  %s12687_s23 = smov 32  }
  0x47   : > { %s14062_s1 = sld [smem:[#allocation20_spill]]  ;;  %s12688_s17 = smov [#allocation7]  }
  0x48   : > { %s287_s22 = sshll.u32 %s12688_s17, 4  ;;  %s288_s22 = int_to_ptr.vmem [resolvable:$true] %s287_s22 }
  0x49   : > { %s12537_s25 = scalar_lea.vmem %s288_s22, 73728  ;;  %p12545_p10 = scmp.lt.s32.totalorder %s288_s22, %s288_s22 }
  0x4a   : > { %p12538_p3 = scmp.ne.s32.totalorder %s288_s22, %s12537_s25  ;;  %p12546_p4 = scmp.lt.s32.totalorder %s12537_s25, %s12537_s25 }
  0x4c   : > { %p12540_p5 = pnand %p12538_p3, %p12814_p13  ;;  %p12547_p7 = por %p12546_p4, %p12545_p10 }
  0x4d   : > { %10772 = dma.hbm_to_vmem [thread:$0]  (!%p12806_p12), %s14062_s1, 6144, %s264_s24, [#allocation3], %s12686_s14, %s12686_s14, %s12687_s23  }
  0x4e   : > { %p12541_p6 = pneg %p12540_p5 }
  0x50   : > { %p12548_p8 = pnand %p12547_p7, %p12541_p6 }
  0x52   : > { %12551 = shalt.err (!%p12548_p8)
}
  0x53   : > { %s12689_s27 = smov 384   ;;  %s12690_s2 = smov 24  }
  0x54   : > { %10778 = dma.hbm_to_vmem [thread:$0]  (!%p12806_p12), %s14044_s3, 73728, %s288_s22, [#allocation6], %s12689_s27, %s12689_s27, %s12690_s2  }
  0x55   : > { %s12691_s14 = smov [#allocation10]  }
  0x56   : > { %s311_s23 = sshll.u32 %s12691_s14, 4  ;;  %s312_s23 = int_to_ptr.vmem [resolvable:$true] %s311_s23 }
  0x57   : > { %s12563_s28 = scalar_lea.vmem %s312_s23, 15360  ;;  %p12571_p2 = scmp.lt.s32.totalorder %s312_s23, %s312_s23 }
  0x58   : > { %p12564_p11 = scmp.ne.s32.totalorder %s312_s23, %s12563_s28  ;;  %p12572_p9 = scmp.lt.s32.totalorder %s12563_s28, %s12563_s28 }
  0x5a   : > { %p12566_p0 = pnand %p12564_p11, %p12814_p13  ;;  %p12573_p3 = por %p12572_p9, %p12571_p2 }
  0x5c   : > { %p12567_p1 = pneg %p12566_p0 }
  0x5e   : > { %p12574_p5 = pnand %p12573_p3, %p12567_p1 }
  0x60   : > { %12577 = shalt.err (!%p12574_p5)
}
  0x61   : > { %s12692_s17 = smov 64   ;;  %s12693_s25 = smov 4  }
  0x62   : > { %10784 = dma.hbm_to_vmem [thread:$0]  (!%p12806_p12), %s14046_s5, 15360, %s312_s23, [#allocation9], %s12692_s17, %s12692_s17, %s12693_s25  }
  0x63   : > { %s12694_s22 = smov [#allocation13]  }
  0x64   : > { %s339_s27 = sshll.u32 %s12694_s22, 4  ;;  %s340_s27 = int_to_ptr.vmem [resolvable:$true] %s339_s27 }
  0x65   : > { %s12589_s24 = scalar_lea.vmem %s340_s27, 16  ;;  %s12596_s14 = scalar_lea.vmem %s340_s27, 32 }
  0x66   : > { %p12590_p6 = scmp.ne.s32.totalorder %s340_s27, %s12589_s24  ;;  %p12597_p7 = scmp.lt.s32.totalorder %s340_s27, %s340_s27 }
  0x67   : > { %p12598_p8 = scmp.lt.s32.totalorder %s12596_s14, %s12589_s24 }
  0x68   : > { %p12592_p10 = pnand %p12590_p6, %p12814_p13 }
  0x69   : > { %p12599_p11 = por %p12598_p8, %p12597_p7 }
  0x6a   : > { %p12593_p4 = pneg %p12592_p10 }
  0x6c   : > { %p12600_p0 = pnand %p12599_p11, %p12593_p4 }
  0x6e   : > { %12603 = shalt.err (!%p12600_p0)
}
  0x6f   : > { %10790 = dma.hbm_to_vmem [thread:$0]  (!%p12806_p12), %s14049_s8, 16, %s340_s27, [#allocation12]  }
  0x70   : > { %p14063_p1 = scmp.ne.s32.totalorder %s14058_s21, 0 }
  0x71   : > { %p14064_p2 = scmp.eq.s32.totalorder (!%p14063_p1), %s12770_s13, 0 }
  0x72   : > { %360 = sbr.rel (%p14063_p1) target bundleno = 2705 (0xa91), region = 56 }
  0x77   : > { %12647 = dma.done.wait (%p14064_p2), [#allocation3], 6144   ;;  %p14065_p13 = pmov %p14064_p2 }
  0x78   : > { %p14066_p9 = pmov %p14064_p2 }
  0x79   : > { %12649 = vsyncadd (%p14065_p13), [#allocation3], 4294961152 }
  0x7a   : > { %12651 = dma.done.wait (%p14066_p9), [#allocation6], 73792   ;;  %p14067_p3 = pmov %p14064_p2 }
  0x7b   : > { %p14068_p5 = pmov %p14064_p2 }
  0x7c   : > { %12653 = vsyncadd (%p14067_p3), [#allocation6], 4294893504 }
  0x7d   : > { %12655 = dma.done.wait (%p14068_p5), [#allocation9], 15408   ;;  %p14069_p12 = pmov %p14064_p2 }
  0x7e   : > { %p14070_p6 = pmov %p14064_p2 }
  0x7f   : > { %12657 = vsyncadd (%p14069_p12), [#allocation9], 4294951888 }
  0x80   : > { %12659 = dma.done.wait (%p14070_p6), [#allocation12], 32   ;;  %p14071_p10 = pmov %p14064_p2 }
  0x81   : > { %p419_p4 = scmp.lt.s32.totalorder %s12770_s13, 1  ;;  %v12695_v0 = vmov 0   ;;  %v456_v1 = vld [vmem:[#allocation2 + $0xc0] sm:$0xff]  ;;  %vm565_vm0 = vcmask 1045504   ;;  %v457_v18 = vld [vmem:[#allocation2 + $0xc8] sm:$0xff]  ;;  %v441_v23 = vld [vmem:[#allocation2 + $0x50] sm:$0xff] }
  0x82   : > { %12661 = vsyncadd (%p14071_p10), [#allocation12], 4294967264  ;;  %622 = vmatprep.mubr.bf16.mxu1 %v12695_v0  ;;  %884 = vmatprep.mubr.bf16.mxu0 %v12695_v0  ;;  %v460_v2 = vld [vmem:[#allocation2 + $0xe0] sm:$0x33]  ;;  %v461_v19 = vld [vmem:[#allocation2 + $0xe8] sm:$0x33] }
  0x83   : > { %s420_s1 = scalar_select %p419_p4, %s12770_s13, 1  ;;  %v439_v3 = vld [vmem:[#allocation2 + $0x40] sm:$0xff]  ;;  %v12900_v4 = vcombine.high %v456_v1, %v460_v2  ;;  %v9596_v6 = vcombine.low %v456_v1, %v460_v2  ;;  %v445_v24 = vld [vmem:[#allocation2 + $0x70] sm:$0x33]  ;;  %v12929_v26 = vcombine.high %v457_v18, %v461_v19  ;;  %v9598_v27 = vcombine.low %v457_v18, %v461_v19  ;;  %v449_v32 = vld [vmem:[#allocation2 + $0x88] sm:$0xff] }
  0x84   : > { %v443_v5 = vld [vmem:[#allocation2 + $0x60] sm:$0x33]  ;;  %v12934_v30 = vcombine.high %v441_v23, %v445_v24  ;;  %v9624_v31 = vcombine.low %v441_v23, %v445_v24  ;;  %v453_v33 = vld [vmem:[#allocation2 + $0xa8] sm:$0xff]  ;;  %v433_v34 = vld [vmem:[#allocation2 + $0x10] sm:$0xff]  ;;  %vm561_vm1 = vcmask 228352   ;;  %vm1018_vm2 = vcmask 1040384  }
  0x85   : > { %s10431_s21 = sshll.u32 %s420_s1, 5  ;;  %v448_v7 = vld [vmem:[#allocation2 + $0x80] sm:$0xff]  ;;  %v12902_v9 = vcombine.high %v439_v3, %v443_v5  ;;  %v9620_v10 = vcombine.low %v439_v3, %v443_v5  ;;  %9604 = vmatprep.subr.msk.bf16.mxu1 %vm565_vm0, %v12900_v4  ;;  %v12910_v15 = vsel %vm565_vm0, %v9596_v6, 0  ;;  %v437_v35 = vld [vmem:[#allocation2 + $0x30] sm:$0xff]  ;;  %v12943_v38 = vsel %vm565_vm0, %v9598_v27, 0  ;;  %v459_v59 = vld [vmem:[#allocation2 + $0xd8] sm:$0xff] }
  0x86   : > { %s12898_s23 = scalar_lea.vmem %s14041_s0, %s10431_s21  ;;  %v452_v8 = vld [vmem:[#allocation2 + $0xa0] sm:$0xff]  ;;  %603 = vmatpush1.bf16.msra.mxu1 %v12910_v15  ;;  %v12950_v40 = vsel %vm565_vm0, %v9624_v31, 0  ;;  %v12952_v41 = vcombine.high %v449_v32, %v453_v33  ;;  %v12954_v42 = vcombine.high %v433_v34, %v437_v35  ;;  %v458_v43 = vld [vmem:[#allocation2 + $0xd0] sm:$0xff]  ;;  %v12962_v47 = vcombine.low %v449_v32, %v453_v33  ;;  %v463_v60 = vld [vmem:[#allocation2 + $0xf8] sm:$0x33]  ;;  %s417_s22 = sand.u32 1, %s12672_s10  }
  0x87   : > { %v12904_v11 = vcombine.high %v448_v7, %v452_v8  ;;  %v431_v12 = vld [vmem:[#allocation2] sm:$0xff]  ;;  %v426_v17 = vld [vmem:[%s12898_s23 + $0x8] sm:$0xff]  ;;  %9628 = vmatprep.subr.msk.bf16.mxu0 %vm565_vm0, %v12902_v9  ;;  %v12919_v20 = vsel %vm565_vm0, %v9620_v10, 0  ;;  %v12921_v21 = vcombine.low %v448_v7, %v452_v8  ;;  %v462_v44 = vld [vmem:[#allocation2 + $0xf0] sm:$0x33]  ;;  %v12964_v48 = vcombine.low %v433_v34, %v437_v35  ;;  %s10428_s27 = sshll.u32 %s12770_s13, 4 }
  0x88   : > { %v435_v13 = vld [vmem:[#allocation2 + $0x20] sm:$0xff]  ;;  %865 = vmatpush1.bf16.msra.mxu0 %v12919_v20  ;;  %v12966_v49 = vcombine.high %v458_v43, %v462_v44  ;;  %v9600_v51 = vcombine.low %v458_v43, %v462_v44  ;;  %v450_v53 = vld [vmem:[#allocation2 + $0x90] sm:$0xff]  ;;  %v428_v55 = vld [vmem:[%s12898_s23 + $0x18] sm:$0xf]  ;;  %v9602_v27 = vcombine.low %v459_v59, %v463_v60  ;;  %vm12697_vm3 = vmmov 0   ;;  %s418_s24 = scalar_lea.vmem [#allocation14], %s417_s22  ;;  %s9442_s21 = scalar_lea.hbm %s14050_s9, %s10428_s27 }
  0x89   : > { %v425_v14 = vld [vmem:[%s12898_s23] sm:$0xff]  ;;  %v12912_v16 = vcombine.high %v431_v12, %v435_v13  ;;  %604 = vmatprep.subr.bf16.mxu1 %v12904_v11  ;;  %v12927_v25 = vcombine.low %v431_v12, %v435_v13  ;;  %v427_v54 = vld [vmem:[%s12898_s23 + $0x10] sm:$0xff]  ;;  %v13005_v12 = vcombine.high %v459_v59, %v463_v60  ;;  %v444_v32 = vld [vmem:[#allocation2 + $0x68] sm:$0x33]  ;;  %vm9418_vm4 = vcmask 73728   ;;  %s9444_s14 = sshll.u32 %s418_s24, 4  ;;  %s9445_s14 = int_to_ptr.vmem [resolvable:$true] %s9444_s14 }
  0x8a   : > { %v12923_v22 = vpack.c.bf16 %v426_v17, %v425_v14  ;;  %605 = vmatpush1.bf16.msra.mxu1 %v12921_v21  ;;  %v473_v45 = vld [vmem:[#allocation2 + $0x140] sm:$0xff]  ;;  %v454_v56 = vld [vmem:[#allocation2 + $0xb0] sm:$0xff]  ;;  %v12978_v61 = vpack.c.bf16 %v428_v55, %v427_v54  ;;  %v12985_v2 = vsel %vm565_vm0, %v9600_v51, 0  ;;  %v451_v14 = vld [vmem:[#allocation2 + $0x98] sm:$0xff]  ;;  %v13027_v33 = vsel %vm565_vm0, %v9602_v27, 0  ;;  %s9432_s26 = scalar_lea.sflag [#allocation4], %s417_s22 }
  0x8b   : > { %866 = vmatprep.subr.bf16.mxu0 %v12912_v16  ;;  %9606 = vmatprep.subr.msk.bf16.mxu1 %vm565_vm0, %v12929_v26  ;;  %v477_v46 = vld [vmem:[#allocation2 + $0x160] sm:$0x33]  ;;  %v475_v62 = vld [vmem:[#allocation2 + $0x150] sm:$0xff]  ;;  %v12990_v5 = vcombine.high %v450_v53, %v454_v56  ;;  %v12998_v7 = vcombine.low %v450_v53, %v454_v56  ;;  %v455_v17 = vld [vmem:[#allocation2 + $0xb8] sm:$0xff]  ;;  %s12604_s29 = scalar_lea.vmem %s9445_s14, 16  ;;  %p14072_p8 = scmp.ne.s32.totalorder %s14056_s19, 0 }
  0x8c   : > { %v482_v28 = vshrl.u32 %v12923_v22, 16  ;;  %v485_v29 = vshll.u32 %v12923_v22, 16  ;;  %867 = vmatpush1.bf16.msra.mxu0 %v12927_v25  ;;  %v12970_v50 = vcombine.high %v473_v45, %v477_v46  ;;  %v9644_v52 = vcombine.low %v473_v45, %v477_v46  ;;  %v465_v57 = vld [vmem:[#allocation2 + $0x100] sm:$0xff]  ;;  %v479_v63 = vld [vmem:[#allocation2 + $0x170] sm:$0x33]  ;;  %v432_v44 = vld [vmem:[#allocation2 + $0x8] sm:$0xff]  ;;  %p12605_p7 = scmp.ne.s32.totalorder %s9445_s14, %s12604_s29 }
  0x8d   : > { %9632 = vmatprep.subr.msk.bf16.mxu0 %vm565_vm0, %v12934_v30  ;;  %v469_v58 = vld [vmem:[#allocation2 + $0x120] sm:$0xff]  ;;  %v1019_v8 = vrot.slane %v12923_v22, 7  ;;  %v1020_v13 = vrot.slane %v12978_v61, 7  ;;  %v467_v18 = vld [vmem:[#allocation2 + $0x110] sm:$0xff]  ;;  %v13014_v24 = vcombine.high %v475_v62, %v479_v63  ;;  %v13032_v35 = vcombine.high %v451_v14, %v455_v17  ;;  %v436_v45 = vld [vmem:[#allocation2 + $0x28] sm:$0xff]  ;;  %s12698_s23 = smov [#allocation14]  }
  0x8e   : > { %v484_v36 = vrot.slane %v482_v28, 3  ;;  %v487_v37 = vrot.slane %v485_v29, 4  ;;  %v2132_v1 = vrot.slane %v485_v29, 1  ;;  %v12988_v3 = vsel %vm565_vm0, %v9644_v52, 0  ;;  %v471_v19 = vld [vmem:[#allocation2 + $0x130] sm:$0xff]  ;;  %v442_v52 = vld [vmem:[#allocation2 + $0x58] sm:$0xff]  ;;  %p12606_p11 = pnand %p12605_p7, %p14072_p8 }
  0x8f   : > { %9629 = vmatmul.mubr.msk.bf16.vlgmr.msra.gmra.mxu0 %vm561_vm1, %v12923_v22  ;;  %v12992_v6 = vcombine.high %v465_v57, %v469_v58  ;;  %v13003_v10 = vcombine.low %v465_v57, %v469_v58  ;;  %v9648_v29 = vcombine.low %v475_v62, %v479_v63  ;;  %v13020_v31 = vsel %vm1018_vm2, %v1019_v8, %v1020_v13  ;;  %v446_v53 = vld [vmem:[#allocation2 + $0x78] sm:$0x33]  ;;  %v474_v62 = vld [vmem:[#allocation2 + $0x148] sm:$0xff]  ;;  %s12608_s17 = sshll.u32 %s12698_s23, 4  ;;  %s12609_s17 = int_to_ptr.vmem [resolvable:$false] %s12608_s17 }
  0x90   : > { %v12945_v39 = vor.u32 %v487_v37, %v484_v36  ;;  %947 = vmatpush1.bf16.msra.mxu0 %v12950_v40  ;;  %966 = vmatprep.mubr.bf16.mxu0 %v12695_v0  ;;  %v13010_v23 = vor.u32 %v2132_v1, %v482_v28  ;;  %v440_v28 = vld [vmem:[#allocation2 + $0x48] sm:$0xff]  ;;  %v13034_v36 = vcombine.high %v467_v18, %v471_v19  ;;  %v434_v57 = vld [vmem:[#allocation2 + $0x18] sm:$0xff]  ;;  %p12607_p0 = pneg %p12606_p11  ;;  %s12610_s13 = scalar_lea.vmem %s12609_s17, 32 }
  0x91   : > { %948 = vmatprep.subr.bf16.mxu0 %v12954_v42  ;;  %v13030_v34 = vsel %vm565_vm0, %v9648_v29, 0  ;;  %v13042_v37 = vcombine.low %v451_v14, %v455_v17  ;;  %v13044_v43 = vcombine.low %v467_v18, %v471_v19  ;;  %v13048_v46 = vcombine.high %v440_v28, %v444_v32  ;;  %v438_v58 = vld [vmem:[#allocation2 + $0x38] sm:$0xff]  ;;  %v478_v63 = vld [vmem:[#allocation2 + $0x168] sm:$0x33]  ;;  %p12611_p1 = scmp.lt.s32.totalorder %s9445_s14, %s12609_s17  ;;  %p12612_p2 = scmp.lt.s32.totalorder %s12610_s13, %s12604_s29 }
  0x92   : > { %9605 = vmatmul.mubr.msk.bf16.vlgmr.msra.gmra.mxu1 %vm561_vm1, %v12945_v39  ;;  %v9622_v51 = vcombine.low %v440_v28, %v444_v32  ;;  %v13061_v55 = vcombine.high %v432_v44, %v436_v45  ;;  %v13069_v56 = vcombine.low %v432_v44, %v436_v45  ;;  %v13073_v59 = vcombine.high %v442_v52, %v446_v53  ;;  %v466_v14 = vld [vmem:[#allocation2 + $0x108] sm:$0xff]  ;;  %v476_v27 = vld [vmem:[#allocation2 + $0x158] sm:$0xff] }
  0x93   : > { %644 = vmatpush1.bf16.msra.mxu1 %v12943_v38  ;;  %663 = vmatprep.mubr.bf16.mxu1 %v12695_v0  ;;  %v9626_v60 = vcombine.low %v442_v52, %v446_v53  ;;  %v13086_v8 = vcombine.high %v434_v57, %v438_v58  ;;  %v13094_v13 = vcombine.low %v434_v57, %v438_v58  ;;  %v470_v17 = vld [vmem:[#allocation2 + $0x128] sm:$0xff]  ;;  %v480_v29 = vld [vmem:[#allocation2 + $0x178] sm:$0x33]  ;;  %p12613_p13 = por %p12612_p2, %p12611_p1 }
  0x94   : > { %645 = vmatprep.subr.bf16.mxu1 %v12952_v41  ;;  %949 = vmatpush1.bf16.msra.mxu0 %v12964_v48  ;;  %v13059_v54 = vsel %vm565_vm0, %v9622_v51, 0  ;;  %v13098_v18 = vcombine.high %v474_v62, %v478_v63  ;;  %v9646_v19 = vcombine.low %v474_v62, %v478_v63  ;;  %v13111_v32 = vcombine.high %v466_v14, %v470_v17  ;;  %v468_v45 = vld [vmem:[#allocation2 + $0x118] sm:$0xff] }
  0x95   : > { %9652 = vmatprep.subr.msk.bf16.mxu0 %vm565_vm0, %v12970_v50  ;;  %v13084_v1 = vsel %vm565_vm0, %v9626_v60, 0  ;;  %v13119_v44 = vcombine.low %v466_v14, %v470_v17  ;;  %v472_v51 = vld [vmem:[#allocation2 + $0x138] sm:$0xff]  ;;  %v13123_v52 = vcombine.high %v476_v27, %v480_v29  ;;  %v9650_v53 = vcombine.low %v476_v27, %v480_v29  ;;  %p12614_p9 = pnand %p12613_p13, %p12607_p0 }
  0x96   : > { %v13109_v28 = vsel %vm565_vm0, %v9646_v19, 0  ;;  %v13136_v58 = vcombine.high %v468_v45, %v472_v51  ;;  %v13144_v60 = vcombine.low %v468_v45, %v472_v51  ;;  %v1622_v62 = vshrl.u32 %v12978_v61, 16  ;;  %v10887_v19 = vld [vmem:[#allocation7 + $0xa54] ss:$24 sps:$4 sm:$0xff]  }
  0x97   : > { %646 = vmatpush1.bf16.msra.mxu1 %v12962_v47  ;;  %9633 = vmatmul.mubr.msk.bf16.vlgmr.msra.gmra.mxu0 %vm561_vm1, %v12923_v22  ;;  %v13134_v57 = vsel %vm565_vm0, %v9650_v53, 0  ;;  %v1625_v63 = vshll.u32 %v12978_v61, 16  ;;  %v10893_v53 = vld [vmem:[#allocation7 + $0xa24] ss:$24 sps:$4 sm:$0xff]  }
  0x98   : > { %9608 = vmatprep.subr.msk.bf16.mxu1 %vm565_vm0, %v12966_v49  ;;  %1134 = vmatpush1.bf16.msra.mxu0 %v12988_v3  ;;  %v1624_v14 = vrot.slane %v1622_v62, 2  ;;  %v10891_v62 = vld [vmem:[#allocation7 + $0xa20] ss:$24 sps:$4 sm:$0xff]  }
  0x99   : > { %1135 = vmatprep.subr.bf16.mxu0 %v12992_v6  ;;  %1153 = vmatprep.mubr.bf16.mxu0 %v12695_v0  ;;  %v1627_v17 = vrot.slane %v1625_v63, 3 }
  0x9a   : > { %9607 = vmatmul.mubr.msk.bf16.vlgmr.msra.gmra.mxu1 %vm561_vm1, %v12945_v39 }
  0x9b   : > { %685 = vmatpush1.bf16.msra.mxu1 %v12985_v2  ;;  %704 = vmatprep.mubr.bf16.mxu1 %v12695_v0  ;;  %v13168_v61 = vor.u32 %v1627_v17, %v1624_v14 }
  0x9c   : > { %686 = vmatprep.subr.bf16.mxu1 %v12990_v5  ;;  %1136 = vmatpush1.bf16.msra.mxu0 %v13003_v10 }
  0x9d   : > { %9656 = vmatprep.subr.msk.bf16.mxu0 %vm565_vm0, %v13014_v24 }
  0x9f   : > { %687 = vmatpush1.bf16.msra.mxu1 %v12998_v7  ;;  %9653 = vmatmul.mubr.msk.bf16.vlgmr.msra.gmra.mxu0 %vm561_vm1, %v13020_v31 }
  0xa0   : > { %9610 = vmatprep.subr.msk.bf16.mxu1 %vm565_vm0, %v13005_v12  ;;  %1216 = vmatpush1.bf16.msra.mxu0 %v13030_v34 }
  0xa1   : > { %1217 = vmatprep.subr.bf16.mxu0 %v13034_v36  ;;  %1235 = vmatprep.mubr.bf16.mxu0 %v12695_v0 }
  0xa2   : > { %9609 = vmatmul.mubr.msk.bf16.vlgmr.msra.gmra.mxu1 %vm561_vm1, %v12945_v39 }
  0xa3   : > { %726 = vmatpush1.bf16.msra.mxu1 %v13027_v33  ;;  %745 = vmatprep.mubr.bf16.mxu1 %v12695_v0 }
  0xa4   : > { %727 = vmatprep.subr.bf16.mxu1 %v13032_v35  ;;  %1218 = vmatpush1.bf16.msra.mxu0 %v13044_v43 }
  0xa5   : > { %9660 = vmatprep.subr.msk.bf16.mxu0 %vm565_vm0, %v12900_v4 }
  0xa7   : > { %728 = vmatpush1.bf16.msra.mxu1 %v13042_v37  ;;  %9657 = vmatmul.mubr.msk.bf16.vlgmr.msra.gmra.mxu0 %vm561_vm1, %v13020_v31 }
  0xa8   : > { %9630 = vmatprep.subr.msk.bf16.mxu1 %vm565_vm0, %v13048_v46  ;;  %1306 = vmatpush1.bf16.msra.mxu0 %v12910_v15 }
  0xa9   : > { %1307 = vmatprep.subr.bf16.mxu0 %v12904_v11  ;;  %1325 = vmatprep.mubr.bf16.mxu0 %v12695_v0 }
  0xaa   : > { %9611 = vmatmul.mubr.msk.bf16.vlgmr.msra.gmra.mxu1 %vm561_vm1, %v12945_v39 }
  0xab   : > { %906 = vmatpush1.bf16.msra.mxu1 %v13059_v54  ;;  %925 = vmatprep.mubr.bf16.mxu1 %v12695_v0 }
  0xac   : > { %907 = vmatprep.subr.bf16.mxu1 %v13061_v55  ;;  %1308 = vmatpush1.bf16.msra.mxu0 %v12921_v21 }
  0xad   : > { %9664 = vmatprep.subr.msk.bf16.mxu0 %vm565_vm0, %v12966_v49 }
  0xaf   : > { %908 = vmatpush1.bf16.msra.mxu1 %v13069_v56  ;;  %9661 = vmatmul.mubr.msk.bf16.vlgmr.msra.gmra.mxu0 %vm561_vm1, %v13020_v31 }
  0xb0   : > { %9634 = vmatprep.subr.msk.bf16.mxu1 %vm565_vm0, %v13073_v59  ;;  %1388 = vmatpush1.bf16.msra.mxu0 %v12985_v2 }
  0xb1   : > { %1389 = vmatprep.subr.bf16.mxu0 %v12990_v5  ;;  %1407 = vmatprep.mubr.bf16.mxu0 %v12695_v0 }
  0xb2   : > { %9631 = vmatmul.mubr.msk.bf16.vlgmr.msra.gmra.mxu1 %vm561_vm1, %v12923_v22 }
  0xb3   : > { %988 = vmatpush1.bf16.msra.mxu1 %v13084_v1  ;;  %1007 = vmatprep.mubr.bf16.mxu1 %v12695_v0 }
  0xb4   : > { %989 = vmatprep.subr.bf16.mxu1 %v13086_v8  ;;  %1390 = vmatpush1.bf16.msra.mxu0 %v12998_v7 }
  0xb5   : > { %9668 = vmatprep.subr.msk.bf16.mxu0 %vm565_vm0, %v12902_v9 }
  0xb7   : > { %990 = vmatpush1.bf16.msra.mxu1 %v13094_v13  ;;  %9665 = vmatmul.mubr.msk.bf16.vlgmr.msra.gmra.mxu0 %vm561_vm1, %v13020_v31 }
  0xb8   : > { %9654 = vmatprep.subr.msk.bf16.mxu1 %vm565_vm0, %v13098_v18  ;;  %1470 = vmatpush1.bf16.msra.mxu0 %v12919_v20 }
  0xb9   : > { %1471 = vmatprep.subr.bf16.mxu0 %v12912_v16  ;;  %1489 = vmatprep.mubr.bf16.mxu0 %v12695_v0 }
  0xba   : > { %9635 = vmatmul.mubr.msk.bf16.vlgmr.msra.gmra.mxu1 %vm561_vm1, %v12923_v22 }
  0xbb   : > { %1175 = vmatpush1.bf16.msra.mxu1 %v13109_v28  ;;  %1194 = vmatprep.mubr.bf16.mxu1 %v12695_v0 }
  0xbc   : > { %1176 = vmatprep.subr.bf16.mxu1 %v13111_v32  ;;  %1472 = vmatpush1.bf16.msra.mxu0 %v12927_v25 }
  0xbd   : > { %9672 = vmatprep.subr.msk.bf16.mxu0 %vm565_vm0, %v12934_v30 }
  0xbf   : > { %1177 = vmatpush1.bf16.msra.mxu1 %v13119_v44  ;;  %9669 = vmatmul.mubr.msk.bf16.vlgmr.msra.gmra.mxu0 %vm561_vm1, %v12945_v39 }
  0xc0   : > { %9658 = vmatprep.subr.msk.bf16.mxu1 %vm565_vm0, %v13123_v52  ;;  %1552 = vmatpush1.bf16.msra.mxu0 %v12950_v40 }
  0xc1   : > { %1553 = vmatprep.subr.bf16.mxu0 %v12954_v42  ;;  %1571 = vmatprep.mubr.bf16.mxu0 %v12695_v0 }
  0xc2   : > { %9655 = vmatmul.mubr.msk.bf16.vlgmr.msra.gmra.mxu1 %vm561_vm1, %v13020_v31 }
  0xc3   : > { %1257 = vmatpush1.bf16.msra.mxu1 %v13134_v57  ;;  %1276 = vmatprep.mubr.bf16.mxu1 %v12695_v0 }
  0xc4   : > { %1258 = vmatprep.subr.bf16.mxu1 %v13136_v58  ;;  %1554 = vmatpush1.bf16.msra.mxu0 %v12964_v48 }
  0xc5   : > { %9676 = vmatprep.subr.msk.bf16.mxu0 %vm565_vm0, %v12970_v50 }
  0xc7   : > { %1259 = vmatpush1.bf16.msra.mxu1 %v13144_v60  ;;  %9673 = vmatmul.mubr.msk.bf16.vlgmr.msra.gmra.mxu0 %vm561_vm1, %v12945_v39 }
  0xc8   : > { %9662 = vmatprep.subr.msk.bf16.mxu1 %vm565_vm0, %v12929_v26  ;;  %1645 = vmatpush1.bf16.msra.mxu0 %v12988_v3 }
  0xc9   : > { %1646 = vmatprep.subr.bf16.mxu0 %v12992_v6  ;;  %1664 = vmatprep.mubr.bf16.mxu0 %v12695_v0 }
  0xca   : > { %9659 = vmatmul.mubr.msk.bf16.vlgmr.msra.gmra.mxu1 %vm561_vm1, %v13020_v31 }
  0xcb   : > { %1347 = vmatpush1.bf16.msra.mxu1 %v12943_v38  ;;  %1366 = vmatprep.mubr.bf16.mxu1 %v12695_v0 }
  0xcc   : > { %1348 = vmatprep.subr.bf16.mxu1 %v12952_v41  ;;  %1647 = vmatpush1.bf16.msra.mxu0 %v13003_v10 }
  0xcd   : > { %9680 = vmatprep.subr.msk.bf16.mxu0 %vm565_vm0, %v13014_v24 }
  0xcf   : > { %1349 = vmatpush1.bf16.msra.mxu1 %v12962_v47  ;;  %9677 = vmatmul.mubr.msk.bf16.vlgmr.msra.gmra.mxu0 %vm561_vm1, %v13168_v61 }
  0xd0   : > { %9666 = vmatprep.subr.msk.bf16.mxu1 %vm565_vm0, %v13005_v12  ;;  %1727 = vmatpush1.bf16.msra.mxu0 %v13030_v34 }
  0xd1   : > { %1728 = vmatprep.subr.bf16.mxu0 %v13034_v36  ;;  %1746 = vmatprep.mubr.bf16.mxu0 %v12695_v0 }
  0xd2   : > { %9663 = vmatmul.mubr.msk.bf16.vlgmr.msra.gmra.mxu1 %vm561_vm1, %v13020_v31 }
  0xd3   : > { %1429 = vmatpush1.bf16.msra.mxu1 %v13027_v33  ;;  %1448 = vmatprep.mubr.bf16.mxu1 %v12695_v0 }
  0xd4   : > { %1430 = vmatprep.subr.bf16.mxu1 %v13032_v35  ;;  %1729 = vmatpush1.bf16.msra.mxu0 %v13044_v43 }
  0xd5   : > { %9684 = vmatprep.subr.msk.bf16.mxu0 %vm565_vm0, %v12900_v4 }
  0xd7   : > { %1431 = vmatpush1.bf16.msra.mxu1 %v13042_v37  ;;  %9681 = vmatmul.mubr.msk.bf16.vlgmr.msra.gmra.mxu0 %vm561_vm1, %v13168_v61 }
  0xd8   : > { %9670 = vmatprep.subr.msk.bf16.mxu1 %vm565_vm0, %v13048_v46  ;;  %1817 = vmatpush1.bf16.msra.mxu0 %v12910_v15 }
  0xd9   : > { %1818 = vmatprep.subr.bf16.mxu0 %v12904_v11  ;;  %1836 = vmatprep.mubr.bf16.mxu0 %v12695_v0 }
  0xda   : > { %9667 = vmatmul.mubr.msk.bf16.vlgmr.msra.gmra.mxu1 %vm561_vm1, %v13020_v31 }
  0xdb   : > { %1511 = vmatpush1.bf16.msra.mxu1 %v13059_v54  ;;  %1530 = vmatprep.mubr.bf16.mxu1 %v12695_v0 }
  0xdc   : > { %1512 = vmatprep.subr.bf16.mxu1 %v13061_v55  ;;  %1819 = vmatpush1.bf16.msra.mxu0 %v12921_v21 }
  0xdd   : > { %9688 = vmatprep.subr.msk.bf16.mxu0 %vm565_vm0, %v12966_v49 }
  0xdf   : > { %1513 = vmatpush1.bf16.msra.mxu1 %v13069_v56  ;;  %9685 = vmatmul.mubr.msk.bf16.vlgmr.msra.gmra.mxu0 %vm561_vm1, %v13168_v61 }
  0xe0   : > { %9674 = vmatprep.subr.msk.bf16.mxu1 %vm565_vm0, %v13073_v59  ;;  %1899 = vmatpush1.bf16.msra.mxu0 %v12985_v2 }
  0xe1   : > { %1900 = vmatprep.subr.bf16.mxu0 %v12990_v5  ;;  %1918 = vmatprep.mubr.bf16.mxu0 %v12695_v0 }
  0xe2   : > { %9671 = vmatmul.mubr.msk.bf16.vlgmr.msra.gmra.mxu1 %vm561_vm1, %v12945_v39 }
  0xe3   : > { %1593 = vmatpush1.bf16.msra.mxu1 %v13084_v1  ;;  %1612 = vmatprep.mubr.bf16.mxu1 %v12695_v0 }
  0xe4   : > { %1594 = vmatprep.subr.bf16.mxu1 %v13086_v8  ;;  %1901 = vmatpush1.bf16.msra.mxu0 %v12998_v7 }
  0xe5   : > { %9692 = vmatprep.subr.msk.bf16.mxu0 %vm565_vm0, %v12902_v9 }
  0xe7   : > { %1595 = vmatpush1.bf16.msra.mxu1 %v13094_v13  ;;  %9689 = vmatmul.mubr.msk.bf16.vlgmr.msra.gmra.mxu0 %vm561_vm1, %v13168_v61 }
  0xe8   : > { %9678 = vmatprep.subr.msk.bf16.mxu1 %vm565_vm0, %v13098_v18  ;;  %1981 = vmatpush1.bf16.msra.mxu0 %v12919_v20 }
  0xe9   : > { %1982 = vmatprep.subr.bf16.mxu0 %v12912_v16  ;;  %2000 = vmatprep.mubr.bf16.mxu0 %v12695_v0 }
  0xea   : > { %9675 = vmatmul.mubr.msk.bf16.vlgmr.msra.gmra.mxu1 %vm561_vm1, %v12945_v39 }
  0xeb   : > { %1686 = vmatpush1.bf16.msra.mxu1 %v13109_v28  ;;  %1705 = vmatprep.mubr.bf16.mxu1 %v12695_v0 }
  0xec   : > { %1687 = vmatprep.subr.bf16.mxu1 %v13111_v32  ;;  %1983 = vmatpush1.bf16.msra.mxu0 %v12927_v25 }
  0xed   : > { %9696 = vmatprep.subr.msk.bf16.mxu0 %vm565_vm0, %v12934_v30 }
  0xef   : > { %1688 = vmatpush1.bf16.msra.mxu1 %v13119_v44  ;;  %9693 = vmatmul.mubr.msk.bf16.vlgmr.msra.gmra.mxu0 %vm561_vm1, %v13020_v31 }
  0xf0   : > { %9682 = vmatprep.subr.msk.bf16.mxu1 %vm565_vm0, %v13123_v52  ;;  %2063 = vmatpush1.bf16.msra.mxu0 %v12950_v40 }
  0xf1   : > { %2064 = vmatprep.subr.bf16.mxu0 %v12954_v42  ;;  %2082 = vmatprep.mubr.bf16.mxu0 %v12695_v0 }
  0xf2   : > { %9679 = vmatmul.mubr.msk.bf16.vlgmr.msra.gmra.mxu1 %vm561_vm1, %v13168_v61 }
  0xf3   : > { %1768 = vmatpush1.bf16.msra.mxu1 %v13134_v57  ;;  %1787 = vmatprep.mubr.bf16.mxu1 %v12695_v0 }
  0xf4   : > { %1769 = vmatprep.subr.bf16.mxu1 %v13136_v58  ;;  %2065 = vmatpush1.bf16.msra.mxu0 %v12964_v48 }
  0xf5   : > { %9700 = vmatprep.subr.msk.bf16.mxu0 %vm565_vm0, %v12970_v50 }
  0xf7   : > { %1770 = vmatpush1.bf16.msra.mxu1 %v13144_v60  ;;  %9697 = vmatmul.mubr.msk.bf16.vlgmr.msra.gmra.mxu0 %vm561_vm1, %v13020_v31 }
  0xf8   : > { %9686 = vmatprep.subr.msk.bf16.mxu1 %vm565_vm0, %v12929_v26  ;;  %2150 = vmatpush1.bf16.msra.mxu0 %v12988_v3 }
  0xf9   : > { %2151 = vmatprep.subr.bf16.mxu0 %v12992_v6  ;;  %2169 = vmatprep.mubr.bf16.mxu0 %v12695_v0 }
  0xfa   : > { %9683 = vmatmul.mubr.msk.bf16.vlgmr.msra.gmra.mxu1 %vm561_vm1, %v13168_v61 }
  0xfb   : > { %1858 = vmatpush1.bf16.msra.mxu1 %v12943_v38  ;;  %1877 = vmatprep.mubr.bf16.mxu1 %v12695_v0 }
  0xfc   : > { %1859 = vmatprep.subr.bf16.mxu1 %v12952_v41  ;;  %2152 = vmatpush1.bf16.msra.mxu0 %v13003_v10 }
  0xfd   : > { %9704 = vmatprep.subr.msk.bf16.mxu0 %vm565_vm0, %v13014_v24 }
  0xff   : > { %1860 = vmatpush1.bf16.msra.mxu1 %v12962_v47  ;;  %9701 = vmatmul.mubr.msk.bf16.vlgmr.msra.gmra.mxu0 %vm561_vm1, %v13010_v23 }
 0x100   : > { %9690 = vmatprep.subr.msk.bf16.mxu1 %vm565_vm0, %v13005_v12  ;;  %2232 = vmatpush1.bf16.msra.mxu0 %v13030_v34 }
 0x101   : > { %2233 = vmatprep.subr.bf16.mxu0 %v13034_v36  ;;  %2251 = vmatprep.mubr.bf16.mxu0 %v12695_v0 }
 0x102   : > { %9687 = vmatmul.mubr.msk.bf16.vlgmr.msra.gmra.mxu1 %vm561_vm1, %v13168_v61 }
 0x103   : > { %1940 = vmatpush1.bf16.msra.mxu1 %v13027_v33  ;;  %1959 = vmatprep.mubr.bf16.mxu1 %v12695_v0 }
 0x104   : > { %1941 = vmatprep.subr.bf16.mxu1 %v13032_v35  ;;  %2234 = vmatpush1.bf16.msra.mxu0 %v13044_v43 }
 0x105   : > { %9708 = vmatprep.subr.msk.bf16.mxu0 %vm565_vm0, %v12900_v4  ;;  %v13363_v4 = vrot.slane %v12923_v22, 4 }
 0x107   : > { %1942 = vmatpush1.bf16.msra.mxu1 %v13042_v37  ;;  %9705 = vmatmul.mubr.msk.bf16.vlgmr.msra.gmra.mxu0 %vm561_vm1, %v13010_v23 }
 0x108   : > { %9694 = vmatprep.subr.msk.bf16.mxu1 %vm565_vm0, %v13048_v46  ;;  %2322 = vmatpush1.bf16.msra.mxu0 %v12910_v15  ;;  %v10863_v15 = vld [vmem:[#allocation7 + $0x724] ss:$24 sps:$4 sm:$0xff]  }
 0x109   : > { %2323 = vmatprep.subr.bf16.mxu0 %v12904_v11  ;;  %2341 = vmatprep.mubr.bf16.mxu0 %v12695_v0  ;;  %v10858_v11 = vld [vmem:[#allocation7 + $0x750] ss:$24 sps:$4 sm:$0xff]  }
 0x10a   : > { %9691 = vmatmul.mubr.msk.bf16.vlgmr.msra.gmra.mxu1 %vm561_vm1, %v13168_v61 }
 0x10b   : > { %2022 = vmatpush1.bf16.msra.mxu1 %v13059_v54  ;;  %2041 = vmatprep.mubr.bf16.mxu1 %v12695_v0 }
 0x10c   : > { %2023 = vmatprep.subr.bf16.mxu1 %v13061_v55  ;;  %2324 = vmatpush1.bf16.msra.mxu0 %v12921_v21  ;;  %v10864_v21 = vld [vmem:[#allocation7 + $0x6f0] ss:$24 sps:$4 sm:$0xff]  }
 0x10d   : > { %9712 = vmatprep.subr.msk.bf16.mxu0 %vm565_vm0, %v12966_v49 }
 0x10f   : > { %2024 = vmatpush1.bf16.msra.mxu1 %v13069_v56  ;;  %9709 = vmatmul.mubr.msk.bf16.vlgmr.msra.gmra.mxu0 %vm561_vm1, %v13010_v23 }
 0x110   : > { %9698 = vmatprep.subr.msk.bf16.mxu1 %vm565_vm0, %v13073_v59  ;;  %2404 = vmatpush1.bf16.msra.mxu0 %v12985_v2  ;;  %v10870_v2 = vld [vmem:[#allocation7 + $0x690] ss:$24 sps:$4 sm:$0xff]  }
 0x111   : > { %2405 = vmatprep.subr.bf16.mxu0 %v12990_v5  ;;  %2423 = vmatprep.mubr.bf16.mxu0 %v12695_v0  ;;  %v10875_v5 = vld [vmem:[#allocation7 + $0x664] ss:$24 sps:$4 sm:$0xff]  }
 0x112   : > { %9695 = vmatmul.mubr.msk.bf16.vlgmr.msra.gmra.mxu1 %vm561_vm1, %v13020_v31 }
 0x113   : > { %2104 = vmatpush1.bf16.msra.mxu1 %v13084_v1  ;;  %2123 = vmatprep.mubr.bf16.mxu1 %v12695_v0 }
 0x114   : > { %2105 = vmatprep.subr.bf16.mxu1 %v13086_v8  ;;  %2406 = vmatpush1.bf16.msra.mxu0 %v12998_v7 }
 0x115   : > { %9716 = vmatprep.subr.msk.bf16.mxu0 %vm565_vm0, %v12902_v9  ;;  %v10860_v9 = vld [vmem:[#allocation7 + $0x754] ss:$24 sps:$4 sm:$0xff]  }
 0x117   : > { %2106 = vmatpush1.bf16.msra.mxu1 %v13094_v13  ;;  %9713 = vmatmul.mubr.msk.bf16.vlgmr.msra.gmra.mxu0 %vm561_vm1, %v13010_v23 }
 0x118   : > { %9702 = vmatprep.subr.msk.bf16.mxu1 %vm565_vm0, %v13098_v18  ;;  %2486 = vmatpush1.bf16.msra.mxu0 %v12919_v20  ;;  %v10866_v20 = vld [vmem:[#allocation7 + $0x6f4] ss:$24 sps:$4 sm:$0xff]  }
 0x119   : > { %2487 = vmatprep.subr.bf16.mxu0 %v12912_v16  ;;  %2505 = vmatprep.mubr.bf16.mxu0 %v12695_v0  ;;  %v10861_v16 = vld [vmem:[#allocation7 + $0x720] ss:$24 sps:$4 sm:$0xff]  }
 0x11a   : > { %9699 = vmatmul.mubr.msk.bf16.vlgmr.msra.gmra.mxu1 %vm561_vm1, %v13020_v31 }
 0x11b   : > { %2191 = vmatpush1.bf16.msra.mxu1 %v13109_v28  ;;  %2210 = vmatprep.mubr.bf16.mxu1 %v12695_v0 }
 0x11c   : > { %2192 = vmatprep.subr.bf16.mxu1 %v13111_v32  ;;  %2488 = vmatpush1.bf16.msra.mxu0 %v12927_v25 }
 0x11d   : > { %9720 = vmatprep.subr.msk.bf16.mxu0 %vm565_vm0, %v12934_v30  ;;  %v10869_v30 = vld [vmem:[#allocation7 + $0x6c4] ss:$24 sps:$4 sm:$0xff]  }
 0x11f   : > { %2193 = vmatpush1.bf16.msra.mxu1 %v13119_v44  ;;  %9717 = vmatmul.mubr.msk.bf16.vlgmr.msra.gmra.mxu0 %vm561_vm1, %v13168_v61 }
 0x120   : > { %9706 = vmatprep.subr.msk.bf16.mxu1 %vm565_vm0, %v13123_v52  ;;  %2568 = vmatpush1.bf16.msra.mxu0 %v12950_v40  ;;  %v10867_v40 = vld [vmem:[#allocation7 + $0x6c0] ss:$24 sps:$4 sm:$0xff]  }
 0x121   : > { %2569 = vmatprep.subr.bf16.mxu0 %v12954_v42  ;;  %2587 = vmatprep.mubr.bf16.mxu0 %v12695_v0 }
 0x122   : > { %9703 = vmatmul.mubr.msk.bf16.vlgmr.msra.gmra.mxu1 %vm561_vm1, %v13010_v23 }
 0x123   : > { %2273 = vmatpush1.bf16.msra.mxu1 %v13134_v57  ;;  %2292 = vmatprep.mubr.bf16.mxu1 %v12695_v0 }
 0x124   : > { %2274 = vmatprep.subr.bf16.mxu1 %v13136_v58  ;;  %2570 = vmatpush1.bf16.msra.mxu0 %v12964_v48  ;;  %v10872_v48 = vld [vmem:[#allocation7 + $0x694] ss:$24 sps:$4 sm:$0xff]  }
 0x125   : > { %9724 = vmatprep.subr.msk.bf16.mxu0 %vm565_vm0, %v12970_v50 }
 0x127   : > { %2275 = vmatpush1.bf16.msra.mxu1 %v13144_v60  ;;  %9721 = vmatmul.mubr.msk.bf16.vlgmr.msra.gmra.mxu0 %vm561_vm1, %v13168_v61 }
 0x128   : > { %9710 = vmatprep.subr.msk.bf16.mxu1 %vm565_vm0, %v12929_v26  ;;  %2654 = vmatpush1.bf16.msra.mxu0 %v12988_v3 }
 0x129   : > { %2655 = vmatprep.subr.bf16.mxu0 %v12992_v6  ;;  %2673 = vmatprep.mubr.bf16.mxu0 %v12695_v0 }
 0x12a   : > { %9707 = vmatmul.mubr.msk.bf16.vlgmr.msra.gmra.mxu1 %vm561_vm1, %v13010_v23 }
 0x12b   : > { %2363 = vmatpush1.bf16.msra.mxu1 %v12943_v38  ;;  %2382 = vmatprep.mubr.bf16.mxu1 %v12695_v0 }
 0x12c   : > { %2364 = vmatprep.subr.bf16.mxu1 %v12952_v41  ;;  %2656 = vmatpush1.bf16.msra.mxu0 %v13003_v10  ;;  %v10873_v10 = vld [vmem:[#allocation7 + $0x660] ss:$24 sps:$4 sm:$0xff]  }
 0x12d   : > { %9728 = vmatprep.subr.msk.bf16.mxu0 %vm565_vm0, %v13014_v24  ;;  %v10878_v24 = vld [vmem:[#allocation7 + $0x634] ss:$24 sps:$4 sm:$0xff]  }
 0x12f   : > { %2365 = vmatpush1.bf16.msra.mxu1 %v12962_v47  ;;  %9725 = vmatmul.mubr.msk.bf16.vlgmr.msra.gmra.mxu0 %vm561_vm1, %v13363_v4 }
 0x130   : > { %9714 = vmatprep.subr.msk.bf16.mxu1 %vm565_vm0, %v13005_v12  ;;  %2736 = vmatpush1.bf16.msra.mxu0 %v13030_v34  ;;  %v10876_v34 = vld [vmem:[#allocation7 + $0x630] ss:$24 sps:$4 sm:$0xff]  }
 0x131   : > { %2737 = vmatprep.subr.bf16.mxu0 %v13034_v36  ;;  %2755 = vmatprep.mubr.bf16.mxu0 %v12695_v0 }
 0x132   : > { %9711 = vmatmul.mubr.msk.bf16.vlgmr.msra.gmra.mxu1 %vm561_vm1, %v13010_v23 }
 0x133   : > { %2445 = vmatpush1.bf16.msra.mxu1 %v13027_v33  ;;  %2464 = vmatprep.mubr.bf16.mxu1 %v12695_v0 }
 0x134   : > { %2446 = vmatprep.subr.bf16.mxu1 %v13032_v35  ;;  %2738 = vmatpush1.bf16.msra.mxu0 %v13044_v43 }
 0x135   : > { %4421 = vmatprep.subr.bf16.mxu0 %v10860_v9 }
 0x137   : > { %2447 = vmatpush1.bf16.msra.mxu1 %v13042_v37  ;;  %9729 = vmatmul.mubr.msk.bf16.vlgmr.msra.gmra.mxu0 %vm561_vm1, %v13363_v4 }
 0x138   : > { %9718 = vmatprep.subr.msk.bf16.mxu1 %vm565_vm0, %v13048_v46  ;;  %4422 = vmatpush1.bf16.msra.mxu0 %v10858_v11  ;;  %v10881_v46 = vld [vmem:[#allocation7 + $0x604] ss:$24 sps:$4 sm:$0xff]  }
 0x139   : > { %4423 = vmatprep.subr.bf16.mxu0 %v10863_v15  ;;  %v10894_v15 = vld [vmem:[#allocation7 + $0x870] ss:$24 sps:$4 sm:$0xff]  }
 0x13a   : > { %9715 = vmatmul.mubr.msk.bf16.vlgmr.msra.gmra.mxu1 %vm561_vm1, %v13010_v23 }
 0x13b   : > { %2527 = vmatpush1.bf16.msra.mxu1 %v13059_v54  ;;  %2546 = vmatprep.mubr.bf16.mxu1 %v12695_v0 }
 0x13c   : > { %2528 = vmatprep.subr.bf16.mxu1 %v13061_v55  ;;  %4424 = vmatpush1.bf16.msra.mxu0 %v10861_v16  ;;  %v10897_v16 = vld [vmem:[#allocation7 + $0x9f0] ss:$24 sps:$4 sm:$0xff]  }
 0x13d   : > { %4425 = vmatprep.subr.bf16.mxu0 %v10866_v20 }
 0x13f   : > { %2529 = vmatpush1.bf16.msra.mxu1 %v13069_v56  ;;  %v10879_v56 = vld [vmem:[#allocation7 + $0x600] ss:$24 sps:$4 sm:$0xff]  }
 0x140   : > { %9722 = vmatprep.subr.msk.bf16.mxu1 %vm565_vm0, %v13073_v59  ;;  %4426 = vmatpush1.bf16.msra.mxu0 %v10864_v21 }
 0x141   : > { %4427 = vmatprep.subr.bf16.mxu0 %v10869_v30 }
 0x142   : > { %9719 = vmatmul.mubr.msk.bf16.vlgmr.msra.gmra.mxu1 %vm561_vm1, %v13168_v61 }
 0x143   : > { %2609 = vmatpush1.bf16.msra.mxu1 %v13084_v1  ;;  %2628 = vmatprep.mubr.bf16.mxu1 %v12695_v0 }
 0x144   : > { %2610 = vmatprep.subr.bf16.mxu1 %v13086_v8  ;;  %4428 = vmatpush1.bf16.msra.mxu0 %v10867_v40  ;;  %v10903_v40 = vld [vmem:[#allocation7 + $0x9c0] ss:$24 sps:$4 sm:$0xff]  }
 0x145   : > { %4429 = vmatprep.subr.bf16.mxu0 %v10872_v48  ;;  %v10908_v48 = vld [vmem:[#allocation7 + $0x814] ss:$24 sps:$4 sm:$0xff]  }
 0x147   : > { %2611 = vmatpush1.bf16.msra.mxu1 %v13094_v13 }
 0x148   : > { %9726 = vmatprep.subr.msk.bf16.mxu1 %vm565_vm0, %v13098_v18  ;;  %4430 = vmatpush1.bf16.msra.mxu0 %v10870_v2  ;;  %v10884_v18 = vld [vmem:[#allocation7 + $0x8d4] ss:$24 sps:$4 sm:$0xff]  }
 0x149   : > { %4431 = vmatprep.subr.bf16.mxu0 %v10875_v5 }
 0x14a   : > { %9723 = vmatmul.mubr.msk.bf16.vlgmr.msra.gmra.mxu1 %vm561_vm1, %v13168_v61  ;;  %v10896_v61 = vld [vmem:[#allocation7 + $0x874] ss:$24 sps:$4 sm:$0xff]  }
 0x14b   : > { %2695 = vmatpush1.bf16.msra.mxu1 %v13109_v28  ;;  %2714 = vmatprep.mubr.bf16.mxu1 %v12695_v0  ;;  %v10882_v28 = vld [vmem:[#allocation7 + $0x8d0] ss:$24 sps:$4 sm:$0xff]  }
 0x14c   : > { %2696 = vmatprep.subr.bf16.mxu1 %v13111_v32  ;;  %4432 = vmatpush1.bf16.msra.mxu0 %v10873_v10  ;;  %v10885_v32 = vld [vmem:[#allocation7 + $0xa50] ss:$24 sps:$4 sm:$0xff]  }
 0x14d   : > { %4433 = vmatprep.subr.bf16.mxu0 %v10878_v24 }
 0x14f   : > { %2697 = vmatpush1.bf16.msra.mxu1 %v13119_v44  ;;  %v886_v25 = vpop.f32.mrf.mxu0 }
 0x150   : > { %9730 = vmatprep.subr.msk.bf16.mxu1 %vm565_vm0, %v13123_v52  ;;  %4434 = vmatpush1.bf16.msra.mxu0 %v10876_v34  ;;  %v10890_v52 = vld [vmem:[#allocation7 + $0x8a4] ss:$24 sps:$4 sm:$0xff]  }
 0x151   : > { %v888_v39 = vpop.f32.mrf.mxu0  ;;  %4435 = vmatprep.subr.bf16.mxu0 %v10881_v46  ;;  %v10923_v46 = vld [vmem:[#allocation7 + $0x934] ss:$24 sps:$4 sm:$0xff]  }
 0x152   : > { %v624_v22 = vpop.f32.mrf.mxu1  ;;  %9727 = vmatmul.mubr.msk.bf16.vlgmr.msra.gmra.mxu1 %vm561_vm1, %v13363_v4 }
 0x153   : > { %v887_v26 = vadd.f32 %v886_v25, %v624_v22  ;;  %2777 = vmatpush1.bf16.msra.mxu1 %v13134_v57  ;;  %2796 = vmatprep.mubr.bf16.mxu1 %v12695_v0  ;;  %v890_v47 = vpop.f32.mrf.mxu0  ;;  %v10902_v25 = vld [vmem:[#allocation7 + $0x844] ss:$24 sps:$4 sm:$0xff]  }
 0x154   : > { %v626_v38 = vpop.f32.mrf.mxu1  ;;  %2778 = vmatprep.subr.bf16.mxu1 %v13136_v58  ;;  %4436 = vmatpush1.bf16.msra.mxu0 %v10879_v56  ;;  %v10918_v56 = vld [vmem:[#allocation7 + $0x7b0] ss:$24 sps:$4 sm:$0xff]  }
 0x155   : > { %v889_v41 = vadd.f32 %v888_v39, %v626_v38  ;;  %v891_v50 = vpop.f32.mrf.mxu0  ;;  %4437 = vmatprep.subr.bf16.mxu0 %v10884_v18  ;;  %v10900_v39 = vld [vmem:[#allocation7 + $0x840] ss:$24 sps:$4 sm:$0xff]  }
 0x156   : > { %v628_v42 = vpop.f32.mrf.mxu1 }
 0x157   : > { %2779 = vmatpush1.bf16.msra.mxu1 %v13144_v60  ;;  %v968_v0 = vpop.f32.mrf.mxu0  ;;  %v10888_v60 = vld [vmem:[#allocation7 + $0x8a0] ss:$24 sps:$4 sm:$0xff]  }
 0x158   : > { %v629_v49 = vpop.f32.mrf.mxu1  ;;  %4462 = vmatprep.subr.bf16.mxu1 %v10887_v19  ;;  %4438 = vmatpush2.bf16.msra.mxu0 %v10882_v28 }
 0x159   : > { %v970_v7 = vpop.f32.mrf.mxu0  ;;  %4439 = vmatprep.subr.bf16.mxu0 %v10890_v52  ;;  %v10911_v49 = vld [vmem:[#allocation7 + $0x994] ss:$24 sps:$4 sm:$0xff]  }
 0x15a   : > { %v13417_v3 = vpop.f32.mrf.mxu1  ;;  %9731 = vmatmul.mubr.msk.bf16.vlgmr.msra.gmra.mxu1 %vm561_vm1, %v13363_v4  ;;  %v10899_v4 = vld [vmem:[#allocation7 + $0x9f4] ss:$24 sps:$4 sm:$0xff]  }
 0x15b   : > { %v972_v23 = vpop.f32.mrf.mxu0  ;;  %4463 = vmatpush1.bf16.msra.mxu1 %v10885_v32 }
 0x15c   : > { %v13421_v6 = vpop.f32.mrf.mxu1  ;;  %4464 = vmatprep.subr.bf16.mxu1 %v10893_v53  ;;  %4440 = vmatpush2.bf16.msra.mxu0 %v10888_v60  ;;  %v10932_v60 = vld [vmem:[#allocation7 + $0xbd4] ss:$24 sps:$4 sm:$0xff]  }
 0x15d   : > { %v973_v33 = vpop.f32.mrf.mxu0  ;;  %4441 = vmatprep.subr.bf16.mxu0 %v10896_v61  ;;  %v10930_v61 = vld [vmem:[#allocation7 + $0xbd0] ss:$24 sps:$4 sm:$0xff]  }
 0x15e   : > { %v669_v12 = vpop.f32.mrf.mxu1  ;;  %v10915_v33 = vld [vmem:[#allocation7 + $0x960] ss:$24 sps:$4 sm:$0xff]  }
 0x15f   : > { %v1155_v36 = vpop.f32.mrf.mxu0  ;;  %4465 = vmatpush1.bf16.msra.mxu1 %v10891_v62  ;;  %v10917_v12 = vld [vmem:[#allocation7 + $0x964] ss:$24 sps:$4 sm:$0xff]  }
 0x160   : > { %v670_v31 = vpop.f32.mrf.mxu1  ;;  %v13423_v43 = vadd.f32 %v1155_v36, %v887_v26  ;;  %4466 = vmatprep.subr.bf16.mxu1 %v10899_v4  ;;  %4442 = vmatpush2.bf16.msra.mxu0 %v10894_v15  ;;  %v10905_v26 = vld [vmem:[#allocation7 + $0x9c4] ss:$24 sps:$4 sm:$0xff]  }
 0x161   : > { %v1157_v55 = vpop.f32.mrf.mxu0  ;;  %4443 = vmatprep.subr.bf16.mxu0 %v10902_v25  ;;  %v10912_v31 = vld [vmem:[#allocation7 + $0x7e0] ss:$24 sps:$4 sm:$0xff]   ;;  %v10935_v62 = vld [vmem:[#allocation7 + $0x75c] ss:$24 sps:$4 sm:$0xff]  }
 0x162   : > { %v706_v35 = vpop.f32.mrf.mxu1  ;;  %v13425_v1 = vadd.f32 %v1157_v55, %v889_v41 }
 0x163   : > { %v969_v37 = vadd.f32 %v968_v0, %v706_v35  ;;  %v1159_v13 = vpop.f32.mrf.mxu0  ;;  %4467 = vmatpush1.bf16.msra.mxu1 %v10897_v16  ;;  %v10906_v0 = vld [vmem:[#allocation7 + $0x810] ss:$24 sps:$4 sm:$0xff]  }
 0x164   : > { %v708_v54 = vpop.f32.mrf.mxu1  ;;  %4468 = vmatprep.subr.bf16.mxu1 %v10905_v26  ;;  %4444 = vmatpush2.bf16.msra.mxu0 %v10900_v39  ;;  %v10936_v26 = vld [vmem:[#allocation7 + $0xba0] ss:$24 sps:$4 sm:$0xff]  }
 0x165   : > { %v971_v59 = vadd.f32 %v970_v7, %v708_v54  ;;  %v1160_v29 = vpop.f32.mrf.mxu0  ;;  %4445 = vmatprep.subr.bf16.mxu0 %v10908_v48 }
 0x166   : > { %v710_v8 = vpop.f32.mrf.mxu1  ;;  %v10929_v29 = vld [vmem:[#allocation7 + $0x904] ss:$24 sps:$4 sm:$0xff]  }
 0x167   : > { %v1237_v45 = vpop.f32.mrf.mxu0  ;;  %4469 = vmatpush1.bf16.msra.mxu1 %v10903_v40 }
 0x168   : > { %v711_v27 = vpop.f32.mrf.mxu1  ;;  %v13427_v51 = vadd.f32 %v1237_v45, %v969_v37  ;;  %4470 = vmatprep.subr.bf16.mxu1 %v10911_v49  ;;  %4446 = vmatpush2.bf16.msra.mxu0 %v10906_v0  ;;  %v10920_v37 = vld [vmem:[#allocation7 + $0x7b4] ss:$24 sps:$4 sm:$0xff]   ;;  %v10927_v45 = vld [vmem:[#allocation7 + $0x900] ss:$24 sps:$4 sm:$0xff]   ;;  %v10950_v0 = vld [vmem:[#allocation7 + $0xb44] ss:$24 sps:$4 sm:$0xff]  }
 0x169   : > { %v1239_v58 = vpop.f32.mrf.mxu0  ;;  %v10926_v27 = vld [vmem:[#allocation7 + $0x784] ss:$24 sps:$4 sm:$0xff]  }
 0x16a   : > { %v747_v44 = vpop.f32.mrf.mxu1  ;;  %v13429_v63 = vadd.f32 %v1239_v58, %v971_v59  ;;  %v10921_v59 = vld [vmem:[#allocation7 + $0x930] ss:$24 sps:$4 sm:$0xff]  }
 0x16b   : > { %v1241_v17 = vpop.f32.mrf.mxu0 }
 0x16c   : > { %v749_v57 = vpop.f32.mrf.mxu1 }
 0x16d   : > { %v1242_v11 = vpop.f32.mrf.mxu0 }
 0x16e   : > { %v751_v14 = vpop.f32.mrf.mxu1 }
 0x16f   : > { %v1327_v21 = vpop.f32.mrf.mxu0 }
 0x170   : > { %v752_v9 = vpop.f32.mrf.mxu1 }
 0x171   : > { %v1329_v38 = vpop.f32.mrf.mxu0 }
 0x172   : > { %v927_v20 = vpop.f32.mrf.mxu1 }
 0x173   : > { %v928_v22 = vadd.f32 %v927_v20, %v13417_v3  ;;  %v1331_v47 = vpop.f32.mrf.mxu0  ;;  %v10909_v3 = vld [vmem:[#allocation7 + $0x990] ss:$24 sps:$4 sm:$0xff]  }
 0x174   : > { %v929_v30 = vpop.f32.mrf.mxu1  ;;  %4471 = vmatpush1.bf16.msra.mxu1 %v10909_v3 }
 0x175   : > { %v930_v41 = vadd.f32 %v929_v30, %v13421_v6  ;;  %v1332_v2 = vpop.f32.mrf.mxu0  ;;  %v10914_v6 = vld [vmem:[#allocation7 + $0x7e4] ss:$24 sps:$4 sm:$0xff]   ;;  %4472 = vmatprep.subr.bf16.mxu1 %v10917_v12 }
 0x176   : > { %v931_v42 = vpop.f32.mrf.mxu1  ;;  %4447 = vmatprep.subr.bf16.mxu0 %v10914_v6 }
 0x177   : > { %v1409_v7 = vpop.f32.mrf.mxu0  ;;  %4448 = vmatpush2.bf16.msra.mxu0 %v10912_v31  ;;  %v10944_v42 = vld [vmem:[#allocation7 + $0xb74] ss:$24 sps:$4 sm:$0xff]   ;;  %v10954_v31 = vld [vmem:[#allocation7 + $0xb10] ss:$24 sps:$4 sm:$0xff]  }
 0x178   : > { %v932_v50 = vpop.f32.mrf.mxu1  ;;  %4473 = vmatpush1.bf16.msra.mxu1 %v10915_v33  ;;  %4449 = vmatprep.subr.bf16.mxu0 %v10920_v37  ;;  %v10956_v33 = vld [vmem:[#allocation7 + $0xb14] ss:$24 sps:$4 sm:$0xff]  }
 0x179   : > { %v1411_v24 = vpop.f32.mrf.mxu0  ;;  %4474 = vmatprep.subr.bf16.mxu1 %v10923_v46 }
 0x17a   : > { %v1009_v5 = vpop.f32.mrf.mxu1 }
 0x17b   : > { %v1010_v10 = vadd.f32 %v1009_v5, %v747_v44  ;;  %v1413_v36 = vpop.f32.mrf.mxu0  ;;  %4450 = vmatpush2.bf16.msra.mxu0 %v10918_v56  ;;  %v10924_v44 = vld [vmem:[#allocation7 + $0x780] ss:$24 sps:$4 sm:$0xff]  }
 0x17c   : > { %v1011_v23 = vpop.f32.mrf.mxu1  ;;  %4475 = vmatpush1.bf16.msra.mxu1 %v10921_v59  ;;  %4451 = vmatprep.subr.bf16.mxu0 %v10926_v27  ;;  %v10960_v56 = vld [vmem:[#allocation7 + $0xae0] ss:$24 sps:$4 sm:$0xff]  }
 0x17d   : > { %v1012_v34 = vadd.f32 %v1011_v23, %v749_v57  ;;  %v1414_v55 = vpop.f32.mrf.mxu0  ;;  %4476 = vmatprep.subr.bf16.mxu1 %v10929_v29  ;;  %v10968_v29 = vld [vmem:[#allocation7 + $0xab4] ss:$24 sps:$4 sm:$0xff]  }
 0x17e   : > { %v1013_v35 = vpop.f32.mrf.mxu1 }
 0x17f   : > { %v1491_v13 = vpop.f32.mrf.mxu0  ;;  %4452 = vmatpush2.bf16.msra.mxu0 %v10924_v44 }
 0x180   : > { %v1014_v54 = vpop.f32.mrf.mxu1  ;;  %v1492_v19 = vadd.f32 %v1491_v13, %v1327_v21  ;;  %4477 = vmatpush1.bf16.msra.mxu1 %v10927_v45  ;;  %4503 = vmatprep.subr.bf16.mxu0 %v10935_v62  ;;  %v10938_v21 = vld [vmem:[#allocation7 + $0xba4] ss:$24 sps:$4 sm:$0xff]   ;;  %v10972_v62 = vld [vmem:[#allocation7 + $0xa80] ss:$24 sps:$4 sm:$0xff]  }
 0x181   : > { %v1493_v32 = vpop.f32.mrf.mxu0  ;;  %4478 = vmatprep.subr.bf16.mxu1 %v10932_v60 }
 0x182   : > { %v1196_v8 = vpop.f32.mrf.mxu1  ;;  %v1494_v53 = vadd.f32 %v1493_v32, %v1329_v38  ;;  %v10966_v32 = vld [vmem:[#allocation7 + $0xab0] ss:$24 sps:$4 sm:$0xff]  }
 0x183   : > { %v13433_v18 = vadd.f32 %v1196_v8, %v928_v22  ;;  %v1495_v58 = vpop.f32.mrf.mxu0 }
 0x184   : > { %v1198_v28 = vpop.f32.mrf.mxu1  ;;  %4479 = vmatpush2.bf16.msra.mxu1 %v10930_v61  ;;  %v10974_v58 = vld [vmem:[#allocation7 + $0xa84] ss:$24 sps:$4 sm:$0xff]  }
 0x185   : > { %v13435_v52 = vadd.f32 %v1198_v28, %v930_v41  ;;  %v1496_v17 = vpop.f32.mrf.mxu0  ;;  %4480 = vmatprep.subr.bf16.mxu1 %v10938_v21  ;;  %v10942_v41 = vld [vmem:[#allocation7 + $0xb70] ss:$24 sps:$4 sm:$0xff]  }
 0x186   : > { %v1200_v57 = vpop.f32.mrf.mxu1 }
 0x187   : > { %v1573_v9 = vpop.f32.mrf.mxu0 }
 0x188   : > { %v1201_v14 = vpop.f32.mrf.mxu1  ;;  %v1574_v15 = vadd.f32 %v1573_v9, %v1409_v7  ;;  %4481 = vmatpush2.bf16.msra.mxu1 %v10936_v26  ;;  %v10948_v7 = vld [vmem:[#allocation7 + $0xb40] ss:$24 sps:$4 sm:$0xff]  }
 0x189   : > { %v1575_v20 = vpop.f32.mrf.mxu0  ;;  %4482 = vmatprep.subr.bf16.mxu1 %v10944_v42 }
 0x18a   : > { %v1278_v4 = vpop.f32.mrf.mxu1  ;;  %v1576_v25 = vadd.f32 %v1575_v20, %v1411_v24 }
 0x18b   : > { %v13437_v11 = vadd.f32 %v1278_v4, %v1010_v10  ;;  %v1577_v38 = vpop.f32.mrf.mxu0  ;;  %v10983_v4 = vld [vmem:[#allocation7 + $0xa5c] ss:$24 sps:$4 sm:$0xff]  }
 0x18c   : > { %v1280_v16 = vpop.f32.mrf.mxu1  ;;  %4483 = vmatpush2.bf16.msra.mxu1 %v10942_v41 }
 0x18d   : > { %v13439_v22 = vadd.f32 %v1280_v16, %v1012_v34  ;;  %v1578_v40 = vpop.f32.mrf.mxu0  ;;  %4484 = vmatprep.subr.bf16.mxu1 %v10950_v0 }
 0x18e   : > { %v1282_v30 = vpop.f32.mrf.mxu1 }
 0x18f   : > { %v1666_v48 = vpop.f32.mrf.mxu0 }
 0x190   : > { %v1283_v39 = vpop.f32.mrf.mxu1  ;;  %v1796_v49 = vadd.f32 %v1666_v48, %v1492_v19  ;;  %4485 = vmatpush2.bf16.msra.mxu1 %v10948_v7 }
 0x191   : > { %v1668_v2 = vpop.f32.mrf.mxu0  ;;  %4486 = vmatprep.subr.bf16.mxu1 %v10956_v33 }
 0x192   : > { %v1368_v47 = vpop.f32.mrf.mxu1  ;;  %v2814_v3 = vmax.f32 %v13423_v43, %v1796_v49  ;;  %v1797_v5 = vadd.f32 %v1668_v2, %v1494_v53  ;;  %v10962_v43 = vld [vmem:[#allocation7 + $0xae4] ss:$24 sps:$4 sm:$0xff]  }
 0x193   : > { %v1670_v6 = vpop.f32.mrf.mxu0 }
 0x194   : > { %v1370_v50 = vpop.f32.mrf.mxu1  ;;  %v2815_v12 = vmax.f32 %v13425_v1, %v1797_v5  ;;  %4487 = vmatpush2.bf16.msra.mxu1 %v10954_v31 }
 0x195   : > { %v1671_v24 = vpop.f32.mrf.mxu0  ;;  %4488 = vmatprep.subr.bf16.mxu1 %v10962_v43 }
 0x196   : > { %v1372_v10 = vpop.f32.mrf.mxu1 }
 0x197   : > { %v1748_v35 = vpop.f32.mrf.mxu0 }
 0x198   : > { %v1373_v23 = vpop.f32.mrf.mxu1  ;;  %v1800_v36 = vadd.f32 %v1748_v35, %v1574_v15  ;;  %4489 = vmatpush2.bf16.msra.mxu1 %v10960_v56 }
 0x199   : > { %v1750_v46 = vpop.f32.mrf.mxu0  ;;  %4490 = vmatprep.subr.bf16.mxu1 %v10968_v29 }
 0x19a   : > { %v1450_v34 = vpop.f32.mrf.mxu1  ;;  %v2818_v54 = vmax.f32 %v13427_v51, %v1800_v36  ;;  %v1801_v55 = vadd.f32 %v1750_v46, %v1576_v25 }
 0x19b   : > { %v1752_v8 = vpop.f32.mrf.mxu0 }
 0x19c   : > { %v1452_v37 = vpop.f32.mrf.mxu1  ;;  %v13444_v1 = vmax.f32 %v2814_v3, %v2818_v54  ;;  %v2819_v13 = vmax.f32 %v13429_v63, %v1801_v55  ;;  %4491 = vmatpush2.bf16.msra.mxu1 %v10966_v32 }
 0x19d   : > { %v1753_v27 = vpop.f32.mrf.mxu0  ;;  %4492 = vmatprep.subr.bf16.mxu1 %v10974_v58 }
 0x19e   : > { %v1454_v59 = vpop.f32.mrf.mxu1  ;;  %v13447_v28 = vmax.f32 %v2815_v12, %v2819_v13 }
 0x19f   : > { %v1838_v45 = vpop.f32.mrf.mxu0 }
 0x1a0   : > { %v1455_v19 = vpop.f32.mrf.mxu1  ;;  %4493 = vmatpush2.bf16.msra.mxu1 %v10972_v62 }
 0x1a1   : > { %v1840_v57 = vpop.f32.mrf.mxu0  ;;  %4544 = vmatprep.subr.bf16.mxu1 %v10983_v4 }
 0x1a2   : > { %v1532_v44 = vpop.f32.mrf.mxu1 }
 0x1a3   : > { %v1533_v51 = vadd.f32 %v1532_v44, %v1368_v47  ;;  %v1842_v17 = vpop.f32.mrf.mxu0 }
 0x1a4   : > { %v1534_v53 = vpop.f32.mrf.mxu1 }
 0x1a5   : > { %v1535_v60 = vadd.f32 %v1534_v53, %v1370_v50  ;;  %v1843_v61 = vpop.f32.mrf.mxu0 }
 0x1a6   : > { %v1536_v14 = vpop.f32.mrf.mxu1 }
 0x1a7   : > { %v1920_v15 = vpop.f32.mrf.mxu0 }
 0x1a8   : > { %v1537_v63 = vpop.f32.mrf.mxu1 }
 0x1a9   : > { %v13449_v21 = vpop.f32.mrf.mxu0 }
 0x1aa   : > { %v1614_v9 = vpop.f32.mrf.mxu1 }
 0x1ab   : > { %v1615_v16 = vadd.f32 %v1614_v9, %v1450_v34  ;;  %v1924_v30 = vpop.f32.mrf.mxu0 }
 0x1ac   : > { %v1616_v20 = vpop.f32.mrf.mxu1 }
 0x1ad   : > { %v1617_v25 = vadd.f32 %v1616_v20, %v1452_v37  ;;  %v1925_v39 = vpop.f32.mrf.mxu0 }
 0x1ae   : > { %v1618_v26 = vpop.f32.mrf.mxu1 }
 0x1af   : > { %v2002_v41 = vpop.f32.mrf.mxu0 }
 0x1b0   : > { %v1619_v38 = vpop.f32.mrf.mxu1  ;;  %v13451_v47 = vadd.f32 %v2002_v41, %v1838_v45 }
 0x1b1   : > { %v2004_v49 = vpop.f32.mrf.mxu0 }
 0x1b2   : > { %v1707_v40 = vpop.f32.mrf.mxu1  ;;  %v13454_v0 = vadd.f32 %v2004_v49, %v1840_v57 }
 0x1b3   : > { %v1798_v42 = vadd.f32 %v1707_v40, %v1533_v51  ;;  %v2006_v5 = vpop.f32.mrf.mxu0 }
 0x1b4   : > { %v1709_v48 = vpop.f32.mrf.mxu1 }
 0x1b5   : > { %v2816_v50 = vmax.f32 %v13433_v18, %v1798_v42  ;;  %v1799_v2 = vadd.f32 %v1709_v48, %v1535_v60  ;;  %v2007_v6 = vpop.f32.mrf.mxu0 }
 0x1b6   : > { %v1711_v3 = vpop.f32.mrf.mxu1 }
 0x1b7   : > { %v2817_v7 = vmax.f32 %v13435_v52, %v1799_v2  ;;  %v2084_v23 = vpop.f32.mrf.mxu0 }
 0x1b8   : > { %v1712_v10 = vpop.f32.mrf.mxu1  ;;  %v13457_v31 = vadd.f32 %v2084_v23, %v1920_v15 }
 0x1b9   : > { %v13459_v34 = vpop.f32.mrf.mxu0 }
 0x1ba   : > { %v1789_v12 = vpop.f32.mrf.mxu1 }
 0x1bb   : > { %v1802_v24 = vadd.f32 %v1789_v12, %v1615_v16  ;;  %v2088_v37 = vpop.f32.mrf.mxu0 }
 0x1bc   : > { %v1791_v33 = vpop.f32.mrf.mxu1  ;;  %v2835_v37 = vlaneseq }
 0x1bd   : > { %v2820_v35 = vmax.f32 %v13437_v11, %v1802_v24  ;;  %v1803_v18 = vadd.f32 %v1791_v33, %v1617_v25  ;;  %v2089_v54 = vpop.f32.mrf.mxu0 }
 0x1be   : > { %v1793_v36 = vpop.f32.mrf.mxu1 }
 0x1bf   : > { %v13462_v46 = vmax.f32 %v2816_v50, %v2820_v35  ;;  %v2821_v43 = vmax.f32 %v13439_v22, %v1803_v18  ;;  %v13467_v59 = vpop.f32.mrf.mxu0 }
 0x1c0   : > { %v1794_v52 = vpop.f32.mrf.mxu1 }
 0x1c1   : > { %v13465_v55 = vmax.f32 %v2817_v7, %v2821_v43  ;;  %v13469_v13 = vpop.f32.mrf.mxu0 }
 0x1c2   : > { %v1879_v56 = vpop.f32.mrf.mxu1 }
 0x1c3   : > { %v2175_v27 = vpop.f32.mrf.mxu0 }
 0x1c4   : > { %v1881_v8 = vpop.f32.mrf.mxu1 }
 0x1c5   : > { %v2176_v29 = vpop.f32.mrf.mxu0 }
 0x1c6   : > { %v1883_v19 = vpop.f32.mrf.mxu1 }
 0x1c7   : > { %v2253_v44 = vpop.f32.mrf.mxu0  ;;  %v13495_v19 = vshrl.u32 %v2835_v37, 7 }
 0x1c8   : > { %v1884_v11 = vpop.f32.mrf.mxu1 }
 0x1c9   : > { %v13473_v51 = vpop.f32.mrf.mxu0 }
 0x1ca   : > { %v1961_v32 = vpop.f32.mrf.mxu1 }
 0x1cb   : > { %v2257_v53 = vpop.f32.mrf.mxu0 }
 0x1cc   : > { %v13471_v45 = vpop.f32.mrf.mxu1 }
 0x1cd   : > { %v2258_v58 = vpop.f32.mrf.mxu0 }
 0x1ce   : > { %v1965_v22 = vpop.f32.mrf.mxu1 }
 0x1cf   : > { %v2343_v62 = vpop.f32.mrf.mxu0 }
 0x1d0   : > { %v1966_v57 = vpop.f32.mrf.mxu1 }
 0x1d1   : > { %v2345_v63 = vpop.f32.mrf.mxu0  ;;  %v2087_v57 = vadd.f32 %v13459_v34, %v13449_v21  ;;  %v2302_v21 = vadd.f32 %v13469_v13, %v13454_v0 }
 0x1d2   : > { %v2043_v60 = vpop.f32.mrf.mxu1 }
 0x1d3   : > { %v13475_v14 = vadd.f32 %v2043_v60, %v1879_v56  ;;  %v2347_v9 = vpop.f32.mrf.mxu0 }
 0x1d4   : > { %v2045_v17 = vpop.f32.mrf.mxu1 }
 0x1d5   : > { %v13477_v61 = vadd.f32 %v2045_v17, %v1881_v8  ;;  %v2348_v16 = vpop.f32.mrf.mxu0  ;;  %v2837_v17 = vsub.s32 0, %v13495_v19 }
 0x1d6   : > { %v2047_v4 = vpop.f32.mrf.mxu1 }
 0x1d7   : > { %v2425_v25 = vpop.f32.mrf.mxu0 }
 0x1d8   : > { %v2048_v15 = vpop.f32.mrf.mxu1 }
 0x1d9   : > { %v2427_v38 = vpop.f32.mrf.mxu0  ;;  %v2305_v15 = vadd.f32 %v2253_v44, %v13457_v31 }
 0x1da   : > { %v2125_v20 = vpop.f32.mrf.mxu1 }
 0x1db   : > { %v13479_v26 = vadd.f32 %v2125_v20, %v1961_v32  ;;  %v2429_v40 = vpop.f32.mrf.mxu0  ;;  %v13505_v20 = vld [vmem:[#allocation5] sm:$0xf] }
 0x1dc   : > { %v13481_v30 = vpop.f32.mrf.mxu1  ;;  %v13516_v31 = vrot.slane %v13505_v20, %v2837_v17 }
 0x1dd   : > { %v2430_v42 = vpop.f32.mrf.mxu0 }
 0x1de   : > { %v2129_v39 = vpop.f32.mrf.mxu1 }
 0x1df   : > { %v2507_v49 = vpop.f32.mrf.mxu0  ;;  %v2306_v39 = vadd.f32 %v13473_v51, %v2087_v57  ;;  %v10953_v57 = vld [vmem:[#allocation7 + $0x6cc] ss:$24 sps:$4 sm:$0xff]  }
 0x1e0   : > { %v2130_v41 = vpop.f32.mrf.mxu1  ;;  %v2508_v8 = vadd.f32 %v2507_v49, %v2343_v62  ;;  %v2301_v62 = vadd.f32 %v13467_v59, %v13451_v47 }
 0x1e1   : > { %v2509_v2 = vpop.f32.mrf.mxu0 }
 0x1e2   : > { %v13483_v48 = vpop.f32.mrf.mxu1  ;;  %v2510_v29 = vadd.f32 %v2509_v2, %v2345_v63 }
 0x1e3   : > { %v2511_v5 = vpop.f32.mrf.mxu0 }
 0x1e4   : > { %v13485_v50 = vpop.f32.mrf.mxu1 }
 0x1e5   : > { %v2512_v10 = vpop.f32.mrf.mxu0 }
 0x1e6   : > { %v2216_v3 = vpop.f32.mrf.mxu1 }
 0x1e7   : > { %v2589_v12 = vpop.f32.mrf.mxu0 }
 0x1e8   : > { %v2217_v7 = vpop.f32.mrf.mxu1  ;;  %v2590_v32 = vadd.f32 %v2589_v12, %v2425_v25  ;;  %v2841_v25 = vsub.s32 1, %v13495_v19 }
 0x1e9   : > { %v2591_v24 = vpop.f32.mrf.mxu0 }
 0x1ea   : > { %v13487_v6 = vpop.f32.mrf.mxu1  ;;  %v2592_v58 = vadd.f32 %v2591_v24, %v2427_v38  ;;  %v13521_v13 = vrot.slane %v13505_v20, %v2841_v25 }
 0x1eb   : > { %v2593_v35 = vpop.f32.mrf.mxu0 }
 0x1ec   : > { %v13489_v23 = vpop.f32.mrf.mxu1 }
 0x1ed   : > { %v2594_v36 = vpop.f32.mrf.mxu0 }
 0x1ee   : > { %v2298_v33 = vpop.f32.mrf.mxu1  ;;  %v10933_v36 = vld [vmem:[#allocation7 + $0x758] ss:$24 sps:$4 sm:$0xff]  }
 0x1ef   : > { %v2675_v52 = vpop.f32.mrf.mxu0 }
 0x1f0   : > { %v2299_v18 = vpop.f32.mrf.mxu1  ;;  %v2805_v60 = vadd.f32 %v2675_v52, %v2508_v8 }
 0x1f1   : > { %v2677_v56 = vpop.f32.mrf.mxu0 }
 0x1f2   : > { %v13491_v43 = vpop.f32.mrf.mxu1  ;;  %v2806_v16 = vadd.f32 %v2677_v56, %v2510_v29  ;;  %v2822_v40 = vmax.f32 %v2301_v62, %v2805_v60  ;;  %v10941_v56 = vld [vmem:[#allocation7 + $0x72c] ss:$24 sps:$4 sm:$0xff]   ;;  %v10947_v29 = vld [vmem:[#allocation7 + $0x6fc] ss:$24 sps:$4 sm:$0xff]   ;;  %v10951_v60 = vld [vmem:[#allocation7 + $0x6c8] ss:$24 sps:$4 sm:$0xff]  }
 0x1f3   : > { %v2679_v11 = vpop.f32.mrf.mxu0  ;;  %v10959_v62 = vld [vmem:[#allocation7 + $0x69c] ss:$24 sps:$4 sm:$0xff]  }
 0x1f4   : > { %v13493_v54 = vpop.f32.mrf.mxu1  ;;  %v2823_v44 = vmax.f32 %v2302_v21, %v2806_v16 }
 0x1f5   : > { %v2680_v53 = vpop.f32.mrf.mxu0 }
 0x1f6   : > { %v2388_v27 = vpop.f32.mrf.mxu1 }
 0x1f7   : > { %v2757_v9 = vpop.f32.mrf.mxu0  ;;  %v10939_v27 = vld [vmem:[#allocation7 + $0x728] ss:$24 sps:$4 sm:$0xff]  }
 0x1f8   : > { %v2389_v22 = vpop.f32.mrf.mxu1  ;;  %v2809_v63 = vadd.f32 %v2757_v9, %v2590_v32 }
 0x1f9   : > { %v2759_v38 = vpop.f32.mrf.mxu0  ;;  %v10945_v22 = vld [vmem:[#allocation7 + $0x6f8] ss:$24 sps:$4 sm:$0xff]  }
 0x1fa   : > { %v13500_v4 = vpop.f32.mrf.mxu1  ;;  %v2826_v41 = vmax.f32 %v2305_v15, %v2809_v63  ;;  %v2810_v42 = vadd.f32 %v2759_v38, %v2592_v58  ;;  %v10957_v63 = vld [vmem:[#allocation7 + $0x698] ss:$24 sps:$4 sm:$0xff]   ;;  %v10965_v38 = vld [vmem:[#allocation7 + $0x66c] ss:$24 sps:$4 sm:$0xff]  }
 0x1fb   : > { %v2761_v59 = vpop.f32.mrf.mxu0 }
 0x1fc   : > { %v13510_v34 = vpop.f32.mrf.mxu1  ;;  %v2863_v49 = vmax.f32 %v2822_v40, %v2826_v41  ;;  %v2827_v2 = vmax.f32 %v2306_v39, %v2810_v42  ;;  %v2845_v42 = vsub.s32 2, %v13495_v19  ;;  %v2303_v59 = vadd.f32 %v13483_v48, %v13475_v14 }
 0x1fd   : > { %v2762_v0 = vpop.f32.mrf.mxu0 }
 0x1fe   : > { %v2470_v47 = vpop.f32.mrf.mxu1  ;;  %v2867_v51 = vadd.f32 %v2863_v49, %v13516_v31  ;;  %v2864_v5 = vmax.f32 %v2823_v44, %v2827_v2  ;;  %v2304_v0 = vadd.f32 %v13485_v50, %v13477_v61  ;;  %v10977_v50 = vld [vmem:[#allocation7 + $0x60c] ss:$24 sps:$4 sm:$0xff]  }
 0x1ff   : > { %v2128_v47 = vadd.f32 %v13481_v30, %v13471_v45  ;;  %v10971_v45 = vld [vmem:[#allocation7 + $0x63c] ss:$24 sps:$4 sm:$0xff]  }
 0x200   : > { %v2471_v3 = vpop.f32.mrf.mxu1  ;;  %v2868_v10 = vadd.f32 %v2864_v5, %v13521_v13  ;;  %v2871_v12 = vmax.f32 %v2867_v51, 0.0 }
 0x201   : > { %v2308_v14 = vadd.f32 %v13489_v23, %v2128_v47  ;;  %v11010_v47 = vld [vmem:[#allocation7 + $0x7ec] ss:$24 sps:$4 sm:$0xff]  }
 0x202   : > { %v2548_v7 = vpop.f32.mrf.mxu1  ;;  %v2872_v33 = vmax.f32 %v2868_v10, 0.0  ;;  %v13527_v37 = vpack.c.bf16 %v2871_v12, %v2871_v12  ;;  %v10969_v12 = vld [vmem:[#allocation7 + $0x638] ss:$24 sps:$4 sm:$0xff]  }
 0x203   : > { %v2549_v16 = vadd.f32 %v2548_v7, %v13491_v43  ;;  %v2307_v43 = vadd.f32 %v13487_v6, %v13479_v26  ;;  %v13550_v6 = vrot.slane %v13505_v20, %v2845_v42 }
 0x204   : > { %v2550_v24 = vpop.f32.mrf.mxu1  ;;  %v13525_v18 = vpack.c.bf16 %v2872_v33, %v2872_v33 }
 0x205   : > { %v2551_v39 = vadd.f32 %v2550_v24, %v13493_v54  ;;  %v10963_v54 = vld [vmem:[#allocation7 + $0x668] ss:$24 sps:$4 sm:$0xff]  }
 0x206   : > { %v2552_v35 = vpop.f32.mrf.mxu1  ;;  %4453 = vmatprep.mubr.bf16.mxu0 %v13525_v18 }
 0x207   : > { %4454 = vmatmul.mubr.bf16.vlgmr.msra.gmra.mxu0 %v13527_v37 }
 0x208   : > { %v2553_v52 = vpop.f32.mrf.mxu1  ;;  %4504 = vmatpush1.bf16.msra.mxu0 %v10933_v36  ;;  %4535 = vmatprep.mubr.bf16.mxu0 %v13525_v18  ;;  %v10975_v36 = vld [vmem:[#allocation7 + $0x608] ss:$24 sps:$4 sm:$0xff]  }
 0x209   : > { %4505 = vmatprep.subr.bf16.mxu0 %v10941_v56  ;;  %v10980_v56 = vld [vmem:[#allocation7 + $0x8dc] ss:$24 sps:$4 sm:$0xff]  }
 0x20a   : > { %v2630_v8 = vpop.f32.mrf.mxu1 }
 0x20b   : > { %v2631_v40 = vadd.f32 %v2630_v8, %v13500_v4  ;;  %v2849_v4 = vsub.s32 3, %v13495_v19 }
 0x20c   : > { %v2632_v11 = vpop.f32.mrf.mxu1  ;;  %4506 = vmatpush1.bf16.msra.mxu0 %v10939_v27 }
 0x20d   : > { %4507 = vmatprep.subr.bf16.mxu0 %v10947_v29  ;;  %v2633_v49 = vadd.f32 %v2632_v11, %v13510_v34  ;;  %v13553_v24 = vrot.slane %v13505_v20, %v2849_v4  ;;  %v10978_v11 = vld [vmem:[#allocation7 + $0x8d8] ss:$24 sps:$4 sm:$0xff]   ;;  %v10986_v20 = vld [vmem:[#allocation7 + $0x8ac] ss:$24 sps:$4 sm:$0xff]  }
 0x20e   : > { %v2634_v32 = vpop.f32.mrf.mxu1  ;;  %v10981_v29 = vld [vmem:[#allocation7 + $0xa58] ss:$24 sps:$4 sm:$0xff]   ;;  %v11022_v4 = vld [vmem:[#allocation7 + $0x78c] ss:$24 sps:$4 sm:$0xff]  }
 0x210   : > { %v2635_v53 = vpop.f32.mrf.mxu1  ;;  %4508 = vmatpush1.bf16.msra.mxu0 %v10945_v22  ;;  %v10989_v22 = vld [vmem:[#allocation7 + $0xa2c] ss:$24 sps:$4 sm:$0xff]  }
 0x211   : > { %4509 = vmatprep.subr.bf16.mxu0 %v10953_v57  ;;  %v10984_v53 = vld [vmem:[#allocation7 + $0x8a8] ss:$24 sps:$4 sm:$0xff]  }
 0x212   : > { %v2716_v58 = vpop.f32.mrf.mxu1  ;;  %v10987_v57 = vld [vmem:[#allocation7 + $0xa28] ss:$24 sps:$4 sm:$0xff]  }
 0x213   : > { %v2807_v41 = vadd.f32 %v2716_v58, %v2549_v16  ;;  %v10992_v58 = vld [vmem:[#allocation7 + $0x87c] ss:$24 sps:$4 sm:$0xff]   ;;  %v11001_v16 = vld [vmem:[#allocation7 + $0x9cc] ss:$24 sps:$4 sm:$0xff]  }
 0x214   : > { %v2718_v9 = vpop.f32.mrf.mxu1  ;;  %4510 = vmatpush1.bf16.msra.mxu0 %v10951_v60  ;;  %v10995_v60 = vld [vmem:[#allocation7 + $0x9fc] ss:$24 sps:$4 sm:$0xff]  }
 0x215   : > { %4511 = vmatprep.subr.bf16.mxu0 %v10959_v62  ;;  %v2808_v2 = vadd.f32 %v2718_v9, %v2551_v39  ;;  %v2824_v30 = vmax.f32 %v2303_v59, %v2807_v41  ;;  %v10990_v9 = vld [vmem:[#allocation7 + $0x878] ss:$24 sps:$4 sm:$0xff]   ;;  %v11007_v39 = vld [vmem:[#allocation7 + $0x99c] ss:$24 sps:$4 sm:$0xff]   ;;  %v11013_v59 = vld [vmem:[#allocation7 + $0x96c] ss:$24 sps:$4 sm:$0xff]  }
 0x216   : > { %v2720_v15 = vpop.f32.mrf.mxu1  ;;  %v10993_v62 = vld [vmem:[#allocation7 + $0x9f8] ss:$24 sps:$4 sm:$0xff]  }
 0x217   : > { %v2825_v34 = vmax.f32 %v2304_v0, %v2808_v2  ;;  %v10998_v15 = vld [vmem:[#allocation7 + $0x84c] ss:$24 sps:$4 sm:$0xff]   ;;  %v11005_v41 = vld [vmem:[#allocation7 + $0x998] ss:$24 sps:$4 sm:$0xff]   ;;  %v11019_v2 = vld [vmem:[#allocation7 + $0x93c] ss:$24 sps:$4 sm:$0xff]  }
 0x218   : > { %v2721_v21 = vpop.f32.mrf.mxu1  ;;  %4512 = vmatpush1.bf16.msra.mxu0 %v10957_v63  ;;  %v10996_v63 = vld [vmem:[#allocation7 + $0x848] ss:$24 sps:$4 sm:$0xff]   ;;  %v11025_v0 = vld [vmem:[#allocation7 + $0x90c] ss:$24 sps:$4 sm:$0xff]  }
 0x219   : > { %4513 = vmatprep.subr.bf16.mxu0 %v10965_v38  ;;  %v10999_v21 = vld [vmem:[#allocation7 + $0x9c8] ss:$24 sps:$4 sm:$0xff]   ;;  %v11004_v38 = vld [vmem:[#allocation7 + $0x81c] ss:$24 sps:$4 sm:$0xff]  }
 0x21a   : > { %v2798_v44 = vpop.f32.mrf.mxu1 }
 0x21b   : > { %v2811_v3 = vadd.f32 %v2798_v44, %v2631_v40  ;;  %v11002_v40 = vld [vmem:[#allocation7 + $0x818] ss:$24 sps:$4 sm:$0xff]   ;;  %v11008_v44 = vld [vmem:[#allocation7 + $0x7e8] ss:$24 sps:$4 sm:$0xff]  }
 0x21c   : > { %v2800_v51 = vpop.f32.mrf.mxu1  ;;  %4514 = vmatpush1.bf16.msra.mxu0 %v10963_v54  ;;  %v11017_v54 = vld [vmem:[#allocation7 + $0x938] ss:$24 sps:$4 sm:$0xff]  }
 0x21d   : > { %v2828_v48 = vmax.f32 %v2307_v43, %v2811_v3  ;;  %v2812_v5 = vadd.f32 %v2800_v51, %v2633_v49  ;;  %4515 = vmatprep.subr.bf16.mxu0 %v10971_v45  ;;  %v11011_v43 = vld [vmem:[#allocation7 + $0x968] ss:$24 sps:$4 sm:$0xff]   ;;  %v11016_v49 = vld [vmem:[#allocation7 + $0x7bc] ss:$24 sps:$4 sm:$0xff]   ;;  %v11014_v3 = vld [vmem:[#allocation7 + $0x7b8] ss:$24 sps:$4 sm:$0xff]  }
 0x21e   : > { %v2802_v26 = vpop.f32.mrf.mxu1  ;;  %v11020_v51 = vld [vmem:[#allocation7 + $0x788] ss:$24 sps:$4 sm:$0xff]  }
 0x21f   : > { %v2865_v7 = vmax.f32 %v2824_v30, %v2828_v48  ;;  %v2829_v10 = vmax.f32 %v2308_v14, %v2812_v5  ;;  %v11023_v45 = vld [vmem:[#allocation7 + $0x908] ss:$24 sps:$4 sm:$0xff]   ;;  %v11028_v14 = vld [vmem:[#allocation7 + $0xbdc] ss:$24 sps:$4 sm:$0xff]   ;;  %v11026_v48 = vld [vmem:[#allocation7 + $0xbd8] ss:$24 sps:$4 sm:$0xff]  }
 0x220   : > { %v2803_v61 = vpop.f32.mrf.mxu1  ;;  %4516 = vmatpush1.bf16.msra.mxu0 %v10969_v12  ;;  %v11031_v30 = vld [vmem:[#allocation7 + $0x764] ss:$24 sps:$4 sm:$0xff]   ;;  %v11029_v5 = vld [vmem:[#allocation7 + $0x760] ss:$24 sps:$4 sm:$0xff]  }
 0x221   : > { %v2869_v23 = vadd.f32 %v2865_v7, %v13550_v6  ;;  %v2866_v33 = vmax.f32 %v2825_v34, %v2829_v10  ;;  %4517 = vmatprep.subr.bf16.mxu0 %v10977_v50  ;;  %v11034_v26 = vld [vmem:[#allocation7 + $0xbac] ss:$24 sps:$4 sm:$0xff]   ;;  %v11032_v7 = vld [vmem:[#allocation7 + $0xba8] ss:$24 sps:$4 sm:$0xff]   ;;  %v11040_v12 = vld [vmem:[#allocation7 + $0xb7c] ss:$24 sps:$4 sm:$0xff]  }
 0x222   : > { %v11037_v34 = vld [vmem:[#allocation7 + $0x734] ss:$24 sps:$4 sm:$0xff]   ;;  %v11035_v10 = vld [vmem:[#allocation7 + $0x730] ss:$24 sps:$4 sm:$0xff]   ;;  %v11043_v61 = vld [vmem:[#allocation7 + $0x704] ss:$24 sps:$4 sm:$0xff]  }
 0x223   : > { %v2870_v35 = vadd.f32 %v2866_v33, %v13553_v24  ;;  %v2873_v52 = vmax.f32 %v2869_v23, 0.0  ;;  %v11038_v50 = vld [vmem:[#allocation7 + $0xb78] ss:$24 sps:$4 sm:$0xff]   ;;  %v11046_v33 = vld [vmem:[#allocation7 + $0xb4c] ss:$24 sps:$4 sm:$0xff]  }
 0x224   : > { %4518 = vmatpush1.bf16.msra.mxu0 %v10975_v36  ;;  %v11041_v23 = vld [vmem:[#allocation7 + $0x700] ss:$24 sps:$4 sm:$0xff]  }
 0x225   : > { %v2874_v8 = vmax.f32 %v2870_v35, 0.0  ;;  %v13559_v32 = vpack.c.bf16 %v2873_v52, %v2873_v52  ;;  %4519 = vmatprep.subr.bf16.mxu0 %v10980_v56  ;;  %v11049_v35 = vld [vmem:[#allocation7 + $0x6d4] ss:$24 sps:$4 sm:$0xff]   ;;  %v11044_v36 = vld [vmem:[#allocation7 + $0xb48] ss:$24 sps:$4 sm:$0xff]  }
 0x226   : > { %v11047_v52 = vld [vmem:[#allocation7 + $0x6d0] ss:$24 sps:$4 sm:$0xff]   ;;  %v11052_v56 = vld [vmem:[#allocation7 + $0xb1c] ss:$24 sps:$4 sm:$0xff]  }
 0x227   : > { %v13557_v27 = vpack.c.bf16 %v2874_v8, %v2874_v8  ;;  %v11055_v8 = vld [vmem:[#allocation7 + $0x6a4] ss:$24 sps:$4 sm:$0xff]  }
 0x228   : > { %4520 = vmatpush2.bf16.msra.mxu0 %v10978_v11  ;;  %v11050_v11 = vld [vmem:[#allocation7 + $0xb18] ss:$24 sps:$4 sm:$0xff]  }
 0x229   : > { %4494 = vmatprep.mubr.bf16.mxu1 %v13557_v27  ;;  %4521 = vmatprep.subr.bf16.mxu0 %v10986_v20  ;;  %v11058_v20 = vld [vmem:[#allocation7 + $0xaec] ss:$24 sps:$4 sm:$0xff]  }
 0x22a   : > { %4495 = vmatmul.mubr.bf16.vlgmr.msra.gmra.mxu1 %v13559_v32 }
 0x22b   : > { %4545 = vmatpush1.bf16.msra.mxu1 %v10981_v29  ;;  %4576 = vmatprep.mubr.bf16.mxu1 %v13557_v27  ;;  %v11053_v29 = vld [vmem:[#allocation7 + $0x6a0] ss:$24 sps:$4 sm:$0xff]  }
 0x22c   : > { %4546 = vmatprep.subr.bf16.mxu1 %v10989_v22  ;;  %4522 = vmatpush2.bf16.msra.mxu0 %v10984_v53  ;;  %v11061_v22 = vld [vmem:[#allocation7 + $0x674] ss:$24 sps:$4 sm:$0xff]   ;;  %v11056_v53 = vld [vmem:[#allocation7 + $0xae8] ss:$24 sps:$4 sm:$0xff]  }
 0x22d   : > { %4523 = vmatprep.subr.bf16.mxu0 %v10992_v58  ;;  %v11064_v58 = vld [vmem:[#allocation7 + $0xabc] ss:$24 sps:$4 sm:$0xff]  }
 0x22f   : > { %4547 = vmatpush1.bf16.msra.mxu1 %v10987_v57  ;;  %v11059_v57 = vld [vmem:[#allocation7 + $0x670] ss:$24 sps:$4 sm:$0xff]  }
 0x230   : > { %4548 = vmatprep.subr.bf16.mxu1 %v10995_v60  ;;  %4524 = vmatpush2.bf16.msra.mxu0 %v10990_v9  ;;  %v11067_v60 = vld [vmem:[#allocation7 + $0x644] ss:$24 sps:$4 sm:$0xff]   ;;  %v11062_v9 = vld [vmem:[#allocation7 + $0xab8] ss:$24 sps:$4 sm:$0xff]  }
 0x231   : > { %4525 = vmatprep.subr.bf16.mxu0 %v10998_v15  ;;  %v11070_v15 = vld [vmem:[#allocation7 + $0xa8c] ss:$24 sps:$4 sm:$0xff]  }
 0x233   : > { %4549 = vmatpush1.bf16.msra.mxu1 %v10993_v62  ;;  %v11065_v62 = vld [vmem:[#allocation7 + $0x640] ss:$24 sps:$4 sm:$0xff]  }
 0x234   : > { %4550 = vmatprep.subr.bf16.mxu1 %v11001_v16  ;;  %4526 = vmatpush2.bf16.msra.mxu0 %v10996_v63  ;;  %v11073_v16 = vld [vmem:[#allocation7 + $0x614] ss:$24 sps:$4 sm:$0xff]   ;;  %v11068_v63 = vld [vmem:[#allocation7 + $0xa88] ss:$24 sps:$4 sm:$0xff]  }
 0x235   : > { %4527 = vmatprep.subr.bf16.mxu0 %v11004_v38  ;;  %v11076_v38 = vld [vmem:[#allocation7 + $0x8e4] ss:$24 sps:$4 sm:$0xff]  }
 0x237   : > { %4551 = vmatpush1.bf16.msra.mxu1 %v10999_v21  ;;  %v11071_v21 = vld [vmem:[#allocation7 + $0x610] ss:$24 sps:$4 sm:$0xff]  }
 0x238   : > { %4552 = vmatprep.subr.bf16.mxu1 %v11007_v39  ;;  %4528 = vmatpush2.bf16.msra.mxu0 %v11002_v40  ;;  %v11079_v39 = vld [vmem:[#allocation7 + $0xa64] ss:$24 sps:$4 sm:$0xff]   ;;  %v11074_v40 = vld [vmem:[#allocation7 + $0x8e0] ss:$24 sps:$4 sm:$0xff]  }
 0x239   : > { %4529 = vmatprep.subr.bf16.mxu0 %v11010_v47  ;;  %v11082_v47 = vld [vmem:[#allocation7 + $0x8b4] ss:$24 sps:$4 sm:$0xff]  }
 0x23b   : > { %4553 = vmatpush1.bf16.msra.mxu1 %v11005_v41  ;;  %v11077_v41 = vld [vmem:[#allocation7 + $0xa60] ss:$24 sps:$4 sm:$0xff]  }
 0x23c   : > { %4554 = vmatprep.subr.bf16.mxu1 %v11013_v59  ;;  %4530 = vmatpush2.bf16.msra.mxu0 %v11008_v44  ;;  %v11085_v59 = vld [vmem:[#allocation7 + $0xa34] ss:$24 sps:$4 sm:$0xff]   ;;  %v11080_v44 = vld [vmem:[#allocation7 + $0x8b0] ss:$24 sps:$4 sm:$0xff]  }
 0x23d   : > { %4531 = vmatprep.subr.bf16.mxu0 %v11016_v49  ;;  %v11088_v49 = vld [vmem:[#allocation7 + $0x884] ss:$24 sps:$4 sm:$0xff]  }
 0x23f   : > { %4555 = vmatpush1.bf16.msra.mxu1 %v11011_v43  ;;  %v11083_v43 = vld [vmem:[#allocation7 + $0xa30] ss:$24 sps:$4 sm:$0xff]  }
 0x240   : > { %4556 = vmatprep.subr.bf16.mxu1 %v11019_v2  ;;  %4532 = vmatpush2.bf16.msra.mxu0 %v11014_v3  ;;  %v11091_v2 = vld [vmem:[#allocation7 + $0xa04] ss:$24 sps:$4 sm:$0xff]   ;;  %v11086_v3 = vld [vmem:[#allocation7 + $0x880] ss:$24 sps:$4 sm:$0xff]  }
 0x241   : > { %4533 = vmatprep.subr.bf16.mxu0 %v11022_v4  ;;  %v11094_v4 = vld [vmem:[#allocation7 + $0x854] ss:$24 sps:$4 sm:$0xff]  }
 0x243   : > { %4557 = vmatpush1.bf16.msra.mxu1 %v11017_v54  ;;  %v11089_v54 = vld [vmem:[#allocation7 + $0xa00] ss:$24 sps:$4 sm:$0xff]  }
 0x244   : > { %4558 = vmatprep.subr.bf16.mxu1 %v11025_v0  ;;  %4534 = vmatpush2.bf16.msra.mxu0 %v11020_v51  ;;  %v11097_v0 = vld [vmem:[#allocation7 + $0x9d4] ss:$24 sps:$4 sm:$0xff]   ;;  %v11092_v51 = vld [vmem:[#allocation7 + $0x850] ss:$24 sps:$4 sm:$0xff]  }
 0x245   : > { %4585 = vmatprep.subr.bf16.mxu0 %v11031_v30  ;;  %v11103_v30 = vld [vmem:[#allocation7 + $0x9a4] ss:$24 sps:$4 sm:$0xff]  }
 0x247   : > { %4559 = vmatpush1.bf16.msra.mxu1 %v11023_v45  ;;  %4536 = vmatmul.mubr.bf16.vlgmr.msra.gmra.mxu0 %v13527_v37  ;;  %v11095_v45 = vld [vmem:[#allocation7 + $0x9d0] ss:$24 sps:$4 sm:$0xff]  }
 0x248   : > { %4560 = vmatprep.subr.bf16.mxu1 %v11028_v14  ;;  %4586 = vmatpush1.bf16.msra.mxu0 %v11029_v5  ;;  %v11100_v14 = vld [vmem:[#allocation7 + $0x824] ss:$24 sps:$4 sm:$0xff]   ;;  %v11101_v5 = vld [vmem:[#allocation7 + $0x9a0] ss:$24 sps:$4 sm:$0xff]  }
 0x249   : > { %4617 = vmatprep.mubr.bf16.mxu0 %v13525_v18  ;;  %4587 = vmatprep.subr.bf16.mxu0 %v11037_v34  ;;  %v11109_v34 = vld [vmem:[#allocation7 + $0x974] ss:$24 sps:$4 sm:$0xff]  }
 0x24b   : > { %4561 = vmatpush2.bf16.msra.mxu1 %v11026_v48  ;;  %v11098_v48 = vld [vmem:[#allocation7 + $0x820] ss:$24 sps:$4 sm:$0xff]  }
 0x24c   : > { %4562 = vmatprep.subr.bf16.mxu1 %v11034_v26  ;;  %4588 = vmatpush1.bf16.msra.mxu0 %v11035_v10  ;;  %v11106_v26 = vld [vmem:[#allocation7 + $0x7f4] ss:$24 sps:$4 sm:$0xff]   ;;  %v11107_v10 = vld [vmem:[#allocation7 + $0x970] ss:$24 sps:$4 sm:$0xff]  }
 0x24d   : > { %4589 = vmatprep.subr.bf16.mxu0 %v11043_v61  ;;  %v11115_v61 = vld [vmem:[#allocation7 + $0x944] ss:$24 sps:$4 sm:$0xff]  }
 0x24f   : > { %4563 = vmatpush2.bf16.msra.mxu1 %v11032_v7  ;;  %v11104_v7 = vld [vmem:[#allocation7 + $0x7f0] ss:$24 sps:$4 sm:$0xff]  }
 0x250   : > { %4564 = vmatprep.subr.bf16.mxu1 %v11040_v12  ;;  %4590 = vmatpush1.bf16.msra.mxu0 %v11041_v23  ;;  %v11112_v12 = vld [vmem:[#allocation7 + $0x7c4] ss:$24 sps:$4 sm:$0xff]   ;;  %v11113_v23 = vld [vmem:[#allocation7 + $0x940] ss:$24 sps:$4 sm:$0xff]  }
 0x251   : > { %4591 = vmatprep.subr.bf16.mxu0 %v11049_v35  ;;  %v11121_v35 = vld [vmem:[#allocation7 + $0x914] ss:$24 sps:$4 sm:$0xff]  }
 0x253   : > { %4565 = vmatpush2.bf16.msra.mxu1 %v11038_v50  ;;  %v11110_v50 = vld [vmem:[#allocation7 + $0x7c0] ss:$24 sps:$4 sm:$0xff]  }
 0x254   : > { %4566 = vmatprep.subr.bf16.mxu1 %v11046_v33  ;;  %4592 = vmatpush1.bf16.msra.mxu0 %v11047_v52  ;;  %v11118_v33 = vld [vmem:[#allocation7 + $0x794] ss:$24 sps:$4 sm:$0xff]   ;;  %v11116_v52 = vld [vmem:[#allocation7 + $0x790] ss:$24 sps:$4 sm:$0xff]  }
 0x255   : > { %4593 = vmatprep.subr.bf16.mxu0 %v11055_v8  ;;  %v11124_v8 = vld [vmem:[#allocation7 + $0xbe4] ss:$24 sps:$4 sm:$0xff]  }
 0x257   : > { %4567 = vmatpush2.bf16.msra.mxu1 %v11044_v36  ;;  %v2856_v36 = vadd.f32 %v13521_v13, %v13447_v28  ;;  %v11128_v28 = vld [vmem:[#allocation7 + $0xbb0] ss:$24 sps:$4 sm:$0xff]   ;;  %v11131_v13 = vld [vmem:[#allocation7 + $0x120] ss:$24 sps:$4 sm:$0xff]  }
 0x258   : > { %4568 = vmatprep.subr.bf16.mxu1 %v11052_v56  ;;  %4594 = vmatpush1.bf16.msra.mxu0 %v11053_v29  ;;  %v11119_v56 = vld [vmem:[#allocation7 + $0x910] ss:$24 sps:$4 sm:$0xff]  }
 0x259   : > { %4595 = vmatprep.subr.bf16.mxu0 %v11061_v22  ;;  %v2860_v29 = vmax.f32 %v2856_v36, 0.0  ;;  %v11125_v22 = vld [vmem:[#allocation7 + $0x150] ss:$24 sps:$4 sm:$0xff]   ;;  %v11190_v36 = vld [vmem:[#allocation7 + $0x244] ss:$24 sps:$4 sm:$0xff]  }
 0x25b   : > { %4569 = vmatpush2.bf16.msra.mxu1 %v11050_v11  ;;  %v11127_v11 = vld [vmem:[#allocation7 + $0x154] ss:$24 sps:$4 sm:$0xff]  }
 0x25c   : > { %4570 = vmatprep.subr.bf16.mxu1 %v11058_v20  ;;  %4596 = vmatpush1.bf16.msra.mxu0 %v11059_v57  ;;  %v11122_v20 = vld [vmem:[#allocation7 + $0xbe0] ss:$24 sps:$4 sm:$0xff]   ;;  %v11133_v57 = vld [vmem:[#allocation7 + $0x124] ss:$24 sps:$4 sm:$0xff]  }
 0x25d   : > { %4597 = vmatprep.subr.bf16.mxu0 %v11067_v60  ;;  %v11136_v60 = vld [vmem:[#allocation7 + $0xb84] ss:$24 sps:$4 sm:$0xff]  }
 0x25f   : > { %4571 = vmatpush2.bf16.msra.mxu1 %v11056_v53  ;;  %v11130_v53 = vld [vmem:[#allocation7 + $0xbb4] ss:$24 sps:$4 sm:$0xff]  }
 0x260   : > { %4572 = vmatprep.subr.bf16.mxu1 %v11064_v58  ;;  %4598 = vmatpush1.bf16.msra.mxu0 %v11065_v62  ;;  %v13570_v58 = vpack.c.bf16 %v2860_v29, %v2860_v29  ;;  %v11134_v62 = vld [vmem:[#allocation7 + $0xb80] ss:$24 sps:$4 sm:$0xff]   ;;  %v11199_v29 = vld [vmem:[#allocation7 + $0x394] ss:$24 sps:$4 sm:$0xff]  }
 0x261   : > { %4599 = vmatprep.subr.bf16.mxu0 %v11073_v16  ;;  %v11142_v16 = vld [vmem:[#allocation7 + $0xb54] ss:$24 sps:$4 sm:$0xff]  }
 0x263   : > { %4573 = vmatpush2.bf16.msra.mxu1 %v11062_v9  ;;  %v11139_v9 = vld [vmem:[#allocation7 + $0xf4] ss:$24 sps:$4 sm:$0xff]  }
 0x264   : > { %4574 = vmatprep.subr.bf16.mxu1 %v11070_v15  ;;  %4600 = vmatpush1.bf16.msra.mxu0 %v11071_v21  ;;  %v11137_v15 = vld [vmem:[#allocation7 + $0xf0] ss:$24 sps:$4 sm:$0xff]  }
 0x265   : > { %4601 = vmatprep.subr.bf16.mxu0 %v11076_v38  ;;  %v11140_v21 = vld [vmem:[#allocation7 + $0xb50] ss:$24 sps:$4 sm:$0xff]   ;;  %v11143_v38 = vld [vmem:[#allocation7 + $0xc0] ss:$24 sps:$4 sm:$0xff]  }
 0x267   : > { %4575 = vmatpush2.bf16.msra.mxu1 %v11068_v63  ;;  %v11145_v63 = vld [vmem:[#allocation7 + $0xc4] ss:$24 sps:$4 sm:$0xff]  }
 0x268   : > { %4626 = vmatprep.subr.bf16.mxu1 %v11079_v39  ;;  %4602 = vmatpush2.bf16.msra.mxu0 %v11074_v40  ;;  %v11148_v39 = vld [vmem:[#allocation7 + $0xb24] ss:$24 sps:$4 sm:$0xff]   ;;  %v11151_v40 = vld [vmem:[#allocation7 + $0x94] ss:$24 sps:$4 sm:$0xff]  }
 0x269   : > { %4603 = vmatprep.subr.bf16.mxu0 %v11082_v47  ;;  %v11149_v47 = vld [vmem:[#allocation7 + $0x90] ss:$24 sps:$4 sm:$0xff]  }
 0x26a   : > { %4577 = vmatmul.mubr.bf16.vlgmr.msra.gmra.mxu1 %v13559_v32 }
 0x26b   : > { %4627 = vmatpush1.bf16.msra.mxu1 %v11077_v41  ;;  %4658 = vmatprep.mubr.bf16.mxu1 %v13557_v27  ;;  %v11146_v41 = vld [vmem:[#allocation7 + $0xb20] ss:$24 sps:$4 sm:$0xff]  }
 0x26c   : > { %4628 = vmatprep.subr.bf16.mxu1 %v11085_v59  ;;  %4604 = vmatpush2.bf16.msra.mxu0 %v11080_v44  ;;  %v11154_v59 = vld [vmem:[#allocation7 + $0xaf4] ss:$24 sps:$4 sm:$0xff]   ;;  %v11157_v44 = vld [vmem:[#allocation7 + $0x64] ss:$24 sps:$4 sm:$0xff]  }
 0x26d   : > { %4605 = vmatprep.subr.bf16.mxu0 %v11088_v49  ;;  %v11155_v49 = vld [vmem:[#allocation7 + $0x60] ss:$24 sps:$4 sm:$0xff]  }
 0x26f   : > { %4629 = vmatpush1.bf16.msra.mxu1 %v11083_v43  ;;  %v11152_v43 = vld [vmem:[#allocation7 + $0xaf0] ss:$24 sps:$4 sm:$0xff]  }
 0x270   : > { %4630 = vmatprep.subr.bf16.mxu1 %v11091_v2  ;;  %4606 = vmatpush2.bf16.msra.mxu0 %v11086_v3  ;;  %v11160_v2 = vld [vmem:[#allocation7 + $0xac4] ss:$24 sps:$4 sm:$0xff]   ;;  %v11163_v3 = vld [vmem:[#allocation7 + $0x34] ss:$24 sps:$4 sm:$0xff]  }
 0x271   : > { %4607 = vmatprep.subr.bf16.mxu0 %v11094_v4  ;;  %v11161_v4 = vld [vmem:[#allocation7 + $0x30] ss:$24 sps:$4 sm:$0xff]  }
 0x273   : > { %4631 = vmatpush1.bf16.msra.mxu1 %v11089_v54  ;;  %v11158_v54 = vld [vmem:[#allocation7 + $0xac0] ss:$24 sps:$4 sm:$0xff]  }
 0x274   : > { %4632 = vmatprep.subr.bf16.mxu1 %v11097_v0  ;;  %4608 = vmatpush2.bf16.msra.mxu0 %v11092_v51  ;;  %v11166_v0 = vld [vmem:[#allocation7 + $0xa94] ss:$24 sps:$4 sm:$0xff]   ;;  %v11169_v51 = vld [vmem:[#allocation7 + $0x4] ss:$24 sps:$4 sm:$0xff]  }
 0x275   : > { %4609 = vmatprep.subr.bf16.mxu0 %v11100_v14  ;;  %v11164_v14 = vld [vmem:[#allocation7 + $0xa90] ss:$24 sps:$4 sm:$0xff]  }
 0x277   : > { %4633 = vmatpush1.bf16.msra.mxu1 %v11095_v45  ;;  %v2858_v45 = vadd.f32 %v13553_v24, %v13465_v55  ;;  %v11176_v55 = vld [vmem:[#allocation7 + $0x2a0] ss:$24 sps:$4 sm:$0xff]  }
 0x278   : > { %4634 = vmatprep.subr.bf16.mxu1 %v11103_v30  ;;  %4610 = vmatpush2.bf16.msra.mxu0 %v11098_v48  ;;  %v11167_v30 = vld [vmem:[#allocation7] ss:$24 sps:$4 sm:$0xff]   ;;  %v11172_v48 = vld [vmem:[#allocation7 + $0x2d4] ss:$24 sps:$4 sm:$0xff]  }
 0x279   : > { %4611 = vmatprep.subr.bf16.mxu0 %v11106_v26  ;;  %v2862_v26 = vmax.f32 %v2858_v45, 0.0  ;;  %v11179_v24 = vld [vmem:[#allocation7 + $0x420] ss:$24 sps:$4 sm:$0xff]   ;;  %v11230_v45 = vld [vmem:[#allocation7 + $0x570] ss:$24 sps:$4 sm:$0xff]  }
 0x27b   : > { %4635 = vmatpush1.bf16.msra.mxu1 %v11101_v5  ;;  %v11175_v5 = vld [vmem:[#allocation7 + $0x454] ss:$24 sps:$4 sm:$0xff]  }
 0x27c   : > { %4636 = vmatprep.subr.bf16.mxu1 %v11109_v34  ;;  %4612 = vmatpush2.bf16.msra.mxu0 %v11104_v7  ;;  %v11170_v34 = vld [vmem:[#allocation7 + $0x2d0] ss:$24 sps:$4 sm:$0xff]  }
 0x27d   : > { %4613 = vmatprep.subr.bf16.mxu0 %v11112_v12  ;;  %v11173_v7 = vld [vmem:[#allocation7 + $0x450] ss:$24 sps:$4 sm:$0xff]   ;;  %v11181_v12 = vld [vmem:[#allocation7 + $0x424] ss:$24 sps:$4 sm:$0xff]  }
 0x27f   : > { %4637 = vmatpush1.bf16.msra.mxu1 %v11107_v10  ;;  %v11178_v10 = vld [vmem:[#allocation7 + $0x2a4] ss:$24 sps:$4 sm:$0xff]  }
 0x280   : > { %4638 = vmatprep.subr.bf16.mxu1 %v11115_v61  ;;  %4614 = vmatpush2.bf16.msra.mxu0 %v11110_v50  ;;  %v13576_v61 = vpack.c.bf16 %v2862_v26, %v2862_v26  ;;  %v11184_v50 = vld [vmem:[#allocation7 + $0x274] ss:$24 sps:$4 sm:$0xff]   ;;  %v11236_v26 = vld [vmem:[#allocation7 + $0x540] ss:$24 sps:$4 sm:$0xff]  }
 0x281   : > { %4615 = vmatprep.subr.bf16.mxu0 %v11118_v33  ;;  %v11182_v33 = vld [vmem:[#allocation7 + $0x270] ss:$24 sps:$4 sm:$0xff]  }
 0x283   : > { %4639 = vmatpush1.bf16.msra.mxu1 %v11113_v23  ;;  %v11187_v23 = vld [vmem:[#allocation7 + $0x3f4] ss:$24 sps:$4 sm:$0xff]  }
 0x284   : > { %4640 = vmatprep.subr.bf16.mxu1 %v11121_v35  ;;  %4616 = vmatpush2.bf16.msra.mxu0 %v11116_v52  ;;  %v11185_v35 = vld [vmem:[#allocation7 + $0x3f0] ss:$24 sps:$4 sm:$0xff]   ;;  %v11193_v52 = vld [vmem:[#allocation7 + $0x3c4] ss:$24 sps:$4 sm:$0xff]  }
 0x285   : > { %5627 = vmatprep.subr.bf16.mxu0 %v11127_v11  ;;  %v11196_v11 = vld [vmem:[#allocation7 + $0x214] ss:$24 sps:$4 sm:$0xff]  }
 0x287   : > { %4641 = vmatpush1.bf16.msra.mxu1 %v11119_v56  ;;  %4618 = vmatmul.mubr.bf16.vlgmr.msra.gmra.mxu0 %v13527_v37  ;;  %v11188_v56 = vld [vmem:[#allocation7 + $0x240] ss:$24 sps:$4 sm:$0xff]  }
 0x288   : > { %4642 = vmatprep.subr.bf16.mxu1 %v11124_v8  ;;  %5628 = vmatpush1.bf16.msra.mxu0 %v11125_v22  ;;  %v11191_v8 = vld [vmem:[#allocation7 + $0x3c0] ss:$24 sps:$4 sm:$0xff]   ;;  %v11197_v22 = vld [vmem:[#allocation7 + $0x390] ss:$24 sps:$4 sm:$0xff]  }
 0x289   : > { %5659 = vmatprep.mubr.bf16.mxu0 %v13570_v58  ;;  %5629 = vmatprep.subr.bf16.mxu0 %v11133_v57  ;;  %v11205_v57 = vld [vmem:[#allocation7 + $0x364] ss:$24 sps:$4 sm:$0xff]  }
 0x28b   : > { %4643 = vmatpush2.bf16.msra.mxu1 %v11122_v20  ;;  %v11194_v20 = vld [vmem:[#allocation7 + $0x210] ss:$24 sps:$4 sm:$0xff]  }
 0x28c   : > { %4644 = vmatprep.subr.bf16.mxu1 %v11130_v53  ;;  %5630 = vmatpush1.bf16.msra.mxu0 %v11131_v13  ;;  %v11202_v53 = vld [vmem:[#allocation7 + $0x1e4] ss:$24 sps:$4 sm:$0xff]   ;;  %v11203_v13 = vld [vmem:[#allocation7 + $0x360] ss:$24 sps:$4 sm:$0xff]  }
 0x28d   : > { %5631 = vmatprep.subr.bf16.mxu0 %v11139_v9  ;;  %v11211_v9 = vld [vmem:[#allocation7 + $0x334] ss:$24 sps:$4 sm:$0xff]  }
 0x28f   : > { %4645 = vmatpush2.bf16.msra.mxu1 %v11128_v28  ;;  %v11200_v28 = vld [vmem:[#allocation7 + $0x1e0] ss:$24 sps:$4 sm:$0xff]  }
 0x290   : > { %4646 = vmatprep.subr.bf16.mxu1 %v11136_v60  ;;  %5632 = vmatpush1.bf16.msra.mxu0 %v11137_v15  ;;  %v11208_v60 = vld [vmem:[#allocation7 + $0x1b4] ss:$24 sps:$4 sm:$0xff]   ;;  %v11209_v15 = vld [vmem:[#allocation7 + $0x330] ss:$24 sps:$4 sm:$0xff]  }
 0x291   : > { %5633 = vmatprep.subr.bf16.mxu0 %v11145_v63  ;;  %v11214_v63 = vld [vmem:[#allocation7 + $0x184] ss:$24 sps:$4 sm:$0xff]  }
 0x293   : > { %4647 = vmatpush2.bf16.msra.mxu1 %v11134_v62  ;;  %v11206_v62 = vld [vmem:[#allocation7 + $0x1b0] ss:$24 sps:$4 sm:$0xff]  }
 0x294   : > { %4648 = vmatprep.subr.bf16.mxu1 %v11142_v16  ;;  %5634 = vmatpush1.bf16.msra.mxu0 %v11143_v38  ;;  %v2855_v16 = vadd.f32 %v13516_v31, %v13444_v1  ;;  %v11212_v38 = vld [vmem:[#allocation7 + $0x180] ss:$24 sps:$4 sm:$0xff]   ;;  %v11226_v1 = vld [vmem:[#allocation7 + $0x5a4] ss:$24 sps:$4 sm:$0xff]  }
 0x295   : > { %5635 = vmatprep.subr.bf16.mxu0 %v11151_v40  ;;  %v11229_v31 = vld [vmem:[#allocation7 + $0x12c] ss:$24 sps:$4 sm:$0xff]  }
 0x296   : > { %v2859_v40 = vmax.f32 %v2855_v16, 0.0  ;;  %v11272_v16 = vld [vmem:[#allocation7 + $0x2a8] ss:$24 sps:$4 sm:$0xff]  }
 0x297   : > { %4649 = vmatpush2.bf16.msra.mxu1 %v11140_v21  ;;  %v11217_v21 = vld [vmem:[#allocation7 + $0x304] ss:$24 sps:$4 sm:$0xff]  }
 0x298   : > { %4650 = vmatprep.subr.bf16.mxu1 %v11148_v39  ;;  %5636 = vmatpush1.bf16.msra.mxu0 %v11149_v47  ;;  %v11215_v39 = vld [vmem:[#allocation7 + $0x300] ss:$24 sps:$4 sm:$0xff]   ;;  %v11223_v47 = vld [vmem:[#allocation7 + $0x15c] ss:$24 sps:$4 sm:$0xff]  }
 0x299   : > { %5637 = vmatprep.subr.bf16.mxu0 %v11157_v44  ;;  %v11221_v44 = vld [vmem:[#allocation7 + $0x158] ss:$24 sps:$4 sm:$0xff]  }
 0x29b   : > { %4651 = vmatpush2.bf16.msra.mxu1 %v11146_v41  ;;  %v11220_v41 = vld [vmem:[#allocation7 + $0x5d4] ss:$24 sps:$4 sm:$0xff]  }
 0x29c   : > { %4652 = vmatprep.subr.bf16.mxu1 %v11154_v59  ;;  %5638 = vmatpush1.bf16.msra.mxu0 %v11155_v49  ;;  %v11218_v59 = vld [vmem:[#allocation7 + $0x5d0] ss:$24 sps:$4 sm:$0xff]  }
 0x29d   : > { %5639 = vmatprep.subr.bf16.mxu0 %v11163_v3  ;;  %v11227_v3 = vld [vmem:[#allocation7 + $0x128] ss:$24 sps:$4 sm:$0xff]  }
 0x29f   : > { %4653 = vmatpush2.bf16.msra.mxu1 %v11152_v43  ;;  %v13582_v43 = vpack.c.bf16 %v2859_v40, %v2859_v40 }
 0x2a0   : > { %4654 = vmatprep.subr.bf16.mxu1 %v11160_v2  ;;  %5640 = vmatpush1.bf16.msra.mxu0 %v11161_v4  ;;  %v11224_v2 = vld [vmem:[#allocation7 + $0x5a0] ss:$24 sps:$4 sm:$0xff]   ;;  %v11232_v4 = vld [vmem:[#allocation7 + $0x574] ss:$24 sps:$4 sm:$0xff]  }
 0x2a1   : > { %5641 = vmatprep.subr.bf16.mxu0 %v11169_v51 }
 0x2a3   : > { %4655 = vmatpush2.bf16.msra.mxu1 %v11158_v54 }
 0x2a4   : > { %4656 = vmatprep.subr.bf16.mxu1 %v11166_v0  ;;  %5642 = vmatpush1.bf16.msra.mxu0 %v11167_v30  ;;  %v11235_v0 = vld [vmem:[#allocation7 + $0xfc] ss:$24 sps:$4 sm:$0xff]  }
 0x2a5   : > { %5643 = vmatprep.subr.bf16.mxu0 %v11172_v48  ;;  %v11238_v48 = vld [vmem:[#allocation7 + $0x544] ss:$24 sps:$4 sm:$0xff]  }
 0x2a7   : > { %4657 = vmatpush2.bf16.msra.mxu1 %v11164_v14  ;;  %v11233_v14 = vld [vmem:[#allocation7 + $0xf8] ss:$24 sps:$4 sm:$0xff]  }
 0x2a8   : > { %5668 = vmatprep.subr.bf16.mxu1 %v11175_v5  ;;  %5644 = vmatpush2.bf16.msra.mxu0 %v11170_v34  ;;  %v11241_v5 = vld [vmem:[#allocation7 + $0xcc] ss:$24 sps:$4 sm:$0xff]   ;;  %v11239_v34 = vld [vmem:[#allocation7 + $0xc8] ss:$24 sps:$4 sm:$0xff]  }
 0x2a9   : > { %5645 = vmatprep.subr.bf16.mxu0 %v11178_v10  ;;  %v11247_v10 = vld [vmem:[#allocation7 + $0x9c] ss:$24 sps:$4 sm:$0xff]  }
 0x2aa   : > { %4659 = vmatmul.mubr.bf16.vlgmr.msra.gmra.mxu1 %v13559_v32 }
 0x2ab   : > { %5669 = vmatpush1.bf16.msra.mxu1 %v11173_v7  ;;  %5700 = vmatprep.mubr.bf16.mxu1 %v13576_v61  ;;  %v11244_v7 = vld [vmem:[#allocation7 + $0x514] ss:$24 sps:$4 sm:$0xff]  }
 0x2ac   : > { %5670 = vmatprep.subr.bf16.mxu1 %v11181_v12  ;;  %5646 = vmatpush2.bf16.msra.mxu0 %v11176_v55  ;;  %v11242_v12 = vld [vmem:[#allocation7 + $0x510] ss:$24 sps:$4 sm:$0xff]  }
 0x2ad   : > { %5647 = vmatprep.subr.bf16.mxu0 %v11184_v50  ;;  %v11245_v55 = vld [vmem:[#allocation7 + $0x98] ss:$24 sps:$4 sm:$0xff]   ;;  %v11253_v50 = vld [vmem:[#allocation7 + $0x6c] ss:$24 sps:$4 sm:$0xff]  }
 0x2af   : > { %5671 = vmatpush1.bf16.msra.mxu1 %v11179_v24  ;;  %v11250_v24 = vld [vmem:[#allocation7 + $0x4e4] ss:$24 sps:$4 sm:$0xff]  }
 0x2b0   : > { %5672 = vmatprep.subr.bf16.mxu1 %v11187_v23  ;;  %5648 = vmatpush2.bf16.msra.mxu0 %v11182_v33  ;;  %v11248_v23 = vld [vmem:[#allocation7 + $0x4e0] ss:$24 sps:$4 sm:$0xff]  }
 0x2b1   : > { %5649 = vmatprep.subr.bf16.mxu0 %v11190_v36  ;;  %v11251_v33 = vld [vmem:[#allocation7 + $0x68] ss:$24 sps:$4 sm:$0xff]   ;;  %v11259_v36 = vld [vmem:[#allocation7 + $0x3c] ss:$24 sps:$4 sm:$0xff]  }
 0x2b3   : > { %5673 = vmatpush1.bf16.msra.mxu1 %v11185_v35  ;;  %v11256_v35 = vld [vmem:[#allocation7 + $0x4b4] ss:$24 sps:$4 sm:$0xff]  }
 0x2b4   : > { %5674 = vmatprep.subr.bf16.mxu1 %v11193_v52  ;;  %5650 = vmatpush2.bf16.msra.mxu0 %v11188_v56  ;;  %v11254_v52 = vld [vmem:[#allocation7 + $0x4b0] ss:$24 sps:$4 sm:$0xff]  }
 0x2b5   : > { %5651 = vmatprep.subr.bf16.mxu0 %v11196_v11  ;;  %v11257_v56 = vld [vmem:[#allocation7 + $0x38] ss:$24 sps:$4 sm:$0xff]   ;;  %v11262_v11 = vld [vmem:[#allocation7 + $0x484] ss:$24 sps:$4 sm:$0xff]  }
 0x2b7   : > { %5675 = vmatpush1.bf16.msra.mxu1 %v11191_v8  ;;  %v2857_v8 = vadd.f32 %v13550_v6, %v13462_v46  ;;  %v11274_v46 = vld [vmem:[#allocation7 + $0x2ac] ss:$24 sps:$4 sm:$0xff]  }
 0x2b8   : > { %5676 = vmatprep.subr.bf16.mxu1 %v11199_v29  ;;  %5652 = vmatpush2.bf16.msra.mxu0 %v11194_v20  ;;  %v11265_v29 = vld [vmem:[#allocation7 + $0xc] ss:$24 sps:$4 sm:$0xff]   ;;  %v11260_v20 = vld [vmem:[#allocation7 + $0x480] ss:$24 sps:$4 sm:$0xff]  }
 0x2b9   : > { %5653 = vmatprep.subr.bf16.mxu0 %v11202_v53  ;;  %v2861_v53 = vmax.f32 %v2857_v8, 0.0  ;;  %v11277_v6 = vld [vmem:[#allocation7 + $0x42c] ss:$24 sps:$4 sm:$0xff]   ;;  %v11323_v8 = vld [vmem:[#allocation7 + $0x130] ss:$24 sps:$4 sm:$0xff]  }
 0x2bb   : > { %5677 = vmatpush1.bf16.msra.mxu1 %v11197_v22  ;;  %v11263_v22 = vld [vmem:[#allocation7 + $0x8] ss:$24 sps:$4 sm:$0xff]  }
 0x2bc   : > { %5678 = vmatprep.subr.bf16.mxu1 %v11205_v57  ;;  %5654 = vmatpush2.bf16.msra.mxu0 %v11200_v28  ;;  %v11268_v57 = vld [vmem:[#allocation7 + $0x2dc] ss:$24 sps:$4 sm:$0xff]  }
 0x2bd   : > { %5655 = vmatprep.subr.bf16.mxu0 %v11208_v60  ;;  %v11271_v28 = vld [vmem:[#allocation7 + $0x45c] ss:$24 sps:$4 sm:$0xff]   ;;  %v11269_v60 = vld [vmem:[#allocation7 + $0x458] ss:$24 sps:$4 sm:$0xff]  }
 0x2bf   : > { %5679 = vmatpush1.bf16.msra.mxu1 %v11203_v13  ;;  %v11266_v13 = vld [vmem:[#allocation7 + $0x2d8] ss:$24 sps:$4 sm:$0xff]  }
 0x2c0   : > { %5680 = vmatprep.subr.bf16.mxu1 %v11211_v9  ;;  %5656 = vmatpush2.bf16.msra.mxu0 %v11206_v62  ;;  %v13592_v9 = vpack.c.bf16 %v2861_v53, %v2861_v53  ;;  %v11326_v53 = vld [vmem:[#allocation7 + $0x578] ss:$24 sps:$4 sm:$0xff]  }
 0x2c1   : > { %5657 = vmatprep.subr.bf16.mxu0 %v11214_v63  ;;  %v11275_v63 = vld [vmem:[#allocation7 + $0x428] ss:$24 sps:$4 sm:$0xff]  }
 0x2c3   : > { %5681 = vmatpush1.bf16.msra.mxu1 %v11209_v15 }
 0x2c4   : > { %5682 = vmatprep.subr.bf16.mxu1 %v11217_v21  ;;  %5658 = vmatpush2.bf16.msra.mxu0 %v11212_v38  ;;  %v11280_v38 = vld [vmem:[#allocation7 + $0x27c] ss:$24 sps:$4 sm:$0xff]  }
 0x2c5   : > { %5709 = vmatprep.subr.bf16.mxu0 %v11223_v47  ;;  %v11278_v47 = vld [vmem:[#allocation7 + $0x278] ss:$24 sps:$4 sm:$0xff]  }
 0x2c7   : > { %5683 = vmatpush1.bf16.msra.mxu1 %v11215_v39  ;;  %5660 = vmatmul.mubr.bf16.vlgmr.msra.gmra.mxu0 %v13582_v43  ;;  %v13585_v49 = vpop.f32.mrf.mxu0  ;;  %v11283_v39 = vld [vmem:[#allocation7 + $0x3fc] ss:$24 sps:$4 sm:$0xff]  }
 0x2c8   : > { %5684 = vmatprep.subr.bf16.mxu1 %v11220_v41  ;;  %5710 = vmatpush1.bf16.msra.mxu0 %v11221_v44 }
 0x2c9   : > { %5741 = vmatprep.mubr.bf16.mxu0 %v13570_v58  ;;  %v13588_v54 = vpop.f32.mrf.mxu0  ;;  %5711 = vmatprep.subr.bf16.mxu0 %v11229_v31  ;;  %v11289_v31 = vld [vmem:[#allocation7 + $0x3cc] ss:$24 sps:$4 sm:$0xff]  }
 0x2cb   : > { %5685 = vmatpush2.bf16.msra.mxu1 %v11218_v59  ;;  %v4459_v51 = vpop.f32.mrf.mxu0  ;;  %v11281_v59 = vld [vmem:[#allocation7 + $0x3f8] ss:$24 sps:$4 sm:$0xff]  }
 0x2cc   : > { %5686 = vmatprep.subr.bf16.mxu1 %v11226_v1  ;;  %5712 = vmatpush1.bf16.msra.mxu0 %v11227_v3  ;;  %v11286_v1 = vld [vmem:[#allocation7 + $0x24c] ss:$24 sps:$4 sm:$0xff]   ;;  %v11292_v3 = vld [vmem:[#allocation7 + $0x21c] ss:$24 sps:$4 sm:$0xff]  }
 0x2cd   : > { %v4460_v30 = vpop.f32.mrf.mxu0  ;;  %5713 = vmatprep.subr.bf16.mxu0 %v11235_v0  ;;  %v11293_v0 = vld [vmem:[#allocation7 + $0x398] ss:$24 sps:$4 sm:$0xff]   ;;  %v11298_v51 = vld [vmem:[#allocation7 + $0x1ec] ss:$24 sps:$4 sm:$0xff]  }
 0x2ce   : > { %v11299_v30 = vld [vmem:[#allocation7 + $0x368] ss:$24 sps:$4 sm:$0xff]  }
 0x2cf   : > { %5687 = vmatpush2.bf16.msra.mxu1 %v11224_v2  ;;  %v11287_v2 = vld [vmem:[#allocation7 + $0x3c8] ss:$24 sps:$4 sm:$0xff]  }
 0x2d0   : > { %5688 = vmatprep.subr.bf16.mxu1 %v11232_v4  ;;  %5714 = vmatpush1.bf16.msra.mxu0 %v11233_v14  ;;  %v11290_v4 = vld [vmem:[#allocation7 + $0x218] ss:$24 sps:$4 sm:$0xff]   ;;  %v11296_v14 = vld [vmem:[#allocation7 + $0x1e8] ss:$24 sps:$4 sm:$0xff]  }
 0x2d1   : > { %5715 = vmatprep.subr.bf16.mxu0 %v11241_v5  ;;  %v11307_v5 = vld [vmem:[#allocation7 + $0x33c] ss:$24 sps:$4 sm:$0xff]  }
 0x2d3   : > { %5689 = vmatpush2.bf16.msra.mxu1 %v11230_v45  ;;  %v11301_v45 = vld [vmem:[#allocation7 + $0x36c] ss:$24 sps:$4 sm:$0xff]  }
 0x2d4   : > { %5690 = vmatprep.subr.bf16.mxu1 %v11238_v48  ;;  %5716 = vmatpush1.bf16.msra.mxu0 %v11239_v34  ;;  %v11304_v48 = vld [vmem:[#allocation7 + $0x1bc] ss:$24 sps:$4 sm:$0xff]   ;;  %v11305_v34 = vld [vmem:[#allocation7 + $0x338] ss:$24 sps:$4 sm:$0xff]  }
 0x2d5   : > { %5717 = vmatprep.subr.bf16.mxu0 %v11247_v10  ;;  %v11313_v10 = vld [vmem:[#allocation7 + $0x30c] ss:$24 sps:$4 sm:$0xff]  }
 0x2d7   : > { %5691 = vmatpush2.bf16.msra.mxu1 %v11236_v26  ;;  %v11302_v26 = vld [vmem:[#allocation7 + $0x1b8] ss:$24 sps:$4 sm:$0xff]  }
 0x2d8   : > { %5692 = vmatprep.subr.bf16.mxu1 %v11244_v7  ;;  %5718 = vmatpush1.bf16.msra.mxu0 %v11245_v55  ;;  %v11310_v7 = vld [vmem:[#allocation7 + $0x18c] ss:$24 sps:$4 sm:$0xff]   ;;  %v11311_v55 = vld [vmem:[#allocation7 + $0x308] ss:$24 sps:$4 sm:$0xff]  }
 0x2d9   : > { %5719 = vmatprep.subr.bf16.mxu0 %v11253_v50  ;;  %v11319_v50 = vld [vmem:[#allocation7 + $0x164] ss:$24 sps:$4 sm:$0xff]  }
 0x2db   : > { %5693 = vmatpush2.bf16.msra.mxu1 %v11242_v12  ;;  %v11308_v12 = vld [vmem:[#allocation7 + $0x188] ss:$24 sps:$4 sm:$0xff]  }
 0x2dc   : > { %5694 = vmatprep.subr.bf16.mxu1 %v11250_v24  ;;  %5720 = vmatpush1.bf16.msra.mxu0 %v11251_v33  ;;  %v11316_v24 = vld [vmem:[#allocation7 + $0x5dc] ss:$24 sps:$4 sm:$0xff]   ;;  %v11317_v33 = vld [vmem:[#allocation7 + $0x160] ss:$24 sps:$4 sm:$0xff]  }
 0x2dd   : > { %5721 = vmatprep.subr.bf16.mxu0 %v11259_v36  ;;  %v11325_v36 = vld [vmem:[#allocation7 + $0x134] ss:$24 sps:$4 sm:$0xff]  }
 0x2df   : > { %5695 = vmatpush2.bf16.msra.mxu1 %v11248_v23  ;;  %v11314_v23 = vld [vmem:[#allocation7 + $0x5d8] ss:$24 sps:$4 sm:$0xff]  }
 0x2e0   : > { %5696 = vmatprep.subr.bf16.mxu1 %v11256_v35  ;;  %5722 = vmatpush1.bf16.msra.mxu0 %v11257_v56  ;;  %v11322_v35 = vld [vmem:[#allocation7 + $0x5ac] ss:$24 sps:$4 sm:$0xff]   ;;  %v11320_v56 = vld [vmem:[#allocation7 + $0x5a8] ss:$24 sps:$4 sm:$0xff]  }
 0x2e1   : > { %5723 = vmatprep.subr.bf16.mxu0 %v11265_v29  ;;  %v11328_v29 = vld [vmem:[#allocation7 + $0x57c] ss:$24 sps:$4 sm:$0xff]  }
 0x2e3   : > { %5697 = vmatpush2.bf16.msra.mxu1 %v11254_v52 }
 0x2e4   : > { %5698 = vmatprep.subr.bf16.mxu1 %v11262_v11  ;;  %5724 = vmatpush1.bf16.msra.mxu0 %v11263_v22 }
 0x2e5   : > { %5725 = vmatprep.subr.bf16.mxu0 %v11268_v57  ;;  %v11329_v57 = vld [vmem:[#allocation7 + $0x100] ss:$24 sps:$4 sm:$0xff]  }
 0x2e7   : > { %5699 = vmatpush2.bf16.msra.mxu1 %v11260_v20  ;;  %v11331_v20 = vld [vmem:[#allocation7 + $0x104] ss:$24 sps:$4 sm:$0xff]  }
 0x2e8   : > { %5750 = vmatprep.subr.bf16.mxu1 %v11271_v28  ;;  %5726 = vmatpush2.bf16.msra.mxu0 %v11266_v13  ;;  %v11334_v13 = vld [vmem:[#allocation7 + $0x54c] ss:$24 sps:$4 sm:$0xff]  }
 0x2e9   : > { %5727 = vmatprep.subr.bf16.mxu0 %v11274_v46  ;;  %v11332_v46 = vld [vmem:[#allocation7 + $0x548] ss:$24 sps:$4 sm:$0xff]  }
 0x2ea   : > { %5701 = vmatmul.mubr.bf16.vlgmr.msra.gmra.mxu1 %v13592_v9  ;;  %v4496_v62 = vpop.f32.mrf.mxu1 }
 0x2eb   : > { %v13596_v15 = vadd.f32 %v4496_v62, %v13585_v49  ;;  %5751 = vmatpush1.bf16.msra.mxu1 %v11269_v60  ;;  %5782 = vmatprep.mubr.bf16.mxu1 %v13576_v61  ;;  %v11284_v49 = vld [vmem:[#allocation7 + $0x248] ss:$24 sps:$4 sm:$0xff]   ;;  %v11337_v60 = vld [vmem:[#allocation7 + $0xd4] ss:$24 sps:$4 sm:$0xff]  }
 0x2ec   : > { %v4498_v21 = vpop.f32.mrf.mxu1  ;;  %5752 = vmatprep.subr.bf16.mxu1 %v11277_v6  ;;  %5728 = vmatpush2.bf16.msra.mxu0 %v11272_v16  ;;  %v11335_v6 = vld [vmem:[#allocation7 + $0xd0] ss:$24 sps:$4 sm:$0xff]   ;;  %v11340_v62 = vld [vmem:[#allocation7 + $0x51c] ss:$24 sps:$4 sm:$0xff]  }
 0x2ed   : > { %v13600_v40 = vadd.f32 %v4498_v21, %v13588_v54  ;;  %5729 = vmatprep.subr.bf16.mxu0 %v11280_v38  ;;  %v11295_v54 = vld [vmem:[#allocation7 + $0x39c] ss:$24 sps:$4 sm:$0xff]   ;;  %v11341_v21 = vld [vmem:[#allocation7 + $0xa0] ss:$24 sps:$4 sm:$0xff]   ;;  %v11346_v38 = vld [vmem:[#allocation7 + $0x4ec] ss:$24 sps:$4 sm:$0xff]  }
 0x2ee   : > { %v4500_v41 = vpop.f32.mrf.mxu1  ;;  %v11343_v16 = vld [vmem:[#allocation7 + $0xa4] ss:$24 sps:$4 sm:$0xff]  }
 0x2ef   : > { %5753 = vmatpush1.bf16.msra.mxu1 %v11275_v63  ;;  %v11338_v63 = vld [vmem:[#allocation7 + $0x518] ss:$24 sps:$4 sm:$0xff]   ;;  %v11344_v41 = vld [vmem:[#allocation7 + $0x4e8] ss:$24 sps:$4 sm:$0xff]  }
 0x2f0   : > { %v4501_v44 = vpop.f32.mrf.mxu1  ;;  %5754 = vmatprep.subr.bf16.mxu1 %v11283_v39  ;;  %5730 = vmatpush2.bf16.msra.mxu0 %v11278_v47  ;;  %v11349_v39 = vld [vmem:[#allocation7 + $0x74] ss:$24 sps:$4 sm:$0xff]   ;;  %v11347_v47 = vld [vmem:[#allocation7 + $0x70] ss:$24 sps:$4 sm:$0xff]  }
 0x2f1   : > { %5731 = vmatprep.subr.bf16.mxu0 %v11286_v1  ;;  %v11355_v44 = vld [vmem:[#allocation7 + $0x44] ss:$24 sps:$4 sm:$0xff]   ;;  %v11350_v1 = vld [vmem:[#allocation7 + $0x4b8] ss:$24 sps:$4 sm:$0xff]  }
 0x2f3   : > { %5755 = vmatpush1.bf16.msra.mxu1 %v11281_v59  ;;  %v11352_v59 = vld [vmem:[#allocation7 + $0x4bc] ss:$24 sps:$4 sm:$0xff]  }
 0x2f4   : > { %5756 = vmatprep.subr.bf16.mxu1 %v11289_v31  ;;  %5732 = vmatpush2.bf16.msra.mxu0 %v11284_v49  ;;  %v11353_v31 = vld [vmem:[#allocation7 + $0x40] ss:$24 sps:$4 sm:$0xff]   ;;  %v11358_v49 = vld [vmem:[#allocation7 + $0x48c] ss:$24 sps:$4 sm:$0xff]  }
 0x2f5   : > { %5733 = vmatprep.subr.bf16.mxu0 %v11292_v3  ;;  %v11356_v3 = vld [vmem:[#allocation7 + $0x488] ss:$24 sps:$4 sm:$0xff]  }
 0x2f7   : > { %5757 = vmatpush1.bf16.msra.mxu1 %v11287_v2  ;;  %v11361_v2 = vld [vmem:[#allocation7 + $0x14] ss:$24 sps:$4 sm:$0xff]  }
 0x2f8   : > { %5758 = vmatprep.subr.bf16.mxu1 %v11295_v54  ;;  %5734 = vmatpush2.bf16.msra.mxu0 %v11290_v4  ;;  %v11359_v54 = vld [vmem:[#allocation7 + $0x10] ss:$24 sps:$4 sm:$0xff]   ;;  %v11364_v4 = vld [vmem:[#allocation7 + $0x2e4] ss:$24 sps:$4 sm:$0xff]  }
 0x2f9   : > { %5735 = vmatprep.subr.bf16.mxu0 %v11298_v51  ;;  %v11362_v51 = vld [vmem:[#allocation7 + $0x2e0] ss:$24 sps:$4 sm:$0xff]  }
 0x2fb   : > { %5759 = vmatpush1.bf16.msra.mxu1 %v11293_v0  ;;  %v11367_v0 = vld [vmem:[#allocation7 + $0x464] ss:$24 sps:$4 sm:$0xff]  }
 0x2fc   : > { %5760 = vmatprep.subr.bf16.mxu1 %v11301_v45  ;;  %5736 = vmatpush2.bf16.msra.mxu0 %v11296_v14  ;;  %v11365_v45 = vld [vmem:[#allocation7 + $0x460] ss:$24 sps:$4 sm:$0xff]   ;;  %v11370_v14 = vld [vmem:[#allocation7 + $0x2b4] ss:$24 sps:$4 sm:$0xff]  }
 0x2fd   : > { %5737 = vmatprep.subr.bf16.mxu0 %v11304_v48 }
 0x2ff   : > { %5761 = vmatpush1.bf16.msra.mxu1 %v11299_v30  ;;  %v11373_v30 = vld [vmem:[#allocation7 + $0x434] ss:$24 sps:$4 sm:$0xff]  }
 0x300   : > { %5762 = vmatprep.subr.bf16.mxu1 %v11307_v5  ;;  %5738 = vmatpush2.bf16.msra.mxu0 %v11302_v26  ;;  %v11368_v26 = vld [vmem:[#allocation7 + $0x2b0] ss:$24 sps:$4 sm:$0xff]  }
 0x301   : > { %5739 = vmatprep.subr.bf16.mxu0 %v11310_v7 }
 0x303   : > { %5763 = vmatpush1.bf16.msra.mxu1 %v11305_v34  ;;  %v11371_v34 = vld [vmem:[#allocation7 + $0x430] ss:$24 sps:$4 sm:$0xff]  }
 0x304   : > { %5764 = vmatprep.subr.bf16.mxu1 %v11313_v10  ;;  %5740 = vmatpush2.bf16.msra.mxu0 %v11308_v12  ;;  %v11376_v10 = vld [vmem:[#allocation7 + $0x284] ss:$24 sps:$4 sm:$0xff]  }
 0x305   : > { %5791 = vmatprep.subr.bf16.mxu0 %v11319_v50  ;;  %v11379_v12 = vld [vmem:[#allocation7 + $0x404] ss:$24 sps:$4 sm:$0xff]   ;;  %v11374_v50 = vld [vmem:[#allocation7 + $0x280] ss:$24 sps:$4 sm:$0xff]  }
 0x307   : > { %5765 = vmatpush1.bf16.msra.mxu1 %v11311_v55  ;;  %v13602_v52 = vpop.f32.mrf.mxu0  ;;  %5742 = vmatmul.mubr.bf16.vlgmr.msra.gmra.mxu0 %v13582_v43 }
 0x308   : > { %5766 = vmatprep.subr.bf16.mxu1 %v11316_v24  ;;  %5792 = vmatpush1.bf16.msra.mxu0 %v11317_v33 }
 0x309   : > { %5823 = vmatprep.mubr.bf16.mxu0 %v13570_v58  ;;  %v13606_v11 = vpop.f32.mrf.mxu0  ;;  %5793 = vmatprep.subr.bf16.mxu0 %v11325_v36  ;;  %v11385_v36 = vld [vmem:[#allocation7 + $0x3d4] ss:$24 sps:$4 sm:$0xff]  }
 0x30b   : > { %5767 = vmatpush2.bf16.msra.mxu1 %v11314_v23  ;;  %v4541_v22 = vpop.f32.mrf.mxu0  ;;  %v11377_v23 = vld [vmem:[#allocation7 + $0x400] ss:$24 sps:$4 sm:$0xff]  }
 0x30c   : > { %5768 = vmatprep.subr.bf16.mxu1 %v11322_v35  ;;  %5794 = vmatpush1.bf16.msra.mxu0 %v11323_v8  ;;  %v11382_v35 = vld [vmem:[#allocation7 + $0x254] ss:$24 sps:$4 sm:$0xff]   ;;  %v11388_v8 = vld [vmem:[#allocation7 + $0x224] ss:$24 sps:$4 sm:$0xff]  }
 0x30d   : > { %v4542_v28 = vpop.f32.mrf.mxu0  ;;  %5795 = vmatprep.subr.bf16.mxu0 %v11331_v20  ;;  %v11389_v20 = vld [vmem:[#allocation7 + $0x3a0] ss:$24 sps:$4 sm:$0xff]   ;;  %v11394_v22 = vld [vmem:[#allocation7 + $0x1f4] ss:$24 sps:$4 sm:$0xff]  }
 0x30e   : > { %v11395_v28 = vld [vmem:[#allocation7 + $0x370] ss:$24 sps:$4 sm:$0xff]  }
 0x30f   : > { %5769 = vmatpush2.bf16.msra.mxu1 %v11320_v56  ;;  %v11383_v56 = vld [vmem:[#allocation7 + $0x3d0] ss:$24 sps:$4 sm:$0xff]  }
 0x310   : > { %5770 = vmatprep.subr.bf16.mxu1 %v11328_v29  ;;  %5796 = vmatpush1.bf16.msra.mxu0 %v11329_v57  ;;  %v11386_v29 = vld [vmem:[#allocation7 + $0x220] ss:$24 sps:$4 sm:$0xff]   ;;  %v11392_v57 = vld [vmem:[#allocation7 + $0x1f0] ss:$24 sps:$4 sm:$0xff]  }
 0x311   : > { %5797 = vmatprep.subr.bf16.mxu0 %v11337_v60  ;;  %v11403_v60 = vld [vmem:[#allocation7 + $0x344] ss:$24 sps:$4 sm:$0xff]  }
 0x313   : > { %5771 = vmatpush2.bf16.msra.mxu1 %v11326_v53  ;;  %v11397_v53 = vld [vmem:[#allocation7 + $0x374] ss:$24 sps:$4 sm:$0xff]  }
 0x314   : > { %5772 = vmatprep.subr.bf16.mxu1 %v11334_v13  ;;  %5798 = vmatpush1.bf16.msra.mxu0 %v11335_v6  ;;  %v11400_v13 = vld [vmem:[#allocation7 + $0x1c4] ss:$24 sps:$4 sm:$0xff]   ;;  %v11401_v6 = vld [vmem:[#allocation7 + $0x340] ss:$24 sps:$4 sm:$0xff]  }
 0x315   : > { %5799 = vmatprep.subr.bf16.mxu0 %v11343_v16  ;;  %v11409_v16 = vld [vmem:[#allocation7 + $0x314] ss:$24 sps:$4 sm:$0xff]  }
 0x317   : > { %5773 = vmatpush2.bf16.msra.mxu1 %v11332_v46  ;;  %v11398_v46 = vld [vmem:[#allocation7 + $0x1c0] ss:$24 sps:$4 sm:$0xff]  }
 0x318   : > { %5774 = vmatprep.subr.bf16.mxu1 %v11340_v62  ;;  %5800 = vmatpush1.bf16.msra.mxu0 %v11341_v21  ;;  %v11406_v62 = vld [vmem:[#allocation7 + $0x194] ss:$24 sps:$4 sm:$0xff]   ;;  %v11404_v21 = vld [vmem:[#allocation7 + $0x190] ss:$24 sps:$4 sm:$0xff]  }
 0x319   : > { %5801 = vmatprep.subr.bf16.mxu0 %v11349_v39  ;;  %v11412_v39 = vld [vmem:[#allocation7 + $0x5e4] ss:$24 sps:$4 sm:$0xff]  }
 0x31b   : > { %5775 = vmatpush2.bf16.msra.mxu1 %v11338_v63  ;;  %v5883_v63 = vshll.u32 %v13570_v58, 16 }
 0x31c   : > { %5776 = vmatprep.subr.bf16.mxu1 %v11346_v38  ;;  %5802 = vmatpush1.bf16.msra.mxu0 %v11347_v47  ;;  %v11407_v38 = vld [vmem:[#allocation7 + $0x310] ss:$24 sps:$4 sm:$0xff]  }
 0x31d   : > { %5803 = vmatprep.subr.bf16.mxu0 %v11355_v44  ;;  %v5885_v47 = vrot.slane %v5883_v63, 1  ;;  %v11413_v44 = vld [vmem:[#allocation7 + $0xd50] ss:$24 sps:$4 sm:$0xff]   ;;  %v11466_v63 = vld [vmem:[#allocation7 + $0xea4] ss:$24 sps:$4 sm:$0xff]  }
 0x31f   : > { %5777 = vmatpush2.bf16.msra.mxu1 %v11344_v41  ;;  %v11415_v41 = vld [vmem:[#allocation7 + $0xd54] ss:$24 sps:$4 sm:$0xff]  }
 0x320   : > { %5778 = vmatprep.subr.bf16.mxu1 %v11352_v59  ;;  %5804 = vmatpush1.bf16.msra.mxu0 %v11353_v31  ;;  %v11410_v59 = vld [vmem:[#allocation7 + $0x5e0] ss:$24 sps:$4 sm:$0xff]   ;;  %v11418_v31 = vld [vmem:[#allocation7 + $0x5b4] ss:$24 sps:$4 sm:$0xff]  }
 0x321   : > { %5805 = vmatprep.subr.bf16.mxu0 %v11361_v2 }
 0x323   : > { %5779 = vmatpush2.bf16.msra.mxu1 %v11350_v1  ;;  %v5881_v1 = vshrl.u32 %v13570_v58, 16 }
 0x324   : > { %5780 = vmatprep.subr.bf16.mxu1 %v11358_v49  ;;  %5806 = vmatpush1.bf16.msra.mxu0 %v11359_v54  ;;  %v11421_v49 = vld [vmem:[#allocation7 + $0xd24] ss:$24 sps:$4 sm:$0xff]   ;;  %v11416_v54 = vld [vmem:[#allocation7 + $0x5b0] ss:$24 sps:$4 sm:$0xff]  }
 0x325   : > { %5807 = vmatprep.subr.bf16.mxu0 %v11364_v4  ;;  %v11419_v4 = vld [vmem:[#allocation7 + $0xd20] ss:$24 sps:$4 sm:$0xff]  }
 0x327   : > { %5781 = vmatpush2.bf16.msra.mxu1 %v11356_v3  ;;  %v13621_v3 = vor.u32 %v5885_v47, %v5881_v1  ;;  %v11464_v47 = vld [vmem:[#allocation7 + $0xea0] ss:$24 sps:$4 sm:$0xff]   ;;  %v11472_v1 = vld [vmem:[#allocation7 + $0xe74] ss:$24 sps:$4 sm:$0xff]  }
 0x328   : > { %5832 = vmatprep.subr.bf16.mxu1 %v11367_v0  ;;  %5808 = vmatpush2.bf16.msra.mxu0 %v11362_v51  ;;  %v11424_v51 = vld [vmem:[#allocation7 + $0x584] ss:$24 sps:$4 sm:$0xff]  }
 0x329   : > { %5809 = vmatprep.subr.bf16.mxu0 %v11370_v14  ;;  %v11422_v14 = vld [vmem:[#allocation7 + $0x580] ss:$24 sps:$4 sm:$0xff]  }
 0x32a   : > { %v4578_v48 = vpop.f32.mrf.mxu1  ;;  %5783 = vmatmul.mubr.bf16.vlgmr.msra.gmra.mxu1 %v13592_v9 }
 0x32b   : > { %v13610_v5 = vadd.f32 %v4578_v48, %v13602_v52  ;;  %5833 = vmatpush1.bf16.msra.mxu1 %v11365_v45  ;;  %5864 = vmatprep.mubr.bf16.mxu1 %v13576_v61  ;;  %v11380_v52 = vld [vmem:[#allocation7 + $0x250] ss:$24 sps:$4 sm:$0xff]   ;;  %v11427_v45 = vld [vmem:[#allocation7 + $0xcf4] ss:$24 sps:$4 sm:$0xff]  }
 0x32c   : > { %v4580_v7 = vpop.f32.mrf.mxu1  ;;  %5834 = vmatprep.subr.bf16.mxu1 %v11373_v30  ;;  %5810 = vmatpush2.bf16.msra.mxu0 %v11368_v26  ;;  %v11425_v30 = vld [vmem:[#allocation7 + $0xcf0] ss:$24 sps:$4 sm:$0xff]   ;;  %v11430_v26 = vld [vmem:[#allocation7 + $0x554] ss:$24 sps:$4 sm:$0xff]  }
 0x32d   : > { %v13614_v55 = vadd.f32 %v4580_v7, %v13606_v11  ;;  %5811 = vmatprep.subr.bf16.mxu0 %v11376_v10  ;;  %v11391_v11 = vld [vmem:[#allocation7 + $0x3a4] ss:$24 sps:$4 sm:$0xff]   ;;  %v11428_v7 = vld [vmem:[#allocation7 + $0x550] ss:$24 sps:$4 sm:$0xff]   ;;  %v11431_v10 = vld [vmem:[#allocation7 + $0xcc0] ss:$24 sps:$4 sm:$0xff]  }
 0x32e   : > { %v4582_v24 = vpop.f32.mrf.mxu1 }
 0x32f   : > { %5835 = vmatpush1.bf16.msra.mxu1 %v11371_v34  ;;  %v11433_v34 = vld [vmem:[#allocation7 + $0xcc4] ss:$24 sps:$4 sm:$0xff]   ;;  %v11439_v24 = vld [vmem:[#allocation7 + $0xc94] ss:$24 sps:$4 sm:$0xff]  }
 0x330   : > { %v4583_v33 = vpop.f32.mrf.mxu1  ;;  %5836 = vmatprep.subr.bf16.mxu1 %v11379_v12  ;;  %5812 = vmatpush2.bf16.msra.mxu0 %v11374_v50  ;;  %v11436_v12 = vld [vmem:[#allocation7 + $0x524] ss:$24 sps:$4 sm:$0xff]   ;;  %v11434_v50 = vld [vmem:[#allocation7 + $0x520] ss:$24 sps:$4 sm:$0xff]  }
 0x331   : > { %5813 = vmatprep.subr.bf16.mxu0 %v11382_v35  ;;  %v11442_v33 = vld [vmem:[#allocation7 + $0x4f4] ss:$24 sps:$4 sm:$0xff]   ;;  %v11445_v35 = vld [vmem:[#allocation7 + $0xc64] ss:$24 sps:$4 sm:$0xff]  }
 0x333   : > { %5837 = vmatpush1.bf16.msra.mxu1 %v11377_v23  ;;  %v11437_v23 = vld [vmem:[#allocation7 + $0xc90] ss:$24 sps:$4 sm:$0xff]  }
 0x334   : > { %5838 = vmatprep.subr.bf16.mxu1 %v11385_v36  ;;  %5814 = vmatpush2.bf16.msra.mxu0 %v11380_v52  ;;  %v11440_v36 = vld [vmem:[#allocation7 + $0x4f0] ss:$24 sps:$4 sm:$0xff]   ;;  %v11443_v52 = vld [vmem:[#allocation7 + $0xc60] ss:$24 sps:$4 sm:$0xff]  }
 0x335   : > { %5815 = vmatprep.subr.bf16.mxu0 %v11388_v8  ;;  %v11451_v8 = vld [vmem:[#allocation7 + $0xc34] ss:$24 sps:$4 sm:$0xff]  }
 0x337   : > { %5839 = vmatpush1.bf16.msra.mxu1 %v11383_v56  ;;  %v11448_v56 = vld [vmem:[#allocation7 + $0x4c4] ss:$24 sps:$4 sm:$0xff]  }
 0x338   : > { %5840 = vmatprep.subr.bf16.mxu1 %v11391_v11  ;;  %5816 = vmatpush2.bf16.msra.mxu0 %v11386_v29  ;;  %v11446_v11 = vld [vmem:[#allocation7 + $0x4c0] ss:$24 sps:$4 sm:$0xff]   ;;  %v11449_v29 = vld [vmem:[#allocation7 + $0xc30] ss:$24 sps:$4 sm:$0xff]  }
 0x339   : > { %5817 = vmatprep.subr.bf16.mxu0 %v11394_v22  ;;  %v11457_v22 = vld [vmem:[#allocation7 + $0xc04] ss:$24 sps:$4 sm:$0xff]  }
 0x33b   : > { %5841 = vmatpush1.bf16.msra.mxu1 %v11389_v20  ;;  %v11454_v20 = vld [vmem:[#allocation7 + $0x494] ss:$24 sps:$4 sm:$0xff]  }
 0x33c   : > { %5842 = vmatprep.subr.bf16.mxu1 %v11397_v53  ;;  %5818 = vmatpush2.bf16.msra.mxu0 %v11392_v57  ;;  %v5897_v53 = vshll.u32 %v13576_v61, 16  ;;  %v11452_v57 = vld [vmem:[#allocation7 + $0x490] ss:$24 sps:$4 sm:$0xff]  }
 0x33d   : > { %5819 = vmatprep.subr.bf16.mxu0 %v11400_v13  ;;  %v11460_v13 = vld [vmem:[#allocation7 + $0xed4] ss:$24 sps:$4 sm:$0xff]  }
 0x33f   : > { %5843 = vmatpush1.bf16.msra.mxu1 %v11395_v28  ;;  %v11455_v28 = vld [vmem:[#allocation7 + $0xc00] ss:$24 sps:$4 sm:$0xff]  }
 0x340   : > { %5844 = vmatprep.subr.bf16.mxu1 %v11403_v60  ;;  %5820 = vmatpush2.bf16.msra.mxu0 %v11398_v46  ;;  %v11463_v60 = vld [vmem:[#allocation7 + $0x1054] ss:$24 sps:$4 sm:$0xff]   ;;  %v5899_v46 = vrot.slane %v5897_v53, 1  ;;  %v11506_v53 = vld [vmem:[#allocation7 + $0x11d0] ss:$24 sps:$4 sm:$0xff]  }
 0x341   : > { %5821 = vmatprep.subr.bf16.mxu0 %v11406_v62  ;;  %v11461_v62 = vld [vmem:[#allocation7 + $0x1050] ss:$24 sps:$4 sm:$0xff]  }
 0x343   : > { %5845 = vmatpush1.bf16.msra.mxu1 %v11401_v6  ;;  %v11458_v6 = vld [vmem:[#allocation7 + $0xed0] ss:$24 sps:$4 sm:$0xff]  }
 0x344   : > { %5846 = vmatprep.subr.bf16.mxu1 %v11409_v16  ;;  %5822 = vmatpush2.bf16.msra.mxu0 %v11404_v21  ;;  %v5895_v16 = vshrl.u32 %v13576_v61, 16  ;;  %v11469_v21 = vld [vmem:[#allocation7 + $0x1024] ss:$24 sps:$4 sm:$0xff]   ;;  %v11475_v61 = vld [vmem:[#allocation7 + $0xff4] ss:$24 sps:$4 sm:$0xff]  }
 0x345   : > { %6865 = vmatprep.subr.bf16.mxu0 %v11415_v41 }
 0x347   : > { %5847 = vmatpush1.bf16.msra.mxu1 %v11407_v38  ;;  %v13618_v2 = vpop.f32.mrf.mxu0  ;;  %5824 = vmatmul.mubr.bf16.vlgmr.msra.gmra.mxu0 %v13582_v43 }
 0x348   : > { %5848 = vmatprep.subr.bf16.mxu1 %v11412_v39  ;;  %6866 = vmatpush1.bf16.msra.mxu0 %v11413_v44  ;;  %v13629_v39 = vor.u32 %v5899_v46, %v5895_v16 }
 0x349   : > { %6897 = vmatprep.mubr.bf16.mxu0 %v13621_v3  ;;  %v13624_v0 = vpop.f32.mrf.mxu0  ;;  %6867 = vmatprep.subr.bf16.mxu0 %v11421_v49 }
 0x34b   : > { %5849 = vmatpush2.bf16.msra.mxu1 %v11410_v59  ;;  %v4623_v58 = vpop.f32.mrf.mxu0  ;;  %v11467_v59 = vld [vmem:[#allocation7 + $0x1020] ss:$24 sps:$4 sm:$0xff]  }
 0x34c   : > { %5850 = vmatprep.subr.bf16.mxu1 %v11418_v31  ;;  %6868 = vmatpush1.bf16.msra.mxu0 %v11419_v4  ;;  %v11476_v58 = vld [vmem:[#allocation7 + $0xe40] ss:$24 sps:$4 sm:$0xff]  }
 0x34d   : > { %v4624_v48 = vpop.f32.mrf.mxu0  ;;  %6869 = vmatprep.subr.bf16.mxu0 %v11427_v45  ;;  %v11481_v45 = vld [vmem:[#allocation7 + $0xfc4] ss:$24 sps:$4 sm:$0xff]  }
 0x34e   : > { %v11482_v48 = vld [vmem:[#allocation7 + $0xe10] ss:$24 sps:$4 sm:$0xff]  }
 0x34f   : > { %5851 = vmatpush2.bf16.msra.mxu1 %v11416_v54  ;;  %v11470_v54 = vld [vmem:[#allocation7 + $0xe70] ss:$24 sps:$4 sm:$0xff]  }
 0x350   : > { %5852 = vmatprep.subr.bf16.mxu1 %v11424_v51  ;;  %6870 = vmatpush1.bf16.msra.mxu0 %v11425_v30  ;;  %v11478_v51 = vld [vmem:[#allocation7 + $0xe44] ss:$24 sps:$4 sm:$0xff]   ;;  %v11484_v30 = vld [vmem:[#allocation7 + $0xe14] ss:$24 sps:$4 sm:$0xff]  }
 0x351   : > { %6871 = vmatprep.subr.bf16.mxu0 %v11433_v34  ;;  %v11490_v34 = vld [vmem:[#allocation7 + $0xde4] ss:$24 sps:$4 sm:$0xff]  }
 0x353   : > { %5853 = vmatpush2.bf16.msra.mxu1 %v11422_v14  ;;  %v11479_v14 = vld [vmem:[#allocation7 + $0xfc0] ss:$24 sps:$4 sm:$0xff]  }
 0x354   : > { %5854 = vmatprep.subr.bf16.mxu1 %v11430_v26  ;;  %6872 = vmatpush1.bf16.msra.mxu0 %v11431_v10  ;;  %v11485_v26 = vld [vmem:[#allocation7 + $0xf90] ss:$24 sps:$4 sm:$0xff]   ;;  %v11488_v10 = vld [vmem:[#allocation7 + $0xde0] ss:$24 sps:$4 sm:$0xff]  }
 0x355   : > { %6873 = vmatprep.subr.bf16.mxu0 %v11439_v24  ;;  %v11496_v24 = vld [vmem:[#allocation7 + $0xdb4] ss:$24 sps:$4 sm:$0xff]  }
 0x357   : > { %5855 = vmatpush2.bf16.msra.mxu1 %v11428_v7  ;;  %v11493_v7 = vld [vmem:[#allocation7 + $0xf64] ss:$24 sps:$4 sm:$0xff]  }
 0x358   : > { %5856 = vmatprep.subr.bf16.mxu1 %v11436_v12  ;;  %6874 = vmatpush1.bf16.msra.mxu0 %v11437_v23  ;;  %v11491_v12 = vld [vmem:[#allocation7 + $0xf60] ss:$24 sps:$4 sm:$0xff]   ;;  %v11494_v23 = vld [vmem:[#allocation7 + $0xdb0] ss:$24 sps:$4 sm:$0xff]  }
 0x359   : > { %6875 = vmatprep.subr.bf16.mxu0 %v11445_v35  ;;  %v11502_v35 = vld [vmem:[#allocation7 + $0xd84] ss:$24 sps:$4 sm:$0xff]  }
 0x35b   : > { %5857 = vmatpush2.bf16.msra.mxu1 %v11434_v50  ;;  %v11499_v50 = vld [vmem:[#allocation7 + $0xf34] ss:$24 sps:$4 sm:$0xff]  }
 0x35c   : > { %5858 = vmatprep.subr.bf16.mxu1 %v11442_v33  ;;  %6876 = vmatpush1.bf16.msra.mxu0 %v11443_v52  ;;  %v11497_v33 = vld [vmem:[#allocation7 + $0xf30] ss:$24 sps:$4 sm:$0xff]   ;;  %v5876_v52 = vshll.u32 %v13582_v43, 16 }
 0x35d   : > { %6877 = vmatprep.subr.bf16.mxu0 %v11451_v8  ;;  %v11503_v8 = vld [vmem:[#allocation7 + $0xf00] ss:$24 sps:$4 sm:$0xff]  }
 0x35f   : > { %5859 = vmatpush2.bf16.msra.mxu1 %v11440_v36  ;;  %v11505_v36 = vld [vmem:[#allocation7 + $0xf04] ss:$24 sps:$4 sm:$0xff]  }
 0x360   : > { %5860 = vmatprep.subr.bf16.mxu1 %v11448_v56  ;;  %6878 = vmatpush1.bf16.msra.mxu0 %v11449_v29  ;;  %v11500_v56 = vld [vmem:[#allocation7 + $0xd80] ss:$24 sps:$4 sm:$0xff]   ;;  %v11508_v29 = vld [vmem:[#allocation7 + $0x11d4] ss:$24 sps:$4 sm:$0xff]  }
 0x361   : > { %6879 = vmatprep.subr.bf16.mxu0 %v11457_v22  ;;  %v5874_v22 = vshrl.u32 %v13582_v43, 16  ;;  %v11515_v43 = vld [vmem:[#allocation7 + $0xd28] ss:$24 sps:$4 sm:$0xff]  }
 0x363   : > { %5861 = vmatpush2.bf16.msra.mxu1 %v11446_v11  ;;  %v5878_v11 = vrot.slane %v5876_v52, 1  ;;  %v11554_v52 = vld [vmem:[#allocation7 + $0xed8] ss:$24 sps:$4 sm:$0xff]  }
 0x364   : > { %5862 = vmatprep.subr.bf16.mxu1 %v11454_v20  ;;  %6880 = vmatpush1.bf16.msra.mxu0 %v11455_v28  ;;  %v11511_v20 = vld [vmem:[#allocation7 + $0xd5c] ss:$24 sps:$4 sm:$0xff]  }
 0x365   : > { %6881 = vmatprep.subr.bf16.mxu0 %v11460_v13  ;;  %v13640_v28 = vor.u32 %v5878_v11, %v5874_v22  ;;  %v11514_v13 = vld [vmem:[#allocation7 + $0x11a4] ss:$24 sps:$4 sm:$0xff]  }
 0x366   : > { %v11562_v11 = vld [vmem:[#allocation7 + $0xeac] ss:$24 sps:$4 sm:$0xff]  }
 0x367   : > { %5863 = vmatpush2.bf16.msra.mxu1 %v11452_v57  ;;  %v11509_v57 = vld [vmem:[#allocation7 + $0xd58] ss:$24 sps:$4 sm:$0xff]  }
 0x368   : > { %6906 = vmatprep.subr.bf16.mxu1 %v11463_v60  ;;  %6882 = vmatpush2.bf16.msra.mxu0 %v11458_v6  ;;  %v11517_v60 = vld [vmem:[#allocation7 + $0xd2c] ss:$24 sps:$4 sm:$0xff]  }
 0x369   : > { %6883 = vmatprep.subr.bf16.mxu0 %v11466_v63  ;;  %v11520_v63 = vld [vmem:[#allocation7 + $0x1174] ss:$24 sps:$4 sm:$0xff]  }
 0x36a   : > { %v4660_v38 = vpop.f32.mrf.mxu1  ;;  %5865 = vmatmul.mubr.bf16.vlgmr.msra.gmra.mxu1 %v13592_v9 }
 0x36b   : > { %v13632_v41 = vadd.f32 %v4660_v38, %v13618_v2  ;;  %6907 = vmatpush1.bf16.msra.mxu1 %v11461_v62  ;;  %6938 = vmatprep.mubr.bf16.mxu1 %v13629_v39  ;;  %v11473_v2 = vld [vmem:[#allocation7 + $0xff0] ss:$24 sps:$4 sm:$0xff]   ;;  %v11512_v62 = vld [vmem:[#allocation7 + $0x11a0] ss:$24 sps:$4 sm:$0xff]  }
 0x36c   : > { %v4662_v44 = vpop.f32.mrf.mxu1  ;;  %6908 = vmatprep.subr.bf16.mxu1 %v11469_v21  ;;  %6884 = vmatpush2.bf16.msra.mxu0 %v11464_v47  ;;  %v11523_v21 = vld [vmem:[#allocation7 + $0xcfc] ss:$24 sps:$4 sm:$0xff]  }
 0x36d   : > { %v13636_v31 = vadd.f32 %v4662_v44, %v13624_v0  ;;  %6885 = vmatprep.subr.bf16.mxu0 %v11472_v1  ;;  %v11487_v0 = vld [vmem:[#allocation7 + $0xf94] ss:$24 sps:$4 sm:$0xff]   ;;  %v11526_v1 = vld [vmem:[#allocation7 + $0x1144] ss:$24 sps:$4 sm:$0xff]  }
 0x36e   : > { %v4664_v49 = vpop.f32.mrf.mxu1 }
 0x36f   : > { %6909 = vmatpush1.bf16.msra.mxu1 %v11467_v59  ;;  %v11518_v59 = vld [vmem:[#allocation7 + $0x1170] ss:$24 sps:$4 sm:$0xff]   ;;  %v11524_v49 = vld [vmem:[#allocation7 + $0x1140] ss:$24 sps:$4 sm:$0xff]  }
 0x370   : > { %v4665_v4 = vpop.f32.mrf.mxu1  ;;  %6910 = vmatprep.subr.bf16.mxu1 %v11475_v61  ;;  %6886 = vmatpush2.bf16.msra.mxu0 %v11470_v54  ;;  %v11529_v61 = vld [vmem:[#allocation7 + $0xccc] ss:$24 sps:$4 sm:$0xff]   ;;  %v11527_v54 = vld [vmem:[#allocation7 + $0xcc8] ss:$24 sps:$4 sm:$0xff]  }
 0x371   : > { %6887 = vmatprep.subr.bf16.mxu0 %v11478_v51  ;;  %v11530_v4 = vld [vmem:[#allocation7 + $0x1110] ss:$24 sps:$4 sm:$0xff]  }
 0x372   : > { %v11533_v51 = vld [vmem:[#allocation7 + $0xc98] ss:$24 sps:$4 sm:$0xff]  }
 0x373   : > { %6911 = vmatpush1.bf16.msra.mxu1 %v11473_v2  ;;  %v11532_v2 = vld [vmem:[#allocation7 + $0x1114] ss:$24 sps:$4 sm:$0xff]  }
 0x374   : > { %6912 = vmatprep.subr.bf16.mxu1 %v11481_v45  ;;  %6888 = vmatpush2.bf16.msra.mxu0 %v11476_v58  ;;  %v11538_v45 = vld [vmem:[#allocation7 + $0x10e4] ss:$24 sps:$4 sm:$0xff]  }
 0x375   : > { %6889 = vmatprep.subr.bf16.mxu0 %v11484_v30  ;;  %v11541_v58 = vld [vmem:[#allocation7 + $0xc6c] ss:$24 sps:$4 sm:$0xff]   ;;  %v11539_v30 = vld [vmem:[#allocation7 + $0xc68] ss:$24 sps:$4 sm:$0xff]  }
 0x377   : > { %6913 = vmatpush1.bf16.msra.mxu1 %v11479_v14  ;;  %v11536_v14 = vld [vmem:[#allocation7 + $0x10e0] ss:$24 sps:$4 sm:$0xff]  }
 0x378   : > { %6914 = vmatprep.subr.bf16.mxu1 %v11487_v0  ;;  %6890 = vmatpush2.bf16.msra.mxu0 %v11482_v48  ;;  %v11544_v0 = vld [vmem:[#allocation7 + $0x10b4] ss:$24 sps:$4 sm:$0xff]  }
 0x379   : > { %6891 = vmatprep.subr.bf16.mxu0 %v11490_v34  ;;  %v11547_v48 = vld [vmem:[#allocation7 + $0xc3c] ss:$24 sps:$4 sm:$0xff]   ;;  %v11545_v34 = vld [vmem:[#allocation7 + $0xc38] ss:$24 sps:$4 sm:$0xff]  }
 0x37b   : > { %6915 = vmatpush1.bf16.msra.mxu1 %v11485_v26  ;;  %v11542_v26 = vld [vmem:[#allocation7 + $0x10b0] ss:$24 sps:$4 sm:$0xff]  }
 0x37c   : > { %6916 = vmatprep.subr.bf16.mxu1 %v11493_v7  ;;  %6892 = vmatpush2.bf16.msra.mxu0 %v11488_v10  ;;  %v11550_v7 = vld [vmem:[#allocation7 + $0x1084] ss:$24 sps:$4 sm:$0xff]  }
 0x37d   : > { %6893 = vmatprep.subr.bf16.mxu0 %v11496_v24  ;;  %v11553_v10 = vld [vmem:[#allocation7 + $0xc0c] ss:$24 sps:$4 sm:$0xff]   ;;  %v11548_v24 = vld [vmem:[#allocation7 + $0x1080] ss:$24 sps:$4 sm:$0xff]  }
 0x37f   : > { %6917 = vmatpush1.bf16.msra.mxu1 %v11491_v12  ;;  %v5890_v12 = vshll.u32 %v13592_v9, 16 }
 0x380   : > { %6918 = vmatprep.subr.bf16.mxu1 %v11499_v50  ;;  %6894 = vmatpush2.bf16.msra.mxu0 %v11494_v23  ;;  %v11551_v50 = vld [vmem:[#allocation7 + $0xc08] ss:$24 sps:$4 sm:$0xff]  }
 0x381   : > { %6895 = vmatprep.subr.bf16.mxu0 %v11502_v35  ;;  %v5892_v23 = vrot.slane %v5890_v12, 1  ;;  %v11559_v35 = vld [vmem:[#allocation7 + $0x105c] ss:$24 sps:$4 sm:$0xff]  }
 0x382   : > { %v11613_v12 = vld [vmem:[#allocation7 + $0xd34] ss:$24 sps:$4 sm:$0xff]  }
 0x383   : > { %6919 = vmatpush1.bf16.msra.mxu1 %v11497_v33  ;;  %v11556_v33 = vld [vmem:[#allocation7 + $0xedc] ss:$24 sps:$4 sm:$0xff]  }
 0x384   : > { %6920 = vmatprep.subr.bf16.mxu1 %v11505_v36  ;;  %6896 = vmatpush2.bf16.msra.mxu0 %v11500_v56  ;;  %v5888_v36 = vshrl.u32 %v13592_v9, 16  ;;  %v11557_v56 = vld [vmem:[#allocation7 + $0x1058] ss:$24 sps:$4 sm:$0xff]   ;;  %v11563_v9 = vld [vmem:[#allocation7 + $0x1028] ss:$24 sps:$4 sm:$0xff]  }
 0x385   : > { %6947 = vmatprep.subr.bf16.mxu0 %v11511_v20 }
 0x387   : > { %6921 = vmatpush1.bf16.msra.mxu1 %v11503_v8  ;;  %v5661_v46 = vpop.f32.mrf.mxu0  ;;  %6898 = vmatmul.mubr.bf16.vlgmr.msra.gmra.mxu0 %v13640_v28  ;;  %v13652_v8 = vor.u32 %v5892_v23, %v5888_v36  ;;  %v11608_v23 = vld [vmem:[#allocation7 + $0x11a8] ss:$24 sps:$4 sm:$0xff]   ;;  %v11616_v36 = vld [vmem:[#allocation7 + $0x117c] ss:$24 sps:$4 sm:$0xff]  }
 0x388   : > { %6922 = vmatprep.subr.bf16.mxu1 %v11508_v29  ;;  %v13644_v6 = vadd.f32 %v5661_v46, %v13596_v15  ;;  %6948 = vmatpush1.bf16.msra.mxu0 %v11509_v57  ;;  %v11521_v15 = vld [vmem:[#allocation7 + $0xcf8] ss:$24 sps:$4 sm:$0xff]   ;;  %v11565_v29 = vld [vmem:[#allocation7 + $0x102c] ss:$24 sps:$4 sm:$0xff]  }
 0x389   : > { %6979 = vmatprep.mubr.bf16.mxu0 %v13621_v3  ;;  %v5663_v16 = vpop.f32.mrf.mxu0  ;;  %6949 = vmatprep.subr.bf16.mxu0 %v11517_v60  ;;  %v11571_v60 = vld [vmem:[#allocation7 + $0xffc] ss:$24 sps:$4 sm:$0xff]  }
 0x38a   : > { %v13648_v38 = vadd.f32 %v5663_v16, %v13600_v40  ;;  %v11535_v40 = vld [vmem:[#allocation7 + $0xc9c] ss:$24 sps:$4 sm:$0xff]  }
 0x38b   : > { %6923 = vmatpush2.bf16.msra.mxu1 %v11506_v53  ;;  %v5665_v47 = vpop.f32.mrf.mxu0  ;;  %v11560_v53 = vld [vmem:[#allocation7 + $0xea8] ss:$24 sps:$4 sm:$0xff]  }
 0x38c   : > { %6924 = vmatprep.subr.bf16.mxu1 %v11514_v13  ;;  %6950 = vmatpush1.bf16.msra.mxu0 %v11515_v43  ;;  %v11568_v13 = vld [vmem:[#allocation7 + $0xe7c] ss:$24 sps:$4 sm:$0xff]   ;;  %v11566_v43 = vld [vmem:[#allocation7 + $0xe78] ss:$24 sps:$4 sm:$0xff]   ;;  %v11572_v47 = vld [vmem:[#allocation7 + $0xe48] ss:$24 sps:$4 sm:$0xff]  }
 0x38d   : > { %v5666_v44 = vpop.f32.mrf.mxu0  ;;  %6951 = vmatprep.subr.bf16.mxu0 %v11523_v21  ;;  %v11577_v21 = vld [vmem:[#allocation7 + $0xfcc] ss:$24 sps:$4 sm:$0xff]  }
 0x38e   : > { %v11578_v44 = vld [vmem:[#allocation7 + $0xe18] ss:$24 sps:$4 sm:$0xff]  }
 0x38f   : > { %6925 = vmatpush2.bf16.msra.mxu1 %v11512_v62 }
 0x390   : > { %6926 = vmatprep.subr.bf16.mxu1 %v11520_v63  ;;  %6952 = vmatpush1.bf16.msra.mxu0 %v11521_v15  ;;  %v11574_v63 = vld [vmem:[#allocation7 + $0xe4c] ss:$24 sps:$4 sm:$0xff]   ;;  %v11580_v15 = vld [vmem:[#allocation7 + $0xe1c] ss:$24 sps:$4 sm:$0xff]  }
 0x391   : > { %6953 = vmatprep.subr.bf16.mxu0 %v11529_v61  ;;  %v11586_v61 = vld [vmem:[#allocation7 + $0xdec] ss:$24 sps:$4 sm:$0xff]  }
 0x393   : > { %6927 = vmatpush2.bf16.msra.mxu1 %v11518_v59  ;;  %v11575_v59 = vld [vmem:[#allocation7 + $0xfc8] ss:$24 sps:$4 sm:$0xff]  }
 0x394   : > { %6928 = vmatprep.subr.bf16.mxu1 %v11526_v1  ;;  %6954 = vmatpush1.bf16.msra.mxu0 %v11527_v54  ;;  %v11581_v1 = vld [vmem:[#allocation7 + $0xf98] ss:$24 sps:$4 sm:$0xff]   ;;  %v11584_v54 = vld [vmem:[#allocation7 + $0xde8] ss:$24 sps:$4 sm:$0xff]  }
 0x395   : > { %6955 = vmatprep.subr.bf16.mxu0 %v11535_v40  ;;  %v11592_v40 = vld [vmem:[#allocation7 + $0xdbc] ss:$24 sps:$4 sm:$0xff]  }
 0x397   : > { %6929 = vmatpush2.bf16.msra.mxu1 %v11524_v49  ;;  %v11589_v49 = vld [vmem:[#allocation7 + $0xf6c] ss:$24 sps:$4 sm:$0xff]  }
 0x398   : > { %6930 = vmatprep.subr.bf16.mxu1 %v11532_v2  ;;  %6956 = vmatpush1.bf16.msra.mxu0 %v11533_v51  ;;  %v11587_v2 = vld [vmem:[#allocation7 + $0xf68] ss:$24 sps:$4 sm:$0xff]   ;;  %v11590_v51 = vld [vmem:[#allocation7 + $0xdb8] ss:$24 sps:$4 sm:$0xff]  }
 0x399   : > { %6957 = vmatprep.subr.bf16.mxu0 %v11541_v58  ;;  %v11598_v58 = vld [vmem:[#allocation7 + $0xd8c] ss:$24 sps:$4 sm:$0xff]  }
 0x39b   : > { %6931 = vmatpush2.bf16.msra.mxu1 %v11530_v4  ;;  %v11595_v4 = vld [vmem:[#allocation7 + $0xf3c] ss:$24 sps:$4 sm:$0xff]  }
 0x39c   : > { %6932 = vmatprep.subr.bf16.mxu1 %v11538_v45  ;;  %6958 = vmatpush1.bf16.msra.mxu0 %v11539_v30  ;;  %v11593_v45 = vld [vmem:[#allocation7 + $0xf38] ss:$24 sps:$4 sm:$0xff]   ;;  %v11596_v30 = vld [vmem:[#allocation7 + $0xd88] ss:$24 sps:$4 sm:$0xff]  }
 0x39d   : > { %6959 = vmatprep.subr.bf16.mxu0 %v11547_v48  ;;  %v11604_v48 = vld [vmem:[#allocation7 + $0x11dc] ss:$24 sps:$4 sm:$0xff]  }
 0x39f   : > { %6933 = vmatpush2.bf16.msra.mxu1 %v11536_v14  ;;  %v11601_v14 = vld [vmem:[#allocation7 + $0xf0c] ss:$24 sps:$4 sm:$0xff]  }
 0x3a0   : > { %6934 = vmatprep.subr.bf16.mxu1 %v11544_v0  ;;  %6960 = vmatpush1.bf16.msra.mxu0 %v11545_v34  ;;  %v11599_v0 = vld [vmem:[#allocation7 + $0xf08] ss:$24 sps:$4 sm:$0xff]   ;;  %v11602_v34 = vld [vmem:[#allocation7 + $0x11d8] ss:$24 sps:$4 sm:$0xff]  }
 0x3a1   : > { %6961 = vmatprep.subr.bf16.mxu0 %v11553_v10  ;;  %v11610_v10 = vld [vmem:[#allocation7 + $0x11ac] ss:$24 sps:$4 sm:$0xff]  }
 0x3a3   : > { %6935 = vmatpush2.bf16.msra.mxu1 %v11542_v26  ;;  %v11607_v26 = vld [vmem:[#allocation7 + $0xd64] ss:$24 sps:$4 sm:$0xff]  }
 0x3a4   : > { %6936 = vmatprep.subr.bf16.mxu1 %v11550_v7  ;;  %6962 = vmatpush1.bf16.msra.mxu0 %v11551_v50  ;;  %v11605_v7 = vld [vmem:[#allocation7 + $0xd60] ss:$24 sps:$4 sm:$0xff]  }
 0x3a5   : > { %6963 = vmatprep.subr.bf16.mxu0 %v11556_v33  ;;  %v11611_v33 = vld [vmem:[#allocation7 + $0xd30] ss:$24 sps:$4 sm:$0xff]  }
 0x3a7   : > { %6937 = vmatpush2.bf16.msra.mxu1 %v11548_v24 }
 0x3a8   : > { %6988 = vmatprep.subr.bf16.mxu1 %v11559_v35  ;;  %6964 = vmatpush2.bf16.msra.mxu0 %v11554_v52  ;;  %v11619_v52 = vld [vmem:[#allocation7 + $0xd04] ss:$24 sps:$4 sm:$0xff]  }
 0x3a9   : > { %6965 = vmatprep.subr.bf16.mxu0 %v11562_v11 }
 0x3aa   : > { %v5702_v20 = vpop.f32.mrf.mxu1  ;;  %6939 = vmatmul.mubr.bf16.vlgmr.msra.gmra.mxu1 %v13652_v8 }
 0x3ab   : > { %v13656_v22 = vadd.f32 %v5702_v20, %v13644_v6  ;;  %6989 = vmatpush1.bf16.msra.mxu1 %v11557_v56  ;;  %7020 = vmatprep.mubr.bf16.mxu1 %v13629_v39  ;;  %v11569_v6 = vld [vmem:[#allocation7 + $0xff8] ss:$24 sps:$4 sm:$0xff]  }
 0x3ac   : > { %v5704_v57 = vpop.f32.mrf.mxu1  ;;  %6990 = vmatprep.subr.bf16.mxu1 %v11565_v29  ;;  %6966 = vmatpush2.bf16.msra.mxu0 %v11560_v53  ;;  %v11614_v29 = vld [vmem:[#allocation7 + $0x1178] ss:$24 sps:$4 sm:$0xff]   ;;  %v11622_v53 = vld [vmem:[#allocation7 + $0x114c] ss:$24 sps:$4 sm:$0xff]  }
 0x3ad   : > { %v13660_v46 = vadd.f32 %v5704_v57, %v13648_v38  ;;  %6967 = vmatprep.subr.bf16.mxu0 %v11568_v13  ;;  %v11583_v38 = vld [vmem:[#allocation7 + $0xf9c] ss:$24 sps:$4 sm:$0xff]   ;;  %v11620_v57 = vld [vmem:[#allocation7 + $0x1148] ss:$24 sps:$4 sm:$0xff]  }
 0x3ae   : > { %v5706_v62 = vpop.f32.mrf.mxu1  ;;  %v11623_v13 = vld [vmem:[#allocation7 + $0xcd0] ss:$24 sps:$4 sm:$0xff]  }
 0x3af   : > { %6991 = vmatpush1.bf16.msra.mxu1 %v11563_v9  ;;  %v11625_v9 = vld [vmem:[#allocation7 + $0xcd4] ss:$24 sps:$4 sm:$0xff]   ;;  %v11626_v62 = vld [vmem:[#allocation7 + $0x1118] ss:$24 sps:$4 sm:$0xff]  }
 0x3b0   : > { %v5707_v16 = vpop.f32.mrf.mxu1  ;;  %6992 = vmatprep.subr.bf16.mxu1 %v11571_v60  ;;  %6968 = vmatpush2.bf16.msra.mxu0 %v11566_v43  ;;  %v11628_v60 = vld [vmem:[#allocation7 + $0x111c] ss:$24 sps:$4 sm:$0xff]   ;;  %v11629_v43 = vld [vmem:[#allocation7 + $0xca0] ss:$24 sps:$4 sm:$0xff]  }
 0x3b1   : > { %6969 = vmatprep.subr.bf16.mxu0 %v11574_v63  ;;  %v11637_v16 = vld [vmem:[#allocation7 + $0xc74] ss:$24 sps:$4 sm:$0xff]   ;;  %v11632_v63 = vld [vmem:[#allocation7 + $0x10e8] ss:$24 sps:$4 sm:$0xff]  }
 0x3b3   : > { %6993 = vmatpush1.bf16.msra.mxu1 %v11569_v6  ;;  %v11634_v6 = vld [vmem:[#allocation7 + $0x10ec] ss:$24 sps:$4 sm:$0xff]  }
 0x3b4   : > { %6994 = vmatprep.subr.bf16.mxu1 %v11577_v21  ;;  %6970 = vmatpush2.bf16.msra.mxu0 %v11572_v47  ;;  %v11635_v21 = vld [vmem:[#allocation7 + $0xc70] ss:$24 sps:$4 sm:$0xff]   ;;  %v11640_v47 = vld [vmem:[#allocation7 + $0x10bc] ss:$24 sps:$4 sm:$0xff]  }
 0x3b5   : > { %6971 = vmatprep.subr.bf16.mxu0 %v11580_v15  ;;  %v11638_v15 = vld [vmem:[#allocation7 + $0x10b8] ss:$24 sps:$4 sm:$0xff]  }
 0x3b7   : > { %6995 = vmatpush1.bf16.msra.mxu1 %v11575_v59  ;;  %v11643_v59 = vld [vmem:[#allocation7 + $0xc44] ss:$24 sps:$4 sm:$0xff]  }
 0x3b8   : > { %6996 = vmatprep.subr.bf16.mxu1 %v11583_v38  ;;  %6972 = vmatpush2.bf16.msra.mxu0 %v11578_v44  ;;  %v11641_v38 = vld [vmem:[#allocation7 + $0xc40] ss:$24 sps:$4 sm:$0xff]   ;;  %v11646_v44 = vld [vmem:[#allocation7 + $0x108c] ss:$24 sps:$4 sm:$0xff]  }
 0x3b9   : > { %6973 = vmatprep.subr.bf16.mxu0 %v11586_v61  ;;  %v11644_v61 = vld [vmem:[#allocation7 + $0x1088] ss:$24 sps:$4 sm:$0xff]  }
 0x3bb   : > { %6997 = vmatpush1.bf16.msra.mxu1 %v11581_v1  ;;  %v11649_v1 = vld [vmem:[#allocation7 + $0xc14] ss:$24 sps:$4 sm:$0xff]  }
 0x3bc   : > { %6998 = vmatprep.subr.bf16.mxu1 %v11589_v49  ;;  %6974 = vmatpush2.bf16.msra.mxu0 %v11584_v54  ;;  %v11647_v49 = vld [vmem:[#allocation7 + $0xc10] ss:$24 sps:$4 sm:$0xff]   ;;  %v11652_v54 = vld [vmem:[#allocation7 + $0xee4] ss:$24 sps:$4 sm:$0xff]  }
 0x3bd   : > { %6975 = vmatprep.subr.bf16.mxu0 %v11592_v40  ;;  %v11650_v40 = vld [vmem:[#allocation7 + $0xee0] ss:$24 sps:$4 sm:$0xff]  }
 0x3bf   : > { %6999 = vmatpush1.bf16.msra.mxu1 %v11587_v2  ;;  %v11655_v2 = vld [vmem:[#allocation7 + $0x1064] ss:$24 sps:$4 sm:$0xff]  }
 0x3c0   : > { %7000 = vmatprep.subr.bf16.mxu1 %v11595_v4  ;;  %6976 = vmatpush2.bf16.msra.mxu0 %v11590_v51  ;;  %v11653_v4 = vld [vmem:[#allocation7 + $0x1060] ss:$24 sps:$4 sm:$0xff]   ;;  %v11658_v51 = vld [vmem:[#allocation7 + $0xeb4] ss:$24 sps:$4 sm:$0xff]  }
 0x3c1   : > { %6977 = vmatprep.subr.bf16.mxu0 %v11598_v58 }
 0x3c3   : > { %7001 = vmatpush1.bf16.msra.mxu1 %v11593_v45  ;;  %v11661_v45 = vld [vmem:[#allocation7 + $0x1034] ss:$24 sps:$4 sm:$0xff]  }
 0x3c4   : > { %7002 = vmatprep.subr.bf16.mxu1 %v11601_v14  ;;  %6978 = vmatpush2.bf16.msra.mxu0 %v11596_v30  ;;  %v11656_v30 = vld [vmem:[#allocation7 + $0xeb0] ss:$24 sps:$4 sm:$0xff]  }
 0x3c5   : > { %7029 = vmatprep.subr.bf16.mxu0 %v11607_v26  ;;  %v11664_v26 = vld [vmem:[#allocation7 + $0xe84] ss:$24 sps:$4 sm:$0xff]  }
 0x3c7   : > { %7003 = vmatpush1.bf16.msra.mxu1 %v11599_v0  ;;  %v5743_v24 = vpop.f32.mrf.mxu0  ;;  %6980 = vmatmul.mubr.bf16.vlgmr.msra.gmra.mxu0 %v13640_v28  ;;  %v11659_v0 = vld [vmem:[#allocation7 + $0x1030] ss:$24 sps:$4 sm:$0xff]  }
 0x3c8   : > { %7004 = vmatprep.subr.bf16.mxu1 %v11604_v48  ;;  %v13664_v50 = vadd.f32 %v5743_v24, %v13610_v5  ;;  %7030 = vmatpush1.bf16.msra.mxu0 %v11605_v7  ;;  %v11617_v5 = vld [vmem:[#allocation7 + $0xd00] ss:$24 sps:$4 sm:$0xff]  }
 0x3c9   : > { %7061 = vmatprep.mubr.bf16.mxu0 %v13621_v3  ;;  %v5745_v35 = vpop.f32.mrf.mxu0  ;;  %7031 = vmatprep.subr.bf16.mxu0 %v11613_v12  ;;  %v11662_v12 = vld [vmem:[#allocation7 + $0xe80] ss:$24 sps:$4 sm:$0xff]  }
 0x3ca   : > { %v13668_v56 = vadd.f32 %v5745_v35, %v13614_v55  ;;  %v11631_v55 = vld [vmem:[#allocation7 + $0xca4] ss:$24 sps:$4 sm:$0xff]   ;;  %v11665_v24 = vld [vmem:[#allocation7 + $0x1000] ss:$24 sps:$4 sm:$0xff]   ;;  %v11668_v35 = vld [vmem:[#allocation7 + $0xe50] ss:$24 sps:$4 sm:$0xff]  }
 0x3cb   : > { %7005 = vmatpush2.bf16.msra.mxu1 %v11602_v34  ;;  %v5747_v11 = vpop.f32.mrf.mxu0  ;;  %v11667_v34 = vld [vmem:[#allocation7 + $0x1004] ss:$24 sps:$4 sm:$0xff]  }
 0x3cc   : > { %7006 = vmatprep.subr.bf16.mxu1 %v11610_v10  ;;  %7032 = vmatpush1.bf16.msra.mxu0 %v11611_v33  ;;  %v11673_v33 = vld [vmem:[#allocation7 + $0xfd4] ss:$24 sps:$4 sm:$0xff]   ;;  %v11674_v11 = vld [vmem:[#allocation7 + $0xe20] ss:$24 sps:$4 sm:$0xff]  }
 0x3cd   : > { %v5748_v20 = vpop.f32.mrf.mxu0  ;;  %7033 = vmatprep.subr.bf16.mxu0 %v11619_v52  ;;  %v11676_v52 = vld [vmem:[#allocation7 + $0xe24] ss:$24 sps:$4 sm:$0xff]  }
 0x3ce   : > { %v11685_v20 = vld [vmem:[#allocation7 + $0xf74] ss:$24 sps:$4 sm:$0xff]  }
 0x3cf   : > { %7007 = vmatpush2.bf16.msra.mxu1 %v11608_v23  ;;  %v11670_v23 = vld [vmem:[#allocation7 + $0xe54] ss:$24 sps:$4 sm:$0xff]  }
 0x3d0   : > { %7008 = vmatprep.subr.bf16.mxu1 %v11616_v36  ;;  %7034 = vmatpush1.bf16.msra.mxu0 %v11617_v5  ;;  %v11671_v36 = vld [vmem:[#allocation7 + $0xfd0] ss:$24 sps:$4 sm:$0xff]   ;;  %v11682_v5 = vld [vmem:[#allocation7 + $0xdf4] ss:$24 sps:$4 sm:$0xff]  }
 0x3d1   : > { %7035 = vmatprep.subr.bf16.mxu0 %v11625_v9  ;;  %v11683_v9 = vld [vmem:[#allocation7 + $0xf70] ss:$24 sps:$4 sm:$0xff]  }
 0x3d3   : > { %7009 = vmatpush2.bf16.msra.mxu1 %v11614_v29  ;;  %v11677_v29 = vld [vmem:[#allocation7 + $0xfa0] ss:$24 sps:$4 sm:$0xff]  }
 0x3d4   : > { %7010 = vmatprep.subr.bf16.mxu1 %v11622_v53  ;;  %7036 = vmatpush1.bf16.msra.mxu0 %v11623_v13  ;;  %v11680_v53 = vld [vmem:[#allocation7 + $0xdf0] ss:$24 sps:$4 sm:$0xff]   ;;  %v11691_v13 = vld [vmem:[#allocation7 + $0xf44] ss:$24 sps:$4 sm:$0xff]  }
 0x3d5   : > { %7037 = vmatprep.subr.bf16.mxu0 %v11631_v55  ;;  %v11689_v55 = vld [vmem:[#allocation7 + $0xf40] ss:$24 sps:$4 sm:$0xff]  }
 0x3d7   : > { %7011 = vmatpush2.bf16.msra.mxu1 %v11620_v57  ;;  %v11688_v57 = vld [vmem:[#allocation7 + $0xdc4] ss:$24 sps:$4 sm:$0xff]  }
 0x3d8   : > { %7012 = vmatprep.subr.bf16.mxu1 %v11628_v60  ;;  %7038 = vmatpush1.bf16.msra.mxu0 %v11629_v43  ;;  %v11686_v60 = vld [vmem:[#allocation7 + $0xdc0] ss:$24 sps:$4 sm:$0xff]   ;;  %v11697_v43 = vld [vmem:[#allocation7 + $0xf14] ss:$24 sps:$4 sm:$0xff]  }
 0x3d9   : > { %7039 = vmatprep.subr.bf16.mxu0 %v11637_v16  ;;  %v11695_v16 = vld [vmem:[#allocation7 + $0xf10] ss:$24 sps:$4 sm:$0xff]  }
 0x3db   : > { %7013 = vmatpush2.bf16.msra.mxu1 %v11626_v62  ;;  %v11694_v62 = vld [vmem:[#allocation7 + $0xd94] ss:$24 sps:$4 sm:$0xff]  }
 0x3dc   : > { %7014 = vmatprep.subr.bf16.mxu1 %v11634_v6  ;;  %7040 = vmatpush1.bf16.msra.mxu0 %v11635_v21  ;;  %v11692_v6 = vld [vmem:[#allocation7 + $0xd90] ss:$24 sps:$4 sm:$0xff]   ;;  %v11698_v21 = vld [vmem:[#allocation7 + $0x11e0] ss:$24 sps:$4 sm:$0xff]  }
 0x3dd   : > { %7041 = vmatprep.subr.bf16.mxu0 %v11643_v59  ;;  %v11703_v59 = vld [vmem:[#allocation7 + $0x11b4] ss:$24 sps:$4 sm:$0xff]  }
 0x3df   : > { %7015 = vmatpush2.bf16.msra.mxu1 %v11632_v63  ;;  %v11700_v63 = vld [vmem:[#allocation7 + $0x11e4] ss:$24 sps:$4 sm:$0xff]  }
 0x3e0   : > { %7016 = vmatprep.subr.bf16.mxu1 %v11640_v47  ;;  %7042 = vmatpush1.bf16.msra.mxu0 %v11641_v38  ;;  %v11846_v47 = vld [vmem:[#allocation7 + $0x754] ss:$24 sps:$4 sm:$0xff]  }
 0x3e1   : > { %7043 = vmatprep.subr.bf16.mxu0 %v11649_v1  ;;  %v11701_v1 = vld [vmem:[#allocation7 + $0x11b0] ss:$24 sps:$4 sm:$0xff]  }
 0x3e3   : > { %7017 = vmatpush2.bf16.msra.mxu1 %v11638_v15 }
 0x3e4   : > { %7018 = vmatprep.subr.bf16.mxu1 %v11646_v44  ;;  %7044 = vmatpush1.bf16.msra.mxu0 %v11647_v49  ;;  %v11847_v44 = vld [vmem:[#allocation7 + $0x750] ss:$24 sps:$4 sm:$0xff]   ;;  %v11706_v49 = vld [vmem:[#allocation7 + $0x1184] ss:$24 sps:$4 sm:$0xff]  }
 0x3e5   : > { %7045 = vmatprep.subr.bf16.mxu0 %v11652_v54 }
 0x3e7   : > { %7019 = vmatpush2.bf16.msra.mxu1 %v11644_v61 }
 0x3e8   : > { %7070 = vmatprep.subr.bf16.mxu1 %v11655_v2  ;;  %7046 = vmatpush2.bf16.msra.mxu0 %v11650_v40  ;;  %v11848_v2 = vld [vmem:[#allocation7 + $0x724] ss:$24 sps:$4 sm:$0xff]  }
 0x3e9   : > { %7047 = vmatprep.subr.bf16.mxu0 %v11658_v51 }
 0x3ea   : > { %v5784_v58 = vpop.f32.mrf.mxu1  ;;  %7021 = vmatmul.mubr.bf16.vlgmr.msra.gmra.mxu1 %v13652_v8 }
 0x3eb   : > { %v13672_v14 = vadd.f32 %v5784_v58, %v13664_v50  ;;  %7071 = vmatpush1.bf16.msra.mxu1 %v11653_v4  ;;  %7102 = vmatprep.mubr.bf16.mxu1 %v13629_v39  ;;  %v11849_v4 = vld [vmem:[#allocation7 + $0x720] ss:$24 sps:$4 sm:$0xff]   ;;  %v11709_v58 = vld [vmem:[#allocation7 + $0x1154] ss:$24 sps:$4 sm:$0xff]  }
 0x3ec   : > { %v5786_v48 = vpop.f32.mrf.mxu1  ;;  %7072 = vmatprep.subr.bf16.mxu1 %v11661_v45  ;;  %7048 = vmatpush2.bf16.msra.mxu0 %v11656_v30  ;;  %v11850_v45 = vld [vmem:[#allocation7 + $0x6f4] ss:$24 sps:$4 sm:$0xff]   ;;  %v11851_v30 = vld [vmem:[#allocation7 + $0x6f0] ss:$24 sps:$4 sm:$0xff]  }
 0x3ed   : > { %v13676_v7 = vadd.f32 %v5786_v48, %v13668_v56  ;;  %7049 = vmatprep.subr.bf16.mxu0 %v11664_v26  ;;  %v11679_v56 = vld [vmem:[#allocation7 + $0xfa4] ss:$24 sps:$4 sm:$0xff]   ;;  %v11853_v26 = vld [vmem:[#allocation7 + $0x6c0] ss:$24 sps:$4 sm:$0xff]  }
 0x3ee   : > { %v5788_v10 = vpop.f32.mrf.mxu1  ;;  %v11852_v48 = vld [vmem:[#allocation7 + $0x6c4] ss:$24 sps:$4 sm:$0xff]  }
 0x3ef   : > { %7073 = vmatpush1.bf16.msra.mxu1 %v11659_v0  ;;  %v11707_v0 = vld [vmem:[#allocation7 + $0x1150] ss:$24 sps:$4 sm:$0xff]   ;;  %v11854_v10 = vld [vmem:[#allocation7 + $0x694] ss:$24 sps:$4 sm:$0xff]  }
 0x3f0   : > { %v5789_v50 = vpop.f32.mrf.mxu1  ;;  %7074 = vmatprep.subr.bf16.mxu1 %v11667_v34  ;;  %7050 = vmatpush2.bf16.msra.mxu0 %v11662_v12  ;;  %v11710_v34 = vld [vmem:[#allocation7 + $0x1120] ss:$24 sps:$4 sm:$0xff]   ;;  %v11715_v12 = vld [vmem:[#allocation7 + $0x10f4] ss:$24 sps:$4 sm:$0xff]  }
 0x3f1   : > { %7051 = vmatprep.subr.bf16.mxu0 %v11670_v23  ;;  %v11713_v50 = vld [vmem:[#allocation7 + $0x10f0] ss:$24 sps:$4 sm:$0xff]   ;;  %v11856_v23 = vld [vmem:[#allocation7 + $0x664] ss:$24 sps:$4 sm:$0xff]  }
 0x3f3   : > { %7075 = vmatpush1.bf16.msra.mxu1 %v11665_v24  ;;  %v11855_v24 = vld [vmem:[#allocation7 + $0x690] ss:$24 sps:$4 sm:$0xff]  }
 0x3f4   : > { %7076 = vmatprep.subr.bf16.mxu1 %v11673_v33  ;;  %7052 = vmatpush2.bf16.msra.mxu0 %v11668_v35  ;;  %v11718_v33 = vld [vmem:[#allocation7 + $0x10c4] ss:$24 sps:$4 sm:$0xff]   ;;  %v11857_v35 = vld [vmem:[#allocation7 + $0x660] ss:$24 sps:$4 sm:$0xff]  }
 0x3f5   : > { %7053 = vmatprep.subr.bf16.mxu0 %v11676_v52  ;;  %v11858_v52 = vld [vmem:[#allocation7 + $0x634] ss:$24 sps:$4 sm:$0xff]  }
 0x3f7   : > { %7077 = vmatpush1.bf16.msra.mxu1 %v11671_v36  ;;  %v11716_v36 = vld [vmem:[#allocation7 + $0x10c0] ss:$24 sps:$4 sm:$0xff]  }
 0x3f8   : > { %7078 = vmatprep.subr.bf16.mxu1 %v11679_v56  ;;  %7054 = vmatpush2.bf16.msra.mxu0 %v11674_v11  ;;  %v11721_v56 = vld [vmem:[#allocation7 + $0x1094] ss:$24 sps:$4 sm:$0xff]   ;;  %v11859_v11 = vld [vmem:[#allocation7 + $0x630] ss:$24 sps:$4 sm:$0xff]  }
 0x3f9   : > { %7055 = vmatprep.subr.bf16.mxu0 %v11682_v5  ;;  %v11860_v5 = vld [vmem:[#allocation7 + $0x604] ss:$24 sps:$4 sm:$0xff]  }
 0x3fb   : > { %7079 = vmatpush1.bf16.msra.mxu1 %v11677_v29  ;;  %v11719_v29 = vld [vmem:[#allocation7 + $0x1090] ss:$24 sps:$4 sm:$0xff]  }
 0x3fc   : > { %7080 = vmatprep.subr.bf16.mxu1 %v11685_v20  ;;  %7056 = vmatpush2.bf16.msra.mxu0 %v11680_v53  ;;  %v11861_v20 = vld [vmem:[#allocation7 + $0x600] ss:$24 sps:$4 sm:$0xff]   ;;  %v11862_v53 = vld [vmem:[#allocation7 + $0x8d4] ss:$24 sps:$4 sm:$0xff]  }
 0x3fd   : > { %7057 = vmatprep.subr.bf16.mxu0 %v11688_v57 }
 0x3ff   : > { %7081 = vmatpush1.bf16.msra.mxu1 %v11683_v9  ;;  %v11863_v9 = vld [vmem:[#allocation7 + $0xa54] ss:$24 sps:$4 sm:$0xff]  }
 0x400   : > { %7082 = vmatprep.subr.bf16.mxu1 %v11691_v13  ;;  %7058 = vmatpush2.bf16.msra.mxu0 %v11686_v60  ;;  %v11864_v60 = vld [vmem:[#allocation7 + $0x8d0] ss:$24 sps:$4 sm:$0xff]  }
 0x401   : > { %7059 = vmatprep.subr.bf16.mxu0 %v11694_v62 }
 0x403   : > { %7083 = vmatpush1.bf16.msra.mxu1 %v11689_v55  ;;  %v11865_v55 = vld [vmem:[#allocation7 + $0xa50] ss:$24 sps:$4 sm:$0xff]  }
 0x404   : > { %7084 = vmatprep.subr.bf16.mxu1 %v11697_v43  ;;  %7060 = vmatpush2.bf16.msra.mxu0 %v11692_v6  ;;  %v11866_v43 = vld [vmem:[#allocation7 + $0x8a4] ss:$24 sps:$4 sm:$0xff]  }
 0x405   : > { %7117 = vmatprep.subr.bf16.mxu0 %v11846_v47  ;;  %v11869_v47 = vld [vmem:[#allocation7 + $0xa20] ss:$24 sps:$4 sm:$0xff]  }
 0x407   : > { %7085 = vmatpush1.bf16.msra.mxu1 %v11695_v16  ;;  %v5825_v15 = vpop.f32.mrf.mxu0  ;;  %7062 = vmatmul.mubr.bf16.vlgmr.msra.gmra.mxu0 %v13640_v28  ;;  %v11867_v16 = vld [vmem:[#allocation7 + $0xa24] ss:$24 sps:$4 sm:$0xff]  }
 0x408   : > { %7086 = vmatprep.subr.bf16.mxu1 %v11700_v63  ;;  %v13680_v38 = vadd.f32 %v5825_v15, %v13632_v41  ;;  %7118 = vmatpush1.bf16.msra.mxu0 %v11847_v44  ;;  %v11704_v41 = vld [vmem:[#allocation7 + $0x1180] ss:$24 sps:$4 sm:$0xff]   ;;  %v11870_v15 = vld [vmem:[#allocation7 + $0x874] ss:$24 sps:$4 sm:$0xff]   ;;  %v11872_v44 = vld [vmem:[#allocation7 + $0x870] ss:$24 sps:$4 sm:$0xff]  }
 0x409   : > { %7149 = vmatprep.mubr.bf16.mxu0 %v13621_v3  ;;  %v5827_v61 = vpop.f32.mrf.mxu0  ;;  %7119 = vmatprep.subr.bf16.mxu0 %v11848_v2  ;;  %v11877_v2 = vld [vmem:[#allocation7 + $0x9c0] ss:$24 sps:$4 sm:$0xff]  }
 0x40a   : > { %v13684_v54 = vadd.f32 %v5827_v61, %v13636_v31  ;;  %v11712_v31 = vld [vmem:[#allocation7 + $0x1124] ss:$24 sps:$4 sm:$0xff]  }
 0x40b   : > { %7087 = vmatpush2.bf16.msra.mxu1 %v11698_v21  ;;  %v5829_v40 = vpop.f32.mrf.mxu0  ;;  %v11868_v21 = vld [vmem:[#allocation7 + $0x8a0] ss:$24 sps:$4 sm:$0xff]   ;;  %v11874_v61 = vld [vmem:[#allocation7 + $0x844] ss:$24 sps:$4 sm:$0xff]  }
 0x40c   : > { %7088 = vmatprep.subr.bf16.mxu1 %v11703_v59  ;;  %7120 = vmatpush1.bf16.msra.mxu0 %v11849_v4  ;;  %v11878_v40 = vld [vmem:[#allocation7 + $0x814] ss:$24 sps:$4 sm:$0xff]  }
 0x40d   : > { %v5830_v51 = vpop.f32.mrf.mxu0  ;;  %7121 = vmatprep.subr.bf16.mxu0 %v11850_v45  ;;  %v11879_v4 = vld [vmem:[#allocation7 + $0x994] ss:$24 sps:$4 sm:$0xff]   ;;  %v11882_v45 = vld [vmem:[#allocation7 + $0x7e4] ss:$24 sps:$4 sm:$0xff]  }
 0x40e   : > { %v11881_v51 = vld [vmem:[#allocation7 + $0x990] ss:$24 sps:$4 sm:$0xff]  }
 0x40f   : > { %7089 = vmatpush2.bf16.msra.mxu1 %v11701_v1  ;;  %v11873_v1 = vld [vmem:[#allocation7 + $0x9f0] ss:$24 sps:$4 sm:$0xff]  }
 0x410   : > { %7090 = vmatprep.subr.bf16.mxu1 %v11706_v49  ;;  %7122 = vmatpush1.bf16.msra.mxu0 %v11851_v30  ;;  %v11875_v49 = vld [vmem:[#allocation7 + $0x9c4] ss:$24 sps:$4 sm:$0xff]   ;;  %v11884_v30 = vld [vmem:[#allocation7 + $0x7e0] ss:$24 sps:$4 sm:$0xff]  }
 0x411   : > { %7123 = vmatprep.subr.bf16.mxu0 %v11852_v48  ;;  %v11886_v48 = vld [vmem:[#allocation7 + $0x7b4] ss:$24 sps:$4 sm:$0xff]  }
 0x413   : > { %7091 = vmatpush2.bf16.msra.mxu1 %v11704_v41  ;;  %v11880_v41 = vld [vmem:[#allocation7 + $0x810] ss:$24 sps:$4 sm:$0xff]  }
 0x414   : > { %7092 = vmatprep.subr.bf16.mxu1 %v11709_v58  ;;  %7124 = vmatpush1.bf16.msra.mxu0 %v11853_v26  ;;  %v11883_v58 = vld [vmem:[#allocation7 + $0x964] ss:$24 sps:$4 sm:$0xff]   ;;  %v11888_v26 = vld [vmem:[#allocation7 + $0x7b0] ss:$24 sps:$4 sm:$0xff]  }
 0x415   : > { %7125 = vmatprep.subr.bf16.mxu0 %v11854_v10  ;;  %v11890_v10 = vld [vmem:[#allocation7 + $0x784] ss:$24 sps:$4 sm:$0xff]  }
 0x417   : > { %7093 = vmatpush2.bf16.msra.mxu1 %v11707_v0  ;;  %v11885_v0 = vld [vmem:[#allocation7 + $0x960] ss:$24 sps:$4 sm:$0xff]  }
 0x418   : > { %7094 = vmatprep.subr.bf16.mxu1 %v11712_v31  ;;  %7126 = vmatpush1.bf16.msra.mxu0 %v11855_v24  ;;  %v11887_v31 = vld [vmem:[#allocation7 + $0x934] ss:$24 sps:$4 sm:$0xff]   ;;  %v11892_v24 = vld [vmem:[#allocation7 + $0x780] ss:$24 sps:$4 sm:$0xff]  }
 0x419   : > { %7127 = vmatprep.subr.bf16.mxu0 %v11856_v23  ;;  %v11894_v23 = vld [vmem:[#allocation7 + $0xbd4] ss:$24 sps:$4 sm:$0xff]  }
 0x41b   : > { %7095 = vmatpush2.bf16.msra.mxu1 %v11710_v34  ;;  %v11889_v34 = vld [vmem:[#allocation7 + $0x930] ss:$24 sps:$4 sm:$0xff]  }
 0x41c   : > { %7096 = vmatprep.subr.bf16.mxu1 %v11715_v12  ;;  %7128 = vmatpush1.bf16.msra.mxu0 %v11857_v35  ;;  %v11891_v12 = vld [vmem:[#allocation7 + $0x904] ss:$24 sps:$4 sm:$0xff]  }
 0x41d   : > { %7129 = vmatprep.subr.bf16.mxu0 %v11858_v52  ;;  %v11897_v52 = vld [vmem:[#allocation7 + $0x758] ss:$24 sps:$4 sm:$0xff]  }
 0x41f   : > { %7097 = vmatpush2.bf16.msra.mxu1 %v11713_v50  ;;  %v11893_v50 = vld [vmem:[#allocation7 + $0x900] ss:$24 sps:$4 sm:$0xff]  }
 0x420   : > { %7098 = vmatprep.subr.bf16.mxu1 %v11718_v33  ;;  %7130 = vmatpush1.bf16.msra.mxu0 %v11859_v11  ;;  %v11895_v33 = vld [vmem:[#allocation7 + $0x75c] ss:$24 sps:$4 sm:$0xff]  }
 0x421   : > { %7131 = vmatprep.subr.bf16.mxu0 %v11860_v5  ;;  %v11898_v11 = vld [vmem:[#allocation7 + $0xba4] ss:$24 sps:$4 sm:$0xff]  }
 0x423   : > { %7099 = vmatpush2.bf16.msra.mxu1 %v11716_v36  ;;  %v11896_v36 = vld [vmem:[#allocation7 + $0xbd0] ss:$24 sps:$4 sm:$0xff]  }
 0x424   : > { %7100 = vmatprep.subr.bf16.mxu1 %v11721_v56  ;;  %7132 = vmatpush1.bf16.msra.mxu0 %v11861_v20  ;;  %v11900_v20 = vld [vmem:[#allocation7 + $0xba0] ss:$24 sps:$4 sm:$0xff]  }
 0x425   : > { %7133 = vmatprep.subr.bf16.mxu0 %v11862_v53  ;;  %v11901_v53 = vld [vmem:[#allocation7 + $0x728] ss:$24 sps:$4 sm:$0xff]  }
 0x427   : > { %7101 = vmatpush2.bf16.msra.mxu1 %v11719_v29  ;;  %v11899_v29 = vld [vmem:[#allocation7 + $0x72c] ss:$24 sps:$4 sm:$0xff]  }
 0x428   : > { %7158 = vmatprep.subr.bf16.mxu1 %v11863_v9  ;;  %7134 = vmatpush2.bf16.msra.mxu0 %v11864_v60  ;;  %v11903_v60 = vld [vmem:[#allocation7 + $0x6fc] ss:$24 sps:$4 sm:$0xff]  }
 0x429   : > { %7135 = vmatprep.subr.bf16.mxu0 %v11866_v43  ;;  %v11906_v43 = vld [vmem:[#allocation7 + $0xb44] ss:$24 sps:$4 sm:$0xff]  }
 0x42a   : > { %v5866_v57 = vpop.f32.mrf.mxu1  ;;  %7103 = vmatmul.mubr.bf16.vlgmr.msra.gmra.mxu1 %v13652_v8 }
 0x42b   : > { %v13688_v13 = vadd.f32 %v5866_v57, %v13680_v38  ;;  %7159 = vmatpush1.bf16.msra.mxu1 %v11865_v55  ;;  %7190 = vmatprep.mubr.bf16.mxu1 %v13629_v39  ;;  %v11871_v38 = vld [vmem:[#allocation7 + $0x9f4] ss:$24 sps:$4 sm:$0xff]   ;;  %v11904_v55 = vld [vmem:[#allocation7 + $0xb70] ss:$24 sps:$4 sm:$0xff]  }
 0x42c   : > { %v5868_v62 = vpop.f32.mrf.mxu1  ;;  %7160 = vmatprep.subr.bf16.mxu1 %v11867_v16  ;;  %7136 = vmatpush2.bf16.msra.mxu0 %v11868_v21  ;;  %v11902_v57 = vld [vmem:[#allocation7 + $0xb74] ss:$24 sps:$4 sm:$0xff]   ;;  %v11909_v21 = vld [vmem:[#allocation7 + $0x6c8] ss:$24 sps:$4 sm:$0xff]  }
 0x42d   : > { %v13692_v6 = vadd.f32 %v5868_v62, %v13684_v54  ;;  %7137 = vmatprep.subr.bf16.mxu0 %v11870_v15  ;;  %v11876_v54 = vld [vmem:[#allocation7 + $0x840] ss:$24 sps:$4 sm:$0xff]   ;;  %v11907_v16 = vld [vmem:[#allocation7 + $0x6cc] ss:$24 sps:$4 sm:$0xff]   ;;  %v11912_v15 = vld [vmem:[#allocation7 + $0xb10] ss:$24 sps:$4 sm:$0xff]  }
 0x42e   : > { %v5870_v63 = vpop.f32.mrf.mxu1  ;;  %v11905_v62 = vld [vmem:[#allocation7 + $0x6f8] ss:$24 sps:$4 sm:$0xff]  }
 0x42f   : > { %7161 = vmatpush1.bf16.msra.mxu1 %v11869_v47  ;;  %v11908_v63 = vld [vmem:[#allocation7 + $0xb40] ss:$24 sps:$4 sm:$0xff]   ;;  %v11910_v47 = vld [vmem:[#allocation7 + $0xb14] ss:$24 sps:$4 sm:$0xff]  }
 0x430   : > { %v5871_v59 = vpop.f32.mrf.mxu1  ;;  %7162 = vmatprep.subr.bf16.mxu1 %v11871_v38  ;;  %7138 = vmatpush2.bf16.msra.mxu0 %v11872_v44  ;;  %v11913_v38 = vld [vmem:[#allocation7 + $0x698] ss:$24 sps:$4 sm:$0xff]   ;;  %v11914_v44 = vld [vmem:[#allocation7 + $0xae4] ss:$24 sps:$4 sm:$0xff]  }
 0x431   : > { %7139 = vmatprep.subr.bf16.mxu0 %v11874_v61  ;;  %v11911_v59 = vld [vmem:[#allocation7 + $0x69c] ss:$24 sps:$4 sm:$0xff]   ;;  %v11916_v61 = vld [vmem:[#allocation7 + $0xae0] ss:$24 sps:$4 sm:$0xff]  }
 0x433   : > { %7163 = vmatpush1.bf16.msra.mxu1 %v11873_v1  ;;  %v11915_v1 = vld [vmem:[#allocation7 + $0x66c] ss:$24 sps:$4 sm:$0xff]  }
 0x434   : > { %7164 = vmatprep.subr.bf16.mxu1 %v11875_v49  ;;  %7140 = vmatpush2.bf16.msra.mxu0 %v11876_v54  ;;  %v11917_v49 = vld [vmem:[#allocation7 + $0x668] ss:$24 sps:$4 sm:$0xff]   ;;  %v11918_v54 = vld [vmem:[#allocation7 + $0xab4] ss:$24 sps:$4 sm:$0xff]  }
 0x435   : > { %7141 = vmatprep.subr.bf16.mxu0 %v11878_v40  ;;  %v11920_v40 = vld [vmem:[#allocation7 + $0xab0] ss:$24 sps:$4 sm:$0xff]  }
 0x437   : > { %7165 = vmatpush1.bf16.msra.mxu1 %v11877_v2  ;;  %v11919_v2 = vld [vmem:[#allocation7 + $0x63c] ss:$24 sps:$4 sm:$0xff]  }
 0x438   : > { %7166 = vmatprep.subr.bf16.mxu1 %v11879_v4  ;;  %7142 = vmatpush2.bf16.msra.mxu0 %v11880_v41  ;;  %v11921_v4 = vld [vmem:[#allocation7 + $0x638] ss:$24 sps:$4 sm:$0xff]   ;;  %v11922_v41 = vld [vmem:[#allocation7 + $0xa84] ss:$24 sps:$4 sm:$0xff]  }
 0x439   : > { %7143 = vmatprep.subr.bf16.mxu0 %v11882_v45  ;;  %v11924_v45 = vld [vmem:[#allocation7 + $0xa80] ss:$24 sps:$4 sm:$0xff]  }
 0x43b   : > { %7167 = vmatpush1.bf16.msra.mxu1 %v11881_v51  ;;  %v11923_v51 = vld [vmem:[#allocation7 + $0x60c] ss:$24 sps:$4 sm:$0xff]  }
 0x43c   : > { %7168 = vmatprep.subr.bf16.mxu1 %v11883_v58  ;;  %7144 = vmatpush2.bf16.msra.mxu0 %v11884_v30  ;;  %v11925_v58 = vld [vmem:[#allocation7 + $0x608] ss:$24 sps:$4 sm:$0xff]   ;;  %v11926_v30 = vld [vmem:[#allocation7 + $0x8dc] ss:$24 sps:$4 sm:$0xff]  }
 0x43d   : > { %7145 = vmatprep.subr.bf16.mxu0 %v11886_v48 }
 0x43f   : > { %7169 = vmatpush1.bf16.msra.mxu1 %v11885_v0  ;;  %v11927_v0 = vld [vmem:[#allocation7 + $0xa5c] ss:$24 sps:$4 sm:$0xff]  }
 0x440   : > { %7170 = vmatprep.subr.bf16.mxu1 %v11887_v31  ;;  %7146 = vmatpush2.bf16.msra.mxu0 %v11888_v26  ;;  %v11928_v26 = vld [vmem:[#allocation7 + $0x8d8] ss:$24 sps:$4 sm:$0xff]  }
 0x441   : > { %7147 = vmatprep.subr.bf16.mxu0 %v11890_v10 }
 0x443   : > { %7171 = vmatpush1.bf16.msra.mxu1 %v11889_v34  ;;  %v11929_v34 = vld [vmem:[#allocation7 + $0xa58] ss:$24 sps:$4 sm:$0xff]  }
 0x444   : > { %7172 = vmatprep.subr.bf16.mxu1 %v11891_v12  ;;  %7148 = vmatpush2.bf16.msra.mxu0 %v11892_v24  ;;  %v11930_v12 = vld [vmem:[#allocation7 + $0x8ac] ss:$24 sps:$4 sm:$0xff]  }
 0x445   : > { %7199 = vmatprep.subr.bf16.mxu0 %v11895_v33 }
 0x447   : > { %7173 = vmatpush1.bf16.msra.mxu1 %v11893_v50  ;;  %v13694_v35 = vpop.f32.mrf.mxu0  ;;  %7150 = vmatmul.mubr.bf16.vlgmr.msra.gmra.mxu0 %v13640_v28 }
 0x448   : > { %7174 = vmatprep.subr.bf16.mxu1 %v11894_v23  ;;  %7200 = vmatpush1.bf16.msra.mxu0 %v11897_v52  ;;  %v11931_v23 = vld [vmem:[#allocation7 + $0xa2c] ss:$24 sps:$4 sm:$0xff]   ;;  %v11933_v52 = vld [vmem:[#allocation7 + $0xa28] ss:$24 sps:$4 sm:$0xff]  }
 0x449   : > { %7231 = vmatprep.mubr.bf16.mxu0 %v13621_v3  ;;  %v13698_v56 = vpop.f32.mrf.mxu0  ;;  %7201 = vmatprep.subr.bf16.mxu0 %v11899_v29  ;;  %v11934_v29 = vld [vmem:[#allocation7 + $0x87c] ss:$24 sps:$4 sm:$0xff]  }
 0x44b   : > { %7175 = vmatpush2.bf16.msra.mxu1 %v11896_v36  ;;  %v6903_v5 = vpop.f32.mrf.mxu0 }
 0x44c   : > { %7176 = vmatprep.subr.bf16.mxu1 %v11898_v11  ;;  %7202 = vmatpush1.bf16.msra.mxu0 %v11901_v53  ;;  %v11935_v5 = vld [vmem:[#allocation7 + $0x9fc] ss:$24 sps:$4 sm:$0xff]   ;;  %v11939_v53 = vld [vmem:[#allocation7 + $0x9cc] ss:$24 sps:$4 sm:$0xff]  }
 0x44d   : > { %v6904_v9 = vpop.f32.mrf.mxu0  ;;  %7203 = vmatprep.subr.bf16.mxu0 %v11903_v60  ;;  %v11943_v60 = vld [vmem:[#allocation7 + $0x99c] ss:$24 sps:$4 sm:$0xff]  }
 0x44e   : > { %v11940_v9 = vld [vmem:[#allocation7 + $0x848] ss:$24 sps:$4 sm:$0xff]  }
 0x44f   : > { %7177 = vmatpush2.bf16.msra.mxu1 %v11900_v20  ;;  %v11936_v20 = vld [vmem:[#allocation7 + $0x878] ss:$24 sps:$4 sm:$0xff]  }
 0x450   : > { %7178 = vmatprep.subr.bf16.mxu1 %v11902_v57  ;;  %7204 = vmatpush1.bf16.msra.mxu0 %v11905_v62  ;;  %v11942_v57 = vld [vmem:[#allocation7 + $0x81c] ss:$24 sps:$4 sm:$0xff]   ;;  %v11945_v62 = vld [vmem:[#allocation7 + $0x998] ss:$24 sps:$4 sm:$0xff]  }
 0x451   : > { %7205 = vmatprep.subr.bf16.mxu0 %v11907_v16  ;;  %v11947_v16 = vld [vmem:[#allocation7 + $0x96c] ss:$24 sps:$4 sm:$0xff]  }
 0x453   : > { %7179 = vmatpush2.bf16.msra.mxu1 %v11904_v55  ;;  %v11944_v55 = vld [vmem:[#allocation7 + $0x818] ss:$24 sps:$4 sm:$0xff]  }
 0x454   : > { %7180 = vmatprep.subr.bf16.mxu1 %v11906_v43  ;;  %7206 = vmatpush1.bf16.msra.mxu0 %v11909_v21  ;;  %v11946_v43 = vld [vmem:[#allocation7 + $0x7ec] ss:$24 sps:$4 sm:$0xff]   ;;  %v11949_v21 = vld [vmem:[#allocation7 + $0x968] ss:$24 sps:$4 sm:$0xff]  }
 0x455   : > { %7207 = vmatprep.subr.bf16.mxu0 %v11911_v59  ;;  %v11951_v59 = vld [vmem:[#allocation7 + $0x93c] ss:$24 sps:$4 sm:$0xff]  }
 0x457   : > { %7181 = vmatpush2.bf16.msra.mxu1 %v11908_v63  ;;  %v11948_v63 = vld [vmem:[#allocation7 + $0x7e8] ss:$24 sps:$4 sm:$0xff]  }
 0x458   : > { %7182 = vmatprep.subr.bf16.mxu1 %v11910_v47  ;;  %7208 = vmatpush1.bf16.msra.mxu0 %v11913_v38  ;;  %v11950_v47 = vld [vmem:[#allocation7 + $0x7bc] ss:$24 sps:$4 sm:$0xff]   ;;  %v11953_v38 = vld [vmem:[#allocation7 + $0x938] ss:$24 sps:$4 sm:$0xff]  }
 0x459   : > { %7209 = vmatprep.subr.bf16.mxu0 %v11915_v1  ;;  %v11955_v1 = vld [vmem:[#allocation7 + $0x90c] ss:$24 sps:$4 sm:$0xff]  }
 0x45b   : > { %7183 = vmatpush2.bf16.msra.mxu1 %v11912_v15  ;;  %v11952_v15 = vld [vmem:[#allocation7 + $0x7b8] ss:$24 sps:$4 sm:$0xff]  }
 0x45c   : > { %7184 = vmatprep.subr.bf16.mxu1 %v11914_v44  ;;  %7210 = vmatpush1.bf16.msra.mxu0 %v11917_v49  ;;  %v11954_v44 = vld [vmem:[#allocation7 + $0x78c] ss:$24 sps:$4 sm:$0xff]   ;;  %v11957_v49 = vld [vmem:[#allocation7 + $0x908] ss:$24 sps:$4 sm:$0xff]  }
 0x45d   : > { %7211 = vmatprep.subr.bf16.mxu0 %v11919_v2  ;;  %v11959_v2 = vld [vmem:[#allocation7 + $0x764] ss:$24 sps:$4 sm:$0xff]  }
 0x45f   : > { %7185 = vmatpush2.bf16.msra.mxu1 %v11916_v61  ;;  %v11956_v61 = vld [vmem:[#allocation7 + $0x788] ss:$24 sps:$4 sm:$0xff]  }
 0x460   : > { %7186 = vmatprep.subr.bf16.mxu1 %v11918_v54  ;;  %7212 = vmatpush1.bf16.msra.mxu0 %v11921_v4  ;;  %v11958_v54 = vld [vmem:[#allocation7 + $0xbdc] ss:$24 sps:$4 sm:$0xff]   ;;  %v11960_v4 = vld [vmem:[#allocation7 + $0xbd8] ss:$24 sps:$4 sm:$0xff]  }
 0x461   : > { %7213 = vmatprep.subr.bf16.mxu0 %v11923_v51 }
 0x463   : > { %7187 = vmatpush2.bf16.msra.mxu1 %v11920_v40 }
 0x464   : > { %7188 = vmatprep.subr.bf16.mxu1 %v11922_v41  ;;  %7214 = vmatpush1.bf16.msra.mxu0 %v11925_v58  ;;  %v11961_v41 = vld [vmem:[#allocation7 + $0x760] ss:$24 sps:$4 sm:$0xff]   ;;  %v11963_v58 = vld [vmem:[#allocation7 + $0x734] ss:$24 sps:$4 sm:$0xff]  }
 0x465   : > { %7215 = vmatprep.subr.bf16.mxu0 %v11926_v30 }
 0x467   : > { %7189 = vmatpush2.bf16.msra.mxu1 %v11924_v45  ;;  %v11962_v45 = vld [vmem:[#allocation7 + $0xbac] ss:$24 sps:$4 sm:$0xff]  }
 0x468   : > { %7240 = vmatprep.subr.bf16.mxu1 %v11927_v0  ;;  %7216 = vmatpush2.bf16.msra.mxu0 %v11928_v26  ;;  %v11964_v0 = vld [vmem:[#allocation7 + $0xba8] ss:$24 sps:$4 sm:$0xff]   ;;  %v11966_v26 = vld [vmem:[#allocation7 + $0xb7c] ss:$24 sps:$4 sm:$0xff]  }
 0x469   : > { %7217 = vmatprep.subr.bf16.mxu0 %v11930_v12  ;;  %v11969_v12 = vld [vmem:[#allocation7 + $0x700] ss:$24 sps:$4 sm:$0xff]  }
 0x46a   : > { %v6940_v48 = vpop.f32.mrf.mxu1  ;;  %7191 = vmatmul.mubr.bf16.vlgmr.msra.gmra.mxu1 %v13652_v8 }
 0x46b   : > { %v6941_v31 = vadd.f32 %v6940_v48, %v13694_v35  ;;  %7241 = vmatpush1.bf16.msra.mxu1 %v11929_v34  ;;  %7272 = vmatprep.mubr.bf16.mxu1 %v13629_v39  ;;  %v11932_v35 = vld [vmem:[#allocation7 + $0x8a8] ss:$24 sps:$4 sm:$0xff]   ;;  %v11967_v34 = vld [vmem:[#allocation7 + $0x704] ss:$24 sps:$4 sm:$0xff]  }
 0x46c   : > { %v6942_v10 = vpop.f32.mrf.mxu1  ;;  %7242 = vmatprep.subr.bf16.mxu1 %v11931_v23  ;;  %7218 = vmatpush2.bf16.msra.mxu0 %v11932_v35  ;;  %v11965_v48 = vld [vmem:[#allocation7 + $0x730] ss:$24 sps:$4 sm:$0xff]   ;;  %v11974_v35 = vld [vmem:[#allocation7 + $0xb1c] ss:$24 sps:$4 sm:$0xff]  }
 0x46d   : > { %v13704_v24 = vadd.f32 %v6941_v31, %v13656_v22  ;;  %v6943_v50 = vadd.f32 %v6942_v10, %v13698_v56  ;;  %7219 = vmatprep.subr.bf16.mxu0 %v11934_v29  ;;  %v11937_v22 = vld [vmem:[#allocation7 + $0x9f8] ss:$24 sps:$4 sm:$0xff]   ;;  %v11938_v56 = vld [vmem:[#allocation7 + $0x84c] ss:$24 sps:$4 sm:$0xff]   ;;  %v11972_v23 = vld [vmem:[#allocation7 + $0xb48] ss:$24 sps:$4 sm:$0xff]  }
 0x46e   : > { %v6944_v33 = vpop.f32.mrf.mxu1  ;;  %v11968_v10 = vld [vmem:[#allocation7 + $0xb78] ss:$24 sps:$4 sm:$0xff]  }
 0x46f   : > { %v13708_v36 = vadd.f32 %v6943_v50, %v13660_v46  ;;  %7243 = vmatpush1.bf16.msra.mxu1 %v11933_v52  ;;  %v11941_v46 = vld [vmem:[#allocation7 + $0x9c8] ss:$24 sps:$4 sm:$0xff]   ;;  %v11971_v50 = vld [vmem:[#allocation7 + $0x6d4] ss:$24 sps:$4 sm:$0xff]   ;;  %v11975_v52 = vld [vmem:[#allocation7 + $0x6a4] ss:$24 sps:$4 sm:$0xff]  }
 0x470   : > { %v6945_v11 = vpop.f32.mrf.mxu1  ;;  %7244 = vmatprep.subr.bf16.mxu1 %v11935_v5  ;;  %7220 = vmatpush2.bf16.msra.mxu0 %v11936_v20  ;;  %v11973_v33 = vld [vmem:[#allocation7 + $0x6d0] ss:$24 sps:$4 sm:$0xff]   ;;  %v11977_v29 = vld [vmem:[#allocation7 + $0x6a0] ss:$24 sps:$4 sm:$0xff]   ;;  %v11978_v5 = vld [vmem:[#allocation7 + $0xaec] ss:$24 sps:$4 sm:$0xff]  }
 0x471   : > { %7221 = vmatprep.subr.bf16.mxu0 %v11938_v56  ;;  %v11976_v11 = vld [vmem:[#allocation7 + $0xb18] ss:$24 sps:$4 sm:$0xff]   ;;  %v11979_v20 = vld [vmem:[#allocation7 + $0x674] ss:$24 sps:$4 sm:$0xff]  }
 0x472   : > { %v11981_v56 = vld [vmem:[#allocation7 + $0x670] ss:$24 sps:$4 sm:$0xff]  }
 0x473   : > { %7245 = vmatpush1.bf16.msra.mxu1 %v11937_v22  ;;  %v11980_v22 = vld [vmem:[#allocation7 + $0xae8] ss:$24 sps:$4 sm:$0xff]  }
 0x474   : > { %7246 = vmatprep.subr.bf16.mxu1 %v11939_v53  ;;  %7222 = vmatpush2.bf16.msra.mxu0 %v11940_v9  ;;  %v11982_v53 = vld [vmem:[#allocation7 + $0xabc] ss:$24 sps:$4 sm:$0xff]  }
 0x475   : > { %7223 = vmatprep.subr.bf16.mxu0 %v11942_v57  ;;  %v11983_v9 = vld [vmem:[#allocation7 + $0x644] ss:$24 sps:$4 sm:$0xff]   ;;  %v11985_v57 = vld [vmem:[#allocation7 + $0x640] ss:$24 sps:$4 sm:$0xff]  }
 0x477   : > { %7247 = vmatpush1.bf16.msra.mxu1 %v11941_v46  ;;  %v11984_v46 = vld [vmem:[#allocation7 + $0xab8] ss:$24 sps:$4 sm:$0xff]  }
 0x478   : > { %7248 = vmatprep.subr.bf16.mxu1 %v11943_v60  ;;  %7224 = vmatpush2.bf16.msra.mxu0 %v11944_v55  ;;  %v11986_v60 = vld [vmem:[#allocation7 + $0xa8c] ss:$24 sps:$4 sm:$0xff]  }
 0x479   : > { %7225 = vmatprep.subr.bf16.mxu0 %v11946_v43  ;;  %v11987_v55 = vld [vmem:[#allocation7 + $0x614] ss:$24 sps:$4 sm:$0xff]   ;;  %v11989_v43 = vld [vmem:[#allocation7 + $0x610] ss:$24 sps:$4 sm:$0xff]  }
 0x47b   : > { %7249 = vmatpush1.bf16.msra.mxu1 %v11945_v62  ;;  %v11988_v62 = vld [vmem:[#allocation7 + $0xa88] ss:$24 sps:$4 sm:$0xff]  }
 0x47c   : > { %7250 = vmatprep.subr.bf16.mxu1 %v11947_v16  ;;  %7226 = vmatpush2.bf16.msra.mxu0 %v11948_v63  ;;  %v11990_v16 = vld [vmem:[#allocation7 + $0x8e4] ss:$24 sps:$4 sm:$0xff]  }
 0x47d   : > { %7227 = vmatprep.subr.bf16.mxu0 %v11950_v47  ;;  %v11991_v63 = vld [vmem:[#allocation7 + $0xa64] ss:$24 sps:$4 sm:$0xff]  }
 0x47f   : > { %7251 = vmatpush1.bf16.msra.mxu1 %v11949_v21 }
 0x480   : > { %7252 = vmatprep.subr.bf16.mxu1 %v11951_v59  ;;  %7228 = vmatpush2.bf16.msra.mxu0 %v11952_v15  ;;  %v11992_v59 = vld [vmem:[#allocation7 + $0x8e0] ss:$24 sps:$4 sm:$0xff]  }
 0x481   : > { %7229 = vmatprep.subr.bf16.mxu0 %v11954_v44  ;;  %v11993_v15 = vld [vmem:[#allocation7 + $0xa60] ss:$24 sps:$4 sm:$0xff]   ;;  %v11994_v44 = vld [vmem:[#allocation7 + $0x8b4] ss:$24 sps:$4 sm:$0xff]  }
 0x483   : > { %7253 = vmatpush1.bf16.msra.mxu1 %v11953_v38 }
 0x484   : > { %7254 = vmatprep.subr.bf16.mxu1 %v11955_v1  ;;  %7230 = vmatpush2.bf16.msra.mxu0 %v11956_v61 }
 0x485   : > { %7281 = vmatprep.subr.bf16.mxu0 %v11959_v2 }
 0x487   : > { %7255 = vmatpush1.bf16.msra.mxu1 %v11957_v49  ;;  %v13710_v40 = vpop.f32.mrf.mxu0  ;;  %7232 = vmatmul.mubr.bf16.vlgmr.msra.gmra.mxu0 %v13640_v28  ;;  %v11995_v49 = vld [vmem:[#allocation7 + $0xa34] ss:$24 sps:$4 sm:$0xff]  }
 0x488   : > { %7256 = vmatprep.subr.bf16.mxu1 %v11958_v54  ;;  %7282 = vmatpush1.bf16.msra.mxu0 %v11961_v41 }
 0x489   : > { %7313 = vmatprep.mubr.bf16.mxu0 %v13621_v3  ;;  %v13714_v51 = vpop.f32.mrf.mxu0  ;;  %7283 = vmatprep.subr.bf16.mxu0 %v11963_v58  ;;  %v11970_v3 = vld [vmem:[#allocation7 + $0xb4c] ss:$24 sps:$4 sm:$0xff]   ;;  %v12000_v58 = vld [vmem:[#allocation7 + $0x880] ss:$24 sps:$4 sm:$0xff]  }
 0x48b   : > { %7257 = vmatpush2.bf16.msra.mxu1 %v11960_v4  ;;  %v6985_v30 = vpop.f32.mrf.mxu0  ;;  %v11997_v4 = vld [vmem:[#allocation7 + $0xa30] ss:$24 sps:$4 sm:$0xff]  }
 0x48c   : > { %7258 = vmatprep.subr.bf16.mxu1 %v11962_v45  ;;  %7284 = vmatpush1.bf16.msra.mxu0 %v11965_v48  ;;  %v11999_v45 = vld [vmem:[#allocation7 + $0xa04] ss:$24 sps:$4 sm:$0xff]   ;;  %v12003_v30 = vld [vmem:[#allocation7 + $0x9d4] ss:$24 sps:$4 sm:$0xff]  }
 0x48d   : > { %v6986_v31 = vpop.f32.mrf.mxu0  ;;  %7285 = vmatprep.subr.bf16.mxu0 %v11967_v34  ;;  %v12006_v48 = vld [vmem:[#allocation7 + $0x824] ss:$24 sps:$4 sm:$0xff]   ;;  %v12009_v34 = vld [vmem:[#allocation7 + $0x9a0] ss:$24 sps:$4 sm:$0xff]  }
 0x48e   : > { %v12007_v31 = vld [vmem:[#allocation7 + $0x9a4] ss:$24 sps:$4 sm:$0xff]  }
 0x48f   : > { %7259 = vmatpush2.bf16.msra.mxu1 %v11964_v0  ;;  %v12004_v0 = vld [vmem:[#allocation7 + $0x850] ss:$24 sps:$4 sm:$0xff]  }
 0x490   : > { %7260 = vmatprep.subr.bf16.mxu1 %v11966_v26  ;;  %7286 = vmatpush1.bf16.msra.mxu0 %v11969_v12  ;;  %v12008_v26 = vld [vmem:[#allocation7 + $0x820] ss:$24 sps:$4 sm:$0xff]   ;;  %v12011_v12 = vld [vmem:[#allocation7 + $0x974] ss:$24 sps:$4 sm:$0xff]  }
 0x491   : > { %7287 = vmatprep.subr.bf16.mxu0 %v11971_v50  ;;  %v12013_v50 = vld [vmem:[#allocation7 + $0x970] ss:$24 sps:$4 sm:$0xff]  }
 0x493   : > { %7261 = vmatpush2.bf16.msra.mxu1 %v11968_v10  ;;  %v12010_v10 = vld [vmem:[#allocation7 + $0x7f4] ss:$24 sps:$4 sm:$0xff]  }
 0x494   : > { %7262 = vmatprep.subr.bf16.mxu1 %v11970_v3  ;;  %7288 = vmatpush1.bf16.msra.mxu0 %v11973_v33  ;;  %v12012_v3 = vld [vmem:[#allocation7 + $0x7f0] ss:$24 sps:$4 sm:$0xff]   ;;  %v12015_v33 = vld [vmem:[#allocation7 + $0x944] ss:$24 sps:$4 sm:$0xff]  }
 0x495   : > { %7289 = vmatprep.subr.bf16.mxu0 %v11975_v52  ;;  %v12017_v52 = vld [vmem:[#allocation7 + $0x940] ss:$24 sps:$4 sm:$0xff]  }
 0x497   : > { %7263 = vmatpush2.bf16.msra.mxu1 %v11972_v23  ;;  %v12014_v23 = vld [vmem:[#allocation7 + $0x7c4] ss:$24 sps:$4 sm:$0xff]  }
 0x498   : > { %7264 = vmatprep.subr.bf16.mxu1 %v11974_v35  ;;  %7290 = vmatpush1.bf16.msra.mxu0 %v11977_v29  ;;  %v12016_v35 = vld [vmem:[#allocation7 + $0x7c0] ss:$24 sps:$4 sm:$0xff]   ;;  %v12019_v29 = vld [vmem:[#allocation7 + $0x914] ss:$24 sps:$4 sm:$0xff]  }
 0x499   : > { %7291 = vmatprep.subr.bf16.mxu0 %v11979_v20  ;;  %v12021_v20 = vld [vmem:[#allocation7 + $0x910] ss:$24 sps:$4 sm:$0xff]  }
 0x49b   : > { %7265 = vmatpush2.bf16.msra.mxu1 %v11976_v11  ;;  %v12018_v11 = vld [vmem:[#allocation7 + $0x794] ss:$24 sps:$4 sm:$0xff]  }
 0x49c   : > { %7266 = vmatprep.subr.bf16.mxu1 %v11978_v5  ;;  %7292 = vmatpush1.bf16.msra.mxu0 %v11981_v56  ;;  %v12020_v5 = vld [vmem:[#allocation7 + $0x790] ss:$24 sps:$4 sm:$0xff]   ;;  %v12023_v56 = vld [vmem:[#allocation7 + $0x154] ss:$24 sps:$4 sm:$0xff]  }
 0x49d   : > { %7293 = vmatprep.subr.bf16.mxu0 %v11983_v9  ;;  %v12024_v9 = vld [vmem:[#allocation7 + $0xbe0] ss:$24 sps:$4 sm:$0xff]  }
 0x49f   : > { %7267 = vmatpush2.bf16.msra.mxu1 %v11980_v22  ;;  %v12022_v22 = vld [vmem:[#allocation7 + $0xbe4] ss:$24 sps:$4 sm:$0xff]  }
 0x4a0   : > { %7268 = vmatprep.subr.bf16.mxu1 %v11982_v53  ;;  %7294 = vmatpush1.bf16.msra.mxu0 %v11985_v57 }
 0x4a1   : > { %7295 = vmatprep.subr.bf16.mxu0 %v11987_v55  ;;  %v12027_v55 = vld [vmem:[#allocation7 + $0x124] ss:$24 sps:$4 sm:$0xff]  }
 0x4a3   : > { %7269 = vmatpush2.bf16.msra.mxu1 %v11984_v46  ;;  %v12025_v46 = vld [vmem:[#allocation7 + $0x150] ss:$24 sps:$4 sm:$0xff]  }
 0x4a4   : > { %7270 = vmatprep.subr.bf16.mxu1 %v11986_v60  ;;  %7296 = vmatpush1.bf16.msra.mxu0 %v11989_v43  ;;  %v12026_v60 = vld [vmem:[#allocation7 + $0xbb4] ss:$24 sps:$4 sm:$0xff]   ;;  %v12028_v43 = vld [vmem:[#allocation7 + $0xbb0] ss:$24 sps:$4 sm:$0xff]  }
 0x4a5   : > { %7297 = vmatprep.subr.bf16.mxu0 %v11990_v16  ;;  %v12029_v16 = vld [vmem:[#allocation7 + $0x120] ss:$24 sps:$4 sm:$0xff]  }
 0x4a7   : > { %7271 = vmatpush2.bf16.msra.mxu1 %v11988_v62 }
 0x4a8   : > { %7322 = vmatprep.subr.bf16.mxu1 %v11991_v63  ;;  %7298 = vmatpush2.bf16.msra.mxu0 %v11992_v59  ;;  %v12033_v59 = vld [vmem:[#allocation7 + $0xf0] ss:$24 sps:$4 sm:$0xff]  }
 0x4a9   : > { %7299 = vmatprep.subr.bf16.mxu0 %v11994_v44  ;;  %v12036_v44 = vld [vmem:[#allocation7 + $0xb50] ss:$24 sps:$4 sm:$0xff]  }
 0x4aa   : > { %v7022_v21 = vpop.f32.mrf.mxu1  ;;  %7273 = vmatmul.mubr.bf16.vlgmr.msra.gmra.mxu1 %v13652_v8 }
 0x4ab   : > { %v7023_v47 = vadd.f32 %v7022_v21, %v13710_v40  ;;  %7323 = vmatpush1.bf16.msra.mxu1 %v11993_v15  ;;  %7354 = vmatprep.mubr.bf16.mxu1 %v13629_v39  ;;  %v11996_v40 = vld [vmem:[#allocation7 + $0x8b0] ss:$24 sps:$4 sm:$0xff]   ;;  %v11998_v39 = vld [vmem:[#allocation7 + $0x884] ss:$24 sps:$4 sm:$0xff]   ;;  %v12034_v15 = vld [vmem:[#allocation7 + $0xb54] ss:$24 sps:$4 sm:$0xff]  }
 0x4ac   : > { %v7024_v38 = vpop.f32.mrf.mxu1  ;;  %7324 = vmatprep.subr.bf16.mxu1 %v11995_v49  ;;  %7300 = vmatpush2.bf16.msra.mxu0 %v11996_v40  ;;  %v12030_v21 = vld [vmem:[#allocation7 + $0xb84] ss:$24 sps:$4 sm:$0xff]   ;;  %v12040_v40 = vld [vmem:[#allocation7 + $0xb20] ss:$24 sps:$4 sm:$0xff]  }
 0x4ad   : > { %v13720_v1 = vadd.f32 %v7023_v47, %v13672_v14  ;;  %v7025_v61 = vadd.f32 %v7024_v38, %v13714_v51  ;;  %7301 = vmatprep.subr.bf16.mxu0 %v11998_v39  ;;  %v12001_v14 = vld [vmem:[#allocation7 + $0xa00] ss:$24 sps:$4 sm:$0xff]   ;;  %v12002_v51 = vld [vmem:[#allocation7 + $0x854] ss:$24 sps:$4 sm:$0xff]   ;;  %v12035_v38 = vld [vmem:[#allocation7 + $0xc4] ss:$24 sps:$4 sm:$0xff]  }
 0x4ae   : > { %v7026_v54 = vpop.f32.mrf.mxu1  ;;  %v12032_v47 = vld [vmem:[#allocation7 + $0xb80] ss:$24 sps:$4 sm:$0xff]   ;;  %v12038_v49 = vld [vmem:[#allocation7 + $0xb24] ss:$24 sps:$4 sm:$0xff]  }
 0x4af   : > { %v13724_v2 = vadd.f32 %v7025_v61, %v13676_v7  ;;  %7325 = vmatpush1.bf16.msra.mxu1 %v11997_v4  ;;  %v12005_v7 = vld [vmem:[#allocation7 + $0x9d0] ss:$24 sps:$4 sm:$0xff]   ;;  %v12037_v61 = vld [vmem:[#allocation7 + $0xc0] ss:$24 sps:$4 sm:$0xff]   ;;  %v12039_v54 = vld [vmem:[#allocation7 + $0x94] ss:$24 sps:$4 sm:$0xff]  }
 0x4b0   : > { %v7027_v41 = vpop.f32.mrf.mxu1  ;;  %7326 = vmatprep.subr.bf16.mxu1 %v11999_v45  ;;  %7302 = vmatpush2.bf16.msra.mxu0 %v12000_v58  ;;  %v12041_v4 = vld [vmem:[#allocation7 + $0x90] ss:$24 sps:$4 sm:$0xff]   ;;  %v12043_v39 = vld [vmem:[#allocation7 + $0x64] ss:$24 sps:$4 sm:$0xff]   ;;  %v12045_v58 = vld [vmem:[#allocation7 + $0x60] ss:$24 sps:$4 sm:$0xff]  }
 0x4b1   : > { %7303 = vmatprep.subr.bf16.mxu0 %v12002_v51  ;;  %v12042_v41 = vld [vmem:[#allocation7 + $0xaf4] ss:$24 sps:$4 sm:$0xff]   ;;  %v12044_v45 = vld [vmem:[#allocation7 + $0xaf0] ss:$24 sps:$4 sm:$0xff]  }
 0x4b2   : > { %v12047_v51 = vld [vmem:[#allocation7 + $0x34] ss:$24 sps:$4 sm:$0xff]  }
 0x4b3   : > { %7327 = vmatpush1.bf16.msra.mxu1 %v12001_v14  ;;  %v12046_v14 = vld [vmem:[#allocation7 + $0xac4] ss:$24 sps:$4 sm:$0xff]  }
 0x4b4   : > { %7328 = vmatprep.subr.bf16.mxu1 %v12003_v30  ;;  %7304 = vmatpush2.bf16.msra.mxu0 %v12004_v0  ;;  %v12048_v30 = vld [vmem:[#allocation7 + $0xac0] ss:$24 sps:$4 sm:$0xff]   ;;  %v12049_v0 = vld [vmem:[#allocation7 + $0x30] ss:$24 sps:$4 sm:$0xff]  }
 0x4b5   : > { %7305 = vmatprep.subr.bf16.mxu0 %v12006_v48  ;;  %v12051_v48 = vld [vmem:[#allocation7 + $0x4] ss:$24 sps:$4 sm:$0xff]  }
 0x4b7   : > { %7329 = vmatpush1.bf16.msra.mxu1 %v12005_v7  ;;  %v12050_v7 = vld [vmem:[#allocation7 + $0xa94] ss:$24 sps:$4 sm:$0xff]  }
 0x4b8   : > { %7330 = vmatprep.subr.bf16.mxu1 %v12007_v31  ;;  %7306 = vmatpush2.bf16.msra.mxu0 %v12008_v26  ;;  %v12052_v31 = vld [vmem:[#allocation7 + $0xa90] ss:$24 sps:$4 sm:$0xff]   ;;  %v12053_v26 = vld [vmem:[#allocation7] ss:$24 sps:$4 sm:$0xff]  }
 0x4b9   : > { %7307 = vmatprep.subr.bf16.mxu0 %v12010_v10  ;;  %v12055_v10 = vld [vmem:[#allocation7 + $0x454] ss:$24 sps:$4 sm:$0xff]  }
 0x4bb   : > { %7331 = vmatpush1.bf16.msra.mxu1 %v12009_v34  ;;  %v12054_v34 = vld [vmem:[#allocation7 + $0x2d4] ss:$24 sps:$4 sm:$0xff]  }
 0x4bc   : > { %7332 = vmatprep.subr.bf16.mxu1 %v12011_v12  ;;  %7308 = vmatpush2.bf16.msra.mxu0 %v12012_v3 }
 0x4bd   : > { %7309 = vmatprep.subr.bf16.mxu0 %v12014_v23  ;;  %v12057_v23 = vld [vmem:[#allocation7 + $0x450] ss:$24 sps:$4 sm:$0xff]  }
 0x4bf   : > { %7333 = vmatpush1.bf16.msra.mxu1 %v12013_v50  ;;  %v12056_v50 = vld [vmem:[#allocation7 + $0x2d0] ss:$24 sps:$4 sm:$0xff]  }
 0x4c0   : > { %7334 = vmatprep.subr.bf16.mxu1 %v12015_v33  ;;  %7310 = vmatpush2.bf16.msra.mxu0 %v12016_v35  ;;  %v12058_v35 = vld [vmem:[#allocation7 + $0x2a4] ss:$24 sps:$4 sm:$0xff]  }
 0x4c1   : > { %7311 = vmatprep.subr.bf16.mxu0 %v12018_v11 }
 0x4c3   : > { %7335 = vmatpush1.bf16.msra.mxu1 %v12017_v52 }
 0x4c4   : > { %7336 = vmatprep.subr.bf16.mxu1 %v12019_v29  ;;  %7312 = vmatpush2.bf16.msra.mxu0 %v12020_v5  ;;  %v12059_v29 = vld [vmem:[#allocation7 + $0x424] ss:$24 sps:$4 sm:$0xff]  }
 0x4c5   : > { %7363 = vmatprep.subr.bf16.mxu0 %v12023_v56 }
 0x4c7   : > { %7337 = vmatpush1.bf16.msra.mxu1 %v12021_v20  ;;  %v13726_v53 = vpop.f32.mrf.mxu0  ;;  %7314 = vmatmul.mubr.bf16.vlgmr.msra.gmra.mxu0 %v13640_v28  ;;  %v12031_v28 = vld [vmem:[#allocation7 + $0xf4] ss:$24 sps:$4 sm:$0xff]   ;;  %v12060_v20 = vld [vmem:[#allocation7 + $0x2a0] ss:$24 sps:$4 sm:$0xff]  }
 0x4c8   : > { %7338 = vmatprep.subr.bf16.mxu1 %v12022_v22  ;;  %7364 = vmatpush1.bf16.msra.mxu0 %v12025_v46  ;;  %v12061_v22 = vld [vmem:[#allocation7 + $0x420] ss:$24 sps:$4 sm:$0xff]   ;;  %v12064_v46 = vld [vmem:[#allocation7 + $0x270] ss:$24 sps:$4 sm:$0xff]  }
 0x4c9   : > { %7395 = vmatprep.mubr.bf16.mxu0 %v13525_v18  ;;  %v13730_v57 = vpop.f32.mrf.mxu0  ;;  %7365 = vmatprep.subr.bf16.mxu0 %v12027_v55  ;;  %v12068_v55 = vld [vmem:[#allocation7 + $0x240] ss:$24 sps:$4 sm:$0xff]  }
 0x4cb   : > { %7339 = vmatpush2.bf16.msra.mxu1 %v12024_v9  ;;  %v7067_v62 = vpop.f32.mrf.mxu0  ;;  %v12063_v9 = vld [vmem:[#allocation7 + $0x3f4] ss:$24 sps:$4 sm:$0xff]  }
 0x4cc   : > { %7340 = vmatprep.subr.bf16.mxu1 %v12026_v60  ;;  %7366 = vmatpush1.bf16.msra.mxu0 %v12029_v16  ;;  %v12067_v60 = vld [vmem:[#allocation7 + $0x3c4] ss:$24 sps:$4 sm:$0xff]   ;;  %v12070_v62 = vld [vmem:[#allocation7 + $0x214] ss:$24 sps:$4 sm:$0xff]   ;;  %v12072_v16 = vld [vmem:[#allocation7 + $0x210] ss:$24 sps:$4 sm:$0xff]  }
 0x4cd   : > { %v7068_v63 = vpop.f32.mrf.mxu0  ;;  %7367 = vmatprep.subr.bf16.mxu0 %v12031_v28  ;;  %v12075_v28 = vld [vmem:[#allocation7 + $0x364] ss:$24 sps:$4 sm:$0xff]  }
 0x4ce   : > { %v12073_v63 = vld [vmem:[#allocation7 + $0x390] ss:$24 sps:$4 sm:$0xff]  }
 0x4cf   : > { %7341 = vmatpush2.bf16.msra.mxu1 %v12028_v43  ;;  %v12071_v43 = vld [vmem:[#allocation7 + $0x394] ss:$24 sps:$4 sm:$0xff]  }
 0x4d0   : > { %7342 = vmatprep.subr.bf16.mxu1 %v12030_v21  ;;  %7368 = vmatpush1.bf16.msra.mxu0 %v12033_v59  ;;  %v12074_v21 = vld [vmem:[#allocation7 + $0x1e4] ss:$24 sps:$4 sm:$0xff]   ;;  %v12077_v59 = vld [vmem:[#allocation7 + $0x360] ss:$24 sps:$4 sm:$0xff]  }
 0x4d1   : > { %7369 = vmatprep.subr.bf16.mxu0 %v12035_v38  ;;  %v12079_v38 = vld [vmem:[#allocation7 + $0x334] ss:$24 sps:$4 sm:$0xff]  }
 0x4d3   : > { %7343 = vmatpush2.bf16.msra.mxu1 %v12032_v47  ;;  %v12076_v47 = vld [vmem:[#allocation7 + $0x1e0] ss:$24 sps:$4 sm:$0xff]  }
 0x4d4   : > { %7344 = vmatprep.subr.bf16.mxu1 %v12034_v15  ;;  %7370 = vmatpush1.bf16.msra.mxu0 %v12037_v61  ;;  %v12078_v15 = vld [vmem:[#allocation7 + $0x1b4] ss:$24 sps:$4 sm:$0xff]   ;;  %v12081_v61 = vld [vmem:[#allocation7 + $0x330] ss:$24 sps:$4 sm:$0xff]  }
 0x4d5   : > { %7371 = vmatprep.subr.bf16.mxu0 %v12039_v54  ;;  %v12083_v54 = vld [vmem:[#allocation7 + $0x304] ss:$24 sps:$4 sm:$0xff]  }
 0x4d7   : > { %7345 = vmatpush2.bf16.msra.mxu1 %v12036_v44  ;;  %v12080_v44 = vld [vmem:[#allocation7 + $0x1b0] ss:$24 sps:$4 sm:$0xff]  }
 0x4d8   : > { %7346 = vmatprep.subr.bf16.mxu1 %v12038_v49  ;;  %7372 = vmatpush1.bf16.msra.mxu0 %v12041_v4  ;;  %v12082_v49 = vld [vmem:[#allocation7 + $0x184] ss:$24 sps:$4 sm:$0xff]   ;;  %v12085_v4 = vld [vmem:[#allocation7 + $0x300] ss:$24 sps:$4 sm:$0xff]  }
 0x4d9   : > { %7373 = vmatprep.subr.bf16.mxu0 %v12043_v39  ;;  %v12087_v39 = vld [vmem:[#allocation7 + $0x15c] ss:$24 sps:$4 sm:$0xff]  }
 0x4db   : > { %7347 = vmatpush2.bf16.msra.mxu1 %v12040_v40  ;;  %v12084_v40 = vld [vmem:[#allocation7 + $0x180] ss:$24 sps:$4 sm:$0xff]  }
 0x4dc   : > { %7348 = vmatprep.subr.bf16.mxu1 %v12042_v41  ;;  %7374 = vmatpush1.bf16.msra.mxu0 %v12045_v58  ;;  %v12086_v41 = vld [vmem:[#allocation7 + $0x5d4] ss:$24 sps:$4 sm:$0xff]   ;;  %v12088_v58 = vld [vmem:[#allocation7 + $0x5d0] ss:$24 sps:$4 sm:$0xff]  }
 0x4dd   : > { %7375 = vmatprep.subr.bf16.mxu0 %v12047_v51 }
 0x4df   : > { %7349 = vmatpush2.bf16.msra.mxu1 %v12044_v45 }
 0x4e0   : > { %7350 = vmatprep.subr.bf16.mxu1 %v12046_v14  ;;  %7376 = vmatpush1.bf16.msra.mxu0 %v12049_v0  ;;  %v12089_v14 = vld [vmem:[#allocation7 + $0x158] ss:$24 sps:$4 sm:$0xff]   ;;  %v12091_v0 = vld [vmem:[#allocation7 + $0x12c] ss:$24 sps:$4 sm:$0xff]  }
 0x4e1   : > { %7377 = vmatprep.subr.bf16.mxu0 %v12051_v48  ;;  %v12092_v48 = vld [vmem:[#allocation7 + $0x5a0] ss:$24 sps:$4 sm:$0xff]  }
 0x4e3   : > { %7351 = vmatpush2.bf16.msra.mxu1 %v12048_v30  ;;  %v12090_v30 = vld [vmem:[#allocation7 + $0x5a4] ss:$24 sps:$4 sm:$0xff]  }
 0x4e4   : > { %7352 = vmatprep.subr.bf16.mxu1 %v12050_v7  ;;  %7378 = vmatpush1.bf16.msra.mxu0 %v12053_v26 }
 0x4e5   : > { %7379 = vmatprep.subr.bf16.mxu0 %v12054_v34  ;;  %v12094_v34 = vld [vmem:[#allocation7 + $0x574] ss:$24 sps:$4 sm:$0xff]  }
 0x4e7   : > { %7353 = vmatpush2.bf16.msra.mxu1 %v12052_v31  ;;  %v12093_v31 = vld [vmem:[#allocation7 + $0x128] ss:$24 sps:$4 sm:$0xff]  }
 0x4e8   : > { %7404 = vmatprep.subr.bf16.mxu1 %v12055_v10  ;;  %7380 = vmatpush2.bf16.msra.mxu0 %v12056_v50  ;;  %v12095_v10 = vld [vmem:[#allocation7 + $0xfc] ss:$24 sps:$4 sm:$0xff]  }
 0x4e9   : > { %7381 = vmatprep.subr.bf16.mxu0 %v12058_v35  ;;  %v12098_v50 = vld [vmem:[#allocation7 + $0x544] ss:$24 sps:$4 sm:$0xff]   ;;  %v12101_v35 = vld [vmem:[#allocation7 + $0xc8] ss:$24 sps:$4 sm:$0xff]  }
 0x4ea   : > { %v7104_v12 = vpop.f32.mrf.mxu1  ;;  %7355 = vmatmul.mubr.bf16.vlgmr.msra.gmra.mxu1 %v13652_v8 }
 0x4eb   : > { %v7105_v3 = vadd.f32 %v7104_v12, %v13726_v53  ;;  %7405 = vmatpush1.bf16.msra.mxu1 %v12057_v23  ;;  %7436 = vmatprep.mubr.bf16.mxu1 %v13557_v27  ;;  %v12062_v53 = vld [vmem:[#allocation7 + $0x274] ss:$24 sps:$4 sm:$0xff]   ;;  %v12096_v12 = vld [vmem:[#allocation7 + $0x570] ss:$24 sps:$4 sm:$0xff]  }
 0x4ec   : > { %v7106_v33 = vpop.f32.mrf.mxu1  ;;  %7406 = vmatprep.subr.bf16.mxu1 %v12059_v29  ;;  %7382 = vmatpush2.bf16.msra.mxu0 %v12060_v20  ;;  %v12099_v23 = vld [vmem:[#allocation7 + $0xcc] ss:$24 sps:$4 sm:$0xff]   ;;  %v12103_v29 = vld [vmem:[#allocation7 + $0x9c] ss:$24 sps:$4 sm:$0xff]   ;;  %v12105_v20 = vld [vmem:[#allocation7 + $0x98] ss:$24 sps:$4 sm:$0xff]  }
 0x4ed   : > { %v13736_v52 = vadd.f32 %v7105_v3, %v13688_v13  ;;  %v7107_v11 = vadd.f32 %v7106_v33, %v13730_v57  ;;  %7383 = vmatprep.subr.bf16.mxu0 %v12062_v53  ;;  %v12065_v13 = vld [vmem:[#allocation7 + $0x3f0] ss:$24 sps:$4 sm:$0xff]   ;;  %v12066_v57 = vld [vmem:[#allocation7 + $0x244] ss:$24 sps:$4 sm:$0xff]   ;;  %v12100_v33 = vld [vmem:[#allocation7 + $0x540] ss:$24 sps:$4 sm:$0xff]  }
 0x4ee   : > { %v7108_v5 = vpop.f32.mrf.mxu1  ;;  %v12097_v3 = vld [vmem:[#allocation7 + $0xf8] ss:$24 sps:$4 sm:$0xff]  }
 0x4ef   : > { %v13740_v8 = vadd.f32 %v7107_v11, %v13692_v6  ;;  %7407 = vmatpush1.bf16.msra.mxu1 %v12061_v22  ;;  %v12069_v6 = vld [vmem:[#allocation7 + $0x3c0] ss:$24 sps:$4 sm:$0xff]   ;;  %v12102_v11 = vld [vmem:[#allocation7 + $0x514] ss:$24 sps:$4 sm:$0xff]   ;;  %v12104_v5 = vld [vmem:[#allocation7 + $0x510] ss:$24 sps:$4 sm:$0xff]  }
 0x4f0   : > { %v7109_v56 = vpop.f32.mrf.mxu1  ;;  %7408 = vmatprep.subr.bf16.mxu1 %v12063_v9  ;;  %7384 = vmatpush2.bf16.msra.mxu0 %v12064_v46  ;;  %v12106_v22 = vld [vmem:[#allocation7 + $0x4e4] ss:$24 sps:$4 sm:$0xff]   ;;  %v12108_v53 = vld [vmem:[#allocation7 + $0x4e0] ss:$24 sps:$4 sm:$0xff]   ;;  %v12110_v46 = vld [vmem:[#allocation7 + $0x4b4] ss:$24 sps:$4 sm:$0xff]  }
 0x4f1   : > { %7385 = vmatprep.subr.bf16.mxu0 %v12066_v57  ;;  %v12107_v56 = vld [vmem:[#allocation7 + $0x6c] ss:$24 sps:$4 sm:$0xff]   ;;  %v12109_v9 = vld [vmem:[#allocation7 + $0x68] ss:$24 sps:$4 sm:$0xff]  }
 0x4f2   : > { %v12112_v57 = vld [vmem:[#allocation7 + $0x4b0] ss:$24 sps:$4 sm:$0xff]  }
 0x4f3   : > { %7409 = vmatpush1.bf16.msra.mxu1 %v12065_v13  ;;  %v12111_v13 = vld [vmem:[#allocation7 + $0x3c] ss:$24 sps:$4 sm:$0xff]  }
 0x4f4   : > { %7410 = vmatprep.subr.bf16.mxu1 %v12067_v60  ;;  %7386 = vmatpush2.bf16.msra.mxu0 %v12068_v55  ;;  %v12113_v60 = vld [vmem:[#allocation7 + $0x38] ss:$24 sps:$4 sm:$0xff]   ;;  %v12114_v55 = vld [vmem:[#allocation7 + $0x484] ss:$24 sps:$4 sm:$0xff]  }
 0x4f5   : > { %7387 = vmatprep.subr.bf16.mxu0 %v12070_v62  ;;  %v12116_v62 = vld [vmem:[#allocation7 + $0x480] ss:$24 sps:$4 sm:$0xff]  }
 0x4f7   : > { %7411 = vmatpush1.bf16.msra.mxu1 %v12069_v6  ;;  %v12115_v6 = vld [vmem:[#allocation7 + $0xc] ss:$24 sps:$4 sm:$0xff]  }
 0x4f8   : > { %7412 = vmatprep.subr.bf16.mxu1 %v12071_v43  ;;  %7388 = vmatpush2.bf16.msra.mxu0 %v12072_v16  ;;  %v12117_v43 = vld [vmem:[#allocation7 + $0x8] ss:$24 sps:$4 sm:$0xff]   ;;  %v12118_v16 = vld [vmem:[#allocation7 + $0x2dc] ss:$24 sps:$4 sm:$0xff]  }
 0x4f9   : > { %7389 = vmatprep.subr.bf16.mxu0 %v12074_v21 }
 0x4fb   : > { %7413 = vmatpush1.bf16.msra.mxu1 %v12073_v63  ;;  %v12119_v63 = vld [vmem:[#allocation7 + $0x45c] ss:$24 sps:$4 sm:$0xff]  }
 0x4fc   : > { %7414 = vmatprep.subr.bf16.mxu1 %v12075_v28  ;;  %7390 = vmatpush2.bf16.msra.mxu0 %v12076_v47  ;;  %v12120_v47 = vld [vmem:[#allocation7 + $0x2d8] ss:$24 sps:$4 sm:$0xff]  }
 0x4fd   : > { %7391 = vmatprep.subr.bf16.mxu0 %v12078_v15 }
 0x4ff   : > { %7415 = vmatpush1.bf16.msra.mxu1 %v12077_v59  ;;  %v12121_v59 = vld [vmem:[#allocation7 + $0x458] ss:$24 sps:$4 sm:$0xff]  }
 0x500   : > { %7416 = vmatprep.subr.bf16.mxu1 %v12079_v38  ;;  %7392 = vmatpush2.bf16.msra.mxu0 %v12080_v44  ;;  %v12122_v38 = vld [vmem:[#allocation7 + $0x2ac] ss:$24 sps:$4 sm:$0xff]  }
 0x501   : > { %7393 = vmatprep.subr.bf16.mxu0 %v12082_v49 }
 0x503   : > { %7417 = vmatpush1.bf16.msra.mxu1 %v12081_v61  ;;  %v12123_v61 = vld [vmem:[#allocation7 + $0x42c] ss:$24 sps:$4 sm:$0xff]  }
 0x504   : > { %7418 = vmatprep.subr.bf16.mxu1 %v12083_v54  ;;  %7394 = vmatpush2.bf16.msra.mxu0 %v12084_v40  ;;  %v12124_v54 = vld [vmem:[#allocation7 + $0x2a8] ss:$24 sps:$4 sm:$0xff]  }
 0x505   : > { %7445 = vmatprep.subr.bf16.mxu0 %v12087_v39  ;;  %v12125_v40 = vld [vmem:[#allocation7 + $0x428] ss:$24 sps:$4 sm:$0xff]   ;;  %v12127_v39 = vld [vmem:[#allocation7 + $0x3fc] ss:$24 sps:$4 sm:$0xff]  }
 0x507   : > { %7419 = vmatpush1.bf16.msra.mxu1 %v12085_v4  ;;  %v13742_v45 = vpop.f32.mrf.mxu0  ;;  %7396 = vmatmul.mubr.bf16.vlgmr.msra.gmra.mxu0 %v13527_v37 }
 0x508   : > { %7420 = vmatprep.subr.bf16.mxu1 %v12086_v41  ;;  %7446 = vmatpush1.bf16.msra.mxu0 %v12089_v14  ;;  %v12126_v41 = vld [vmem:[#allocation7 + $0x27c] ss:$24 sps:$4 sm:$0xff]   ;;  %v12130_v14 = vld [vmem:[#allocation7 + $0x24c] ss:$24 sps:$4 sm:$0xff]  }
 0x509   : > { %7477 = vmatprep.mubr.bf16.mxu0 %v13525_v18  ;;  %v13746_v51 = vpop.f32.mrf.mxu0  ;;  %7447 = vmatprep.subr.bf16.mxu0 %v12091_v0  ;;  %v12133_v0 = vld [vmem:[#allocation7 + $0x3c8] ss:$24 sps:$4 sm:$0xff]  }
 0x50b   : > { %7421 = vmatpush2.bf16.msra.mxu1 %v12088_v58  ;;  %v7155_v7 = vpop.f32.mrf.mxu0  ;;  %v12129_v58 = vld [vmem:[#allocation7 + $0x3f8] ss:$24 sps:$4 sm:$0xff]  }
 0x50c   : > { %7422 = vmatprep.subr.bf16.mxu1 %v12090_v30  ;;  %7448 = vmatpush1.bf16.msra.mxu0 %v12093_v31  ;;  %v12132_v30 = vld [vmem:[#allocation7 + $0x248] ss:$24 sps:$4 sm:$0xff]   ;;  %v12134_v7 = vld [vmem:[#allocation7 + $0x21c] ss:$24 sps:$4 sm:$0xff]   ;;  %v12136_v31 = vld [vmem:[#allocation7 + $0x218] ss:$24 sps:$4 sm:$0xff]  }
 0x50d   : > { %v7156_v26 = vpop.f32.mrf.mxu0  ;;  %7449 = vmatprep.subr.bf16.mxu0 %v12095_v10  ;;  %v12139_v10 = vld [vmem:[#allocation7 + $0x36c] ss:$24 sps:$4 sm:$0xff]  }
 0x50e   : > { %v12137_v26 = vld [vmem:[#allocation7 + $0x398] ss:$24 sps:$4 sm:$0xff]  }
 0x50f   : > { %7423 = vmatpush2.bf16.msra.mxu1 %v12092_v48  ;;  %v12135_v48 = vld [vmem:[#allocation7 + $0x39c] ss:$24 sps:$4 sm:$0xff]  }
 0x510   : > { %7424 = vmatprep.subr.bf16.mxu1 %v12094_v34  ;;  %7450 = vmatpush1.bf16.msra.mxu0 %v12097_v3  ;;  %v12138_v34 = vld [vmem:[#allocation7 + $0x1ec] ss:$24 sps:$4 sm:$0xff]   ;;  %v12141_v3 = vld [vmem:[#allocation7 + $0x368] ss:$24 sps:$4 sm:$0xff]  }
 0x511   : > { %7451 = vmatprep.subr.bf16.mxu0 %v12099_v23  ;;  %v12143_v23 = vld [vmem:[#allocation7 + $0x33c] ss:$24 sps:$4 sm:$0xff]  }
 0x513   : > { %7425 = vmatpush2.bf16.msra.mxu1 %v12096_v12  ;;  %v12140_v12 = vld [vmem:[#allocation7 + $0x1e8] ss:$24 sps:$4 sm:$0xff]  }
 0x514   : > { %7426 = vmatprep.subr.bf16.mxu1 %v12098_v50  ;;  %7452 = vmatpush1.bf16.msra.mxu0 %v12101_v35  ;;  %v12142_v50 = vld [vmem:[#allocation7 + $0x1bc] ss:$24 sps:$4 sm:$0xff]   ;;  %v12145_v35 = vld [vmem:[#allocation7 + $0x338] ss:$24 sps:$4 sm:$0xff]  }
 0x515   : > { %7453 = vmatprep.subr.bf16.mxu0 %v12103_v29  ;;  %v12147_v29 = vld [vmem:[#allocation7 + $0x30c] ss:$24 sps:$4 sm:$0xff]  }
 0x517   : > { %7427 = vmatpush2.bf16.msra.mxu1 %v12100_v33  ;;  %v12144_v33 = vld [vmem:[#allocation7 + $0x1b8] ss:$24 sps:$4 sm:$0xff]  }
 0x518   : > { %7428 = vmatprep.subr.bf16.mxu1 %v12102_v11  ;;  %7454 = vmatpush1.bf16.msra.mxu0 %v12105_v20  ;;  %v12146_v11 = vld [vmem:[#allocation7 + $0x18c] ss:$24 sps:$4 sm:$0xff]   ;;  %v12149_v20 = vld [vmem:[#allocation7 + $0x308] ss:$24 sps:$4 sm:$0xff]  }
 0x519   : > { %7455 = vmatprep.subr.bf16.mxu0 %v12107_v56  ;;  %v12151_v56 = vld [vmem:[#allocation7 + $0x164] ss:$24 sps:$4 sm:$0xff]  }
 0x51b   : > { %7429 = vmatpush2.bf16.msra.mxu1 %v12104_v5  ;;  %v12148_v5 = vld [vmem:[#allocation7 + $0x188] ss:$24 sps:$4 sm:$0xff]  }
 0x51c   : > { %7430 = vmatprep.subr.bf16.mxu1 %v12106_v22  ;;  %7456 = vmatpush1.bf16.msra.mxu0 %v12109_v9  ;;  %v12150_v22 = vld [vmem:[#allocation7 + $0x5dc] ss:$24 sps:$4 sm:$0xff]   ;;  %v12152_v9 = vld [vmem:[#allocation7 + $0x5d8] ss:$24 sps:$4 sm:$0xff]  }
 0x51d   : > { %7457 = vmatprep.subr.bf16.mxu0 %v12111_v13 }
 0x51f   : > { %7431 = vmatpush2.bf16.msra.mxu1 %v12108_v53 }
 0x520   : > { %7432 = vmatprep.subr.bf16.mxu1 %v12110_v46  ;;  %7458 = vmatpush1.bf16.msra.mxu0 %v12113_v60  ;;  %v12153_v46 = vld [vmem:[#allocation7 + $0x160] ss:$24 sps:$4 sm:$0xff]   ;;  %v12155_v60 = vld [vmem:[#allocation7 + $0x134] ss:$24 sps:$4 sm:$0xff]  }
 0x521   : > { %7459 = vmatprep.subr.bf16.mxu0 %v12115_v6  ;;  %v12156_v6 = vld [vmem:[#allocation7 + $0x5a8] ss:$24 sps:$4 sm:$0xff]  }
 0x523   : > { %7433 = vmatpush2.bf16.msra.mxu1 %v12112_v57  ;;  %v12154_v57 = vld [vmem:[#allocation7 + $0x5ac] ss:$24 sps:$4 sm:$0xff]  }
 0x524   : > { %7434 = vmatprep.subr.bf16.mxu1 %v12114_v55  ;;  %7460 = vmatpush1.bf16.msra.mxu0 %v12117_v43 }
 0x525   : > { %7461 = vmatprep.subr.bf16.mxu0 %v12118_v16  ;;  %v12158_v16 = vld [vmem:[#allocation7 + $0x57c] ss:$24 sps:$4 sm:$0xff]  }
 0x527   : > { %7435 = vmatpush2.bf16.msra.mxu1 %v12116_v62  ;;  %v12157_v62 = vld [vmem:[#allocation7 + $0x130] ss:$24 sps:$4 sm:$0xff]  }
 0x528   : > { %7486 = vmatprep.subr.bf16.mxu1 %v12119_v63  ;;  %7462 = vmatpush2.bf16.msra.mxu0 %v12120_v47  ;;  %v12159_v63 = vld [vmem:[#allocation7 + $0x104] ss:$24 sps:$4 sm:$0xff]   ;;  %v12161_v47 = vld [vmem:[#allocation7 + $0x100] ss:$24 sps:$4 sm:$0xff]  }
 0x529   : > { %7463 = vmatprep.subr.bf16.mxu0 %v12122_v38  ;;  %v12164_v38 = vld [vmem:[#allocation7 + $0x548] ss:$24 sps:$4 sm:$0xff]  }
 0x52a   : > { %v7192_v21 = vpop.f32.mrf.mxu1  ;;  %7437 = vmatmul.mubr.bf16.vlgmr.msra.gmra.mxu1 %v13559_v32 }
 0x52b   : > { %v13750_v28 = vadd.f32 %v7192_v21, %v13742_v45  ;;  %7487 = vmatpush1.bf16.msra.mxu1 %v12121_v59  ;;  %7518 = vmatprep.mubr.bf16.mxu1 %v13557_v27  ;;  %v12128_v45 = vld [vmem:[#allocation7 + $0x278] ss:$24 sps:$4 sm:$0xff]   ;;  %v12162_v59 = vld [vmem:[#allocation7 + $0x54c] ss:$24 sps:$4 sm:$0xff]  }
 0x52c   : > { %v7194_v15 = vpop.f32.mrf.mxu1  ;;  %7488 = vmatprep.subr.bf16.mxu1 %v12123_v61  ;;  %7464 = vmatpush2.bf16.msra.mxu0 %v12124_v54  ;;  %v12160_v21 = vld [vmem:[#allocation7 + $0x578] ss:$24 sps:$4 sm:$0xff]   ;;  %v12167_v54 = vld [vmem:[#allocation7 + $0xa4] ss:$24 sps:$4 sm:$0xff]  }
 0x52d   : > { %v13754_v44 = vadd.f32 %v7194_v15, %v13746_v51  ;;  %7465 = vmatprep.subr.bf16.mxu0 %v12126_v41  ;;  %v12131_v51 = vld [vmem:[#allocation7 + $0x3cc] ss:$24 sps:$4 sm:$0xff]   ;;  %v12165_v61 = vld [vmem:[#allocation7 + $0xd0] ss:$24 sps:$4 sm:$0xff]  }
 0x52e   : > { %v7196_v49 = vpop.f32.mrf.mxu1  ;;  %v12163_v15 = vld [vmem:[#allocation7 + $0xd4] ss:$24 sps:$4 sm:$0xff]  }
 0x52f   : > { %7489 = vmatpush1.bf16.msra.mxu1 %v12125_v40  ;;  %v12166_v49 = vld [vmem:[#allocation7 + $0x51c] ss:$24 sps:$4 sm:$0xff]   ;;  %v12168_v40 = vld [vmem:[#allocation7 + $0x518] ss:$24 sps:$4 sm:$0xff]   ;;  %v12170_v41 = vld [vmem:[#allocation7 + $0x4ec] ss:$24 sps:$4 sm:$0xff]  }
 0x530   : > { %v7197_v4 = vpop.f32.mrf.mxu1  ;;  %7490 = vmatprep.subr.bf16.mxu1 %v12127_v39  ;;  %7466 = vmatpush2.bf16.msra.mxu0 %v12128_v45  ;;  %v12171_v39 = vld [vmem:[#allocation7 + $0x74] ss:$24 sps:$4 sm:$0xff]   ;;  %v12172_v45 = vld [vmem:[#allocation7 + $0x4e8] ss:$24 sps:$4 sm:$0xff]  }
 0x531   : > { %7467 = vmatprep.subr.bf16.mxu0 %v12130_v14  ;;  %v12169_v4 = vld [vmem:[#allocation7 + $0xa0] ss:$24 sps:$4 sm:$0xff]   ;;  %v12174_v14 = vld [vmem:[#allocation7 + $0x4bc] ss:$24 sps:$4 sm:$0xff]  }
 0x533   : > { %7491 = vmatpush1.bf16.msra.mxu1 %v12129_v58  ;;  %v12173_v58 = vld [vmem:[#allocation7 + $0x70] ss:$24 sps:$4 sm:$0xff]  }
 0x534   : > { %7492 = vmatprep.subr.bf16.mxu1 %v12131_v51  ;;  %7468 = vmatpush2.bf16.msra.mxu0 %v12132_v30  ;;  %v12175_v51 = vld [vmem:[#allocation7 + $0x44] ss:$24 sps:$4 sm:$0xff]   ;;  %v12176_v30 = vld [vmem:[#allocation7 + $0x4b8] ss:$24 sps:$4 sm:$0xff]  }
 0x535   : > { %7469 = vmatprep.subr.bf16.mxu0 %v12134_v7  ;;  %v12178_v7 = vld [vmem:[#allocation7 + $0x48c] ss:$24 sps:$4 sm:$0xff]  }
 0x537   : > { %7493 = vmatpush1.bf16.msra.mxu1 %v12133_v0  ;;  %v12177_v0 = vld [vmem:[#allocation7 + $0x40] ss:$24 sps:$4 sm:$0xff]  }
 0x538   : > { %7494 = vmatprep.subr.bf16.mxu1 %v12135_v48  ;;  %7470 = vmatpush2.bf16.msra.mxu0 %v12136_v31  ;;  %v12179_v48 = vld [vmem:[#allocation7 + $0x14] ss:$24 sps:$4 sm:$0xff]   ;;  %v12180_v31 = vld [vmem:[#allocation7 + $0x488] ss:$24 sps:$4 sm:$0xff]  }
 0x539   : > { %7471 = vmatprep.subr.bf16.mxu0 %v12138_v34  ;;  %v12182_v34 = vld [vmem:[#allocation7 + $0x2e4] ss:$24 sps:$4 sm:$0xff]  }
 0x53b   : > { %7495 = vmatpush1.bf16.msra.mxu1 %v12137_v26  ;;  %v12181_v26 = vld [vmem:[#allocation7 + $0x10] ss:$24 sps:$4 sm:$0xff]  }
 0x53c   : > { %7496 = vmatprep.subr.bf16.mxu1 %v12139_v10  ;;  %7472 = vmatpush2.bf16.msra.mxu0 %v12140_v12  ;;  %v12183_v10 = vld [vmem:[#allocation7 + $0x464] ss:$24 sps:$4 sm:$0xff]  }
 0x53d   : > { %7473 = vmatprep.subr.bf16.mxu0 %v12142_v50  ;;  %v12184_v50 = vld [vmem:[#allocation7 + $0x2e0] ss:$24 sps:$4 sm:$0xff]  }
 0x53f   : > { %7497 = vmatpush1.bf16.msra.mxu1 %v12141_v3 }
 0x540   : > { %7498 = vmatprep.subr.bf16.mxu1 %v12143_v23  ;;  %7474 = vmatpush2.bf16.msra.mxu0 %v12144_v33  ;;  %v12185_v23 = vld [vmem:[#allocation7 + $0x460] ss:$24 sps:$4 sm:$0xff]  }
 0x541   : > { %7475 = vmatprep.subr.bf16.mxu0 %v12146_v11 }
 0x543   : > { %7499 = vmatpush1.bf16.msra.mxu1 %v12145_v35  ;;  %v12186_v35 = vld [vmem:[#allocation7 + $0x2b4] ss:$24 sps:$4 sm:$0xff]  }
 0x544   : > { %7500 = vmatprep.subr.bf16.mxu1 %v12147_v29  ;;  %7476 = vmatpush2.bf16.msra.mxu0 %v12148_v5  ;;  %v12187_v29 = vld [vmem:[#allocation7 + $0x434] ss:$24 sps:$4 sm:$0xff]  }
 0x545   : > { %7527 = vmatprep.subr.bf16.mxu0 %v12151_v56 }
 0x547   : > { %7501 = vmatpush1.bf16.msra.mxu1 %v12149_v20  ;;  %v13756_v53 = vpop.f32.mrf.mxu0  ;;  %7478 = vmatmul.mubr.bf16.vlgmr.msra.gmra.mxu0 %v13527_v37  ;;  %v12188_v20 = vld [vmem:[#allocation7 + $0x2b0] ss:$24 sps:$4 sm:$0xff]  }
 0x548   : > { %7502 = vmatprep.subr.bf16.mxu1 %v12150_v22  ;;  %7528 = vmatpush1.bf16.msra.mxu0 %v12153_v46  ;;  %v12189_v22 = vld [vmem:[#allocation7 + $0x430] ss:$24 sps:$4 sm:$0xff]   ;;  %v12192_v46 = vld [vmem:[#allocation7 + $0x280] ss:$24 sps:$4 sm:$0xff]  }
 0x549   : > { %7559 = vmatprep.mubr.bf16.mxu0 %v13525_v18  ;;  %v13760_v13 = vpop.f32.mrf.mxu0  ;;  %7529 = vmatprep.subr.bf16.mxu0 %v12155_v60  ;;  %v12194_v60 = vld [vmem:[#allocation7 + $0x254] ss:$24 sps:$4 sm:$0xff]  }
 0x54b   : > { %7503 = vmatpush2.bf16.msra.mxu1 %v12152_v9  ;;  %v7237_v55 = vpop.f32.mrf.mxu0  ;;  %v12191_v9 = vld [vmem:[#allocation7 + $0x404] ss:$24 sps:$4 sm:$0xff]  }
 0x54c   : > { %7504 = vmatprep.subr.bf16.mxu1 %v12154_v57  ;;  %7530 = vmatpush1.bf16.msra.mxu0 %v12157_v62  ;;  %v12193_v57 = vld [vmem:[#allocation7 + $0x400] ss:$24 sps:$4 sm:$0xff]   ;;  %v12196_v55 = vld [vmem:[#allocation7 + $0x250] ss:$24 sps:$4 sm:$0xff]   ;;  %v12198_v62 = vld [vmem:[#allocation7 + $0x224] ss:$24 sps:$4 sm:$0xff]  }
 0x54d   : > { %v7238_v43 = vpop.f32.mrf.mxu0  ;;  %7531 = vmatprep.subr.bf16.mxu0 %v12159_v63  ;;  %v12201_v63 = vld [vmem:[#allocation7 + $0x3a0] ss:$24 sps:$4 sm:$0xff]  }
 0x54e   : > { %v12199_v43 = vld [vmem:[#allocation7 + $0x3a4] ss:$24 sps:$4 sm:$0xff]  }
 0x54f   : > { %7505 = vmatpush2.bf16.msra.mxu1 %v12156_v6  ;;  %v12197_v6 = vld [vmem:[#allocation7 + $0x3d0] ss:$24 sps:$4 sm:$0xff]  }
 0x550   : > { %7506 = vmatprep.subr.bf16.mxu1 %v12158_v16  ;;  %7532 = vmatpush1.bf16.msra.mxu0 %v12161_v47  ;;  %v12200_v16 = vld [vmem:[#allocation7 + $0x220] ss:$24 sps:$4 sm:$0xff]   ;;  %v12203_v47 = vld [vmem:[#allocation7 + $0x374] ss:$24 sps:$4 sm:$0xff]  }
 0x551   : > { %7533 = vmatprep.subr.bf16.mxu0 %v12163_v15  ;;  %v12205_v15 = vld [vmem:[#allocation7 + $0x370] ss:$24 sps:$4 sm:$0xff]  }
 0x553   : > { %7507 = vmatpush2.bf16.msra.mxu1 %v12160_v21  ;;  %v12202_v21 = vld [vmem:[#allocation7 + $0x1f4] ss:$24 sps:$4 sm:$0xff]  }
 0x554   : > { %7508 = vmatprep.subr.bf16.mxu1 %v12162_v59  ;;  %7534 = vmatpush1.bf16.msra.mxu0 %v12165_v61  ;;  %v12204_v59 = vld [vmem:[#allocation7 + $0x1f0] ss:$24 sps:$4 sm:$0xff]   ;;  %v12207_v61 = vld [vmem:[#allocation7 + $0x344] ss:$24 sps:$4 sm:$0xff]  }
 0x555   : > { %7535 = vmatprep.subr.bf16.mxu0 %v12167_v54  ;;  %v12208_v54 = vld [vmem:[#allocation7 + $0x1c0] ss:$24 sps:$4 sm:$0xff]  }
 0x557   : > { %7509 = vmatpush2.bf16.msra.mxu1 %v12164_v38  ;;  %v12206_v38 = vld [vmem:[#allocation7 + $0x1c4] ss:$24 sps:$4 sm:$0xff]  }
 0x558   : > { %7510 = vmatprep.subr.bf16.mxu1 %v12166_v49  ;;  %7536 = vmatpush1.bf16.msra.mxu0 %v12169_v4  ;;  %v7619_v49 = vshll.u32 %v13525_v18, 16  ;;  %v12210_v4 = vld [vmem:[#allocation7 + $0x194] ss:$24 sps:$4 sm:$0xff]  }
 0x559   : > { %7537 = vmatprep.subr.bf16.mxu0 %v12171_v39 }
 0x55a   : > { %v7621_v39 = vrot.slane %v7619_v49, 1  ;;  %v12245_v49 = vld [vmem:[#allocation7 + $0xc00] ss:$24 sps:$4 sm:$0xff]  }
 0x55b   : > { %7511 = vmatpush2.bf16.msra.mxu1 %v12168_v40  ;;  %v12209_v40 = vld [vmem:[#allocation7 + $0x340] ss:$24 sps:$4 sm:$0xff]  }
 0x55c   : > { %7512 = vmatprep.subr.bf16.mxu1 %v12170_v41  ;;  %7538 = vmatpush1.bf16.msra.mxu0 %v12173_v58  ;;  %v12211_v41 = vld [vmem:[#allocation7 + $0x314] ss:$24 sps:$4 sm:$0xff]   ;;  %v12213_v58 = vld [vmem:[#allocation7 + $0x310] ss:$24 sps:$4 sm:$0xff]  }
 0x55d   : > { %7539 = vmatprep.subr.bf16.mxu0 %v12175_v51  ;;  %v12215_v51 = vld [vmem:[#allocation7 + $0xd54] ss:$24 sps:$4 sm:$0xff]  }
 0x55f   : > { %7513 = vmatpush2.bf16.msra.mxu1 %v12172_v45  ;;  %v12212_v45 = vld [vmem:[#allocation7 + $0x190] ss:$24 sps:$4 sm:$0xff]  }
 0x560   : > { %7514 = vmatprep.subr.bf16.mxu1 %v12174_v14  ;;  %7540 = vmatpush1.bf16.msra.mxu0 %v12177_v0  ;;  %v12214_v14 = vld [vmem:[#allocation7 + $0x5e4] ss:$24 sps:$4 sm:$0xff]  }
 0x561   : > { %7541 = vmatprep.subr.bf16.mxu0 %v12179_v48  ;;  %v12216_v48 = vld [vmem:[#allocation7 + $0x5e0] ss:$24 sps:$4 sm:$0xff]  }
 0x563   : > { %7515 = vmatpush2.bf16.msra.mxu1 %v12176_v30  ;;  %v7617_v30 = vshrl.u32 %v13525_v18, 16  ;;  %v12220_v18 = vld [vmem:[#allocation7 + $0x5b0] ss:$24 sps:$4 sm:$0xff]  }
 0x564   : > { %7516 = vmatprep.subr.bf16.mxu1 %v12178_v7  ;;  %7542 = vmatpush1.bf16.msra.mxu0 %v12181_v26 }
 0x565   : > { %7543 = vmatprep.subr.bf16.mxu0 %v12182_v34  ;;  %v13775_v7 = vor.u32 %v7621_v39, %v7617_v30  ;;  %v12218_v34 = vld [vmem:[#allocation7 + $0x5b4] ss:$24 sps:$4 sm:$0xff]   ;;  %v12250_v30 = vld [vmem:[#allocation7 + $0xea4] ss:$24 sps:$4 sm:$0xff]  }
 0x567   : > { %7517 = vmatpush2.bf16.msra.mxu1 %v12180_v31  ;;  %v12217_v31 = vld [vmem:[#allocation7 + $0xd50] ss:$24 sps:$4 sm:$0xff]  }
 0x568   : > { %7568 = vmatprep.subr.bf16.mxu1 %v12183_v10  ;;  %7544 = vmatpush2.bf16.msra.mxu0 %v12184_v50  ;;  %v12219_v10 = vld [vmem:[#allocation7 + $0xd24] ss:$24 sps:$4 sm:$0xff]   ;;  %v12221_v50 = vld [vmem:[#allocation7 + $0xd20] ss:$24 sps:$4 sm:$0xff]  }
 0x569   : > { %7545 = vmatprep.subr.bf16.mxu0 %v12186_v35  ;;  %v12223_v35 = vld [vmem:[#allocation7 + $0xcf4] ss:$24 sps:$4 sm:$0xff]  }
 0x56a   : > { %v7274_v12 = vpop.f32.mrf.mxu1  ;;  %7519 = vmatmul.mubr.bf16.vlgmr.msra.gmra.mxu1 %v13559_v32 }
 0x56b   : > { %v13764_v3 = vadd.f32 %v7274_v12, %v13756_v53  ;;  %7569 = vmatpush1.bf16.msra.mxu1 %v12185_v23  ;;  %7600 = vmatprep.mubr.bf16.mxu1 %v13557_v27  ;;  %v12190_v53 = vld [vmem:[#allocation7 + $0x284] ss:$24 sps:$4 sm:$0xff]  }
 0x56c   : > { %v7276_v33 = vpop.f32.mrf.mxu1  ;;  %7570 = vmatprep.subr.bf16.mxu1 %v12187_v29  ;;  %7546 = vmatpush2.bf16.msra.mxu0 %v12188_v20  ;;  %v12224_v29 = vld [vmem:[#allocation7 + $0x580] ss:$24 sps:$4 sm:$0xff]   ;;  %v12226_v20 = vld [vmem:[#allocation7 + $0x554] ss:$24 sps:$4 sm:$0xff]  }
 0x56d   : > { %v13768_v11 = vadd.f32 %v7276_v33, %v13760_v13  ;;  %7547 = vmatprep.subr.bf16.mxu0 %v12190_v53  ;;  %v12195_v13 = vld [vmem:[#allocation7 + $0x3d4] ss:$24 sps:$4 sm:$0xff]   ;;  %v12222_v33 = vld [vmem:[#allocation7 + $0x584] ss:$24 sps:$4 sm:$0xff]   ;;  %v12229_v53 = vld [vmem:[#allocation7 + $0xcc0] ss:$24 sps:$4 sm:$0xff]  }
 0x56e   : > { %v7278_v5 = vpop.f32.mrf.mxu1 }
 0x56f   : > { %7571 = vmatpush1.bf16.msra.mxu1 %v12189_v22  ;;  %v12225_v5 = vld [vmem:[#allocation7 + $0xcf0] ss:$24 sps:$4 sm:$0xff]   ;;  %v12227_v22 = vld [vmem:[#allocation7 + $0xcc4] ss:$24 sps:$4 sm:$0xff]  }
 0x570   : > { %v7279_v56 = vpop.f32.mrf.mxu1  ;;  %7572 = vmatprep.subr.bf16.mxu1 %v12191_v9  ;;  %7548 = vmatpush2.bf16.msra.mxu0 %v12192_v46  ;;  %v12230_v9 = vld [vmem:[#allocation7 + $0x524] ss:$24 sps:$4 sm:$0xff]   ;;  %v12231_v46 = vld [vmem:[#allocation7 + $0xc94] ss:$24 sps:$4 sm:$0xff]  }
 0x571   : > { %7549 = vmatprep.subr.bf16.mxu0 %v12194_v60  ;;  %v12228_v56 = vld [vmem:[#allocation7 + $0x550] ss:$24 sps:$4 sm:$0xff]  }
 0x572   : > { %v12233_v60 = vld [vmem:[#allocation7 + $0xc90] ss:$24 sps:$4 sm:$0xff]  }
 0x573   : > { %7573 = vmatpush1.bf16.msra.mxu1 %v12193_v57  ;;  %v12232_v57 = vld [vmem:[#allocation7 + $0x520] ss:$24 sps:$4 sm:$0xff]  }
 0x574   : > { %7574 = vmatprep.subr.bf16.mxu1 %v12195_v13  ;;  %7550 = vmatpush2.bf16.msra.mxu0 %v12196_v55  ;;  %v12234_v13 = vld [vmem:[#allocation7 + $0x4f4] ss:$24 sps:$4 sm:$0xff]   ;;  %v12235_v55 = vld [vmem:[#allocation7 + $0xc64] ss:$24 sps:$4 sm:$0xff]  }
 0x575   : > { %7551 = vmatprep.subr.bf16.mxu0 %v12198_v62  ;;  %v12237_v62 = vld [vmem:[#allocation7 + $0xc60] ss:$24 sps:$4 sm:$0xff]  }
 0x577   : > { %7575 = vmatpush1.bf16.msra.mxu1 %v12197_v6  ;;  %v12236_v6 = vld [vmem:[#allocation7 + $0x4f0] ss:$24 sps:$4 sm:$0xff]  }
 0x578   : > { %7576 = vmatprep.subr.bf16.mxu1 %v12199_v43  ;;  %7552 = vmatpush2.bf16.msra.mxu0 %v12200_v16  ;;  %v12238_v43 = vld [vmem:[#allocation7 + $0x4c4] ss:$24 sps:$4 sm:$0xff]   ;;  %v12239_v16 = vld [vmem:[#allocation7 + $0xc34] ss:$24 sps:$4 sm:$0xff]  }
 0x579   : > { %7553 = vmatprep.subr.bf16.mxu0 %v12202_v21  ;;  %v12240_v21 = vld [vmem:[#allocation7 + $0x4c0] ss:$24 sps:$4 sm:$0xff]  }
 0x57b   : > { %7577 = vmatpush1.bf16.msra.mxu1 %v12201_v63  ;;  %v7633_v63 = vshll.u32 %v13557_v27, 16 }
 0x57c   : > { %7578 = vmatprep.subr.bf16.mxu1 %v12203_v47  ;;  %7554 = vmatpush2.bf16.msra.mxu0 %v12204_v59  ;;  %v12241_v47 = vld [vmem:[#allocation7 + $0xc30] ss:$24 sps:$4 sm:$0xff]   ;;  %v12242_v59 = vld [vmem:[#allocation7 + $0x494] ss:$24 sps:$4 sm:$0xff]  }
 0x57d   : > { %7555 = vmatprep.subr.bf16.mxu0 %v12206_v38  ;;  %v7635_v38 = vrot.slane %v7633_v63, 1 }
 0x57f   : > { %7579 = vmatpush1.bf16.msra.mxu1 %v12205_v15  ;;  %v12243_v15 = vld [vmem:[#allocation7 + $0xc04] ss:$24 sps:$4 sm:$0xff]  }
 0x580   : > { %7580 = vmatprep.subr.bf16.mxu1 %v12207_v61  ;;  %7556 = vmatpush2.bf16.msra.mxu0 %v12208_v54  ;;  %v12244_v61 = vld [vmem:[#allocation7 + $0x490] ss:$24 sps:$4 sm:$0xff]   ;;  %v12246_v54 = vld [vmem:[#allocation7 + $0xed4] ss:$24 sps:$4 sm:$0xff]  }
 0x581   : > { %7557 = vmatprep.subr.bf16.mxu0 %v12210_v4  ;;  %v7631_v4 = vshrl.u32 %v13557_v27, 16  ;;  %v12251_v27 = vld [vmem:[#allocation7 + $0x1024] ss:$24 sps:$4 sm:$0xff]  }
 0x583   : > { %7581 = vmatpush1.bf16.msra.mxu1 %v12209_v40  ;;  %v12247_v40 = vld [vmem:[#allocation7 + $0x1054] ss:$24 sps:$4 sm:$0xff]   ;;  %v13783_v39 = vor.u32 %v7635_v38, %v7631_v4  ;;  %v12281_v4 = vld [vmem:[#allocation7 + $0xd58] ss:$24 sps:$4 sm:$0xff]  }
 0x584   : > { %7582 = vmatprep.subr.bf16.mxu1 %v12211_v41  ;;  %7558 = vmatpush2.bf16.msra.mxu0 %v12212_v45  ;;  %v12278_v38 = vld [vmem:[#allocation7 + $0x11d4] ss:$24 sps:$4 sm:$0xff]  }
 0x585   : > { %7641 = vmatprep.subr.bf16.mxu0 %v12215_v51 }
 0x587   : > { %7583 = vmatpush1.bf16.msra.mxu1 %v12213_v58  ;;  %v13772_v0 = vpop.f32.mrf.mxu0  ;;  %7560 = vmatmul.mubr.bf16.vlgmr.msra.gmra.mxu0 %v13527_v37  ;;  %v12248_v58 = vld [vmem:[#allocation7 + $0xed0] ss:$24 sps:$4 sm:$0xff]  }
 0x588   : > { %7584 = vmatprep.subr.bf16.mxu1 %v12214_v14  ;;  %7642 = vmatpush1.bf16.msra.mxu0 %v12217_v31  ;;  %v12249_v14 = vld [vmem:[#allocation7 + $0x1050] ss:$24 sps:$4 sm:$0xff]  }
 0x589   : > { %7673 = vmatprep.mubr.bf16.mxu0 %v13775_v7  ;;  %v13778_v26 = vpop.f32.mrf.mxu0  ;;  %7643 = vmatprep.subr.bf16.mxu0 %v12219_v10  ;;  %v12253_v10 = vld [vmem:[#allocation7 + $0x1020] ss:$24 sps:$4 sm:$0xff]  }
 0x58b   : > { %7585 = vmatpush2.bf16.msra.mxu1 %v12216_v48  ;;  %v7319_v12 = vpop.f32.mrf.mxu0 }
 0x58c   : > { %7586 = vmatprep.subr.bf16.mxu1 %v12218_v34  ;;  %7644 = vmatpush1.bf16.msra.mxu0 %v12221_v50  ;;  %v12252_v34 = vld [vmem:[#allocation7 + $0xea0] ss:$24 sps:$4 sm:$0xff]   ;;  %v12254_v12 = vld [vmem:[#allocation7 + $0xe74] ss:$24 sps:$4 sm:$0xff]   ;;  %v12256_v50 = vld [vmem:[#allocation7 + $0xe70] ss:$24 sps:$4 sm:$0xff]  }
 0x58d   : > { %v7320_v23 = vpop.f32.mrf.mxu0  ;;  %7645 = vmatprep.subr.bf16.mxu0 %v12223_v35  ;;  %v12260_v35 = vld [vmem:[#allocation7 + $0xe40] ss:$24 sps:$4 sm:$0xff]  }
 0x58e   : > { %v12257_v23 = vld [vmem:[#allocation7 + $0xff0] ss:$24 sps:$4 sm:$0xff]  }
 0x58f   : > { %7587 = vmatpush2.bf16.msra.mxu1 %v12220_v18  ;;  %v12255_v18 = vld [vmem:[#allocation7 + $0xff4] ss:$24 sps:$4 sm:$0xff]  }
 0x590   : > { %7588 = vmatprep.subr.bf16.mxu1 %v12222_v33  ;;  %7646 = vmatpush1.bf16.msra.mxu0 %v12225_v5  ;;  %v12258_v33 = vld [vmem:[#allocation7 + $0xe44] ss:$24 sps:$4 sm:$0xff]   ;;  %v12262_v5 = vld [vmem:[#allocation7 + $0xe14] ss:$24 sps:$4 sm:$0xff]  }
 0x591   : > { %7647 = vmatprep.subr.bf16.mxu0 %v12227_v22  ;;  %v12264_v22 = vld [vmem:[#allocation7 + $0xe10] ss:$24 sps:$4 sm:$0xff]  }
 0x593   : > { %7589 = vmatpush2.bf16.msra.mxu1 %v12224_v29  ;;  %v12261_v29 = vld [vmem:[#allocation7 + $0xfc0] ss:$24 sps:$4 sm:$0xff]  }
 0x594   : > { %7590 = vmatprep.subr.bf16.mxu1 %v12226_v20  ;;  %7648 = vmatpush1.bf16.msra.mxu0 %v12229_v53  ;;  %v12263_v20 = vld [vmem:[#allocation7 + $0xf94] ss:$24 sps:$4 sm:$0xff]   ;;  %v12266_v53 = vld [vmem:[#allocation7 + $0xde4] ss:$24 sps:$4 sm:$0xff]  }
 0x595   : > { %7649 = vmatprep.subr.bf16.mxu0 %v12231_v46  ;;  %v12268_v46 = vld [vmem:[#allocation7 + $0xde0] ss:$24 sps:$4 sm:$0xff]  }
 0x597   : > { %7591 = vmatpush2.bf16.msra.mxu1 %v12228_v56  ;;  %v12265_v56 = vld [vmem:[#allocation7 + $0xf90] ss:$24 sps:$4 sm:$0xff]  }
 0x598   : > { %7592 = vmatprep.subr.bf16.mxu1 %v12230_v9  ;;  %7650 = vmatpush1.bf16.msra.mxu0 %v12233_v60  ;;  %v12267_v9 = vld [vmem:[#allocation7 + $0xf64] ss:$24 sps:$4 sm:$0xff]   ;;  %v12270_v60 = vld [vmem:[#allocation7 + $0xdb4] ss:$24 sps:$4 sm:$0xff]  }
 0x599   : > { %7651 = vmatprep.subr.bf16.mxu0 %v12235_v55  ;;  %v7612_v55 = vshll.u32 %v13527_v37, 16 }
 0x59b   : > { %7593 = vmatpush2.bf16.msra.mxu1 %v12232_v57  ;;  %v12269_v57 = vld [vmem:[#allocation7 + $0xf60] ss:$24 sps:$4 sm:$0xff]   ;;  %v7614_v63 = vrot.slane %v7612_v55, 1 }
 0x59c   : > { %7594 = vmatprep.subr.bf16.mxu1 %v12234_v13  ;;  %7652 = vmatpush1.bf16.msra.mxu0 %v12237_v62  ;;  %v12271_v13 = vld [vmem:[#allocation7 + $0xf34] ss:$24 sps:$4 sm:$0xff]   ;;  %v12273_v62 = vld [vmem:[#allocation7 + $0xf30] ss:$24 sps:$4 sm:$0xff]  }
 0x59d   : > { %7653 = vmatprep.subr.bf16.mxu0 %v12239_v16  ;;  %v12275_v16 = vld [vmem:[#allocation7 + $0xf04] ss:$24 sps:$4 sm:$0xff]  }
 0x59f   : > { %7595 = vmatpush2.bf16.msra.mxu1 %v12236_v6  ;;  %v12272_v6 = vld [vmem:[#allocation7 + $0xdb0] ss:$24 sps:$4 sm:$0xff]  }
 0x5a0   : > { %7596 = vmatprep.subr.bf16.mxu1 %v12238_v43  ;;  %7654 = vmatpush1.bf16.msra.mxu0 %v12241_v47  ;;  %v12274_v43 = vld [vmem:[#allocation7 + $0xd84] ss:$24 sps:$4 sm:$0xff]   ;;  %v12276_v47 = vld [vmem:[#allocation7 + $0xd80] ss:$24 sps:$4 sm:$0xff]  }
 0x5a1   : > { %7655 = vmatprep.subr.bf16.mxu0 %v12243_v15 }
 0x5a3   : > { %7597 = vmatpush2.bf16.msra.mxu1 %v12240_v21  ;;  %v7610_v21 = vshrl.u32 %v13527_v37, 16 }
 0x5a4   : > { %7598 = vmatprep.subr.bf16.mxu1 %v12242_v59  ;;  %7656 = vmatpush1.bf16.msra.mxu0 %v12245_v49  ;;  %v12277_v59 = vld [vmem:[#allocation7 + $0xf00] ss:$24 sps:$4 sm:$0xff]  }
 0x5a5   : > { %7657 = vmatprep.subr.bf16.mxu0 %v12246_v54  ;;  %v13794_v15 = vor.u32 %v7614_v63, %v7610_v21  ;;  %v12310_v63 = vld [vmem:[#allocation7 + $0xedc] ss:$24 sps:$4 sm:$0xff]  }
 0x5a6   : > { %v12311_v21 = vld [vmem:[#allocation7 + $0x105c] ss:$24 sps:$4 sm:$0xff]  }
 0x5a7   : > { %7599 = vmatpush2.bf16.msra.mxu1 %v12244_v61  ;;  %v12279_v61 = vld [vmem:[#allocation7 + $0xd5c] ss:$24 sps:$4 sm:$0xff]  }
 0x5a8   : > { %7682 = vmatprep.subr.bf16.mxu1 %v12247_v40  ;;  %7658 = vmatpush2.bf16.msra.mxu0 %v12248_v58  ;;  %v12280_v40 = vld [vmem:[#allocation7 + $0x11d0] ss:$24 sps:$4 sm:$0xff]  }
 0x5a9   : > { %7659 = vmatprep.subr.bf16.mxu0 %v12250_v30  ;;  %v12284_v30 = vld [vmem:[#allocation7 + $0x11a0] ss:$24 sps:$4 sm:$0xff]  }
 0x5aa   : > { %v7356_v41 = vpop.f32.mrf.mxu1  ;;  %7601 = vmatmul.mubr.bf16.vlgmr.msra.gmra.mxu1 %v13559_v32 }
 0x5ab   : > { %v13786_v45 = vadd.f32 %v7356_v41, %v13772_v0  ;;  %7683 = vmatpush1.bf16.msra.mxu1 %v12249_v14  ;;  %7714 = vmatprep.mubr.bf16.mxu1 %v13783_v39  ;;  %v12282_v41 = vld [vmem:[#allocation7 + $0x11a4] ss:$24 sps:$4 sm:$0xff]  }
 0x5ac   : > { %v7358_v51 = vpop.f32.mrf.mxu1  ;;  %7684 = vmatprep.subr.bf16.mxu1 %v12251_v27  ;;  %7660 = vmatpush2.bf16.msra.mxu0 %v12252_v34  ;;  %v12283_v14 = vld [vmem:[#allocation7 + $0xd2c] ss:$24 sps:$4 sm:$0xff]   ;;  %v12285_v27 = vld [vmem:[#allocation7 + $0xd28] ss:$24 sps:$4 sm:$0xff]   ;;  %v12287_v34 = vld [vmem:[#allocation7 + $0xcfc] ss:$24 sps:$4 sm:$0xff]  }
 0x5ad   : > { %v13790_v48 = vadd.f32 %v7358_v51, %v13778_v26  ;;  %7661 = vmatprep.subr.bf16.mxu0 %v12254_v12  ;;  %v12259_v26 = vld [vmem:[#allocation7 + $0xfc4] ss:$24 sps:$4 sm:$0xff]  }
 0x5ae   : > { %v7360_v31 = vpop.f32.mrf.mxu1  ;;  %v12290_v12 = vld [vmem:[#allocation7 + $0x1144] ss:$24 sps:$4 sm:$0xff]  }
 0x5af   : > { %7685 = vmatpush1.bf16.msra.mxu1 %v12253_v10  ;;  %v12286_v31 = vld [vmem:[#allocation7 + $0x1174] ss:$24 sps:$4 sm:$0xff]   ;;  %v12288_v10 = vld [vmem:[#allocation7 + $0x1170] ss:$24 sps:$4 sm:$0xff]  }
 0x5b0   : > { %v7361_v0 = vpop.f32.mrf.mxu1  ;;  %7686 = vmatprep.subr.bf16.mxu1 %v12255_v18  ;;  %7662 = vmatpush2.bf16.msra.mxu0 %v12256_v50  ;;  %v12292_v18 = vld [vmem:[#allocation7 + $0x1140] ss:$24 sps:$4 sm:$0xff]  }
 0x5b1   : > { %7663 = vmatprep.subr.bf16.mxu0 %v12258_v33  ;;  %v12289_v0 = vld [vmem:[#allocation7 + $0xcf8] ss:$24 sps:$4 sm:$0xff]   ;;  %v12293_v50 = vld [vmem:[#allocation7 + $0xcc8] ss:$24 sps:$4 sm:$0xff]   ;;  %v12295_v33 = vld [vmem:[#allocation7 + $0xc9c] ss:$24 sps:$4 sm:$0xff]  }
 0x5b3   : > { %7687 = vmatpush1.bf16.msra.mxu1 %v12257_v23  ;;  %v12294_v23 = vld [vmem:[#allocation7 + $0x1114] ss:$24 sps:$4 sm:$0xff]  }
 0x5b4   : > { %7688 = vmatprep.subr.bf16.mxu1 %v12259_v26  ;;  %7664 = vmatpush2.bf16.msra.mxu0 %v12260_v35  ;;  %v12296_v26 = vld [vmem:[#allocation7 + $0x1110] ss:$24 sps:$4 sm:$0xff]  }
 0x5b5   : > { %7665 = vmatprep.subr.bf16.mxu0 %v12262_v5  ;;  %v12297_v35 = vld [vmem:[#allocation7 + $0xc98] ss:$24 sps:$4 sm:$0xff]   ;;  %v12299_v5 = vld [vmem:[#allocation7 + $0xc6c] ss:$24 sps:$4 sm:$0xff]  }
 0x5b7   : > { %7689 = vmatpush1.bf16.msra.mxu1 %v12261_v29  ;;  %v12298_v29 = vld [vmem:[#allocation7 + $0x10e4] ss:$24 sps:$4 sm:$0xff]  }
 0x5b8   : > { %7690 = vmatprep.subr.bf16.mxu1 %v12263_v20  ;;  %7666 = vmatpush2.bf16.msra.mxu0 %v12264_v22  ;;  %v12300_v20 = vld [vmem:[#allocation7 + $0x10e0] ss:$24 sps:$4 sm:$0xff]  }
 0x5b9   : > { %7667 = vmatprep.subr.bf16.mxu0 %v12266_v53  ;;  %v12301_v22 = vld [vmem:[#allocation7 + $0xc68] ss:$24 sps:$4 sm:$0xff]   ;;  %v12303_v53 = vld [vmem:[#allocation7 + $0xc3c] ss:$24 sps:$4 sm:$0xff]  }
 0x5bb   : > { %7691 = vmatpush1.bf16.msra.mxu1 %v12265_v56  ;;  %v12302_v56 = vld [vmem:[#allocation7 + $0x10b4] ss:$24 sps:$4 sm:$0xff]  }
 0x5bc   : > { %7692 = vmatprep.subr.bf16.mxu1 %v12267_v9  ;;  %7668 = vmatpush2.bf16.msra.mxu0 %v12268_v46  ;;  %v7626_v9 = vshll.u32 %v13559_v32, 16  ;;  %v12304_v46 = vld [vmem:[#allocation7 + $0x10b0] ss:$24 sps:$4 sm:$0xff]  }
 0x5bd   : > { %7669 = vmatprep.subr.bf16.mxu0 %v12270_v60  ;;  %v12306_v60 = vld [vmem:[#allocation7 + $0x1084] ss:$24 sps:$4 sm:$0xff]  }
 0x5be   : > { %v7628_v55 = vrot.slane %v7626_v9, 1  ;;  %v12341_v9 = vld [vmem:[#allocation7 + $0xf08] ss:$24 sps:$4 sm:$0xff]  }
 0x5bf   : > { %7693 = vmatpush1.bf16.msra.mxu1 %v12269_v57  ;;  %v12305_v57 = vld [vmem:[#allocation7 + $0xc38] ss:$24 sps:$4 sm:$0xff]  }
 0x5c0   : > { %7694 = vmatprep.subr.bf16.mxu1 %v12271_v13  ;;  %7670 = vmatpush2.bf16.msra.mxu0 %v12272_v6  ;;  %v12307_v13 = vld [vmem:[#allocation7 + $0xc0c] ss:$24 sps:$4 sm:$0xff]   ;;  %v7624_v6 = vshrl.u32 %v13559_v32, 16 }
 0x5c1   : > { %7671 = vmatprep.subr.bf16.mxu0 %v12274_v43  ;;  %v12309_v43 = vld [vmem:[#allocation7 + $0xc08] ss:$24 sps:$4 sm:$0xff]  }
 0x5c3   : > { %7695 = vmatpush1.bf16.msra.mxu1 %v12273_v62  ;;  %v12308_v62 = vld [vmem:[#allocation7 + $0x1080] ss:$24 sps:$4 sm:$0xff]  }
 0x5c4   : > { %7696 = vmatprep.subr.bf16.mxu1 %v12275_v16  ;;  %7672 = vmatpush2.bf16.msra.mxu0 %v12276_v47  ;;  %v13806_v16 = vor.u32 %v7628_v55, %v7624_v6  ;;  %v12344_v55 = vld [vmem:[#allocation7 + $0x11d8] ss:$24 sps:$4 sm:$0xff]  }
 0x5c5   : > { %7723 = vmatprep.subr.bf16.mxu0 %v12279_v61  ;;  %v12313_v61 = vld [vmem:[#allocation7 + $0x1058] ss:$24 sps:$4 sm:$0xff]  }
 0x5c6   : > { %v12345_v6 = vld [vmem:[#allocation7 + $0xd60] ss:$24 sps:$4 sm:$0xff]  }
 0x5c7   : > { %7697 = vmatpush1.bf16.msra.mxu1 %v12277_v59  ;;  %v7397_v49 = vpop.f32.mrf.mxu0  ;;  %7674 = vmatmul.mubr.bf16.vlgmr.msra.gmra.mxu0 %v13794_v15 }
 0x5c8   : > { %7698 = vmatprep.subr.bf16.mxu1 %v12278_v38  ;;  %v13798_v54 = vadd.f32 %v7397_v49, %v13750_v28  ;;  %7724 = vmatpush1.bf16.msra.mxu0 %v12281_v4  ;;  %v12312_v38 = vld [vmem:[#allocation7 + $0xed8] ss:$24 sps:$4 sm:$0xff]   ;;  %v12314_v49 = vld [vmem:[#allocation7 + $0xeac] ss:$24 sps:$4 sm:$0xff]  }
 0x5c9   : > { %7755 = vmatprep.mubr.bf16.mxu0 %v13775_v7  ;;  %v7399_v37 = vpop.f32.mrf.mxu0  ;;  %7725 = vmatprep.subr.bf16.mxu0 %v12283_v14  ;;  %v12315_v4 = vld [vmem:[#allocation7 + $0x102c] ss:$24 sps:$4 sm:$0xff]   ;;  %v12317_v14 = vld [vmem:[#allocation7 + $0x1028] ss:$24 sps:$4 sm:$0xff]  }
 0x5ca   : > { %v13802_v58 = vadd.f32 %v7399_v37, %v13754_v44  ;;  %v12291_v44 = vld [vmem:[#allocation7 + $0xccc] ss:$24 sps:$4 sm:$0xff]  }
 0x5cb   : > { %7699 = vmatpush2.bf16.msra.mxu1 %v12280_v40  ;;  %v7401_v51 = vpop.f32.mrf.mxu0 }
 0x5cc   : > { %7700 = vmatprep.subr.bf16.mxu1 %v12282_v41  ;;  %7726 = vmatpush1.bf16.msra.mxu0 %v12285_v27  ;;  %v12316_v41 = vld [vmem:[#allocation7 + $0xea8] ss:$24 sps:$4 sm:$0xff]   ;;  %v12318_v51 = vld [vmem:[#allocation7 + $0xe7c] ss:$24 sps:$4 sm:$0xff]   ;;  %v12320_v27 = vld [vmem:[#allocation7 + $0xe78] ss:$24 sps:$4 sm:$0xff]  }
 0x5cd   : > { %v7402_v28 = vpop.f32.mrf.mxu0  ;;  %7727 = vmatprep.subr.bf16.mxu0 %v12287_v34  ;;  %v12324_v34 = vld [vmem:[#allocation7 + $0xe48] ss:$24 sps:$4 sm:$0xff]  }
 0x5ce   : > { %v12321_v28 = vld [vmem:[#allocation7 + $0xff8] ss:$24 sps:$4 sm:$0xff]  }
 0x5cf   : > { %7701 = vmatpush2.bf16.msra.mxu1 %v12284_v30  ;;  %v12319_v30 = vld [vmem:[#allocation7 + $0xffc] ss:$24 sps:$4 sm:$0xff]  }
 0x5d0   : > { %7702 = vmatprep.subr.bf16.mxu1 %v12286_v31  ;;  %7728 = vmatpush1.bf16.msra.mxu0 %v12289_v0  ;;  %v12322_v31 = vld [vmem:[#allocation7 + $0xe4c] ss:$24 sps:$4 sm:$0xff]   ;;  %v12326_v0 = vld [vmem:[#allocation7 + $0xe1c] ss:$24 sps:$4 sm:$0xff]  }
 0x5d1   : > { %7729 = vmatprep.subr.bf16.mxu0 %v12291_v44  ;;  %v12328_v44 = vld [vmem:[#allocation7 + $0xe18] ss:$24 sps:$4 sm:$0xff]  }
 0x5d3   : > { %7703 = vmatpush2.bf16.msra.mxu1 %v12288_v10  ;;  %v12325_v10 = vld [vmem:[#allocation7 + $0xfc8] ss:$24 sps:$4 sm:$0xff]  }
 0x5d4   : > { %7704 = vmatprep.subr.bf16.mxu1 %v12290_v12  ;;  %7730 = vmatpush1.bf16.msra.mxu0 %v12293_v50  ;;  %v12327_v12 = vld [vmem:[#allocation7 + $0xf9c] ss:$24 sps:$4 sm:$0xff]   ;;  %v12330_v50 = vld [vmem:[#allocation7 + $0xdec] ss:$24 sps:$4 sm:$0xff]  }
 0x5d5   : > { %7731 = vmatprep.subr.bf16.mxu0 %v12295_v33  ;;  %v12332_v33 = vld [vmem:[#allocation7 + $0xde8] ss:$24 sps:$4 sm:$0xff]  }
 0x5d7   : > { %7705 = vmatpush2.bf16.msra.mxu1 %v12292_v18  ;;  %v12329_v18 = vld [vmem:[#allocation7 + $0xf98] ss:$24 sps:$4 sm:$0xff]  }
 0x5d8   : > { %7706 = vmatprep.subr.bf16.mxu1 %v12294_v23  ;;  %7732 = vmatpush1.bf16.msra.mxu0 %v12297_v35  ;;  %v12331_v23 = vld [vmem:[#allocation7 + $0xf6c] ss:$24 sps:$4 sm:$0xff]   ;;  %v12334_v35 = vld [vmem:[#allocation7 + $0xdbc] ss:$24 sps:$4 sm:$0xff]  }
 0x5d9   : > { %7733 = vmatprep.subr.bf16.mxu0 %v12299_v5  ;;  %v12336_v5 = vld [vmem:[#allocation7 + $0xdb8] ss:$24 sps:$4 sm:$0xff]  }
 0x5db   : > { %7707 = vmatpush2.bf16.msra.mxu1 %v12296_v26  ;;  %v12333_v26 = vld [vmem:[#allocation7 + $0xf68] ss:$24 sps:$4 sm:$0xff]  }
 0x5dc   : > { %7708 = vmatprep.subr.bf16.mxu1 %v12298_v29  ;;  %7734 = vmatpush1.bf16.msra.mxu0 %v12301_v22  ;;  %v12335_v29 = vld [vmem:[#allocation7 + $0xf3c] ss:$24 sps:$4 sm:$0xff]   ;;  %v12338_v22 = vld [vmem:[#allocation7 + $0xd8c] ss:$24 sps:$4 sm:$0xff]  }
 0x5dd   : > { %7735 = vmatprep.subr.bf16.mxu0 %v12303_v53  ;;  %v12340_v53 = vld [vmem:[#allocation7 + $0xd88] ss:$24 sps:$4 sm:$0xff]  }
 0x5df   : > { %7709 = vmatpush2.bf16.msra.mxu1 %v12300_v20  ;;  %v12337_v20 = vld [vmem:[#allocation7 + $0xf38] ss:$24 sps:$4 sm:$0xff]  }
 0x5e0   : > { %7710 = vmatprep.subr.bf16.mxu1 %v12302_v56  ;;  %7736 = vmatpush1.bf16.msra.mxu0 %v12305_v57  ;;  %v12339_v56 = vld [vmem:[#allocation7 + $0xf0c] ss:$24 sps:$4 sm:$0xff]  }
 0x5e1   : > { %7737 = vmatprep.subr.bf16.mxu0 %v12307_v13  ;;  %v12343_v57 = vld [vmem:[#allocation7 + $0xd64] ss:$24 sps:$4 sm:$0xff]  }
 0x5e3   : > { %7711 = vmatpush2.bf16.msra.mxu1 %v12304_v46  ;;  %v12342_v46 = vld [vmem:[#allocation7 + $0x11dc] ss:$24 sps:$4 sm:$0xff]  }
 0x5e4   : > { %7712 = vmatprep.subr.bf16.mxu1 %v12306_v60  ;;  %7738 = vmatpush1.bf16.msra.mxu0 %v12309_v43  ;;  %v12346_v43 = vld [vmem:[#allocation7 + $0x11ac] ss:$24 sps:$4 sm:$0xff]  }
 0x5e5   : > { %7739 = vmatprep.subr.bf16.mxu0 %v12310_v63 }
 0x5e7   : > { %7713 = vmatpush2.bf16.msra.mxu1 %v12308_v62 }
 0x5e8   : > { %7764 = vmatprep.subr.bf16.mxu1 %v12311_v21  ;;  %7740 = vmatpush2.bf16.msra.mxu0 %v12312_v38  ;;  %v12347_v21 = vld [vmem:[#allocation7 + $0xd34] ss:$24 sps:$4 sm:$0xff]   ;;  %v12348_v38 = vld [vmem:[#allocation7 + $0x11a8] ss:$24 sps:$4 sm:$0xff]  }
 0x5e9   : > { %7741 = vmatprep.subr.bf16.mxu0 %v12314_v49  ;;  %v12351_v49 = vld [vmem:[#allocation7 + $0xd04] ss:$24 sps:$4 sm:$0xff]  }
 0x5ea   : > { %v7438_v47 = vpop.f32.mrf.mxu1  ;;  %7715 = vmatmul.mubr.bf16.vlgmr.msra.gmra.mxu1 %v13806_v16 }
 0x5eb   : > { %v13810_v59 = vadd.f32 %v7438_v47, %v13798_v54  ;;  %7765 = vmatpush1.bf16.msra.mxu1 %v12313_v61  ;;  %7796 = vmatprep.mubr.bf16.mxu1 %v13783_v39  ;;  %v12349_v61 = vld [vmem:[#allocation7 + $0xd30] ss:$24 sps:$4 sm:$0xff]  }
 0x5ec   : > { %v7440_v32 = vpop.f32.mrf.mxu1  ;;  %7766 = vmatprep.subr.bf16.mxu1 %v12315_v4  ;;  %7742 = vmatpush2.bf16.msra.mxu0 %v12316_v41  ;;  %v12352_v4 = vld [vmem:[#allocation7 + $0x1178] ss:$24 sps:$4 sm:$0xff]   ;;  %v12356_v41 = vld [vmem:[#allocation7 + $0x1148] ss:$24 sps:$4 sm:$0xff]  }
 0x5ed   : > { %v13814_v40 = vadd.f32 %v7440_v32, %v13802_v58  ;;  %7743 = vmatprep.subr.bf16.mxu0 %v12318_v51  ;;  %v12323_v58 = vld [vmem:[#allocation7 + $0xfcc] ss:$24 sps:$4 sm:$0xff]   ;;  %v12350_v32 = vld [vmem:[#allocation7 + $0x117c] ss:$24 sps:$4 sm:$0xff]  }
 0x5ee   : > { %v7442_v37 = vpop.f32.mrf.mxu1  ;;  %v12359_v51 = vld [vmem:[#allocation7 + $0xca4] ss:$24 sps:$4 sm:$0xff]  }
 0x5ef   : > { %7767 = vmatpush1.bf16.msra.mxu1 %v12317_v14  ;;  %v12354_v37 = vld [vmem:[#allocation7 + $0x114c] ss:$24 sps:$4 sm:$0xff]   ;;  %v12357_v14 = vld [vmem:[#allocation7 + $0xcd0] ss:$24 sps:$4 sm:$0xff]  }
 0x5f0   : > { %v7443_v54 = vpop.f32.mrf.mxu1  ;;  %7768 = vmatprep.subr.bf16.mxu1 %v12319_v30  ;;  %7744 = vmatpush2.bf16.msra.mxu0 %v12320_v27  ;;  %v12360_v30 = vld [vmem:[#allocation7 + $0x1118] ss:$24 sps:$4 sm:$0xff]  }
 0x5f1   : > { %7745 = vmatprep.subr.bf16.mxu0 %v12322_v31  ;;  %v12358_v54 = vld [vmem:[#allocation7 + $0x111c] ss:$24 sps:$4 sm:$0xff]   ;;  %v12361_v27 = vld [vmem:[#allocation7 + $0xca0] ss:$24 sps:$4 sm:$0xff]  }
 0x5f2   : > { %v12363_v31 = vld [vmem:[#allocation7 + $0xc74] ss:$24 sps:$4 sm:$0xff]  }
 0x5f3   : > { %7769 = vmatpush1.bf16.msra.mxu1 %v12321_v28  ;;  %v12362_v28 = vld [vmem:[#allocation7 + $0x10ec] ss:$24 sps:$4 sm:$0xff]  }
 0x5f4   : > { %7770 = vmatprep.subr.bf16.mxu1 %v12323_v58  ;;  %7746 = vmatpush2.bf16.msra.mxu0 %v12324_v34  ;;  %v12364_v58 = vld [vmem:[#allocation7 + $0x10e8] ss:$24 sps:$4 sm:$0xff]  }
 0x5f5   : > { %7747 = vmatprep.subr.bf16.mxu0 %v12326_v0  ;;  %v12365_v34 = vld [vmem:[#allocation7 + $0xc70] ss:$24 sps:$4 sm:$0xff]   ;;  %v12367_v0 = vld [vmem:[#allocation7 + $0xc44] ss:$24 sps:$4 sm:$0xff]  }
 0x5f7   : > { %7771 = vmatpush1.bf16.msra.mxu1 %v12325_v10  ;;  %v12366_v10 = vld [vmem:[#allocation7 + $0x10bc] ss:$24 sps:$4 sm:$0xff]  }
 0x5f8   : > { %7772 = vmatprep.subr.bf16.mxu1 %v12327_v12  ;;  %7748 = vmatpush2.bf16.msra.mxu0 %v12328_v44  ;;  %v12368_v12 = vld [vmem:[#allocation7 + $0x10b8] ss:$24 sps:$4 sm:$0xff]  }
 0x5f9   : > { %7749 = vmatprep.subr.bf16.mxu0 %v12330_v50  ;;  %v12369_v44 = vld [vmem:[#allocation7 + $0xc40] ss:$24 sps:$4 sm:$0xff]   ;;  %v12371_v50 = vld [vmem:[#allocation7 + $0xc14] ss:$24 sps:$4 sm:$0xff]  }
 0x5fb   : > { %7773 = vmatpush1.bf16.msra.mxu1 %v12329_v18  ;;  %v12370_v18 = vld [vmem:[#allocation7 + $0x108c] ss:$24 sps:$4 sm:$0xff]  }
 0x5fc   : > { %7774 = vmatprep.subr.bf16.mxu1 %v12331_v23  ;;  %7750 = vmatpush2.bf16.msra.mxu0 %v12332_v33  ;;  %v12372_v23 = vld [vmem:[#allocation7 + $0x1088] ss:$24 sps:$4 sm:$0xff]  }
 0x5fd   : > { %7751 = vmatprep.subr.bf16.mxu0 %v12334_v35  ;;  %v12373_v33 = vld [vmem:[#allocation7 + $0xc10] ss:$24 sps:$4 sm:$0xff]   ;;  %v12375_v35 = vld [vmem:[#allocation7 + $0x1064] ss:$24 sps:$4 sm:$0xff]  }
 0x5ff   : > { %7775 = vmatpush1.bf16.msra.mxu1 %v12333_v26  ;;  %v12374_v26 = vld [vmem:[#allocation7 + $0xee4] ss:$24 sps:$4 sm:$0xff]  }
 0x600   : > { %7776 = vmatprep.subr.bf16.mxu1 %v12335_v29  ;;  %7752 = vmatpush2.bf16.msra.mxu0 %v12336_v5 }
 0x601   : > { %7753 = vmatprep.subr.bf16.mxu0 %v12338_v22  ;;  %v12377_v22 = vld [vmem:[#allocation7 + $0x1060] ss:$24 sps:$4 sm:$0xff]  }
 0x603   : > { %7777 = vmatpush1.bf16.msra.mxu1 %v12337_v20  ;;  %v12376_v20 = vld [vmem:[#allocation7 + $0xee0] ss:$24 sps:$4 sm:$0xff]  }
 0x604   : > { %7778 = vmatprep.subr.bf16.mxu1 %v12339_v56  ;;  %7754 = vmatpush2.bf16.msra.mxu0 %v12340_v53  ;;  %v12378_v53 = vld [vmem:[#allocation7 + $0xeb4] ss:$24 sps:$4 sm:$0xff]  }
 0x605   : > { %7805 = vmatprep.subr.bf16.mxu0 %v12343_v57 }
 0x607   : > { %7779 = vmatpush1.bf16.msra.mxu1 %v12341_v9  ;;  %v7479_v60 = vpop.f32.mrf.mxu0  ;;  %7756 = vmatmul.mubr.bf16.vlgmr.msra.gmra.mxu0 %v13794_v15 }
 0x608   : > { %7780 = vmatprep.subr.bf16.mxu1 %v12342_v46  ;;  %v13818_v13 = vadd.f32 %v7479_v60, %v13764_v3  ;;  %7806 = vmatpush1.bf16.msra.mxu0 %v12345_v6  ;;  %v12379_v46 = vld [vmem:[#allocation7 + $0x1034] ss:$24 sps:$4 sm:$0xff]   ;;  %v12380_v60 = vld [vmem:[#allocation7 + $0xeb0] ss:$24 sps:$4 sm:$0xff]   ;;  %v12382_v6 = vld [vmem:[#allocation7 + $0xe84] ss:$24 sps:$4 sm:$0xff]  }
 0x609   : > { %7837 = vmatprep.mubr.bf16.mxu0 %v13775_v7  ;;  %v7481_v62 = vpop.f32.mrf.mxu0  ;;  %7807 = vmatprep.subr.bf16.mxu0 %v12347_v21  ;;  %v12353_v7 = vld [vmem:[#allocation7 + $0xd00] ss:$24 sps:$4 sm:$0xff]   ;;  %v12386_v21 = vld [vmem:[#allocation7 + $0xe54] ss:$24 sps:$4 sm:$0xff]  }
 0x60a   : > { %v13822_v63 = vadd.f32 %v7481_v62, %v13768_v11  ;;  %v12355_v11 = vld [vmem:[#allocation7 + $0xcd4] ss:$24 sps:$4 sm:$0xff]   ;;  %v12383_v62 = vld [vmem:[#allocation7 + $0x1004] ss:$24 sps:$4 sm:$0xff]  }
 0x60b   : > { %7781 = vmatpush2.bf16.msra.mxu1 %v12344_v55  ;;  %v7483_v47 = vpop.f32.mrf.mxu0  ;;  %v12381_v55 = vld [vmem:[#allocation7 + $0x1030] ss:$24 sps:$4 sm:$0xff]  }
 0x60c   : > { %7782 = vmatprep.subr.bf16.mxu1 %v12346_v43  ;;  %7808 = vmatpush1.bf16.msra.mxu0 %v12349_v61  ;;  %v12384_v43 = vld [vmem:[#allocation7 + $0xe80] ss:$24 sps:$4 sm:$0xff]   ;;  %v12388_v47 = vld [vmem:[#allocation7 + $0xe50] ss:$24 sps:$4 sm:$0xff]   ;;  %v12390_v61 = vld [vmem:[#allocation7 + $0xe24] ss:$24 sps:$4 sm:$0xff]  }
 0x60d   : > { %v7484_v3 = vpop.f32.mrf.mxu0  ;;  %7809 = vmatprep.subr.bf16.mxu0 %v12351_v49  ;;  %v12393_v49 = vld [vmem:[#allocation7 + $0xfa0] ss:$24 sps:$4 sm:$0xff]  }
 0x60e   : > { %v12391_v3 = vld [vmem:[#allocation7 + $0xfa4] ss:$24 sps:$4 sm:$0xff]  }
 0x60f   : > { %7783 = vmatpush2.bf16.msra.mxu1 %v12348_v38  ;;  %v12389_v38 = vld [vmem:[#allocation7 + $0xfd0] ss:$24 sps:$4 sm:$0xff]  }
 0x610   : > { %7784 = vmatprep.subr.bf16.mxu1 %v12350_v32  ;;  %7810 = vmatpush1.bf16.msra.mxu0 %v12353_v7  ;;  %v12392_v32 = vld [vmem:[#allocation7 + $0xe20] ss:$24 sps:$4 sm:$0xff]   ;;  %v12395_v7 = vld [vmem:[#allocation7 + $0xf74] ss:$24 sps:$4 sm:$0xff]  }
 0x611   : > { %7811 = vmatprep.subr.bf16.mxu0 %v12355_v11  ;;  %v12397_v11 = vld [vmem:[#allocation7 + $0xf70] ss:$24 sps:$4 sm:$0xff]  }
 0x613   : > { %7785 = vmatpush2.bf16.msra.mxu1 %v12352_v4  ;;  %v12394_v4 = vld [vmem:[#allocation7 + $0xdf4] ss:$24 sps:$4 sm:$0xff]  }
 0x614   : > { %7786 = vmatprep.subr.bf16.mxu1 %v12354_v37  ;;  %7812 = vmatpush1.bf16.msra.mxu0 %v12357_v14  ;;  %v12396_v37 = vld [vmem:[#allocation7 + $0xdf0] ss:$24 sps:$4 sm:$0xff]   ;;  %v12399_v14 = vld [vmem:[#allocation7 + $0xf44] ss:$24 sps:$4 sm:$0xff]  }
 0x615   : > { %7813 = vmatprep.subr.bf16.mxu0 %v12359_v51  ;;  %v12401_v51 = vld [vmem:[#allocation7 + $0xf40] ss:$24 sps:$4 sm:$0xff]  }
 0x617   : > { %7787 = vmatpush2.bf16.msra.mxu1 %v12356_v41  ;;  %v12398_v41 = vld [vmem:[#allocation7 + $0xdc4] ss:$24 sps:$4 sm:$0xff]  }
 0x618   : > { %7788 = vmatprep.subr.bf16.mxu1 %v12358_v54  ;;  %7814 = vmatpush1.bf16.msra.mxu0 %v12361_v27  ;;  %v12400_v54 = vld [vmem:[#allocation7 + $0xdc0] ss:$24 sps:$4 sm:$0xff]   ;;  %v12403_v27 = vld [vmem:[#allocation7 + $0xf14] ss:$24 sps:$4 sm:$0xff]  }
 0x619   : > { %7815 = vmatprep.subr.bf16.mxu0 %v12363_v31  ;;  %v12405_v31 = vld [vmem:[#allocation7 + $0xf10] ss:$24 sps:$4 sm:$0xff]  }
 0x61b   : > { %7789 = vmatpush2.bf16.msra.mxu1 %v12360_v30  ;;  %v12402_v30 = vld [vmem:[#allocation7 + $0xd94] ss:$24 sps:$4 sm:$0xff]  }
 0x61c   : > { %7790 = vmatprep.subr.bf16.mxu1 %v12362_v28  ;;  %7816 = vmatpush1.bf16.msra.mxu0 %v12365_v34  ;;  %v12404_v28 = vld [vmem:[#allocation7 + $0xd90] ss:$24 sps:$4 sm:$0xff]  }
 0x61d   : > { %7817 = vmatprep.subr.bf16.mxu0 %v12367_v0  ;;  %v12407_v0 = vld [vmem:[#allocation7 + $0x11e0] ss:$24 sps:$4 sm:$0xff]  }
 0x61f   : > { %7791 = vmatpush2.bf16.msra.mxu1 %v12364_v58  ;;  %v12406_v58 = vld [vmem:[#allocation7 + $0x11e4] ss:$24 sps:$4 sm:$0xff]  }
 0x620   : > { %7792 = vmatprep.subr.bf16.mxu1 %v12366_v10  ;;  %7818 = vmatpush1.bf16.msra.mxu0 %v12369_v44  ;;  %v12408_v44 = vld [vmem:[#allocation7 + $0x11b4] ss:$24 sps:$4 sm:$0xff]  }
 0x621   : > { %7819 = vmatprep.subr.bf16.mxu0 %v12371_v50 }
 0x623   : > { %7793 = vmatpush2.bf16.msra.mxu1 %v12368_v12 }
 0x624   : > { %7794 = vmatprep.subr.bf16.mxu1 %v12370_v18  ;;  %7820 = vmatpush1.bf16.msra.mxu0 %v12373_v33 }
 0x625   : > { %7821 = vmatprep.subr.bf16.mxu0 %v12374_v26  ;;  %v12410_v26 = vld [vmem:[#allocation7 + $0x1184] ss:$24 sps:$4 sm:$0xff]  }
 0x627   : > { %7795 = vmatpush2.bf16.msra.mxu1 %v12372_v23  ;;  %v12409_v23 = vld [vmem:[#allocation7 + $0x11b0] ss:$24 sps:$4 sm:$0xff]  }
 0x628   : > { %7846 = vmatprep.subr.bf16.mxu1 %v12375_v35  ;;  %7822 = vmatpush2.bf16.msra.mxu0 %v12376_v20  ;;  %v12411_v35 = vld [vmem:[#allocation7 + $0x1180] ss:$24 sps:$4 sm:$0xff]  }
 0x629   : > { %7823 = vmatprep.subr.bf16.mxu0 %v12378_v53  ;;  %v12415_v20 = vld [vmem:[#allocation7 + $0x1120] ss:$24 sps:$4 sm:$0xff]  }
 0x62a   : > { %v7520_v29 = vpop.f32.mrf.mxu1  ;;  %7797 = vmatmul.mubr.bf16.vlgmr.msra.gmra.mxu1 %v13806_v16  ;;  %v12419_v53 = vld [vmem:[#allocation7 + $0x10c0] ss:$24 sps:$4 sm:$0xff]  }
 0x62b   : > { %v13826_v5 = vadd.f32 %v7520_v29, %v13818_v13  ;;  %7847 = vmatpush1.bf16.msra.mxu1 %v12377_v22  ;;  %7878 = vmatprep.mubr.bf16.mxu1 %v13783_v39  ;;  %v12385_v39 = vld [vmem:[#allocation7 + $0x1000] ss:$24 sps:$4 sm:$0xff]   ;;  %v12412_v29 = vld [vmem:[#allocation7 + $0x1154] ss:$24 sps:$4 sm:$0xff]  }
 0x62c   : > { %v7522_v56 = vpop.f32.mrf.mxu1  ;;  %7848 = vmatprep.subr.bf16.mxu1 %v12379_v46  ;;  %7824 = vmatpush2.bf16.msra.mxu0 %v12380_v60  ;;  %v12416_v22 = vld [vmem:[#allocation7 + $0x10f4] ss:$24 sps:$4 sm:$0xff]  }
 0x62d   : > { %v13830_v9 = vadd.f32 %v7522_v56, %v13822_v63  ;;  %7825 = vmatprep.subr.bf16.mxu0 %v12382_v6  ;;  %v12387_v63 = vld [vmem:[#allocation7 + $0xfd4] ss:$24 sps:$4 sm:$0xff]   ;;  %v12417_v56 = vld [vmem:[#allocation7 + $0x10f0] ss:$24 sps:$4 sm:$0xff]  }
 0x62e   : > { %v7524_v57 = vpop.f32.mrf.mxu1  ;;  %v12420_v46 = vld [vmem:[#allocation7 + $0x1094] ss:$24 sps:$4 sm:$0xff]  }
 0x62f   : > { %7849 = vmatpush1.bf16.msra.mxu1 %v12381_v55  ;;  %v12421_v57 = vld [vmem:[#allocation7 + $0x1090] ss:$24 sps:$4 sm:$0xff]  }
 0x630   : > { %v7525_v13 = vpop.f32.mrf.mxu1  ;;  %7850 = vmatprep.subr.bf16.mxu1 %v12383_v62  ;;  %7826 = vmatpush2.bf16.msra.mxu0 %v12384_v43 }
 0x631   : > { %7827 = vmatprep.subr.bf16.mxu0 %v12386_v21 }
 0x633   : > { %7851 = vmatpush1.bf16.msra.mxu1 %v12385_v39 }
 0x634   : > { %7852 = vmatprep.subr.bf16.mxu1 %v12387_v63  ;;  %7828 = vmatpush2.bf16.msra.mxu0 %v12388_v47 }
 0x635   : > { %7829 = vmatprep.subr.bf16.mxu0 %v12390_v61  ;;  %v11723_v61 = vld [vmem:[#allocation10 + $0xf8] sm:$0xff]  }
 0x637   : > { %7853 = vmatpush1.bf16.msra.mxu1 %v12389_v38  ;;  %v11722_v38 = vld [vmem:[#allocation10 + $0x138] sm:$0xff]  }
 0x638   : > { %7854 = vmatprep.subr.bf16.mxu1 %v12391_v3  ;;  %7830 = vmatpush2.bf16.msra.mxu0 %v12392_v32  ;;  %v11724_v3 = vld [vmem:[#allocation10 + $0x178] sm:$0xff]   ;;  %v12696_v32 = vmov 0.0  }
 0x639   : > { %7831 = vmatprep.subr.bf16.mxu0 %v12394_v4  ;;  %v11726_v4 = vld [vmem:[#allocation10 + $0xf0] sm:$0xff]  }
 0x63b   : > { %7855 = vmatpush1.bf16.msra.mxu1 %v12393_v49  ;;  %v11725_v49 = vld [vmem:[#allocation10 + $0x130] sm:$0xff]  }
 0x63c   : > { %7856 = vmatprep.subr.bf16.mxu1 %v12395_v7  ;;  %7832 = vmatpush2.bf16.msra.mxu0 %v12396_v37  ;;  %v11728_v7 = vld [vmem:[#allocation10 + $0x128] sm:$0xff]  }
 0x63d   : > { %7833 = vmatprep.subr.bf16.mxu0 %v12398_v41  ;;  %v11730_v37 = vld [vmem:[#allocation10 + $0x168] sm:$0xff]   ;;  %v11731_v41 = vld [vmem:[#allocation10 + $0x120] sm:$0xff]  }
 0x63f   : > { %7857 = vmatpush1.bf16.msra.mxu1 %v12397_v11  ;;  %v11729_v11 = vld [vmem:[#allocation10 + $0xe8] sm:$0xff]  }
 0x640   : > { %7858 = vmatprep.subr.bf16.mxu1 %v12399_v14  ;;  %7834 = vmatpush2.bf16.msra.mxu0 %v12400_v54  ;;  %v11733_v14 = vld [vmem:[#allocation10 + $0x160] sm:$0xff]  }
 0x641   : > { %7835 = vmatprep.subr.bf16.mxu0 %v12402_v30  ;;  %v11732_v54 = vld [vmem:[#allocation10 + $0xe0] sm:$0xff]   ;;  %v11734_v30 = vld [vmem:[#allocation10 + $0x118] sm:$0xff]  }
 0x643   : > { %7859 = vmatpush1.bf16.msra.mxu1 %v12401_v51 }
 0x644   : > { %7860 = vmatprep.subr.bf16.mxu1 %v12403_v27  ;;  %7836 = vmatpush2.bf16.msra.mxu0 %v12404_v28  ;;  %v11735_v28 = vld [vmem:[#allocation10 + $0xd8] sm:$0xff]  }
 0x645   : > { %10432 = vmatprep.subr.bf16.mxu0 %v11722_v38 }
 0x647   : > { %7861 = vmatpush1.bf16.msra.mxu1 %v12405_v31  ;;  %v7561_v34 = vpop.f32.mrf.mxu0  ;;  %7838 = vmatmul.mubr.bf16.vlgmr.msra.gmra.mxu0 %v13794_v15  ;;  %v12413_v15 = vld [vmem:[#allocation7 + $0x1150] ss:$24 sps:$4 sm:$0xff]  }
 0x648   : > { %7862 = vmatprep.subr.bf16.mxu1 %v12406_v58  ;;  %v7562_v10 = vadd.f32 %v7561_v34, %v13786_v45  ;;  %v12414_v45 = vld [vmem:[#allocation7 + $0x1124] ss:$24 sps:$4 sm:$0xff]   ;;  %10433 = vmatpush3.bf16.msra.mxu0 %v11723_v61 }
 0x649   : > { %v7563_v12 = vpop.f32.mrf.mxu0  ;;  %10434 = vmatprep.subr.bf16.mxu0 %v11725_v49  ;;  %v11736_v58 = vld [vmem:[#allocation10 + $0x158] sm:$0xff]  }
 0x64a   : > { %v7564_v18 = vadd.f32 %v7563_v12, %v13790_v48  ;;  %v12418_v48 = vld [vmem:[#allocation7 + $0x10c4] ss:$24 sps:$4 sm:$0xff]   ;;  %v11737_v12 = vld [vmem:[#allocation10 + $0x110] sm:$0xff]   ;;  %v7902_v49 = vld [vmem:[#allocation8] sm:$0x7] }
 0x64b   : > { %7863 = vmatpush2.bf16.msra.mxu1 %v12407_v0  ;;  %v7565_v50 = vpop.f32.mrf.mxu0 }
 0x64c   : > { %7864 = vmatprep.subr.bf16.mxu1 %v12408_v44  ;;  %10435 = vmatpush3.bf16.msra.mxu0 %v11726_v4  ;;  %v11738_v50 = vld [vmem:[#allocation10 + $0xd0] sm:$0xff]  }
 0x64d   : > { %v7566_v33 = vpop.f32.mrf.mxu0  ;;  %10436 = vmatprep.subr.bf16.mxu0 %v11728_v7 }
 0x64e   : > { %v11739_v33 = vld [vmem:[#allocation10 + $0x150] sm:$0xff]  }
 0x64f   : > { %7865 = vmatpush2.bf16.msra.mxu1 %v12409_v23 }
 0x650   : > { %7866 = vmatprep.subr.bf16.mxu1 %v12410_v26  ;;  %10437 = vmatpush3.bf16.msra.mxu0 %v11729_v11 }
 0x651   : > { %10438 = vmatprep.subr.bf16.mxu0 %v11731_v41 }
 0x653   : > { %7867 = vmatpush2.bf16.msra.mxu1 %v12411_v35  ;;  %v11741_v35 = vld [vmem:[#allocation10 + $0xc8] sm:$0xff]  }
 0x654   : > { %7868 = vmatprep.subr.bf16.mxu1 %v12412_v29  ;;  %10439 = vmatpush3.bf16.msra.mxu0 %v11732_v54  ;;  %v11742_v29 = vld [vmem:[#allocation10 + $0x148] sm:$0xff]  }
 0x655   : > { %10440 = vmatprep.subr.bf16.mxu0 %v11734_v30 }
 0x657   : > { %7869 = vmatpush2.bf16.msra.mxu1 %v12413_v15  ;;  %v11745_v15 = vld [vmem:[#allocation10 + $0x140] sm:$0xff]  }
 0x658   : > { %7870 = vmatprep.subr.bf16.mxu1 %v12414_v45  ;;  %10441 = vmatpush3.bf16.msra.mxu0 %v11735_v28  ;;  %v11746_v45 = vld [vmem:[#allocation10 + $0x78] sm:$0xff]  }
 0x659   : > { %10442 = vmatprep.subr.bf16.mxu0 %v11737_v12  ;;  %v11748_v12 = vld [vmem:[#allocation10 + $0xb8] sm:$0xff]  }
 0x65b   : > { %7871 = vmatpush2.bf16.msra.mxu1 %v12415_v20 }
 0x65c   : > { %7872 = vmatprep.subr.bf16.mxu1 %v12416_v22  ;;  %10443 = vmatpush3.bf16.msra.mxu0 %v11738_v50  ;;  %v11752_v50 = vld [vmem:[#allocation10 + $0x68] sm:$0xff]  }
 0x65f   : > { %7873 = vmatpush2.bf16.msra.mxu1 %v12417_v56 }
 0x660   : > { %7874 = vmatprep.subr.bf16.mxu1 %v12418_v48 }
 0x663   : > { %7875 = vmatpush2.bf16.msra.mxu1 %v12419_v53 }
 0x664   : > { %7876 = vmatprep.subr.bf16.mxu1 %v12420_v46 }
 0x667   : > { %7877 = vmatpush2.bf16.msra.mxu1 %v12421_v57 }
 0x668   : > { %10604 = vmatprep.subr.bf16.mxu1 %v12696_v32 }
 0x66a   : > { %v7602_v60 = vpop.f32.mrf.mxu1  ;;  %7879 = vmatmul.mubr.bf16.vlgmr.msra.gmra.mxu1 %v13806_v16  ;;  %v11727_v16 = vld [vmem:[#allocation10 + $0x170] sm:$0xff]  }
 0x66b   : > { %v13836_v55 = vadd.f32 %v7602_v60, %v7562_v10  ;;  %10605 = vmatpush3.bf16.msra.mxu1 %v11724_v3  ;;  %10620 = vmatprep.mubr.msk.bf16.mxu1 %vm12697_vm3, %v12696_v32 }
 0x66c   : > { %v7604_v13 = vpop.f32.mrf.mxu1  ;;  %10606 = vmatprep.subr.bf16.mxu1 %v12696_v32 }
 0x66d   : > { %v13838_v6 = vadd.f32 %v7604_v13, %v7564_v18 }
 0x66e   : > { %v7606_v62 = vpop.f32.mrf.mxu1 }
 0x66f   : > { %10607 = vmatpush3.bf16.msra.mxu1 %v11727_v16  ;;  %v7907_v16 = vrot.slane %v7902_v49, %v2837_v17  ;;  %v7915_v17 = vrot.slane %v7902_v49, %v2845_v42  ;;  %v11749_v42 = vld [vmem:[#allocation10 + $0x70] sm:$0xff]  }
 0x670   : > { %v7607_v43 = vpop.f32.mrf.mxu1  ;;  %10608 = vmatprep.subr.bf16.mxu1 %v12696_v32 }
 0x673   : > { %10609 = vmatpush3.bf16.msra.mxu1 %v11730_v37 }
 0x674   : > { %10610 = vmatprep.subr.bf16.mxu1 %v12696_v32 }
 0x677   : > { %10611 = vmatpush3.bf16.msra.mxu1 %v11733_v14 }
 0x678   : > { %10612 = vmatprep.subr.bf16.mxu1 %v12696_v32 }
 0x67b   : > { %10613 = vmatpush3.bf16.msra.mxu1 %v11736_v58 }
 0x67c   : > { %10614 = vmatprep.subr.bf16.mxu1 %v12696_v32 }
 0x67f   : > { %10615 = vmatpush3.bf16.msra.mxu1 %v11739_v33  ;;  %v11754_v33 = vld [vmem:[#allocation10 + $0xa8] sm:$0xff]  }
 0x680   : > { %10616 = vmatprep.subr.bf16.mxu1 %v12696_v32 }
 0x683   : > { %10617 = vmatpush3.bf16.msra.mxu1 %v11742_v29  ;;  %v11758_v29 = vld [vmem:[#allocation10 + $0x58] sm:$0xff]  }
 0x684   : > { %10618 = vmatprep.subr.bf16.mxu1 %v12696_v32 }
 0x687   : > { %v7675_v39 = vpop.f32.mrf.mxu0  ;;  %10619 = vmatpush3.bf16.msra.mxu1 %v11745_v15  ;;  %v11761_v15 = vld [vmem:[#allocation10 + $0x50] sm:$0xff]  }
 0x688   : > { %10624 = vmatprep.subr.bf16.mxu1 %v12696_v32 }
 0x689   : > { %v7677_v21 = vpop.f32.mrf.mxu0 }
 0x68b   : > { %v7679_v63 = vpop.f32.mrf.mxu0 }
 0x68d   : > { %v7680_v47 = vpop.f32.mrf.mxu0 }
 0x6aa   : > { %v7716_v51 = vpop.f32.mrf.mxu1 }
 0x6ab   : > { %v7717_v27 = vadd.f32 %v7716_v51, %v7675_v39 }
 0x6ac   : > { %v7718_v31 = vpop.f32.mrf.mxu1 }
 0x6ad   : > { %v7887_v34 = vadd.f32 %v7717_v27, %v13810_v59  ;;  %v7719_v10 = vadd.f32 %v7718_v31, %v7677_v21  ;;  %v11740_v59 = vld [vmem:[#allocation10 + $0x108] sm:$0xff]  }
 0x6ae   : > { %v7720_v0 = vpop.f32.mrf.mxu1  ;;  %10444 = vmatprep.subr.bf16.mxu0 %v11740_v59  ;;  %v11756_v59 = vld [vmem:[#allocation10 + $0x20] sm:$0xff]  }
 0x6af   : > { %v7893_v44 = vmax.f32 %v13704_v24, %v7887_v34  ;;  %v7888_v18 = vadd.f32 %v7719_v10, %v13814_v40  ;;  %10445 = vmatpush3.bf16.msra.mxu0 %v11741_v35  ;;  %v11743_v24 = vld [vmem:[#allocation10 + $0x100] sm:$0xff]   ;;  %v11747_v0 = vld [vmem:[#allocation10 + $0x38] sm:$0xff]  }
 0x6b0   : > { %v7721_v23 = vpop.f32.mrf.mxu1  ;;  %v11744_v40 = vld [vmem:[#allocation10 + $0xc0] sm:$0xff]   ;;  %10446 = vmatprep.subr.bf16.mxu0 %v11743_v24  ;;  %v11759_v24 = vld [vmem:[#allocation10 + $0x18] sm:$0xff]  }
 0x6b1   : > { %v7894_v26 = vmax.f32 %v13708_v36, %v7888_v18  ;;  %v11751_v18 = vld [vmem:[#allocation10 + $0xb0] sm:$0xff]   ;;  %v11753_v23 = vld [vmem:[#allocation10 + $0x28] sm:$0xff]   ;;  %v11757_v35 = vld [vmem:[#allocation10 + $0xa0] sm:$0xff]  }
 0x6b3   : > { %10447 = vmatpush3.bf16.msra.mxu0 %v11744_v40  ;;  %v11760_v40 = vld [vmem:[#allocation10 + $0x98] sm:$0xff]  }
 0x6b4   : > { %10463 = vmatprep.subr.bf16.mxu0 %v11746_v45  ;;  %v11762_v45 = vld [vmem:[#allocation10 + $0x10] sm:$0xff]  }
 0x6c7   : > { %v7757_v36 = vpop.f32.mrf.mxu0 }
 0x6c9   : > { %v7759_v20 = vpop.f32.mrf.mxu0 }
 0x6cb   : > { %v7761_v22 = vpop.f32.mrf.mxu0 }
 0x6cc   : > { %v11765_v22 = vld [vmem:[#allocation10 + $0x8] sm:$0xff]  }
 0x6cd   : > { %v7762_v56 = vpop.f32.mrf.mxu0 }
 0x6ce   : > { %v11766_v56 = vld [vmem:[#allocation10 + $0x88] sm:$0xff]  }
 0x6ea   : > { %v7798_v48 = vpop.f32.mrf.mxu1 }
 0x6eb   : > { %v7799_v53 = vadd.f32 %v7798_v48, %v7757_v36  ;;  %v11763_v36 = vld [vmem:[#allocation10 + $0x90] sm:$0xff]   ;;  %v11767_v48 = vld [vmem:[#allocation10 + $0x40] sm:$0xff]  }
 0x6ec   : > { %v7800_v46 = vpop.f32.mrf.mxu1 }
 0x6ed   : > { %v7889_v57 = vadd.f32 %v7799_v53, %v13826_v5  ;;  %v7801_v60 = vadd.f32 %v7800_v46, %v7759_v20  ;;  %v11764_v20 = vld [vmem:[#allocation10 + $0x48] sm:$0xff]   ;;  %v11768_v53 = vld [vmem:[#allocation10] sm:$0xff]  }
 0x6ee   : > { %v7802_v13 = vpop.f32.mrf.mxu1  ;;  %v11769_v46 = vld [vmem:[#allocation10 + $0x80] sm:$0xff]  }
 0x6ef   : > { %v7895_v62 = vmax.f32 %v13720_v1, %v7889_v57  ;;  %v7890_v43 = vadd.f32 %v7801_v60, %v13830_v9  ;;  %v11770_v57 = vld [vmem:[#allocation10 + $0x1f8] sm:$0xff]  }
 0x6f0   : > { %v7803_v39 = vpop.f32.mrf.mxu1  ;;  %v11771_v60 = vld [vmem:[#allocation10 + $0x1b8] sm:$0xff]  }
 0x6f1   : > { %v7896_v21 = vmax.f32 %v13724_v2, %v7890_v43  ;;  %v7911_v2 = vrot.slane %v7902_v49, %v2841_v25  ;;  %v11772_v13 = vld [vmem:[#allocation10 + $0x238] sm:$0xff]   ;;  %v11774_v39 = vld [vmem:[#allocation10 + $0x1b0] sm:$0xff]   ;;  %v11781_v49 = vld [vmem:[#allocation10 + $0x220] sm:$0xff]  }
 0x6f3   : > { %v7899_v63 = vmax.f32 %v7893_v44, %v7896_v21  ;;  %v11750_v44 = vld [vmem:[#allocation10 + $0x30] sm:$0xff]  }
 0x6f4   : > { %v11775_v21 = vld [vmem:[#allocation10 + $0x230] sm:$0xff]  }
 0x6f5   : > { %v7919_v11 = vadd.f32 %v7907_v16, %v7899_v63  ;;  %v11776_v63 = vld [vmem:[#allocation10 + $0x1e8] sm:$0xff]   ;;  %v11782_v16 = vld [vmem:[#allocation10 + $0x1d8] sm:$0xff]  }
 0x6f7   : > { %v7922_v27 = vmax.f32 %v7919_v11, 0.0  ;;  %v11788_v11 = vld [vmem:[#allocation10 + $0x1c8] sm:$0xff]  }
 0x6f9   : > { %v13869_v34 = vpack.c.bf16 %v7922_v27, %v7922_v27  ;;  %v11796_v27 = vld [vmem:[#allocation10 + $0x2f8] sm:$0xff]  }
 0x707   : > { %v7839_v47 = vpop.f32.mrf.mxu0 }
 0x709   : > { %v7841_v38 = vpop.f32.mrf.mxu0 }
 0x70b   : > { %v7843_v61 = vpop.f32.mrf.mxu0 }
 0x70c   : > { %v11779_v61 = vld [vmem:[#allocation10 + $0x1e0] sm:$0xff]  }
 0x70d   : > { %v7844_v3 = vpop.f32.mrf.mxu0 }
 0x70e   : > { %v11780_v3 = vld [vmem:[#allocation10 + $0x1a0] sm:$0xff]  }
 0x72a   : > { %v7880_v4 = vpop.f32.mrf.mxu1 }
 0x72b   : > { %v7881_v5 = vadd.f32 %v7880_v4, %v7839_v47  ;;  %v11777_v47 = vld [vmem:[#allocation10 + $0x1a8] sm:$0xff]   ;;  %v11783_v4 = vld [vmem:[#allocation10 + $0x198] sm:$0xff]  }
 0x72c   : > { %v7882_v7 = vpop.f32.mrf.mxu1 }
 0x72d   : > { %v7891_v37 = vadd.f32 %v7881_v5, %v13836_v55  ;;  %v7883_v1 = vadd.f32 %v7882_v7, %v7841_v38  ;;  %v11778_v38 = vld [vmem:[#allocation10 + $0x228] sm:$0xff]   ;;  %v11784_v5 = vld [vmem:[#allocation10 + $0x218] sm:$0xff]   ;;  %v11785_v7 = vld [vmem:[#allocation10 + $0x1d0] sm:$0xff]  }
 0x72e   : > { %v7884_v9 = vpop.f32.mrf.mxu1 }
 0x72f   : > { %v7897_v41 = vmax.f32 %v13736_v52, %v7891_v37  ;;  %v7892_v14 = vadd.f32 %v7883_v1, %v13838_v6  ;;  %v11786_v37 = vld [vmem:[#allocation10 + $0x190] sm:$0xff]   ;;  %v11789_v9 = vld [vmem:[#allocation10 + $0x188] sm:$0xff]  }
 0x730   : > { %v7885_v54 = vpop.f32.mrf.mxu1  ;;  %v11787_v1 = vld [vmem:[#allocation10 + $0x210] sm:$0xff]  }
 0x731   : > { %v7900_v51 = vmax.f32 %v7894_v26, %v7897_v41  ;;  %v7898_v30 = vmax.f32 %v13740_v8, %v7892_v14  ;;  %v8026_v8 = vshrl.u32 %v13869_v34, 16  ;;  %v11755_v26 = vld [vmem:[#allocation10 + $0x60] sm:$0xff]   ;;  %v11790_v41 = vld [vmem:[#allocation10 + $0x208] sm:$0xff]  }
 0x732   : > { %v11792_v14 = vld [vmem:[#allocation10 + $0x180] sm:$0xff]  }
 0x733   : > { %v7920_v28 = vadd.f32 %v7911_v2, %v7900_v51  ;;  %v7901_v55 = vmax.f32 %v7895_v62, %v7898_v30  ;;  %v11773_v62 = vld [vmem:[#allocation10 + $0x1f0] sm:$0xff]   ;;  %v11791_v2 = vld [vmem:[#allocation10 + $0x1c0] sm:$0xff]   ;;  %v11794_v51 = vld [vmem:[#allocation10 + $0x2b8] sm:$0xff]  }
 0x734   : > { %v11793_v54 = vld [vmem:[#allocation10 + $0x200] sm:$0xff]   ;;  %v11795_v30 = vld [vmem:[#allocation10 + $0x278] sm:$0xff]  }
 0x735   : > { %v7923_v31 = vmax.f32 %v7920_v28, 0.0  ;;  %v7921_v58 = vadd.f32 %v7915_v17, %v7901_v55  ;;  %v8537_v17 = vrot.slane %v13869_v34, 1  ;;  %v11797_v55 = vld [vmem:[#allocation10 + $0x2b0] sm:$0xff]  }
 0x737   : > { %v13871_v52 = vpack.c.bf16 %v7923_v31, %v7923_v31  ;;  %v7924_v10 = vmax.f32 %v7921_v58, 0.0  ;;  %v11798_v58 = vld [vmem:[#allocation10 + $0x270] sm:$0xff]  }
 0x739   : > { %v13873_v25 = vpack.c.bf16 %v7924_v10, %v7924_v10  ;;  %v8029_v6 = vshrl.u32 %v13871_v52, 16  ;;  %v8538_v43 = vrot.slane %v13871_v52, 1  ;;  %v11799_v10 = vld [vmem:[#allocation10 + $0x2f0] sm:$0xff]  }
 0x73b   : > { %8213 = vmatprep.mubr.bf16.mxu0 %v8029_v6  ;;  %v8032_v19 = vshrl.u32 %v13873_v25, 16  ;;  %v8539_v28 = vrot.slane %v13873_v25, 1  ;;  %v8818_v31 = vrot.slane %v8029_v6, 1  ;;  %v11804_v6 = vld [vmem:[#allocation10 + $0x260] sm:$0xff]  }
 0x73c   : > { %8214 = vmatmul.mubr.bf16.vlgmr.msra.gmra.mxu0 %v8026_v8 }
 0x73d   : > { %10464 = vmatpush3.bf16.msra.mxu0 %v11747_v0  ;;  %10621 = vmatmul.mubr.bf16.vlgmr.msra.gmra.mxu1 %v8032_v19  ;;  %v11800_v0 = vld [vmem:[#allocation10 + $0x2a8] sm:$0xff]  }
 0x73e   : > { %8437 = vmatprep.mubr.bf16.mxu0 %v13871_v52  ;;  %10625 = vmatpush3.bf16.msra.mxu1 %v11748_v12  ;;  %v11801_v12 = vld [vmem:[#allocation10 + $0x268] sm:$0xff]  }
 0x73f   : > { %10465 = vmatprep.subr.bf16.mxu0 %v11749_v42  ;;  %10626 = vmatprep.subr.bf16.mxu1 %v12696_v32  ;;  %v11802_v42 = vld [vmem:[#allocation10 + $0x2e8] sm:$0xff]  }
 0x740   : > { %10640 = vmatprep.mubr.msk.bf16.mxu1 %vm12697_vm3, %v12696_v32 }
 0x741   : > { %10466 = vmatpush3.bf16.msra.mxu0 %v11750_v44  ;;  %v11803_v44 = vld [vmem:[#allocation10 + $0x2a0] sm:$0xff]  }
 0x742   : > { %10627 = vmatpush3.bf16.msra.mxu1 %v11751_v18  ;;  %10467 = vmatprep.subr.bf16.mxu0 %v11752_v50  ;;  %v11805_v18 = vld [vmem:[#allocation10 + $0x2e0] sm:$0xff]   ;;  %v11806_v50 = vld [vmem:[#allocation10 + $0x298] sm:$0xff]  }
 0x743   : > { %10628 = vmatprep.subr.bf16.mxu1 %v12696_v32 }
 0x745   : > { %10468 = vmatpush3.bf16.msra.mxu0 %v11753_v23  ;;  %v11807_v23 = vld [vmem:[#allocation10 + $0x258] sm:$0xff]  }
 0x746   : > { %10629 = vmatpush3.bf16.msra.mxu1 %v11754_v33  ;;  %10469 = vmatprep.subr.bf16.mxu0 %v11755_v26  ;;  %v11808_v33 = vld [vmem:[#allocation10 + $0x2d8] sm:$0xff]   ;;  %v11809_v26 = vld [vmem:[#allocation10 + $0x290] sm:$0xff]  }
 0x747   : > { %10630 = vmatprep.subr.bf16.mxu1 %v12696_v32 }
 0x749   : > { %10470 = vmatpush3.bf16.msra.mxu0 %v11756_v59  ;;  %v11810_v59 = vld [vmem:[#allocation10 + $0x250] sm:$0xff]  }
 0x74a   : > { %10631 = vmatpush3.bf16.msra.mxu1 %v11757_v35  ;;  %10471 = vmatprep.subr.bf16.mxu0 %v11758_v29  ;;  %v11811_v35 = vld [vmem:[#allocation10 + $0x2d0] sm:$0xff]   ;;  %v11812_v29 = vld [vmem:[#allocation10 + $0x288] sm:$0xff]  }
 0x74b   : > { %10632 = vmatprep.subr.bf16.mxu1 %v12696_v32 }
 0x74d   : > { %10472 = vmatpush3.bf16.msra.mxu0 %v11759_v24  ;;  %v11813_v24 = vld [vmem:[#allocation10 + $0x248] sm:$0xff]  }
 0x74e   : > { %10633 = vmatpush3.bf16.msra.mxu1 %v11760_v40  ;;  %10473 = vmatprep.subr.bf16.mxu0 %v11761_v15  ;;  %v11814_v40 = vld [vmem:[#allocation10 + $0x2c8] sm:$0xff]   ;;  %v11815_v15 = vld [vmem:[#allocation10 + $0x280] sm:$0xff]  }
 0x74f   : > { %10634 = vmatprep.subr.bf16.mxu1 %v12696_v32 }
 0x751   : > { %10474 = vmatpush3.bf16.msra.mxu0 %v11762_v45  ;;  %v11816_v45 = vld [vmem:[#allocation10 + $0x240] sm:$0xff]  }
 0x752   : > { %10635 = vmatpush3.bf16.msra.mxu1 %v11763_v36  ;;  %10475 = vmatprep.subr.bf16.mxu0 %v11764_v20  ;;  %v11817_v36 = vld [vmem:[#allocation10 + $0x2c0] sm:$0xff]   ;;  %v11818_v20 = vld [vmem:[#allocation10 + $0x378] sm:$0xff]  }
 0x753   : > { %10636 = vmatprep.subr.bf16.mxu1 %v12696_v32 }
 0x755   : > { %10476 = vmatpush3.bf16.msra.mxu0 %v11765_v22  ;;  %v11819_v22 = vld [vmem:[#allocation10 + $0x338] sm:$0xff]  }
 0x756   : > { %10637 = vmatpush3.bf16.msra.mxu1 %v11766_v56  ;;  %10477 = vmatprep.subr.bf16.mxu0 %v11767_v48  ;;  %v8817_v56 = vrot.slane %v8026_v8, 1  ;;  %v11820_v48 = vld [vmem:[#allocation10 + $0x3b8] sm:$0xff]   ;;  %v11825_v8 = vld [vmem:[#allocation10 + $0x328] sm:$0xff]  }
 0x757   : > { %10638 = vmatprep.subr.bf16.mxu1 %v12696_v32 }
 0x759   : > { %10478 = vmatpush3.bf16.msra.mxu0 %v11768_v53  ;;  %v8819_v53 = vrot.slane %v8032_v19, 1  ;;  %v11826_v19 = vld [vmem:[#allocation10 + $0x3a8] sm:$0xff]  }
 0x75a   : > { %10639 = vmatpush3.bf16.msra.mxu1 %v11769_v46  ;;  %10494 = vmatprep.subr.bf16.mxu0 %v11770_v57  ;;  %v11821_v46 = vld [vmem:[#allocation10 + $0x370] sm:$0xff]   ;;  %v9098_v57 = vrot.slane %v13871_v52, 2  ;;  %v11828_v52 = vld [vmem:[#allocation10 + $0x320] sm:$0xff]  }
 0x75b   : > { %10644 = vmatprep.subr.bf16.mxu1 %v12696_v32 }
 0x75c   : > { %8438 = vmatmul.mubr.bf16.vlgmr.msra.gmra.mxu0 %v13869_v34 }
 0x75d   : > { %10641 = vmatmul.mubr.bf16.vlgmr.msra.gmra.mxu1 %v13873_v25  ;;  %10495 = vmatpush3.bf16.msra.mxu0 %v11771_v60  ;;  %v11822_v60 = vld [vmem:[#allocation10 + $0x330] sm:$0xff]  }
 0x75e   : > { %8719 = vmatprep.mubr.bf16.mxu0 %v8538_v43  ;;  %10645 = vmatpush3.bf16.msra.mxu1 %v11772_v13  ;;  %v11823_v13 = vld [vmem:[#allocation10 + $0x3b0] sm:$0xff]   ;;  %v11827_v43 = vld [vmem:[#allocation10 + $0x360] sm:$0xff]  }
 0x75f   : > { %10496 = vmatprep.subr.bf16.mxu0 %v11773_v62  ;;  %10646 = vmatprep.subr.bf16.mxu1 %v12696_v32  ;;  %v11824_v62 = vld [vmem:[#allocation10 + $0x368] sm:$0xff]  }
 0x760   : > { %10660 = vmatprep.mubr.msk.bf16.mxu1 %vm12697_vm3, %v12696_v32 }
 0x761   : > { %10497 = vmatpush3.bf16.msra.mxu0 %v11774_v39  ;;  %v11829_v39 = vld [vmem:[#allocation10 + $0x3a0] sm:$0xff]  }
 0x762   : > { %10647 = vmatpush3.bf16.msra.mxu1 %v11775_v21  ;;  %10498 = vmatprep.subr.bf16.mxu0 %v11776_v63  ;;  %v11830_v21 = vld [vmem:[#allocation10 + $0x358] sm:$0xff]  }
 0x763   : > { %10648 = vmatprep.subr.bf16.mxu1 %v12696_v32  ;;  %v11831_v63 = vld [vmem:[#allocation10 + $0x318] sm:$0xff]  }
 0x765   : > { %10499 = vmatpush3.bf16.msra.mxu0 %v11777_v47  ;;  %v11832_v47 = vld [vmem:[#allocation10 + $0x398] sm:$0xff]  }
 0x766   : > { %10649 = vmatpush3.bf16.msra.mxu1 %v11778_v38  ;;  %10500 = vmatprep.subr.bf16.mxu0 %v11779_v61  ;;  %v11833_v38 = vld [vmem:[#allocation10 + $0x350] sm:$0xff]  }
 0x767   : > { %10650 = vmatprep.subr.bf16.mxu1 %v12696_v32  ;;  %v11834_v61 = vld [vmem:[#allocation10 + $0x310] sm:$0xff]  }
 0x769   : > { %10501 = vmatpush3.bf16.msra.mxu0 %v11780_v3  ;;  %v11835_v3 = vld [vmem:[#allocation10 + $0x390] sm:$0xff]  }
 0x76a   : > { %10651 = vmatpush3.bf16.msra.mxu1 %v11781_v49  ;;  %10502 = vmatprep.subr.bf16.mxu0 %v11782_v16  ;;  %v11836_v49 = vld [vmem:[#allocation10 + $0x348] sm:$0xff]  }
 0x76b   : > { %10652 = vmatprep.subr.bf16.mxu1 %v12696_v32  ;;  %v11837_v16 = vld [vmem:[#allocation10 + $0x308] sm:$0xff]  }
 0x76d   : > { %10503 = vmatpush3.bf16.msra.mxu0 %v11783_v4  ;;  %v11838_v4 = vld [vmem:[#allocation10 + $0x388] sm:$0xff]  }
 0x76e   : > { %10653 = vmatpush3.bf16.msra.mxu1 %v11784_v5  ;;  %10504 = vmatprep.subr.bf16.mxu0 %v11785_v7  ;;  %v11839_v5 = vld [vmem:[#allocation10 + $0x340] sm:$0xff]  }
 0x76f   : > { %10654 = vmatprep.subr.bf16.mxu1 %v12696_v32  ;;  %v11840_v7 = vld [vmem:[#allocation10 + $0x300] sm:$0xff]  }
 0x771   : > { %10505 = vmatpush3.bf16.msra.mxu0 %v11786_v37  ;;  %v11841_v37 = vld [vmem:[#allocation10 + $0x380] sm:$0xff]  }
 0x772   : > { %10655 = vmatpush3.bf16.msra.mxu1 %v11787_v1  ;;  %10506 = vmatprep.subr.bf16.mxu0 %v11788_v11  ;;  %v9097_v1 = vrot.slane %v13869_v34, 2  ;;  %v9099_v11 = vrot.slane %v13873_v25, 2  ;;  %v9344_v34 = vld [vmem:[%s14048_s7 + $0x68] sm:$0xff]  ;;  %v9343_v25 = vld [vmem:[%s14048_s7 + $0x60] sm:$0xff] }
 0x773   : > { %10656 = vmatprep.subr.bf16.mxu1 %v12696_v32 }
 0x775   : > { %10507 = vmatpush3.bf16.msra.mxu0 %v11789_v9  ;;  %v9346_v9 = vld [vmem:[%s14048_s7 + $0x78] sm:$0xff] }
 0x776   : > { %10657 = vmatpush3.bf16.msra.mxu1 %v11790_v41  ;;  %10508 = vmatprep.subr.bf16.mxu0 %v11791_v2  ;;  %v9345_v41 = vld [vmem:[%s14048_s7 + $0x70] sm:$0xff]  ;;  %v9342_v2 = vld [vmem:[%s14048_s7 + $0x58] sm:$0xff] }
 0x777   : > { %10658 = vmatprep.subr.bf16.mxu1 %v12696_v32 }
 0x779   : > { %10509 = vmatpush3.bf16.msra.mxu0 %v11792_v14  ;;  %v9341_v14 = vld [vmem:[%s14048_s7 + $0x50] sm:$0xff] }
 0x77a   : > { %10659 = vmatpush3.bf16.msra.mxu1 %v11793_v54  ;;  %10525 = vmatprep.subr.bf16.mxu0 %v11794_v51  ;;  %v9340_v54 = vld [vmem:[%s14048_s7 + $0x48] sm:$0xff]  ;;  %v9339_v51 = vld [vmem:[%s14048_s7 + $0x40] sm:$0xff] }
 0x77b   : > { %10664 = vmatprep.subr.bf16.mxu1 %v12696_v32 }
 0x77c   : > { %8720 = vmatmul.mubr.bf16.vlgmr.msra.gmra.mxu0 %v8537_v17 }
 0x77d   : > { %10661 = vmatmul.mubr.bf16.vlgmr.msra.gmra.mxu1 %v8539_v28  ;;  %10526 = vmatpush3.bf16.msra.mxu0 %v11795_v30  ;;  %v9338_v30 = vld [vmem:[%s14048_s7 + $0x38] sm:$0xff] }
 0x77e   : > { %8999 = vmatprep.mubr.bf16.mxu0 %v8818_v31  ;;  %10665 = vmatpush3.bf16.msra.mxu1 %v11796_v27  ;;  %v9337_v27 = vld [vmem:[%s14048_s7 + $0x30] sm:$0xff]  ;;  %v9336_v31 = vld [vmem:[%s14048_s7 + $0x28] sm:$0xff] }
 0x77f   : > { %10527 = vmatprep.subr.bf16.mxu0 %v11797_v55  ;;  %10666 = vmatprep.subr.bf16.mxu1 %v12696_v32 }
 0x780   : > { %10680 = vmatprep.mubr.msk.bf16.mxu1 %vm12697_vm3, %v12696_v32 }
 0x781   : > { %10528 = vmatpush3.bf16.msra.mxu0 %v11798_v58 }
 0x782   : > { %10667 = vmatpush3.bf16.msra.mxu1 %v11799_v10  ;;  %10529 = vmatprep.subr.bf16.mxu0 %v11800_v0 }
 0x783   : > { %10668 = vmatprep.subr.bf16.mxu1 %v12696_v32 }
 0x785   : > { %10530 = vmatpush3.bf16.msra.mxu0 %v11801_v12  ;;  %v9335_v12 = vld [vmem:[%s14048_s7 + $0x20] sm:$0xff] }
 0x786   : > { %10669 = vmatpush3.bf16.msra.mxu1 %v11802_v42  ;;  %10531 = vmatprep.subr.bf16.mxu0 %v11803_v44 }
 0x787   : > { %10670 = vmatprep.subr.bf16.mxu1 %v12696_v32 }
 0x789   : > { %10532 = vmatpush3.bf16.msra.mxu0 %v11804_v6 }
 0x78a   : > { %10671 = vmatpush3.bf16.msra.mxu1 %v11805_v18  ;;  %10533 = vmatprep.subr.bf16.mxu0 %v11806_v50  ;;  %v9334_v18 = vld [vmem:[%s14048_s7 + $0x18] sm:$0xff] }
 0x78b   : > { %10672 = vmatprep.subr.bf16.mxu1 %v12696_v32 }
 0x78d   : > { %10534 = vmatpush3.bf16.msra.mxu0 %v11807_v23  ;;  %v9333_v23 = vld [vmem:[%s14048_s7 + $0x10] sm:$0xff] }
 0x78e   : > { %10673 = vmatpush3.bf16.msra.mxu1 %v11808_v33  ;;  %10535 = vmatprep.subr.bf16.mxu0 %v11809_v26  ;;  %v9332_v33 = vld [vmem:[%s14048_s7 + $0x8] sm:$0xff]  ;;  %v9331_v26 = vld [vmem:[%s14048_s7] sm:$0xff] }
 0x78f   : > { %10674 = vmatprep.subr.bf16.mxu1 %v12696_v32 }
 0x791   : > { %10536 = vmatpush3.bf16.msra.mxu0 %v11810_v59 }
 0x792   : > { %10675 = vmatpush3.bf16.msra.mxu1 %v11811_v35  ;;  %10537 = vmatprep.subr.bf16.mxu0 %v11812_v29 }
 0x793   : > { %10676 = vmatprep.subr.bf16.mxu1 %v12696_v32 }
 0x795   : > { %10538 = vmatpush3.bf16.msra.mxu0 %v11813_v24 }
 0x796   : > { %10677 = vmatpush3.bf16.msra.mxu1 %v11814_v40  ;;  %10539 = vmatprep.subr.bf16.mxu0 %v11815_v15 }
 0x797   : > { %10678 = vmatprep.subr.bf16.mxu1 %v12696_v32 }
 0x799   : > { %10540 = vmatpush3.bf16.msra.mxu0 %v11816_v45 }
 0x79a   : > { %10679 = vmatpush3.bf16.msra.mxu1 %v11817_v36  ;;  %10556 = vmatprep.subr.bf16.mxu0 %v11818_v20 }
 0x79b   : > { %10684 = vmatprep.subr.bf16.mxu1 %v12696_v32 }
 0x79c   : > { %9000 = vmatmul.mubr.bf16.vlgmr.msra.gmra.mxu0 %v8817_v56 }
 0x79d   : > { %10681 = vmatmul.mubr.bf16.vlgmr.msra.gmra.mxu1 %v8819_v53  ;;  %10557 = vmatpush3.bf16.msra.mxu0 %v11819_v22 }
 0x79e   : > { %9279 = vmatprep.mubr.bf16.mxu0 %v9098_v57  ;;  %10685 = vmatpush3.bf16.msra.mxu1 %v11820_v48 }
 0x79f   : > { %10558 = vmatprep.subr.bf16.mxu0 %v11821_v46  ;;  %10686 = vmatprep.subr.bf16.mxu1 %v12696_v32 }
 0x7a0   : > { %10700 = vmatprep.mubr.msk.bf16.mxu1 %vm12697_vm3, %v12696_v32 }
 0x7a1   : > { %10559 = vmatpush3.bf16.msra.mxu0 %v11822_v60 }
 0x7a2   : > { %10687 = vmatpush3.bf16.msra.mxu1 %v11823_v13  ;;  %10560 = vmatprep.subr.bf16.mxu0 %v11824_v62 }
 0x7a3   : > { %10688 = vmatprep.subr.bf16.mxu1 %v12696_v32 }
 0x7a5   : > { %10561 = vmatpush3.bf16.msra.mxu0 %v11825_v8 }
 0x7a6   : > { %10689 = vmatpush3.bf16.msra.mxu1 %v11826_v19  ;;  %10562 = vmatprep.subr.bf16.mxu0 %v11827_v43 }
 0x7a7   : > { %10690 = vmatprep.subr.bf16.mxu1 %v12696_v32 }
 0x7a9   : > { %10563 = vmatpush3.bf16.msra.mxu0 %v11828_v52 }
 0x7aa   : > { %10691 = vmatpush3.bf16.msra.mxu1 %v11829_v39  ;;  %10564 = vmatprep.subr.bf16.mxu0 %v11830_v21 }
 0x7ab   : > { %10692 = vmatprep.subr.bf16.mxu1 %v12696_v32 }
 0x7ad   : > { %10565 = vmatpush3.bf16.msra.mxu0 %v11831_v63 }
 0x7ae   : > { %10693 = vmatpush3.bf16.msra.mxu1 %v11832_v47  ;;  %10566 = vmatprep.subr.bf16.mxu0 %v11833_v38 }
 0x7af   : > { %10694 = vmatprep.subr.bf16.mxu1 %v12696_v32 }
 0x7b1   : > { %10567 = vmatpush3.bf16.msra.mxu0 %v11834_v61 }
 0x7b2   : > { %10695 = vmatpush3.bf16.msra.mxu1 %v11835_v3  ;;  %10568 = vmatprep.subr.bf16.mxu0 %v11836_v49 }
 0x7b3   : > { %10696 = vmatprep.subr.bf16.mxu1 %v12696_v32 }
 0x7b5   : > { %10569 = vmatpush3.bf16.msra.mxu0 %v11837_v16 }
 0x7b6   : > { %10697 = vmatpush3.bf16.msra.mxu1 %v11838_v4  ;;  %10570 = vmatprep.subr.bf16.mxu0 %v11839_v5 }
 0x7b7   : > { %10698 = vmatprep.subr.bf16.mxu1 %v12696_v32 }
 0x7b9   : > { %10571 = vmatpush3.bf16.msra.mxu0 %v11840_v7 }
 0x7ba   : > { %10699 = vmatpush3.bf16.msra.mxu1 %v11841_v37  ;;  %10704 = vmatprep.subr.mxu0 %v12696_v32 }
 0x7bc   : > { %9280 = vmatmul.mubr.bf16.vlgmr.msra.gmra.mxu0 %v9097_v1 }
 0x7bd   : > { %10701 = vmatmul.mubr.bf16.vlgmr.msra.gmra.mxu1 %v9099_v11  ;;  %10736 = vmatprep.mubr.msk.f32.mxu0 %vm12697_vm3, %v12696_v32 }
 0x7be   : > { %10705 = vmatpush3.msra.mxu0 %v9346_v9 }
 0x7bf   : > { %10706 = vmatprep.subr.mxu0 %v12696_v32 }
 0x7c0   : > { %10707 = vmatpush3.msra.mxu0 %v9345_v41 }
 0x7c1   : > { %10708 = vmatprep.subr.mxu0 %v12696_v32 }
 0x7c2   : > { %10709 = vmatpush3.msra.mxu0 %v9344_v34 }
 0x7c3   : > { %10710 = vmatprep.subr.mxu0 %v12696_v32 }
 0x7c4   : > { %10711 = vmatpush3.msra.mxu0 %v9343_v25  ;;  %v9328_v25 = vld [vmem:[#allocation11] sm:$0x1] }
 0x7c5   : > { %10712 = vmatprep.subr.mxu0 %v12696_v32 }
 0x7c6   : > { %10713 = vmatpush3.msra.mxu0 %v9342_v2 }
 0x7c7   : > { %10714 = vmatprep.subr.mxu0 %v12696_v32 }
 0x7c8   : > { %10715 = vmatpush3.msra.mxu0 %v9341_v14 }
 0x7c9   : > { %10716 = vmatprep.subr.mxu0 %v12696_v32 }
 0x7ca   : > { %10717 = vmatpush3.msra.mxu0 %v9340_v54 }
 0x7cb   : > { %10718 = vmatprep.subr.mxu0 %v12696_v32 }
 0x7cc   : > { %10719 = vmatpush3.msra.mxu0 %v9339_v51 }
 0x7cd   : > { %10720 = vmatprep.subr.mxu0 %v12696_v32 }
 0x7ce   : > { %10721 = vmatpush3.msra.mxu0 %v9338_v30 }
 0x7cf   : > { %10722 = vmatprep.subr.mxu0 %v12696_v32 }
 0x7d0   : > { %10723 = vmatpush3.msra.mxu0 %v9337_v27 }
 0x7d1   : > { %10724 = vmatprep.subr.mxu0 %v12696_v32 }
 0x7d2   : > { %10725 = vmatpush3.msra.mxu0 %v9336_v31 }
 0x7d3   : > { %10726 = vmatprep.subr.mxu0 %v12696_v32 }
 0x7d4   : > { %10727 = vmatpush3.msra.mxu0 %v9335_v12 }
 0x7d5   : > { %10728 = vmatprep.subr.mxu0 %v12696_v32 }
 0x7d6   : > { %10729 = vmatpush3.msra.mxu0 %v9334_v18 }
 0x7d7   : > { %10730 = vmatprep.subr.mxu0 %v12696_v32 }
 0x7d8   : > { %10731 = vmatpush3.msra.mxu0 %v9333_v23 }
 0x7d9   : > { %10732 = vmatprep.subr.mxu0 %v12696_v32 }
 0x7da   : > { %10733 = vmatpush3.msra.mxu0 %v9332_v33 }
 0x7db   : > { %10734 = vmatprep.subr.mxu0 %v12696_v32 }
 0x7dc   : > { %10735 = vmatpush3.msra.mxu0 %v9331_v26 }
 0x7fc   : > { %v10448_v17 = vpop.f32.mrf.mxu0 }
 0x7fd   : > { %v8255_v28 = vpop.f32.mrf.mxu1 }
 0x7fe   : > { %v10449_v55 = vpop.f32.mrf.mxu0 }
 0x7ff   : > { %v10450_v58 = vadd.f32 %v10449_v55, %v10448_v17  ;;  %v10622_v10 = vpop.f32.mrf.mxu1  ;;  %v9347_v17 = vld [vmem:[#allocation13] sm:$0x1] }
 0x800   : > { %v10451_v0 = vpop.f32.mrf.mxu0 }
 0x801   : > { %v8256_v42 = vadd.f32 %v10450_v58, %v8255_v28  ;;  %v8258_v44 = vpop.f32.mrf.mxu1 }
 0x802   : > { %v10452_v6 = vpop.f32.mrf.mxu0 }
 0x803   : > { %v10623_v50 = vpop.f32.mrf.mxu1 }
 0x81c   : > { %v10479_v59 = vpop.f32.mrf.mxu0 }
 0x81d   : > { %v8479_v35 = vpop.f32.mrf.mxu1 }
 0x81e   : > { %v10480_v29 = vpop.f32.mrf.mxu0 }
 0x81f   : > { %v10481_v24 = vadd.f32 %v10480_v29, %v10479_v59  ;;  %v10642_v40 = vpop.f32.mrf.mxu1 }
 0x820   : > { %v10482_v15 = vpop.f32.mrf.mxu0 }
 0x821   : > { %v8440_v45 = vadd.f32 %v10481_v24, %v8256_v42  ;;  %v8482_v36 = vpop.f32.mrf.mxu1 }
 0x822   : > { %v10483_v20 = vpop.f32.mrf.mxu0 }
 0x823   : > { %v8480_v22 = vadd.f32 %v8479_v35, %v8440_v45  ;;  %v10643_v56 = vpop.f32.mrf.mxu1 }
 0x83c   : > { %v10510_v48 = vpop.f32.mrf.mxu0 }
 0x83d   : > { %v8761_v53 = vpop.f32.mrf.mxu1 }
 0x83e   : > { %v10511_v46 = vpop.f32.mrf.mxu0 }
 0x83f   : > { %v10662_v57 = vpop.f32.mrf.mxu1  ;;  %v10512_v38 = vadd.f32 %v10511_v46, %v10510_v48 }
 0x840   : > { %v10513_v60 = vpop.f32.mrf.mxu0 }
 0x841   : > { %v8764_v13 = vpop.f32.mrf.mxu1  ;;  %v8762_v3 = vadd.f32 %v10512_v38, %v8761_v53 }
 0x842   : > { %v10514_v62 = vpop.f32.mrf.mxu0 }
 0x843   : > { %v10663_v32 = vpop.f32.mrf.mxu1  ;;  %v8767_v7 = vadd.f32 %v8762_v3, %v8480_v22 }
 0x85c   : > { %v10541_v8 = vpop.f32.mrf.mxu0 }
 0x85d   : > { %v9041_v19 = vpop.f32.mrf.mxu1 }
 0x85e   : > { %v10542_v43 = vpop.f32.mrf.mxu0 }
 0x85f   : > { %v10682_v52 = vpop.f32.mrf.mxu1  ;;  %v10543_v61 = vadd.f32 %v10542_v43, %v10541_v8 }
 0x860   : > { %v10544_v39 = vpop.f32.mrf.mxu0 }
 0x861   : > { %v9044_v21 = vpop.f32.mrf.mxu1  ;;  %v9042_v16 = vadd.f32 %v10543_v61, %v9041_v19 }
 0x862   : > { %v10545_v63 = vpop.f32.mrf.mxu0 }
 0x863   : > { %v10683_v47 = vpop.f32.mrf.mxu1  ;;  %v9047_v9 = vadd.f32 %v9042_v16, %v8767_v7 }
 0x87c   : > { %v10572_v49 = vpop.f32.mrf.mxu0 }
 0x87d   : > { %v9321_v4 = vpop.f32.mrf.mxu1 }
 0x87e   : > { %v10573_v5 = vpop.f32.mrf.mxu0 }
 0x87f   : > { %v10574_v37 = vadd.f32 %v10573_v5, %v10572_v49  ;;  %v10702_v1 = vpop.f32.mrf.mxu1 }
 0x880   : > { %v10575_v11 = vpop.f32.mrf.mxu0 }
 0x881   : > { %v9322_v41 = vadd.f32 %v10574_v37, %v9321_v4  ;;  %v9324_v34 = vpop.f32.mrf.mxu1 }
 0x882   : > { %v10576_v2 = vpop.f32.mrf.mxu0 }
 0x883   : > { %v9327_v14 = vadd.f32 %v9322_v41, %v9047_v9  ;;  %v10703_v54 = vpop.f32.mrf.mxu1 }
 0x885   : > { %v9329_v51 = vadd.f32 %v9328_v25, %v9327_v14 }
 0x887   : > { %v9330_v30 = vmax.f32 %v9329_v51, 0.0 }
 0x889   : > { %10737 = vmatmul.mubr.f32.vlgmr.msra.gmra.mxu0 %v9330_v30 }
 0x949   : > { %v9414_v27 = vpop.f32.mrf.mxu0 }
 0x94a   : > { %v9415_v28 = vadd.f32 %v9414_v27, %v9347_v17 }
 0x94b   : > { %v10738_v55 = vpop.f32.mrf.mxu0 }
 0x94c   : > { %v9419_v31 = vsel %vm9418_vm4, %v9415_v28, -inf }
 0x94d   : > { %9420 = vmax.xlane.f32.xlu0 %v9419_v31 }
 0x9d6   : > { %v9421_v58 = vpop.xlane.xlu0 %9420 }
 0x9d7   : > { %v9422_v10 = vsub.f32 %v9415_v28, %v9421_v58 }
 0x9d9   : > { %v9423_v0 = vmul.f32 1.442695, %v9422_v10 }
 0x9db   : > { %11842 = vpow2.f32 %v9423_v0 }
 0x9e8   : > { %v11843_v12 = vpop.eup %11842 }
 0x9e9   : > { %v9425_v42 = vsel %vm9418_vm4, %v11843_v12, 0.0 }
 0x9ea   : > { %9426 = vadd.xlane.f32.xlu0 %v9425_v42 }
 0xa73   : > { %v9427_v44 = vpop.xlane.xlu0 %9426 }
 0xa74   : > { %11844 = vrcp.f32 %v9427_v44 }
 0xa81   : > { %v11845_v6 = vpop.eup %11844 }
 0xa82   : > { %v9429_v18 = vmul.f32 %v11845_v6, %v11843_v12 }
 0xa84   : > { %9430 = vst.msk [vmem:[%s418_s24] sm:$0x1] %vm9418_vm4, %v9429_v18 }
 0xa85   : > { %12617 = shalt.err (!%p12614_p9)
}
 0xa86   : > { %s12618_s25 = scalar_lea.hbm %s9442_s21, 16  ;;  %s12622_s22 = scalar_lea.hbm %s14050_s9, 32 }
 0xa87   : > { %p12619_p3 = scmp.ne.s32.totalorder %s9442_s21, %s12618_s25  ;;  %p12623_p6 = scmp.lt.s32.totalorder %s9442_s21, %s14050_s9 }
 0xa88   : > { %p12624_p10 = scmp.lt.s32.totalorder %s12622_s22, %s12618_s25 }
 0xa89   : > { %p12620_p5 = pnand %p12619_p3, %p14072_p8 }
 0xa8a   : > { %p12625_p4 = por %p12624_p10, %p12623_p6 }
 0xa8b   : > { %p12621_p12 = pneg %p12620_p5 }
 0xa8d   : > { %p12626_p7 = pnand %p12625_p4, %p12621_p12 }
 0xa8f   : > { %12629 = shalt.err (!%p12626_p7)
}
 0xa90   : > { %10767 = dma.vmem_to_hbm [thread:$0]  (%p14072_p8), %s9445_s14, 16, %s9442_s21, %s9432_s26  }
 0xa91 PF: > { %p10809_p11 = scmp.ge.s32.totalorder %s12680_s12, 2  ;;  %s9456_s28 = sand.u32 1, %s12668_s30  }
 0xa92   : > { %p14073_p0 = scmp.ne.s32.totalorder %s14057_s20, 0  ;;  %s9457_s1 = scalar_lea.sflag [#allocation4], %s9456_s28 }
 0xa94   : > { %p10792_p1 = pnand %p10809_p11, %p14073_p0 }
 0xa96   : > { %p10793_p2 = pneg %p10792_p1 }
 0xa98   : > { %12663 = dma.done.wait (%p10793_p2), %s9457_s1, 16  }
 0xa99   : > { %12665 = vsyncadd (%p10793_p2), %s9457_s1, 4294967280  ;;  %p23_p13 = scmp.ge.s32.totalorder %s12774_s15, 4   ;;  %s14074_s30 = smov %s12672_s10 }
 0xa9a   : > { %s14075_s10 = smov %s12676_s11  ;;  %s14076_s11 = smov %s12785_s18 }
 0xa9b   : > { %s14077_s12 = smov %s12774_s15  ;;  %25 = sbr.rel (!%p23_p13) target bundleno = 10 (0xa), region = 128 }
 0xaa0   :  { %9461 = vsyncpa [#allocation3], 1 }
 0xaa1   :  { %9463 = vsyncpa [#allocation3 + $0x1], 1 }
 0xaa2   :  { %9464 = vsyncpa [#allocation6], 1 }
 0xaa3   :  { %9465 = vsyncpa [#allocation9], 1 }
 0xaa4   :  { %9466 = vsyncpa [#allocation12], 1 }
 0xaa5   :  { %9467 = vsyncpa [#allocation4], 1 }
 0xaa6   :  { %9469 = vsyncpa [#allocation4 + $0x1], 1 }

</bundles_post_ra>
